<compile_context>
chip_gen: v6e
topology: v6e:2x2x1
jax: 0.10.0
libtpu: 0.0.40
codegen_flags: <defaults>
</compile_context>

<pallas_src>
import functools

import jax
import jax.numpy as jnp
from jax.experimental import pallas as pl
from jax.experimental.pallas import tpu as pltpu


def _round_up(v, m):
    return ((v + m - 1) // m) * m


# ----------------------------- Pallas kernels -----------------------------

def _mm_bias_kernel(w_ref, x_ref, b_ref, o_ref, *, relu):
    # w: (N, K) bf16, x: (K, tn) bf16, b: (N, 1) f32  ->  o: (N, tn) f32
    y = jnp.dot(w_ref[...], x_ref[...], preferred_element_type=jnp.float32)
    y = y + b_ref[...]
    if relu:
        y = jnp.maximum(y, 0.0)
    o_ref[...] = y


def matmul_cf(w, x, b, *, relu=False):
    """y = act(w @ x + b);  w:(N,K) bf16, x:(K,M), b:(N,).  Returns (N, M) f32.

    The spatial dim M sits on lanes (lane-dense output); M is padded up to a
    multiple of 128 and tiled with the largest of {512, 256, 128} dividing it.
    """
    N, K = w.shape
    K2, M = x.shape
    assert K == K2, (K, K2)
    Mp = _round_up(M, 128)
    tn = next(t for t in (512, 256, 128) if Mp % t == 0)

    x = x.astype(jnp.bfloat16)
    if Mp != M:
        x = jnp.pad(x, ((0, 0), (0, Mp - M)))

    out = pl.pallas_call(
        functools.partial(_mm_bias_kernel, relu=relu),
        out_shape=jax.ShapeDtypeStruct((N, Mp), jnp.float32),
        grid=(Mp // tn,),
        in_specs=[
            pl.BlockSpec((N, K), lambda i: (0, 0)),    # weight stays resident
            pl.BlockSpec((K, tn), lambda i: (0, i)),
            pl.BlockSpec((N, 1), lambda i: (0, 0)),
        ],
        out_specs=pl.BlockSpec((N, tn), lambda i: (0, i)),
        compiler_params=pltpu.CompilerParams(
            dimension_semantics=("parallel",),
            vmem_limit_bytes=32 * 1024 * 1024,
        ),
    )(w.astype(jnp.bfloat16), x, b.reshape(N, 1).astype(jnp.float32))
    return out[:, :M] if Mp != M else out


def _attn_kernel(x_ref, wq_ref, bq_ref, wk_ref, bk_ref, wv_ref, bv_ref,
                 g_ref, o_ref):
    """Fused SAGAN attention for one batch element.

    x: (1, N, C) f32.  wq/wk: (C, Cq) bf16, wv: (C, C) bf16, biases f32.
    """
    f32 = jnp.float32
    x = x_ref[0]                                   # (N, C) f32
    xb = x.astype(jnp.bfloat16)
    q = jnp.dot(xb, wq_ref[...], preferred_element_type=f32) + bq_ref[...]
    k = jnp.dot(xb, wk_ref[...], preferred_element_type=f32) + bk_ref[...]
    v = jnp.dot(xb, wv_ref[...], preferred_element_type=f32) + bv_ref[...]
    # energy[i, j] = <q_i, k_j>   (torch.bmm(q^T, k) with q,k stored (C', N))
    s = jax.lax.dot_general(
        q.astype(jnp.bfloat16), k.astype(jnp.bfloat16),
        (((1,), (1,)), ((), ())), preferred_element_type=f32)   # (N, N)
    s = s - jnp.max(s, axis=-1, keepdims=True)
    p = jnp.exp(s)
    p = p * pl.reciprocal(jnp.sum(p, axis=-1, keepdims=True), approx=True)
    out = jnp.dot(p.astype(jnp.bfloat16), v.astype(jnp.bfloat16),
                  preferred_element_type=f32)                   # (N, C)
    o_ref[0] = g_ref[0, 0] * out + x


def self_attention(e3_cf, p):
    """e3_cf: (C, B, H, W) -> gamma*attn(e3) + e3, same layout."""
    C, B, H, W = e3_cf.shape
    N = H * W
    Cq = p['attn_wq'].shape[1]
    xn = jnp.transpose(e3_cf, (1, 2, 3, 0)).reshape(B, N, C)
    out = pl.pallas_call(
        _attn_kernel,
        out_shape=jax.ShapeDtypeStruct((B, N, C), jnp.float32),
        grid=(B,),
        in_specs=[
            pl.BlockSpec((1, N, C), lambda b: (b, 0, 0)),
            pl.BlockSpec((C, Cq), lambda b: (0, 0)),
            pl.BlockSpec((1, Cq), lambda b: (0, 0)),
            pl.BlockSpec((C, Cq), lambda b: (0, 0)),
            pl.BlockSpec((1, Cq), lambda b: (0, 0)),
            pl.BlockSpec((C, C), lambda b: (0, 0)),
            pl.BlockSpec((1, C), lambda b: (0, 0)),
            pl.BlockSpec((1, 1), lambda b: (0, 0)),
        ],
        out_specs=pl.BlockSpec((1, N, C), lambda b: (b, 0, 0)),
        compiler_params=pltpu.CompilerParams(
            dimension_semantics=("parallel",),
            vmem_limit_bytes=32 * 1024 * 1024,
        ),
    )(xn, p['attn_wq'], p['attn_bq'], p['attn_wk'], p['attn_bk'],
      p['attn_wv'], p['attn_bv'], p['attn_gamma'])
    return jnp.transpose(out.reshape(B, H, W, C), (3, 0, 1, 2))


def _finish_kernel(x_ref, o_ref, *, factor):
    t = jnp.tanh(x_ref[...])                       # (C, B, HW) f32
    m = jnp.mean(t, axis=-1, keepdims=True)        # spatial mean per (c, b)
    y = t * (1.0 + factor) - m * factor
    o_ref[...] = jnp.clip(y, -1.0, 1.0)


def finish_cf(raw_cf, factor=0.02):
    """tanh + balanced color enhancement + clamp; (C,B,H,W) -> NCHW."""
    C, B, H, W = raw_cf.shape
    x = raw_cf.reshape(C, B, H * W)
    out = pl.pallas_call(
        functools.partial(_finish_kernel, factor=factor),
        out_shape=jax.ShapeDtypeStruct((C, B, H * W), jnp.float32),
        grid=(1,),
        in_specs=[pl.BlockSpec((C, B, H * W), lambda i: (0, 0, 0))],
        out_specs=pl.BlockSpec((C, B, H * W), lambda i: (0, 0, 0)),
    )(x)
    return jnp.transpose(out.reshape(C, B, H, W), (1, 0, 2, 3))


# ------------------------------ JAX glue -----------------------------------

def _im2col_cf(x, kh, kw, stride, pad):
    """x: (C, B, H, W) -> ((kh*kw*C), B*Ho*Wo) with (ki, kj, c) row order."""
    if pad:
        x = jnp.pad(x, ((0, 0), (0, 0), (pad, pad), (pad, pad)))
    C, B, Hp, Wp = x.shape
    Ho = (Hp - kh) // stride + 1          # assumes clean divisibility (as ref)
    Wo = (Wp - kw) // stride + 1
    cols = []
    for ki in range(kh):
        for kj in range(kw):
            cols.append(x[:, :, ki:ki + stride * Ho:stride,
                          kj:kj + stride * Wo:stride])
    patches = jnp.stack(cols, axis=0)              # (kh*kw, C, B, Ho, Wo)
    return patches.reshape(kh * kw * C, B * Ho * Wo), Ho, Wo


def conv_cf(x, wm, b, kh, kw, stride, pad, *, relu):
    """x: (C, B, H, W); wm: (out_c, kh*kw*C) bf16 (prepacked)."""
    B = x.shape[1]
    patches, Ho, Wo = _im2col_cf(x, kh, kw, stride, pad)
    y = matmul_cf(wm, patches, b, relu=relu)       # (out_c, B*Ho*Wo)
    return y.reshape(-1, B, Ho, Wo)


def conv_transpose_cf(x, wall, ball, *, relu=True):
    """Subpixel ConvTranspose2d(k=4, s=2, p=1).

    x: (C, B, H, W); wall: (4*out_c, 4*C) bf16 (prepacked sub-kernels);
    returns (out_c, B, 2H, 2W).  out[o, n, 2u+a, 2v+b] is a 2x2 stride-1 conv
    of the 1-padded input evaluated at offset (u+a, v+b).
    """
    C, B, H, W = x.shape
    out_c = wall.shape[0] // 4
    xp = jnp.pad(x, ((0, 0), (0, 0), (1, 1), (1, 1)))
    cols = [xp[:, :, di:di + H + 1, dj:dj + W + 1]
            for di in range(2) for dj in range(2)]
    patches = jnp.stack(cols, axis=0).reshape(4 * C, B * (H + 1) * (W + 1))
    y = matmul_cf(wall, patches, ball, relu=relu)  # (4*out_c, B*(H+1)*(W+1))
    y = y.reshape(2, 2, out_c, B, H + 1, W + 1)
    subs = jnp.stack(
        [jnp.stack([y[a, bb, :, :, a:a + H, bb:bb + W] for bb in range(2)],
                   axis=0) for a in range(2)],
        axis=0)                                     # (2a, 2b, out_c, B, H, W)
    out = jnp.transpose(subs, (2, 3, 4, 0, 5, 1))   # (out_c, B, H, a, W, b)
    return out.reshape(out_c, B, 2 * H, 2 * W)


def adaptive_avg_pool_cf(x, out_size):
    C, B, H, W = x.shape
    assert H % out_size == 0 and W % out_size == 0
    return x.reshape(C, B, out_size, H // out_size,
                     out_size, W // out_size).mean(axis=(3, 5))


# ------------------------------ params --------------------------------------

def init_params(key, bf=16):
    keys = iter(jax.random.split(key, 64))
    nk = lambda: next(keys)

    def conv(out_c, in_c, k):
        fan_in = in_c * k * k
        w = jax.random.normal(nk(), (out_c, in_c, k, k), jnp.float32) / jnp.sqrt(fan_in)
        b = jax.random.normal(nk(), (out_c,), jnp.float32) * 0.01
        return w, b

    def convT(in_c, out_c, k):
        fan_in = in_c * k * k
        w = jax.random.normal(nk(), (in_c, out_c, k, k), jnp.float32) / jnp.sqrt(fan_in)
        b = jax.random.normal(nk(), (out_c,), jnp.float32) * 0.01
        return w, b

    def lin(out_f, in_f):
        w = jax.random.normal(nk(), (out_f, in_f), jnp.float32) / jnp.sqrt(in_f)
        b = jax.random.normal(nk(), (out_f,), jnp.float32) * 0.01
        return w, b

    p = {}
    p['enc1_w'], p['enc1_b'] = conv(bf, 2, 3)
    p['enc2_w'], p['enc2_b'] = conv(bf * 2, bf, 4)
    p['enc3_w'], p['enc3_b'] = conv(bf * 4, bf * 2, 4)
    p['se1_w'], p['se1_b'] = conv(bf, 3, 3)
    p['se2_w'], p['se2_b'] = conv(bf * 2, bf, 4)
    p['se3_w'], p['se3_b'] = conv(bf * 4, bf * 2, 4)
    p['fc1_w'], p['fc1_b'] = lin(bf * 4, bf * 4 * 8 * 8)
    p['fc2_w'], p['fc2_b'] = lin(bf * 4, bf * 4)
    p['smod_w'], p['smod_b'] = conv(bf * 4, bf * 8, 3)
    p['attn_q_w'], p['attn_q_b'] = conv(bf * 4 // 8, bf * 4, 1)
    p['attn_k_w'], p['attn_k_b'] = conv(bf * 4 // 8, bf * 4, 1)
    p['attn_v_w'], p['attn_v_b'] = conv(bf * 4, bf * 4, 1)
    p['attn_gamma'] = jnp.float32(0.1)
    p['bott_w'], p['bott_b'] = conv(bf * 4, bf * 4, 3)
    p['dec3_w'], p['dec3_b'] = convT(bf * 8, bf * 2, 4)
    p['dec2_w'], p['dec2_b'] = convT(bf * 4, bf, 4)
    p['dec1_w'], p['dec1_b'] = conv(3, bf * 2, 3)
    return p


def _pack_deconv(w, b):
    """ConvTranspose2d(4,2,1) weight (in_c,out_c,4,4) -> stacked subpixel
    weight (4*out_c, 4*in_c); row block (a*2+b), col block (di*2+dj),
    value = w[c, o, 3-a-2*di, 3-b-2*dj]."""
    in_c, out_c, kh, kw = w.shape
    assert kh == 4 and kw == 4
    blocks = []
    for a in range(2):
        for bb in range(2):
            cols = []
            for di in range(2):
                for dj in range(2):
                    ki = 3 - a - 2 * di
                    kj = 3 - bb - 2 * dj
                    cols.append(jnp.transpose(w[:, :, ki, kj], (1, 0)))
            blocks.append(jnp.concatenate(cols, axis=1))      # (out_c, 4*in_c)
    wall = jnp.concatenate(blocks, axis=0).astype(jnp.bfloat16)
    ball = jnp.tile(b, 4).astype(jnp.float32)
    return wall, ball


def pack_params(p):
    """Prepack PyTorch-layout f32 weights into matmul-ready bf16 matrices."""
    q = {}
    for name in ('enc1', 'enc2', 'enc3', 'se1', 'se2', 'se3',
                 'smod', 'bott', 'dec1'):
        w, b = p[name + '_w'], p[name + '_b']
        out_c, in_c, kh, kw = w.shape
        wm = jnp.transpose(w, (0, 2, 3, 1)).reshape(out_c, kh * kw * in_c)
        q[name + '_w'] = wm.astype(jnp.bfloat16)
        q[name + '_b'] = b.astype(jnp.float32)
    for name in ('dec3', 'dec2'):
        q[name + '_w'], q[name + '_b'] = _pack_deconv(p[name + '_w'],
                                                      p[name + '_b'])
    for name in ('fc1', 'fc2'):
        q[name + '_w'] = p[name + '_w'].astype(jnp.bfloat16)
        q[name + '_b'] = p[name + '_b'].astype(jnp.float32)
    for name in ('q', 'k', 'v'):
        w = p['attn_%s_w' % name]
        b = p['attn_%s_b' % name]
        out_c, in_c = w.shape[0], w.shape[1]
        q['attn_w%s' % name] = jnp.transpose(
            w.reshape(out_c, in_c), (1, 0)).astype(jnp.bfloat16)  # (in_c,out_c)
        q['attn_b%s' % name] = b.reshape(1, out_c).astype(jnp.float32)
    q['attn_gamma'] = jnp.reshape(p['attn_gamma'], (1, 1)).astype(jnp.float32)
    return q


# ------------------------------ model --------------------------------------

def sketch_depth_colorizer(packed, sketch, depth, style_image=None):
    """Inputs NCHW (torch convention); returns NCHW float32 in [-1, 1]."""
    to_cf = lambda a: jnp.transpose(a.astype(jnp.float32), (1, 0, 2, 3))

    x = jnp.concatenate([to_cf(sketch), to_cf(depth)], axis=0)   # (2, B, H, W)
    e1 = conv_cf(x, packed['enc1_w'], packed['enc1_b'], 3, 3, 1, 1, relu=True)
    e2 = conv_cf(e1, packed['enc2_w'], packed['enc2_b'], 4, 4, 2, 1, relu=True)
    e3 = conv_cf(e2, packed['enc3_w'], packed['enc3_b'], 4, 4, 2, 1, relu=True)

    if style_image is not None:
        s = to_cf(style_image)
        s1 = conv_cf(s, packed['se1_w'], packed['se1_b'], 3, 3, 1, 1, relu=True)
        s2 = conv_cf(s1, packed['se2_w'], packed['se2_b'], 4, 4, 2, 1, relu=True)
        s3 = conv_cf(s2, packed['se3_w'], packed['se3_b'], 4, 4, 2, 1, relu=True)
        pooled = adaptive_avg_pool_cf(s3, 8)                     # (C, B, 8, 8)
        C4, B = pooled.shape[0], pooled.shape[1]
        # match torch Flatten order on NCHW: row index = c*64 + h*8 + w
        flat = jnp.transpose(pooled, (0, 2, 3, 1)).reshape(C4 * 64, B)
        sf = matmul_cf(packed['fc1_w'], flat, packed['fc1_b'], relu=True)
        sf = matmul_cf(packed['fc2_w'], sf, packed['fc2_b'], relu=True)
        style_spatial = jnp.broadcast_to(sf[:, :, None, None], e3.shape)
        e3 = conv_cf(jnp.concatenate([e3, style_spatial], axis=0),
                     packed['smod_w'], packed['smod_b'], 3, 3, 1, 1, relu=True)

    # fused self-attention (q/k/v + softmax + PV + gamma residual, one kernel)
    e3 = self_attention(e3, packed)

    b_ = conv_cf(e3, packed['bott_w'], packed['bott_b'], 3, 3, 1, 1, relu=True)
    d3 = conv_transpose_cf(jnp.concatenate([b_, e3], axis=0),
                           packed['dec3_w'], packed['dec3_b'], relu=True)
    d2 = conv_transpose_cf(jnp.concatenate([d3, e2], axis=0),
                           packed['dec2_w'], packed['dec2_b'], relu=True)
    raw = conv_cf(jnp.concatenate([d2, e1], axis=0),
                  packed['dec1_w'], packed['dec1_b'], 3, 3, 1, 1, relu=False)
    return finish_cf(raw, 0.02)                                  # NCHW


# ------------------------------ main ----------------------------------------

if __name__ == "__main__":
    key = jax.random.PRNGKey(0)
    k_params, k_sk, k_dp, k_st = jax.random.split(key, 4)

    params = init_params(k_params, bf=16)
    packed = pack_params(params)          # bf16 matmul-ready weights, once

    B, H, W = 2, 32, 32
    sketch = jax.random.normal(k_sk, (B, 1, H, W), jnp.float32)
    depth = jax.random.normal(k_dp, (B, 1, H, W), jnp.float32)
    style = jax.random.normal(k_st, (B, 3, H, W), jnp.float32)

    fwd = jax.jit(sketch_depth_colorizer)
    out = fwd(packed, sketch, depth, style)
    out = jax.block_until_ready(out)

    assert out.shape == (B, 3, H, W), out.shape
    assert bool(jnp.all(jnp.isfinite(out)))
    assert bool(jnp.all(out <= 1.0)) and bool(jnp.all(out >= -1.0))
    print("KERNEL_OK")
</pallas_src>

<mosaic_0001>
module attributes {stable_mosaic.version = 11 : i64} {
  func.func @_mm_bias_kernel(%arg0: i32, %arg1: memref<16x18xbf16, #tpu.memory_space<vmem>>, %arg2: memref<18x512xbf16, #tpu.memory_space<vmem>>, %arg3: memref<16x1xf32, #tpu.memory_space<vmem>>, %arg4: memref<16x512xf32, #tpu.memory_space<vmem>>) attributes {dimension_semantics = [#tpu.dimension_semantics<parallel>], iteration_bounds = array<i64: 4>, scalar_prefetch = 0 : i64, scratch_operands = 0 : i64, tpu.core_type = #tpu.core_type<tc>, window_params = [{pipeline_mode = #tpu.pipeline_mode<synchronous>, transform_indices = @transform_0, window_bounds = array<i64: 16, 18>}, {transform_indices = @transform_1, window_bounds = array<i64: 18, 512>}, {pipeline_mode = #tpu.pipeline_mode<synchronous>, transform_indices = @transform_2, window_bounds = array<i64: 16, 1>}, {transform_indices = @transform_3, window_bounds = array<i64: 16, 512>}]} {
    %c0 = arith.constant 0 : index
    %c0_0 = arith.constant 0 : index
    %0 = vector.load %arg1[%c0, %c0_0] : memref<16x18xbf16, #tpu.memory_space<vmem>>, vector<16x18xbf16>
    %c0_1 = arith.constant 0 : index
    %c0_2 = arith.constant 0 : index
    %1 = vector.load %arg2[%c0_1, %c0_2] : memref<18x512xbf16, #tpu.memory_space<vmem>>, vector<18x512xbf16>
    %cst = arith.constant dense<0.000000e+00> : vector<16x512xf32>
    %2 = tpu.matmul %0, %1, %cst {dimension_numbers = #tpu.dot_dimension_numbers<[1], [0], [0], [1], [0, 0, 1, 1], [], []>} : vector<16x18xbf16>, vector<18x512xbf16>, vector<16x512xf32> -> vector<16x512xf32>
    %c0_3 = arith.constant 0 : index
    %c0_4 = arith.constant 0 : index
    %3 = vector.load %arg3[%c0_3, %c0_4] : memref<16x1xf32, #tpu.memory_space<vmem>>, vector<16x1xf32>
    %4 = vector.broadcast %3 : vector<16x1xf32> to vector<16x512xf32>
    %5 = arith.addf %2, %4 : vector<16x512xf32>
    %cst_5 = arith.constant 0.000000e+00 : f32
    %6 = vector.broadcast %cst_5 : f32 to vector<16x512xf32>
    %7 = arith.maximumf %5, %6 : vector<16x512xf32>
    %c0_6 = arith.constant 0 : index
    %c0_7 = arith.constant 0 : index
    %8 = vector.load %arg4[%c0_6, %c0_7] : memref<16x512xf32, #tpu.memory_space<vmem>>, vector<16x512xf32>
    tpu.vector_store %arg4[%c0_6, %c0_7], %7 {strides = array<i32>} : memref<16x512xf32, #tpu.memory_space<vmem>>, vector<16x512xf32>,
    return
  }
  func.func @transform_0(%arg0: i32) -> (i32, i32) {
    %c0_i32 = arith.constant 0 : i32
    %c0_i32_0 = arith.constant 0 : i32
    %c0_i32_1 = arith.constant 0 : i32
    return %c0_i32, %c0_i32_0 : i32, i32
  }
  func.func @transform_1(%arg0: i32) -> (i32, i32) {
    %c0_i32 = arith.constant 0 : i32
    %c0_i32_0 = arith.constant 0 : i32
    return %c0_i32, %arg0 : i32, i32
  }
  func.func @transform_2(%arg0: i32) -> (i32, i32) {
    %c0_i32 = arith.constant 0 : i32
    %c0_i32_0 = arith.constant 0 : i32
    %c0_i32_1 = arith.constant 0 : i32
    return %c0_i32, %c0_i32_0 : i32, i32
  }
  func.func @transform_3(%arg0: i32) -> (i32, i32) {
    %c0_i32 = arith.constant 0 : i32
    %c0_i32_0 = arith.constant 0 : i32
    return %c0_i32, %arg0 : i32, i32
  }
}

module attributes {stable_mosaic.version = 11 : i64} {
  func.func @_mm_bias_kernel(%arg0: i32, %arg1: memref<32x256xbf16, #tpu.memory_space<vmem>>, %arg2: memref<256x512xbf16, #tpu.memory_space<vmem>>, %arg3: memref<32x1xf32, #tpu.memory_space<vmem>>, %arg4: memref<32x512xf32, #tpu.memory_space<vmem>>) attributes {dimension_semantics = [#tpu.dimension_semantics<parallel>], iteration_bounds = array<i64: 1>, scalar_prefetch = 0 : i64, scratch_operands = 0 : i64, tpu.core_type = #tpu.core_type<tc>, window_params = [{pipeline_mode = #tpu.pipeline_mode<synchronous>, transform_indices = @transform_0, window_bounds = array<i64: 32, 256>}, {transform_indices = @transform_1, window_bounds = array<i64: 256, 512>}, {pipeline_mode = #tpu.pipeline_mode<synchronous>, transform_indices = @transform_2, window_bounds = array<i64: 32, 1>}, {transform_indices = @transform_3, window_bounds = array<i64: 32, 512>}]} {
    %c0 = arith.constant 0 : index
    %c0_0 = arith.constant 0 : index
    %0 = vector.load %arg1[%c0, %c0_0] : memref<32x256xbf16, #tpu.memory_space<vmem>>, vector<32x256xbf16>
    %c0_1 = arith.constant 0 : index
    %c0_2 = arith.constant 0 : index
    %1 = vector.load %arg2[%c0_1, %c0_2] : memref<256x512xbf16, #tpu.memory_space<vmem>>, vector<256x512xbf16>
    %cst = arith.constant dense<0.000000e+00> : vector<32x512xf32>
    %2 = tpu.matmul %0, %1, %cst {dimension_numbers = #tpu.dot_dimension_numbers<[1], [0], [0], [1], [0, 0, 1, 1], [], []>} : vector<32x256xbf16>, vector<256x512xbf16>, vector<32x512xf32> -> vector<32x512xf32>
    %c0_3 = arith.constant 0 : index
    %c0_4 = arith.constant 0 : index
    %3 = vector.load %arg3[%c0_3, %c0_4] : memref<32x1xf32, #tpu.memory_space<vmem>>, vector<32x1xf32>
    %4 = vector.broadcast %3 : vector<32x1xf32> to vector<32x512xf32>
    %5 = arith.addf %2, %4 : vector<32x512xf32>
    %cst_5 = arith.constant 0.000000e+00 : f32
    %6 = vector.broadcast %cst_5 : f32 to vector<32x512xf32>
    %7 = arith.maximumf %5, %6 : vector<32x512xf32>
    %c0_6 = arith.constant 0 : index
    %c0_7 = arith.constant 0 : index
    %8 = vector.load %arg4[%c0_6, %c0_7] : memref<32x512xf32, #tpu.memory_space<vmem>>, vector<32x512xf32>
    tpu.vector_store %arg4[%c0_6, %c0_7], %7 {strides = array<i32>} : memref<32x512xf32, #tpu.memory_space<vmem>>, vector<32x512xf32>,
    return
  }
  func.func @transform_0(%arg0: i32) -> (i32, i32) {
    %c0_i32 = arith.constant 0 : i32
    %c0_i32_0 = arith.constant 0 : i32
    %c0_i32_1 = arith.constant 0 : i32
    return %c0_i32, %c0_i32_0 : i32, i32
  }
  func.func @transform_1(%arg0: i32) -> (i32, i32) {
    %c0_i32 = arith.constant 0 : i32
    %c0_i32_0 = arith.constant 0 : i32
    return %c0_i32, %arg0 : i32, i32
  }
  func.func @transform_2(%arg0: i32) -> (i32, i32) {
    %c0_i32 = arith.constant 0 : i32
    %c0_i32_0 = arith.constant 0 : i32
    %c0_i32_1 = arith.constant 0 : i32
    return %c0_i32, %c0_i32_0 : i32, i32
  }
  func.func @transform_3(%arg0: i32) -> (i32, i32) {
    %c0_i32 = arith.constant 0 : i32
    %c0_i32_0 = arith.constant 0 : i32
    return %c0_i32, %arg0 : i32, i32
  }
}

module attributes {stable_mosaic.version = 11 : i64} {
  func.func @_mm_bias_kernel(%arg0: i32, %arg1: memref<64x512xbf16, #tpu.memory_space<vmem>>, %arg2: memref<512x128xbf16, #tpu.memory_space<vmem>>, %arg3: memref<64x1xf32, #tpu.memory_space<vmem>>, %arg4: memref<64x128xf32, #tpu.memory_space<vmem>>) attributes {dimension_semantics = [#tpu.dimension_semantics<parallel>], iteration_bounds = array<i64: 1>, scalar_prefetch = 0 : i64, scratch_operands = 0 : i64, tpu.core_type = #tpu.core_type<tc>, window_params = [{pipeline_mode = #tpu.pipeline_mode<synchronous>, transform_indices = @transform_0, window_bounds = array<i64: 64, 512>}, {transform_indices = @transform_1, window_bounds = array<i64: 512, 128>}, {pipeline_mode = #tpu.pipeline_mode<synchronous>, transform_indices = @transform_2, window_bounds = array<i64: 64, 1>}, {transform_indices = @transform_3, window_bounds = array<i64: 64, 128>}]} {
    %c0 = arith.constant 0 : index
    %c0_0 = arith.constant 0 : index
    %0 = vector.load %arg1[%c0, %c0_0] : memref<64x512xbf16, #tpu.memory_space<vmem>>, vector<64x512xbf16>
    %c0_1 = arith.constant 0 : index
    %c0_2 = arith.constant 0 : index
    %1 = vector.load %arg2[%c0_1, %c0_2] : memref<512x128xbf16, #tpu.memory_space<vmem>>, vector<512x128xbf16>
    %cst = arith.constant dense<0.000000e+00> : vector<64x128xf32>
    %2 = tpu.matmul %0, %1, %cst {dimension_numbers = #tpu.dot_dimension_numbers<[1], [0], [0], [1], [0, 0, 1, 1], [], []>} : vector<64x512xbf16>, vector<512x128xbf16>, vector<64x128xf32> -> vector<64x128xf32>
    %c0_3 = arith.constant 0 : index
    %c0_4 = arith.constant 0 : index
    %3 = vector.load %arg3[%c0_3, %c0_4] : memref<64x1xf32, #tpu.memory_space<vmem>>, vector<64x1xf32>
    %4 = vector.broadcast %3 : vector<64x1xf32> to vector<64x128xf32>
    %5 = arith.addf %2, %4 : vector<64x128xf32>
    %cst_5 = arith.constant 0.000000e+00 : f32
    %6 = vector.broadcast %cst_5 : f32 to vector<64x128xf32>
    %7 = arith.maximumf %5, %6 : vector<64x128xf32>
    %c0_6 = arith.constant 0 : index
    %c0_7 = arith.constant 0 : index
    %8 = vector.load %arg4[%c0_6, %c0_7] : memref<64x128xf32, #tpu.memory_space<vmem>>, vector<64x128xf32>
    tpu.vector_store %arg4[%c0_6, %c0_7], %7 {strides = array<i32>} : memref<64x128xf32, #tpu.memory_space<vmem>>, vector<64x128xf32>,
    return
  }
  func.func @transform_0(%arg0: i32) -> (i32, i32) {
    %c0_i32 = arith.constant 0 : i32
    %c0_i32_0 = arith.constant 0 : i32
    %c0_i32_1 = arith.constant 0 : i32
    return %c0_i32, %c0_i32_0 : i32, i32
  }
  func.func @transform_1(%arg0: i32) -> (i32, i32) {
    %c0_i32 = arith.constant 0 : i32
    %c0_i32_0 = arith.constant 0 : i32
    return %c0_i32, %arg0 : i32, i32
  }
  func.func @transform_2(%arg0: i32) -> (i32, i32) {
    %c0_i32 = arith.constant 0 : i32
    %c0_i32_0 = arith.constant 0 : i32
    %c0_i32_1 = arith.constant 0 : i32
    return %c0_i32, %c0_i32_0 : i32, i32
  }
  func.func @transform_3(%arg0: i32) -> (i32, i32) {
    %c0_i32 = arith.constant 0 : i32
    %c0_i32_0 = arith.constant 0 : i32
    return %c0_i32, %arg0 : i32, i32
  }
}

module attributes {stable_mosaic.version = 11 : i64} {
  func.func @_mm_bias_kernel(%arg0: i32, %arg1: memref<16x27xbf16, #tpu.memory_space<vmem>>, %arg2: memref<27x512xbf16, #tpu.memory_space<vmem>>, %arg3: memref<16x1xf32, #tpu.memory_space<vmem>>, %arg4: memref<16x512xf32, #tpu.memory_space<vmem>>) attributes {dimension_semantics = [#tpu.dimension_semantics<parallel>], iteration_bounds = array<i64: 4>, scalar_prefetch = 0 : i64, scratch_operands = 0 : i64, tpu.core_type = #tpu.core_type<tc>, window_params = [{pipeline_mode = #tpu.pipeline_mode<synchronous>, transform_indices = @transform_0, window_bounds = array<i64: 16, 27>}, {transform_indices = @transform_1, window_bounds = array<i64: 27, 512>}, {pipeline_mode = #tpu.pipeline_mode<synchronous>, transform_indices = @transform_2, window_bounds = array<i64: 16, 1>}, {transform_indices = @transform_3, window_bounds = array<i64: 16, 512>}]} {
    %c0 = arith.constant 0 : index
    %c0_0 = arith.constant 0 : index
    %0 = vector.load %arg1[%c0, %c0_0] : memref<16x27xbf16, #tpu.memory_space<vmem>>, vector<16x27xbf16>
    %c0_1 = arith.constant 0 : index
    %c0_2 = arith.constant 0 : index
    %1 = vector.load %arg2[%c0_1, %c0_2] : memref<27x512xbf16, #tpu.memory_space<vmem>>, vector<27x512xbf16>
    %cst = arith.constant dense<0.000000e+00> : vector<16x512xf32>
    %2 = tpu.matmul %0, %1, %cst {dimension_numbers = #tpu.dot_dimension_numbers<[1], [0], [0], [1], [0, 0, 1, 1], [], []>} : vector<16x27xbf16>, vector<27x512xbf16>, vector<16x512xf32> -> vector<16x512xf32>
    %c0_3 = arith.constant 0 : index
    %c0_4 = arith.constant 0 : index
    %3 = vector.load %arg3[%c0_3, %c0_4] : memref<16x1xf32, #tpu.memory_space<vmem>>, vector<16x1xf32>
    %4 = vector.broadcast %3 : vector<16x1xf32> to vector<16x512xf32>
    %5 = arith.addf %2, %4 : vector<16x512xf32>
    %cst_5 = arith.constant 0.000000e+00 : f32
    %6 = vector.broadcast %cst_5 : f32 to vector<16x512xf32>
    %7 = arith.maximumf %5, %6 : vector<16x512xf32>
    %c0_6 = arith.constant 0 : index
    %c0_7 = arith.constant 0 : index
    %8 = vector.load %arg4[%c0_6, %c0_7] : memref<16x512xf32, #tpu.memory_space<vmem>>, vector<16x512xf32>
    tpu.vector_store %arg4[%c0_6, %c0_7], %7 {strides = array<i32>} : memref<16x512xf32, #tpu.memory_space<vmem>>, vector<16x512xf32>,
    return
  }
  func.func @transform_0(%arg0: i32) -> (i32, i32) {
    %c0_i32 = arith.constant 0 : i32
    %c0_i32_0 = arith.constant 0 : i32
    %c0_i32_1 = arith.constant 0 : i32
    return %c0_i32, %c0_i32_0 : i32, i32
  }
  func.func @transform_1(%arg0: i32) -> (i32, i32) {
    %c0_i32 = arith.constant 0 : i32
    %c0_i32_0 = arith.constant 0 : i32
    return %c0_i32, %arg0 : i32, i32
  }
  func.func @transform_2(%arg0: i32) -> (i32, i32) {
    %c0_i32 = arith.constant 0 : i32
    %c0_i32_0 = arith.constant 0 : i32
    %c0_i32_1 = arith.constant 0 : i32
    return %c0_i32, %c0_i32_0 : i32, i32
  }
  func.func @transform_3(%arg0: i32) -> (i32, i32) {
    %c0_i32 = arith.constant 0 : i32
    %c0_i32_0 = arith.constant 0 : i32
    return %c0_i32, %arg0 : i32, i32
  }
}

module attributes {stable_mosaic.version = 11 : i64} {
  func.func @_mm_bias_kernel(%arg0: i32, %arg1: memref<64x4096xbf16, #tpu.memory_space<vmem>>, %arg2: memref<4096x128xbf16, #tpu.memory_space<vmem>>, %arg3: memref<64x1xf32, #tpu.memory_space<vmem>>, %arg4: memref<64x128xf32, #tpu.memory_space<vmem>>) attributes {dimension_semantics = [#tpu.dimension_semantics<parallel>], iteration_bounds = array<i64: 1>, scalar_prefetch = 0 : i64, scratch_operands = 0 : i64, tpu.core_type = #tpu.core_type<tc>, window_params = [{pipeline_mode = #tpu.pipeline_mode<synchronous>, transform_indices = @transform_0, window_bounds = array<i64: 64, 4096>}, {transform_indices = @transform_1, window_bounds = array<i64: 4096, 128>}, {pipeline_mode = #tpu.pipeline_mode<synchronous>, transform_indices = @transform_2, window_bounds = array<i64: 64, 1>}, {transform_indices = @transform_3, window_bounds = array<i64: 64, 128>}]} {
    %c0 = arith.constant 0 : index
    %c0_0 = arith.constant 0 : index
    %0 = vector.load %arg1[%c0, %c0_0] : memref<64x4096xbf16, #tpu.memory_space<vmem>>, vector<64x4096xbf16>
    %c0_1 = arith.constant 0 : index
    %c0_2 = arith.constant 0 : index
    %1 = vector.load %arg2[%c0_1, %c0_2] : memref<4096x128xbf16, #tpu.memory_space<vmem>>, vector<4096x128xbf16>
    %cst = arith.constant dense<0.000000e+00> : vector<64x128xf32>
    %2 = tpu.matmul %0, %1, %cst {dimension_numbers = #tpu.dot_dimension_numbers<[1], [0], [0], [1], [0, 0, 1, 1], [], []>} : vector<64x4096xbf16>, vector<4096x128xbf16>, vector<64x128xf32> -> vector<64x128xf32>
    %c0_3 = arith.constant 0 : index
    %c0_4 = arith.constant 0 : index
    %3 = vector.load %arg3[%c0_3, %c0_4] : memref<64x1xf32, #tpu.memory_space<vmem>>, vector<64x1xf32>
    %4 = vector.broadcast %3 : vector<64x1xf32> to vector<64x128xf32>
    %5 = arith.addf %2, %4 : vector<64x128xf32>
    %cst_5 = arith.constant 0.000000e+00 : f32
    %6 = vector.broadcast %cst_5 : f32 to vector<64x128xf32>
    %7 = arith.maximumf %5, %6 : vector<64x128xf32>
    %c0_6 = arith.constant 0 : index
    %c0_7 = arith.constant 0 : index
    %8 = vector.load %arg4[%c0_6, %c0_7] : memref<64x128xf32, #tpu.memory_space<vmem>>, vector<64x128xf32>
    tpu.vector_store %arg4[%c0_6, %c0_7], %7 {strides = array<i32>} : memref<64x128xf32, #tpu.memory_space<vmem>>, vector<64x128xf32>,
    return
  }
  func.func @transform_0(%arg0: i32) -> (i32, i32) {
    %c0_i32 = arith.constant 0 : i32
    %c0_i32_0 = arith.constant 0 : i32
    %c0_i32_1 = arith.constant 0 : i32
    return %c0_i32, %c0_i32_0 : i32, i32
  }
  func.func @transform_1(%arg0: i32) -> (i32, i32) {
    %c0_i32 = arith.constant 0 : i32
    %c0_i32_0 = arith.constant 0 : i32
    return %c0_i32, %arg0 : i32, i32
  }
  func.func @transform_2(%arg0: i32) -> (i32, i32) {
    %c0_i32 = arith.constant 0 : i32
    %c0_i32_0 = arith.constant 0 : i32
    %c0_i32_1 = arith.constant 0 : i32
    return %c0_i32, %c0_i32_0 : i32, i32
  }
  func.func @transform_3(%arg0: i32) -> (i32, i32) {
    %c0_i32 = arith.constant 0 : i32
    %c0_i32_0 = arith.constant 0 : i32
    return %c0_i32, %arg0 : i32, i32
  }
}

module attributes {stable_mosaic.version = 11 : i64} {
  func.func @_mm_bias_kernel(%arg0: i32, %arg1: memref<64x64xbf16, #tpu.memory_space<vmem>>, %arg2: memref<64x128xbf16, #tpu.memory_space<vmem>>, %arg3: memref<64x1xf32, #tpu.memory_space<vmem>>, %arg4: memref<64x128xf32, #tpu.memory_space<vmem>>) attributes {dimension_semantics = [#tpu.dimension_semantics<parallel>], iteration_bounds = array<i64: 1>, scalar_prefetch = 0 : i64, scratch_operands = 0 : i64, tpu.core_type = #tpu.core_type<tc>, window_params = [{pipeline_mode = #tpu.pipeline_mode<synchronous>, transform_indices = @transform_0, window_bounds = array<i64: 64, 64>}, {transform_indices = @transform_1, window_bounds = array<i64: 64, 128>}, {pipeline_mode = #tpu.pipeline_mode<synchronous>, transform_indices = @transform_2, window_bounds = array<i64: 64, 1>}, {transform_indices = @transform_3, window_bounds = array<i64: 64, 128>}]} {
    %c0 = arith.constant 0 : index
    %c0_0 = arith.constant 0 : index
    %0 = vector.load %arg1[%c0, %c0_0] : memref<64x64xbf16, #tpu.memory_space<vmem>>, vector<64x64xbf16>
    %c0_1 = arith.constant 0 : index
    %c0_2 = arith.constant 0 : index
    %1 = vector.load %arg2[%c0_1, %c0_2] : memref<64x128xbf16, #tpu.memory_space<vmem>>, vector<64x128xbf16>
    %cst = arith.constant dense<0.000000e+00> : vector<64x128xf32>
    %2 = tpu.matmul %0, %1, %cst {dimension_numbers = #tpu.dot_dimension_numbers<[1], [0], [0], [1], [0, 0, 1, 1], [], []>} : vector<64x64xbf16>, vector<64x128xbf16>, vector<64x128xf32> -> vector<64x128xf32>
    %c0_3 = arith.constant 0 : index
    %c0_4 = arith.constant 0 : index
    %3 = vector.load %arg3[%c0_3, %c0_4] : memref<64x1xf32, #tpu.memory_space<vmem>>, vector<64x1xf32>
    %4 = vector.broadcast %3 : vector<64x1xf32> to vector<64x128xf32>
    %5 = arith.addf %2, %4 : vector<64x128xf32>
    %cst_5 = arith.constant 0.000000e+00 : f32
    %6 = vector.broadcast %cst_5 : f32 to vector<64x128xf32>
    %7 = arith.maximumf %5, %6 : vector<64x128xf32>
    %c0_6 = arith.constant 0 : index
    %c0_7 = arith.constant 0 : index
    %8 = vector.load %arg4[%c0_6, %c0_7] : memref<64x128xf32, #tpu.memory_space<vmem>>, vector<64x128xf32>
    tpu.vector_store %arg4[%c0_6, %c0_7], %7 {strides = array<i32>} : memref<64x128xf32, #tpu.memory_space<vmem>>, vector<64x128xf32>,
    return
  }
  func.func @transform_0(%arg0: i32) -> (i32, i32) {
    %c0_i32 = arith.constant 0 : i32
    %c0_i32_0 = arith.constant 0 : i32
    %c0_i32_1 = arith.constant 0 : i32
    return %c0_i32, %c0_i32_0 : i32, i32
  }
  func.func @transform_1(%arg0: i32) -> (i32, i32) {
    %c0_i32 = arith.constant 0 : i32
    %c0_i32_0 = arith.constant 0 : i32
    return %c0_i32, %arg0 : i32, i32
  }
  func.func @transform_2(%arg0: i32) -> (i32, i32) {
    %c0_i32 = arith.constant 0 : i32
    %c0_i32_0 = arith.constant 0 : i32
    %c0_i32_1 = arith.constant 0 : i32
    return %c0_i32, %c0_i32_0 : i32, i32
  }
  func.func @transform_3(%arg0: i32) -> (i32, i32) {
    %c0_i32 = arith.constant 0 : i32
    %c0_i32_0 = arith.constant 0 : i32
    return %c0_i32, %arg0 : i32, i32
  }
}

module attributes {stable_mosaic.version = 11 : i64} {
  func.func @_mm_bias_kernel(%arg0: i32, %arg1: memref<64x1152xbf16, #tpu.memory_space<vmem>>, %arg2: memref<1152x128xbf16, #tpu.memory_space<vmem>>, %arg3: memref<64x1xf32, #tpu.memory_space<vmem>>, %arg4: memref<64x128xf32, #tpu.memory_space<vmem>>) attributes {dimension_semantics = [#tpu.dimension_semantics<parallel>], iteration_bounds = array<i64: 1>, scalar_prefetch = 0 : i64, scratch_operands = 0 : i64, tpu.core_type = #tpu.core_type<tc>, window_params = [{pipeline_mode = #tpu.pipeline_mode<synchronous>, transform_indices = @transform_0, window_bounds = array<i64: 64, 1152>}, {transform_indices = @transform_1, window_bounds = array<i64: 1152, 128>}, {pipeline_mode = #tpu.pipeline_mode<synchronous>, transform_indices = @transform_2, window_bounds = array<i64: 64, 1>}, {transform_indices = @transform_3, window_bounds = array<i64: 64, 128>}]} {
    %c0 = arith.constant 0 : index
    %c0_0 = arith.constant 0 : index
    %0 = vector.load %arg1[%c0, %c0_0] : memref<64x1152xbf16, #tpu.memory_space<vmem>>, vector<64x1152xbf16>
    %c0_1 = arith.constant 0 : index
    %c0_2 = arith.constant 0 : index
    %1 = vector.load %arg2[%c0_1, %c0_2] : memref<1152x128xbf16, #tpu.memory_space<vmem>>, vector<1152x128xbf16>
    %cst = arith.constant dense<0.000000e+00> : vector<64x128xf32>
    %2 = tpu.matmul %0, %1, %cst {dimension_numbers = #tpu.dot_dimension_numbers<[1], [0], [0], [1], [0, 0, 1, 1], [], []>} : vector<64x1152xbf16>, vector<1152x128xbf16>, vector<64x128xf32> -> vector<64x128xf32>
    %c0_3 = arith.constant 0 : index
    %c0_4 = arith.constant 0 : index
    %3 = vector.load %arg3[%c0_3, %c0_4] : memref<64x1xf32, #tpu.memory_space<vmem>>, vector<64x1xf32>
    %4 = vector.broadcast %3 : vector<64x1xf32> to vector<64x128xf32>
    %5 = arith.addf %2, %4 : vector<64x128xf32>
    %cst_5 = arith.constant 0.000000e+00 : f32
    %6 = vector.broadcast %cst_5 : f32 to vector<64x128xf32>
    %7 = arith.maximumf %5, %6 : vector<64x128xf32>
    %c0_6 = arith.constant 0 : index
    %c0_7 = arith.constant 0 : index
    %8 = vector.load %arg4[%c0_6, %c0_7] : memref<64x128xf32, #tpu.memory_space<vmem>>, vector<64x128xf32>
    tpu.vector_store %arg4[%c0_6, %c0_7], %7 {strides = array<i32>} : memref<64x128xf32, #tpu.memory_space<vmem>>, vector<64x128xf32>,
    return
  }
  func.func @transform_0(%arg0: i32) -> (i32, i32) {
    %c0_i32 = arith.constant 0 : i32
    %c0_i32_0 = arith.constant 0 : i32
    %c0_i32_1 = arith.constant 0 : i32
    return %c0_i32, %c0_i32_0 : i32, i32
  }
  func.func @transform_1(%arg0: i32) -> (i32, i32) {
    %c0_i32 = arith.constant 0 : i32
    %c0_i32_0 = arith.constant 0 : i32
    return %c0_i32, %arg0 : i32, i32
  }
  func.func @transform_2(%arg0: i32) -> (i32, i32) {
    %c0_i32 = arith.constant 0 : i32
    %c0_i32_0 = arith.constant 0 : i32
    %c0_i32_1 = arith.constant 0 : i32
    return %c0_i32, %c0_i32_0 : i32, i32
  }
  func.func @transform_3(%arg0: i32) -> (i32, i32) {
    %c0_i32 = arith.constant 0 : i32
    %c0_i32_0 = arith.constant 0 : i32
    return %c0_i32, %arg0 : i32, i32
  }
}

module attributes {stable_mosaic.version = 11 : i64} {
  func.func @_attn_kernel(%arg0: i32, %arg1: memref<1x64x64xf32, #tpu.memory_space<vmem>>, %arg2: memref<64x8xbf16, #tpu.memory_space<vmem>>, %arg3: memref<1x8xf32, #tpu.memory_space<vmem>>, %arg4: memref<64x8xbf16, #tpu.memory_space<vmem>>, %arg5: memref<1x8xf32, #tpu.memory_space<vmem>>, %arg6: memref<64x64xbf16, #tpu.memory_space<vmem>>, %arg7: memref<1x64xf32, #tpu.memory_space<vmem>>, %arg8: memref<1x1xf32, #tpu.memory_space<vmem>>, %arg9: memref<1x64x64xf32, #tpu.memory_space<vmem>>) attributes {dimension_semantics = [#tpu.dimension_semantics<parallel>], iteration_bounds = array<i64: 2>, scalar_prefetch = 0 : i64, scratch_operands = 0 : i64, tpu.core_type = #tpu.core_type<tc>, window_params = [{transform_indices = @transform_0, window_bounds = array<i64: 1, 64, 64>}, {pipeline_mode = #tpu.pipeline_mode<synchronous>, transform_indices = @transform_1, window_bounds = array<i64: 64, 8>}, {pipeline_mode = #tpu.pipeline_mode<synchronous>, transform_indices = @transform_2, window_bounds = array<i64: 1, 8>}, {pipeline_mode = #tpu.pipeline_mode<synchronous>, transform_indices = @transform_3, window_bounds = array<i64: 64, 8>}, {pipeline_mode = #tpu.pipeline_mode<synchronous>, transform_indices = @transform_4, window_bounds = array<i64: 1, 8>}, {pipeline_mode = #tpu.pipeline_mode<synchronous>, transform_indices = @transform_5, window_bounds = array<i64: 64, 64>}, {pipeline_mode = #tpu.pipeline_mode<synchronous>, transform_indices = @transform_6, window_bounds = array<i64: 1, 64>}, {pipeline_mode = #tpu.pipeline_mode<synchronous>, transform_indices = @transform_7, window_bounds = array<i64: 1, 1>}, {transform_indices = @transform_8, window_bounds = array<i64: 1, 64, 64>}]} {
    %c0 = arith.constant 0 : index
    %c0_0 = arith.constant 0 : index
    %c0_1 = arith.constant 0 : index
    %0 = vector.load %arg1[%c0, %c0_0, %c0_1] : memref<1x64x64xf32, #tpu.memory_space<vmem>>, vector<1x64x64xf32>
    %1 = vector.shape_cast %0 : vector<1x64x64xf32> to vector<64x64xf32>
    %2 = arith.truncf %1 : vector<64x64xf32> to vector<64x64xbf16>
    %c0_2 = arith.constant 0 : index
    %c0_3 = arith.constant 0 : index
    %3 = vector.load %arg2[%c0_2, %c0_3] : memref<64x8xbf16, #tpu.memory_space<vmem>>, vector<64x8xbf16>
    %cst = arith.constant dense<0.000000e+00> : vector<64x8xf32>
    %4 = tpu.matmul %2, %3, %cst {dimension_numbers = #tpu.dot_dimension_numbers<[1], [0], [0], [1], [0, 0, 1, 1], [], []>} : vector<64x64xbf16>, vector<64x8xbf16>, vector<64x8xf32> -> vector<64x8xf32>
    %c0_4 = arith.constant 0 : index
    %c0_5 = arith.constant 0 : index
    %5 = vector.load %arg3[%c0_4, %c0_5] : memref<1x8xf32, #tpu.memory_space<vmem>>, vector<1x8xf32>
    %6 = vector.broadcast %5 : vector<1x8xf32> to vector<64x8xf32>
    %7 = arith.addf %4, %6 : vector<64x8xf32>
    %c0_6 = arith.constant 0 : index
    %c0_7 = arith.constant 0 : index
    %8 = vector.load %arg4[%c0_6, %c0_7] : memref<64x8xbf16, #tpu.memory_space<vmem>>, vector<64x8xbf16>
    %cst_8 = arith.constant dense<0.000000e+00> : vector<64x8xf32>
    %9 = tpu.matmul %2, %8, %cst_8 {dimension_numbers = #tpu.dot_dimension_numbers<[1], [0], [0], [1], [0, 0, 1, 1], [], []>} : vector<64x64xbf16>, vector<64x8xbf16>, vector<64x8xf32> -> vector<64x8xf32>
    %c0_9 = arith.constant 0 : index
    %c0_10 = arith.constant 0 : index
    %10 = vector.load %arg5[%c0_9, %c0_10] : memref<1x8xf32, #tpu.memory_space<vmem>>, vector<1x8xf32>
    %11 = vector.broadcast %10 : vector<1x8xf32> to vector<64x8xf32>
    %12 = arith.addf %9, %11 : vector<64x8xf32>
    %c0_11 = arith.constant 0 : index
    %c0_12 = arith.constant 0 : index
    %13 = vector.load %arg6[%c0_11, %c0_12] : memref<64x64xbf16, #tpu.memory_space<vmem>>, vector<64x64xbf16>
    %cst_13 = arith.constant dense<0.000000e+00> : vector<64x64xf32>
    %14 = tpu.matmul %2, %13, %cst_13 {dimension_numbers = #tpu.dot_dimension_numbers<[1], [0], [0], [1], [0, 0, 1, 1], [], []>} : vector<64x64xbf16>, vector<64x64xbf16>, vector<64x64xf32> -> vector<64x64xf32>
    %c0_14 = arith.constant 0 : index
    %c0_15 = arith.constant 0 : index
    %15 = vector.load %arg7[%c0_14, %c0_15] : memref<1x64xf32, #tpu.memory_space<vmem>>, vector<1x64xf32>
    %16 = vector.broadcast %15 : vector<1x64xf32> to vector<64x64xf32>
    %17 = arith.addf %14, %16 : vector<64x64xf32>
    %18 = arith.truncf %7 : vector<64x8xf32> to vector<64x8xbf16>
    %19 = arith.truncf %12 : vector<64x8xf32> to vector<64x8xbf16>
    %cst_16 = arith.constant dense<0.000000e+00> : vector<64x64xf32>
    %20 = tpu.matmul %18, %19, %cst_16 {dimension_numbers = #tpu.dot_dimension_numbers<[1], [1], [0], [0], [0, 0, 1, 0], [], []>} : vector<64x8xbf16>, vector<64x8xbf16>, vector<64x64xf32> -> vector<64x64xf32>
    %cst_17 = arith.constant dense<0xFF800000> : vector<64xf32>
    %21 = vector.multi_reduction <maximumf>, %20, %cst_17 [1] : vector<64x64xf32> to vector<64xf32>
    %22 = vector.shape_cast %21 : vector<64xf32> to vector<64x1xf32>
    %23 = vector.broadcast %22 : vector<64x1xf32> to vector<64x64xf32>
    %24 = arith.subf %20, %23 : vector<64x64xf32>
    %25 = math.exp %24 : vector<64x64xf32>
    %cst_18 = arith.constant dense<0.000000e+00> : vector<64xf32>
    %26 = vector.multi_reduction <add>, %25, %cst_18 [1] : vector<64x64xf32> to vector<64xf32>
    %27 = vector.shape_cast %26 : vector<64xf32> to vector<64x1xf32>
    %28 = tpu.reciprocal %27 {approx = true} : vector<64x1xf32> -> vector<64x1xf32>
    %29 = vector.broadcast %28 : vector<64x1xf32> to vector<64x64xf32>
    %30 = arith.mulf %25, %29 : vector<64x64xf32>
    %31 = arith.truncf %30 : vector<64x64xf32> to vector<64x64xbf16>
    %32 = arith.truncf %17 : vector<64x64xf32> to vector<64x64xbf16>
    %cst_19 = arith.constant dense<0.000000e+00> : vector<64x64xf32>
    %33 = tpu.matmul %31, %32, %cst_19 {dimension_numbers = #tpu.dot_dimension_numbers<[1], [0], [0], [1], [0, 0, 1, 1], [], []>} : vector<64x64xbf16>, vector<64x64xbf16>, vector<64x64xf32> -> vector<64x64xf32>
    %c0_20 = arith.constant 0 : index
    %c0_21 = arith.constant 0 : index
    %34 = vector.load %arg8[%c0_20, %c0_21] : memref<1x1xf32, #tpu.memory_space<vmem>>, vector<1x1xf32>
    %35 = vector.extract %34[0, 0] : f32 from vector<1x1xf32>
    %36 = vector.broadcast %35 : f32 to vector<64x64xf32>
    %37 = arith.mulf %36, %33 : vector<64x64xf32>
    %38 = arith.addf %37, %1 : vector<64x64xf32>
    %c0_22 = arith.constant 0 : index
    %c0_23 = arith.constant 0 : index
    %c0_24 = arith.constant 0 : index
    %39 = vector.load %arg9[%c0_22, %c0_23, %c0_24] : memref<1x64x64xf32, #tpu.memory_space<vmem>>, vector<1x64x64xf32>
    %40 = vector.shape_cast %39 : vector<1x64x64xf32> to vector<64x64xf32>
    %41 = vector.shape_cast %38 : vector<64x64xf32> to vector<1x64x64xf32>
    tpu.vector_store %arg9[%c0_22, %c0_23, %c0_24], %41 {strides = array<i32>} : memref<1x64x64xf32, #tpu.memory_space<vmem>>, vector<1x64x64xf32>,
    return
  }
  func.func @transform_0(%arg0: i32) -> (i32, i32, i32) {
    %c0_i32 = arith.constant 0 : i32
    %c0_i32_0 = arith.constant 0 : i32
    %c0_i32_1 = arith.constant 0 : i32
    return %arg0, %c0_i32, %c0_i32_0 : i32, i32, i32
  }
  func.func @transform_1(%arg0: i32) -> (i32, i32) {
    %c0_i32 = arith.constant 0 : i32
    %c0_i32_0 = arith.constant 0 : i32
    %c0_i32_1 = arith.constant 0 : i32
    return %c0_i32, %c0_i32_0 : i32, i32
  }
  func.func @transform_2(%arg0: i32) -> (i32, i32) {
    %c0_i32 = arith.constant 0 : i32
    %c0_i32_0 = arith.constant 0 : i32
    %c0_i32_1 = arith.constant 0 : i32
    return %c0_i32, %c0_i32_0 : i32, i32
  }
  func.func @transform_3(%arg0: i32) -> (i32, i32) {
    %c0_i32 = arith.constant 0 : i32
    %c0_i32_0 = arith.constant 0 : i32
    %c0_i32_1 = arith.constant 0 : i32
    return %c0_i32, %c0_i32_0 : i32, i32
  }
  func.func @transform_4(%arg0: i32) -> (i32, i32) {
    %c0_i32 = arith.constant 0 : i32
    %c0_i32_0 = arith.constant 0 : i32
    %c0_i32_1 = arith.constant 0 : i32
    return %c0_i32, %c0_i32_0 : i32, i32
  }
  func.func @transform_5(%arg0: i32) -> (i32, i32) {
    %c0_i32 = arith.constant 0 : i32
    %c0_i32_0 = arith.constant 0 : i32
    %c0_i32_1 = arith.constant 0 : i32
    return %c0_i32, %c0_i32_0 : i32, i32
  }
  func.func @transform_6(%arg0: i32) -> (i32, i32) {
    %c0_i32 = arith.constant 0 : i32
    %c0_i32_0 = arith.constant 0 : i32
    %c0_i32_1 = arith.constant 0 : i32
    return %c0_i32, %c0_i32_0 : i32, i32
  }
  func.func @transform_7(%arg0: i32) -> (i32, i32) {
    %c0_i32 = arith.constant 0 : i32
    %c0_i32_0 = arith.constant 0 : i32
    %c0_i32_1 = arith.constant 0 : i32
    return %c0_i32, %c0_i32_0 : i32, i32
  }
  func.func @transform_8(%arg0: i32) -> (i32, i32, i32) {
    %c0_i32 = arith.constant 0 : i32
    %c0_i32_0 = arith.constant 0 : i32
    %c0_i32_1 = arith.constant 0 : i32
    return %arg0, %c0_i32, %c0_i32_0 : i32, i32, i32
  }
}

module attributes {stable_mosaic.version = 11 : i64} {
  func.func @_mm_bias_kernel(%arg0: i32, %arg1: memref<64x576xbf16, #tpu.memory_space<vmem>>, %arg2: memref<576x128xbf16, #tpu.memory_space<vmem>>, %arg3: memref<64x1xf32, #tpu.memory_space<vmem>>, %arg4: memref<64x128xf32, #tpu.memory_space<vmem>>) attributes {dimension_semantics = [#tpu.dimension_semantics<parallel>], iteration_bounds = array<i64: 1>, scalar_prefetch = 0 : i64, scratch_operands = 0 : i64, tpu.core_type = #tpu.core_type<tc>, window_params = [{pipeline_mode = #tpu.pipeline_mode<synchronous>, transform_indices = @transform_0, window_bounds = array<i64: 64, 576>}, {transform_indices = @transform_1, window_bounds = array<i64: 576, 128>}, {pipeline_mode = #tpu.pipeline_mode<synchronous>, transform_indices = @transform_2, window_bounds = array<i64: 64, 1>}, {transform_indices = @transform_3, window_bounds = array<i64: 64, 128>}]} {
    %c0 = arith.constant 0 : index
    %c0_0 = arith.constant 0 : index
    %0 = vector.load %arg1[%c0, %c0_0] : memref<64x576xbf16, #tpu.memory_space<vmem>>, vector<64x576xbf16>
    %c0_1 = arith.constant 0 : index
    %c0_2 = arith.constant 0 : index
    %1 = vector.load %arg2[%c0_1, %c0_2] : memref<576x128xbf16, #tpu.memory_space<vmem>>, vector<576x128xbf16>
    %cst = arith.constant dense<0.000000e+00> : vector<64x128xf32>
    %2 = tpu.matmul %0, %1, %cst {dimension_numbers = #tpu.dot_dimension_numbers<[1], [0], [0], [1], [0, 0, 1, 1], [], []>} : vector<64x576xbf16>, vector<576x128xbf16>, vector<64x128xf32> -> vector<64x128xf32>
    %c0_3 = arith.constant 0 : index
    %c0_4 = arith.constant 0 : index
    %3 = vector.load %arg3[%c0_3, %c0_4] : memref<64x1xf32, #tpu.memory_space<vmem>>, vector<64x1xf32>
    %4 = vector.broadcast %3 : vector<64x1xf32> to vector<64x128xf32>
    %5 = arith.addf %2, %4 : vector<64x128xf32>
    %cst_5 = arith.constant 0.000000e+00 : f32
    %6 = vector.broadcast %cst_5 : f32 to vector<64x128xf32>
    %7 = arith.maximumf %5, %6 : vector<64x128xf32>
    %c0_6 = arith.constant 0 : index
    %c0_7 = arith.constant 0 : index
    %8 = vector.load %arg4[%c0_6, %c0_7] : memref<64x128xf32, #tpu.memory_space<vmem>>, vector<64x128xf32>
    tpu.vector_store %arg4[%c0_6, %c0_7], %7 {strides = array<i32>} : memref<64x128xf32, #tpu.memory_space<vmem>>, vector<64x128xf32>,
    return
  }
  func.func @transform_0(%arg0: i32) -> (i32, i32) {
    %c0_i32 = arith.constant 0 : i32
    %c0_i32_0 = arith.constant 0 : i32
    %c0_i32_1 = arith.constant 0 : i32
    return %c0_i32, %c0_i32_0 : i32, i32
  }
  func.func @transform_1(%arg0: i32) -> (i32, i32) {
    %c0_i32 = arith.constant 0 : i32
    %c0_i32_0 = arith.constant 0 : i32
    return %c0_i32, %arg0 : i32, i32
  }
  func.func @transform_2(%arg0: i32) -> (i32, i32) {
    %c0_i32 = arith.constant 0 : i32
    %c0_i32_0 = arith.constant 0 : i32
    %c0_i32_1 = arith.constant 0 : i32
    return %c0_i32, %c0_i32_0 : i32, i32
  }
  func.func @transform_3(%arg0: i32) -> (i32, i32) {
    %c0_i32 = arith.constant 0 : i32
    %c0_i32_0 = arith.constant 0 : i32
    return %c0_i32, %arg0 : i32, i32
  }
}

module attributes {stable_mosaic.version = 11 : i64} {
  func.func @_mm_bias_kernel(%arg0: i32, %arg1: memref<128x512xbf16, #tpu.memory_space<vmem>>, %arg2: memref<512x256xbf16, #tpu.memory_space<vmem>>, %arg3: memref<128x1xf32, #tpu.memory_space<vmem>>, %arg4: memref<128x256xf32, #tpu.memory_space<vmem>>) attributes {dimension_semantics = [#tpu.dimension_semantics<parallel>], iteration_bounds = array<i64: 1>, scalar_prefetch = 0 : i64, scratch_operands = 0 : i64, tpu.core_type = #tpu.core_type<tc>, window_params = [{pipeline_mode = #tpu.pipeline_mode<synchronous>, transform_indices = @transform_0, window_bounds = array<i64: 128, 512>}, {transform_indices = @transform_1, window_bounds = array<i64: 512, 256>}, {pipeline_mode = #tpu.pipeline_mode<synchronous>, transform_indices = @transform_2, window_bounds = array<i64: 128, 1>}, {transform_indices = @transform_3, window_bounds = array<i64: 128, 256>}]} {
    %c0 = arith.constant 0 : index
    %c0_0 = arith.constant 0 : index
    %0 = vector.load %arg1[%c0, %c0_0] : memref<128x512xbf16, #tpu.memory_space<vmem>>, vector<128x512xbf16>
    %c0_1 = arith.constant 0 : index
    %c0_2 = arith.constant 0 : index
    %1 = vector.load %arg2[%c0_1, %c0_2] : memref<512x256xbf16, #tpu.memory_space<vmem>>, vector<512x256xbf16>
    %cst = arith.constant dense<0.000000e+00> : vector<128x256xf32>
    %2 = tpu.matmul %0, %1, %cst {dimension_numbers = #tpu.dot_dimension_numbers<[1], [0], [0], [1], [0, 0, 1, 1], [], []>} : vector<128x512xbf16>, vector<512x256xbf16>, vector<128x256xf32> -> vector<128x256xf32>
    %c0_3 = arith.constant 0 : index
    %c0_4 = arith.constant 0 : index
    %3 = vector.load %arg3[%c0_3, %c0_4] : memref<128x1xf32, #tpu.memory_space<vmem>>, vector<128x1xf32>
    %4 = vector.broadcast %3 : vector<128x1xf32> to vector<128x256xf32>
    %5 = arith.addf %2, %4 : vector<128x256xf32>
    %cst_5 = arith.constant 0.000000e+00 : f32
    %6 = vector.broadcast %cst_5 : f32 to vector<128x256xf32>
    %7 = arith.maximumf %5, %6 : vector<128x256xf32>
    %c0_6 = arith.constant 0 : index
    %c0_7 = arith.constant 0 : index
    %8 = vector.load %arg4[%c0_6, %c0_7] : memref<128x256xf32, #tpu.memory_space<vmem>>, vector<128x256xf32>
    tpu.vector_store %arg4[%c0_6, %c0_7], %7 {strides = array<i32>} : memref<128x256xf32, #tpu.memory_space<vmem>>, vector<128x256xf32>,
    return
  }
  func.func @transform_0(%arg0: i32) -> (i32, i32) {
    %c0_i32 = arith.constant 0 : i32
    %c0_i32_0 = arith.constant 0 : i32
    %c0_i32_1 = arith.constant 0 : i32
    return %c0_i32, %c0_i32_0 : i32, i32
  }
  func.func @transform_1(%arg0: i32) -> (i32, i32) {
    %c0_i32 = arith.constant 0 : i32
    %c0_i32_0 = arith.constant 0 : i32
    return %c0_i32, %arg0 : i32, i32
  }
  func.func @transform_2(%arg0: i32) -> (i32, i32) {
    %c0_i32 = arith.constant 0 : i32
    %c0_i32_0 = arith.constant 0 : i32
    %c0_i32_1 = arith.constant 0 : i32
    return %c0_i32, %c0_i32_0 : i32, i32
  }
  func.func @transform_3(%arg0: i32) -> (i32, i32) {
    %c0_i32 = arith.constant 0 : i32
    %c0_i32_0 = arith.constant 0 : i32
    return %c0_i32, %arg0 : i32, i32
  }
}

module attributes {stable_mosaic.version = 11 : i64} {
  func.func @_mm_bias_kernel(%arg0: i32, %arg1: memref<64x256xbf16, #tpu.memory_space<vmem>>, %arg2: memref<256x128xbf16, #tpu.memory_space<vmem>>, %arg3: memref<64x1xf32, #tpu.memory_space<vmem>>, %arg4: memref<64x128xf32, #tpu.memory_space<vmem>>) attributes {dimension_semantics = [#tpu.dimension_semantics<parallel>], iteration_bounds = array<i64: 5>, scalar_prefetch = 0 : i64, scratch_operands = 0 : i64, tpu.core_type = #tpu.core_type<tc>, window_params = [{pipeline_mode = #tpu.pipeline_mode<synchronous>, transform_indices = @transform_0, window_bounds = array<i64: 64, 256>}, {transform_indices = @transform_1, window_bounds = array<i64: 256, 128>}, {pipeline_mode = #tpu.pipeline_mode<synchronous>, transform_indices = @transform_2, window_bounds = array<i64: 64, 1>}, {transform_indices = @transform_3, window_bounds = array<i64: 64, 128>}]} {
    %c0 = arith.constant 0 : index
    %c0_0 = arith.constant 0 : index
    %0 = vector.load %arg1[%c0, %c0_0] : memref<64x256xbf16, #tpu.memory_space<vmem>>, vector<64x256xbf16>
    %c0_1 = arith.constant 0 : index
    %c0_2 = arith.constant 0 : index
    %1 = vector.load %arg2[%c0_1, %c0_2] : memref<256x128xbf16, #tpu.memory_space<vmem>>, vector<256x128xbf16>
    %cst = arith.constant dense<0.000000e+00> : vector<64x128xf32>
    %2 = tpu.matmul %0, %1, %cst {dimension_numbers = #tpu.dot_dimension_numbers<[1], [0], [0], [1], [0, 0, 1, 1], [], []>} : vector<64x256xbf16>, vector<256x128xbf16>, vector<64x128xf32> -> vector<64x128xf32>
    %c0_3 = arith.constant 0 : index
    %c0_4 = arith.constant 0 : index
    %3 = vector.load %arg3[%c0_3, %c0_4] : memref<64x1xf32, #tpu.memory_space<vmem>>, vector<64x1xf32>
    %4 = vector.broadcast %3 : vector<64x1xf32> to vector<64x128xf32>
    %5 = arith.addf %2, %4 : vector<64x128xf32>
    %cst_5 = arith.constant 0.000000e+00 : f32
    %6 = vector.broadcast %cst_5 : f32 to vector<64x128xf32>
    %7 = arith.maximumf %5, %6 : vector<64x128xf32>
    %c0_6 = arith.constant 0 : index
    %c0_7 = arith.constant 0 : index
    %8 = vector.load %arg4[%c0_6, %c0_7] : memref<64x128xf32, #tpu.memory_space<vmem>>, vector<64x128xf32>
    tpu.vector_store %arg4[%c0_6, %c0_7], %7 {strides = array<i32>} : memref<64x128xf32, #tpu.memory_space<vmem>>, vector<64x128xf32>,
    return
  }
  func.func @transform_0(%arg0: i32) -> (i32, i32) {
    %c0_i32 = arith.constant 0 : i32
    %c0_i32_0 = arith.constant 0 : i32
    %c0_i32_1 = arith.constant 0 : i32
    return %c0_i32, %c0_i32_0 : i32, i32
  }
  func.func @transform_1(%arg0: i32) -> (i32, i32) {
    %c0_i32 = arith.constant 0 : i32
    %c0_i32_0 = arith.constant 0 : i32
    return %c0_i32, %arg0 : i32, i32
  }
  func.func @transform_2(%arg0: i32) -> (i32, i32) {
    %c0_i32 = arith.constant 0 : i32
    %c0_i32_0 = arith.constant 0 : i32
    %c0_i32_1 = arith.constant 0 : i32
    return %c0_i32, %c0_i32_0 : i32, i32
  }
  func.func @transform_3(%arg0: i32) -> (i32, i32) {
    %c0_i32 = arith.constant 0 : i32
    %c0_i32_0 = arith.constant 0 : i32
    return %c0_i32, %arg0 : i32, i32
  }
}

module attributes {stable_mosaic.version = 11 : i64} {
  func.func @_mm_bias_kernel(%arg0: i32, %arg1: memref<3x288xbf16, #tpu.memory_space<vmem>>, %arg2: memref<288x512xbf16, #tpu.memory_space<vmem>>, %arg3: memref<3x1xf32, #tpu.memory_space<vmem>>, %arg4: memref<3x512xf32, #tpu.memory_space<vmem>>) attributes {dimension_semantics = [#tpu.dimension_semantics<parallel>], iteration_bounds = array<i64: 4>, scalar_prefetch = 0 : i64, scratch_operands = 0 : i64, tpu.core_type = #tpu.core_type<tc>, window_params = [{pipeline_mode = #tpu.pipeline_mode<synchronous>, transform_indices = @transform_0, window_bounds = array<i64: 3, 288>}, {transform_indices = @transform_1, window_bounds = array<i64: 288, 512>}, {pipeline_mode = #tpu.pipeline_mode<synchronous>, transform_indices = @transform_2, window_bounds = array<i64: 3, 1>}, {transform_indices = @transform_3, window_bounds = array<i64: 3, 512>}]} {
    %c0 = arith.constant 0 : index
    %c0_0 = arith.constant 0 : index
    %0 = vector.load %arg1[%c0, %c0_0] : memref<3x288xbf16, #tpu.memory_space<vmem>>, vector<3x288xbf16>
    %c0_1 = arith.constant 0 : index
    %c0_2 = arith.constant 0 : index
    %1 = vector.load %arg2[%c0_1, %c0_2] : memref<288x512xbf16, #tpu.memory_space<vmem>>, vector<288x512xbf16>
    %cst = arith.constant dense<0.000000e+00> : vector<3x512xf32>
    %2 = tpu.matmul %0, %1, %cst {dimension_numbers = #tpu.dot_dimension_numbers<[1], [0], [0], [1], [0, 0, 1, 1], [], []>} : vector<3x288xbf16>, vector<288x512xbf16>, vector<3x512xf32> -> vector<3x512xf32>
    %c0_3 = arith.constant 0 : index
    %c0_4 = arith.constant 0 : index
    %3 = vector.load %arg3[%c0_3, %c0_4] : memref<3x1xf32, #tpu.memory_space<vmem>>, vector<3x1xf32>
    %4 = vector.broadcast %3 : vector<3x1xf32> to vector<3x512xf32>
    %5 = arith.addf %2, %4 : vector<3x512xf32>
    %c0_5 = arith.constant 0 : index
    %c0_6 = arith.constant 0 : index
    %6 = vector.load %arg4[%c0_5, %c0_6] : memref<3x512xf32, #tpu.memory_space<vmem>>, vector<3x512xf32>
    tpu.vector_store %arg4[%c0_5, %c0_6], %5 {strides = array<i32>} : memref<3x512xf32, #tpu.memory_space<vmem>>, vector<3x512xf32>,
    return
  }
  func.func @transform_0(%arg0: i32) -> (i32, i32) {
    %c0_i32 = arith.constant 0 : i32
    %c0_i32_0 = arith.constant 0 : i32
    %c0_i32_1 = arith.constant 0 : i32
    return %c0_i32, %c0_i32_0 : i32, i32
  }
  func.func @transform_1(%arg0: i32) -> (i32, i32) {
    %c0_i32 = arith.constant 0 : i32
    %c0_i32_0 = arith.constant 0 : i32
    return %c0_i32, %arg0 : i32, i32
  }
  func.func @transform_2(%arg0: i32) -> (i32, i32) {
    %c0_i32 = arith.constant 0 : i32
    %c0_i32_0 = arith.constant 0 : i32
    %c0_i32_1 = arith.constant 0 : i32
    return %c0_i32, %c0_i32_0 : i32, i32
  }
  func.func @transform_3(%arg0: i32) -> (i32, i32) {
    %c0_i32 = arith.constant 0 : i32
    %c0_i32_0 = arith.constant 0 : i32
    return %c0_i32, %arg0 : i32, i32
  }
}

module attributes {stable_mosaic.version = 11 : i64} {
  func.func @_finish_kernel(%arg0: i32, %arg1: memref<3x2x1024xf32, #tpu.memory_space<vmem>>, %arg2: memref<3x2x1024xf32, #tpu.memory_space<vmem>>) attributes {dimension_semantics = [#tpu.dimension_semantics<arbitrary>], iteration_bounds = array<i64: 1>, scalar_prefetch = 0 : i64, scratch_operands = 0 : i64, tpu.core_type = #tpu.core_type<tc>, window_params = [{pipeline_mode = #tpu.pipeline_mode<synchronous>, transform_indices = @transform_0, window_bounds = array<i64: 3, 2, 1024>}, {pipeline_mode = #tpu.pipeline_mode<synchronous>, transform_indices = @transform_1, window_bounds = array<i64: 3, 2, 1024>}]} {
    %c0 = arith.constant 0 : index
    %c0_0 = arith.constant 0 : index
    %c0_1 = arith.constant 0 : index
    %0 = vector.load %arg1[%c0, %c0_0, %c0_1] : memref<3x2x1024xf32, #tpu.memory_space<vmem>>, vector<3x2x1024xf32>
    %1 = math.tanh %0 : vector<3x2x1024xf32>
    %cst = arith.constant dense<0.000000e+00> : vector<3x2xf32>
    %2 = vector.multi_reduction <add>, %1, %cst [2] : vector<3x2x1024xf32> to vector<3x2xf32>
    %3 = vector.shape_cast %2 : vector<3x2xf32> to vector<3x2x1xf32>
    %cst_2 = arith.constant 1.024000e+03 : f32
    %4 = vector.broadcast %cst_2 : f32 to vector<3x2x1xf32>
    %5 = arith.divf %3, %4 : vector<3x2x1xf32>
    %cst_3 = arith.constant 1.020000e+00 : f32
    %6 = vector.broadcast %cst_3 : f32 to vector<3x2x1024xf32>
    %7 = arith.mulf %1, %6 : vector<3x2x1024xf32>
    %cst_4 = arith.constant 2.000000e-02 : f32
    %8 = vector.broadcast %cst_4 : f32 to vector<3x2x1xf32>
    %9 = arith.mulf %5, %8 : vector<3x2x1xf32>
    %10 = vector.broadcast %9 : vector<3x2x1xf32> to vector<3x2x1024xf32>
    %11 = arith.subf %7, %10 : vector<3x2x1024xf32>
    %cst_5 = arith.constant -1.000000e+00 : f32
    %cst_6 = arith.constant 1.000000e+00 : f32
    %12 = vector.broadcast %cst_5 : f32 to vector<3x2x1024xf32>
    %13 = arith.maximumf %12, %11 : vector<3x2x1024xf32>
    %14 = vector.broadcast %cst_6 : f32 to vector<3x2x1024xf32>
    %15 = arith.minimumf %14, %13 : vector<3x2x1024xf32>
    %c0_7 = arith.constant 0 : index
    %c0_8 = arith.constant 0 : index
    %c0_9 = arith.constant 0 : index
    %16 = vector.load %arg2[%c0_7, %c0_8, %c0_9] : memref<3x2x1024xf32, #tpu.memory_space<vmem>>, vector<3x2x1024xf32>
    tpu.vector_store %arg2[%c0_7, %c0_8, %c0_9], %15 {strides = array<i32>} : memref<3x2x1024xf32, #tpu.memory_space<vmem>>, vector<3x2x1024xf32>,
    return
  }
  func.func @transform_0(%arg0: i32) -> (i32, i32, i32) {
    %c0_i32 = arith.constant 0 : i32
    %c0_i32_0 = arith.constant 0 : i32
    %c0_i32_1 = arith.constant 0 : i32
    %c0_i32_2 = arith.constant 0 : i32
    return %c0_i32, %c0_i32_0, %c0_i32_1 : i32, i32, i32
  }
  func.func @transform_1(%arg0: i32) -> (i32, i32, i32) {
    %c0_i32 = arith.constant 0 : i32
    %c0_i32_0 = arith.constant 0 : i32
    %c0_i32_1 = arith.constant 0 : i32
    %c0_i32_2 = arith.constant 0 : i32
    return %c0_i32, %c0_i32_0, %c0_i32_1 : i32, i32, i32
  }
}

</mosaic_0001>

<bundles_post_ra>
// kernel: sketch_depth_colorizer.15
= control target key start
LH: loop header
LB: loop body
LE: loop exit
PB: predicated region body
PF: predicated region fallthrough
CT: control target
= control target key end

     0   :  { %8 = vsyncpa [#allocation3], 0  ;;  %s656_s12 = smov 0   ;;  %s658_s13 = smov 0   ;;  %s768_s0 = inlined_call_operand.hbm [shape: bf16[16,18], index: 0, kind: input, shape index: {}]   ;;  %s769_s1 = inlined_call_operand.vmem [shape: bf16[18,2048], index: 1, kind: input, shape index: {}]   ;;  %s770_s2 = inlined_call_operand.vmem [shape: f32[16,1], index: 2, kind: input, shape index: {}]   ;;  %s771_s3 = inlined_call_operand.vmem [shape: f32[16,2048], index: 3, kind: output, shape index: {}]  }
   0x1   :  { %s660_s14 = smov 0  }
   0x2 LB: > { %s672_s15 = sadd.s32 4294967295, %s630_s14   ;;  %s675_s16 = sadd.s32 1, %s630_s14   ;;  %s630_s14 = sphi %s660_s14, %s778_s14   ;;  %s626_s13 = sphi %s658_s13, %s777_s13   ;;  %s622_s12 = sphi %s656_s12, %s776_s12  }
   0x3   : > { %s39_s17 = ssub.s32 %s630_s14, %s675_s16  ;;  %s42_s18 = sadd.s32 1, %s626_s13 }
   0x4   : > { %p40_p0 = scmp.eq.s32.totalorder %s39_s17, 0  ;;  %p49_p1 = scmp.ne.s32.totalorder %s626_s13, %s622_s12 }
   0x5   : > { %p50_p2 = scmp.eq.s32.totalorder %s630_s14, 0  ;;  %p100_p3 = scmp.eq.s32.totalorder %s672_s15, 3 }
   0x6   : > { %s685_s19 = scalar_select %p40_p0, %s626_s13, %s42_s18  }
   0x7   : > { %p687_p4 = por %p50_p2, %p49_p1  ;;  %p691_p5 = por %p100_p3, %p49_p1 }
   0x8   : > { %p498_p6 = scmp.ge.s32.totalorder %s630_s14, 1  ;;  %p113_p7 = scmp.lt.s32.totalorder %s630_s14, 5 }
   0x9   : > { %s773_s21 = scalar_select %p691_p5, 1, 0 }
   0xa   : > { %p536_p8 = scmp.eq.s32.totalorder %s672_s15, 0  ;;  %p698_p9 = pnand %p498_p6, %p113_p7 }
   0xb   : > { %s632_s23 = smov [#allocation2]  }
   0xc   : > { %s125_s24 = sshll.u32 %s632_s23, 4  ;;  %p532_p10 = pneg %p698_p9  ;;  %s126_s24 = int_to_ptr.vmem [resolvable:$true] %s125_s24 }
   0xd   : > { %s589_s25 = scalar_lea.vmem %s126_s24, 128  ;;  %p597_p2 = scmp.lt.s32.totalorder %s126_s24, %s126_s24 }
   0xe   : > { %p533_p11 = pnand %p536_p8, %p532_p10  ;;  %p590_p13 = scmp.ne.s32.totalorder %s126_s24, %s589_s25 }
   0xf   : > { %p598_p3 = scmp.lt.s32.totalorder %s589_s25, %s589_s25 }
  0x10   : > { %p580_p12 = pneg %p533_p11 }
  0x11   : > { %p599_p5 = por %p598_p3, %p597_p2 }
  0x12   : > { %p592_p0 = pnand %p590_p13, %p580_p12 }
  0x14   : > { %p593_p1 = pneg %p592_p0 }
  0x16   : > { %p600_p6 = pnand %p599_p5, %p593_p1 }
  0x18   : > { %603 = shalt.err (!%p600_p6)
}
  0x19   : > { %s633_s26 = smov 64   ;;  %s634_s27 = smov 4  }
  0x1a   : > { %535 = dma.hbm_to_vmem [thread:$0]  (!%p533_p11), %s768_s0, 128, %s126_s24, [#allocation3], %s633_s26, %s633_s26, %s634_s27  }
  0x1b   : > { %p500_p7 = scmp.ge.s32.totalorder %s630_s14, 4 }
  0x1d   : > { %138 = sbr.rel (%p500_p7) target bundleno = 41 (0x29), region = 24 }
  0x22   : > { %141 = sbr.rel (!%p687_p4) target bundleno = 41 (0x29), region = 28  ;;  %s143_s30 = sand.u32 (%p687_p4), 1, %s626_s13  }
  0x23   : > { %s524_s4 = sshll.u32 (%p687_p4), %s630_s14, 4  ;;  %s526_s5 = smul.u32 (%p687_p4), 48, %s143_s30 }
  0x24   : > { %s148_s8 = scalar_lea.vmem (%p687_p4), %s769_s1, %s524_s4 }
  0x25   : > { %v161_v0 = vld [vmem:[%s148_s8] sm:$0xff] (%p687_p4)  ;;  %v163_v1 = vld [vmem:[%s148_s8 + $0x8] sm:$0xff] (%p687_p4)  ;;  %s145_s9 = scalar_lea.vmem (%p687_p4), [#allocation4], %s526_s5 }
  0x26   : > { %v165_v2 = vld [vmem:[%s148_s8 + $0x40] sm:$0xff] (%p687_p4)  ;;  %v167_v3 = vld [vmem:[%s148_s8 + $0x48] sm:$0xff] (%p687_p4)  ;;  %162 = vst [vmem:[%s145_s9] sm:$0xff] (%p687_p4), %v161_v0  ;;  %164 = vst [vmem:[%s145_s9 + $0x8] sm:$0xff] (%p687_p4), %v163_v1 }
  0x27   : > { %v169_v4 = vld [vmem:[%s148_s8 + $0x80] sm:$0xff]  ;;  %v171_v5 = vld [vmem:[%s148_s8 + $0x88] sm:$0xff]  ;;  %166 = vst [vmem:[%s145_s9 + $0x10] sm:$0xff] %v165_v2  ;;  %168 = vst [vmem:[%s145_s9 + $0x18] sm:$0xff] %v167_v3 }
  0x28   : > { %170 = vst [vmem:[%s145_s9 + $0x20] sm:$0xff] %v169_v4  ;;  %172 = vst [vmem:[%s145_s9 + $0x28] sm:$0xff] %v171_v5 }
  0x29 PF: > { %181 = sbr.rel (%p698_p9) target bundleno = 274 (0x112), region = 51 }
  0x2e   : > { %617 = dma.done.wait (%p536_p8), [#allocation3], 128  }
  0x2f   : > { %619 = vsyncadd (%p536_p8), [#allocation3], 4294967168  ;;  %s188_s10 = sand.u32 1, %s622_s12   ;;  %v635_v6 = vmov 0   ;;  %vm272_vm0 = vcmask 1040384   ;;  %v221_v19 = vld [vmem:[%s770_s2] sm:$0xff] }
  0x30   : > { %s527_s11 = smul.u32 48, %s188_s10  ;;  %317 = vmatprep.mubr.bf16.mxu0 %v635_v6  ;;  %360 = vmatprep.mubr.bf16.mxu1 %v635_v6  ;;  %v577_v20 = vld [vmem:[#allocation2] sm:$0xff]   ;;  %v222_v21 = vld [vmem:[%s770_s2 + $0x8] sm:$0xff]  ;;  %vm268_vm1 = vcmask 146432   ;;  %s505_s23 = sshll.u32 %s188_s10, 6 }
  0x31   : > { %566 = vset.pattern.permute.xlu0 %v635_v6  ;;  %s734_s24 = scalar_lea.vmem [#allocation5], %s505_s23  ;;  %p775_p4 = scmp.ne.s32.totalorder %s773_s21, 0 }
  0x32   : > { %s190_s14 = scalar_lea.vmem [#allocation4], %s527_s11  ;;  %225 = vperm.xlu0 %566, %v221_v19   ;;  %s525_s12 = sshll.u32 (%p775_p4), %s672_s15, 5 }
  0x33   : > { %v219_v7 = vld [vmem:[%s190_s14 + $0x20] sm:$0x11]  ;;  %v220_v8 = vld [vmem:[%s190_s14 + $0x28] sm:$0x11]  ;;  %s396_s27 = scalar_lea.vmem (%p775_p4), %s771_s3, %s525_s12 }
  0x34   : > { %v512_v9 = vcombine.high %v219_v7, %v219_v7  ;;  %v514_v10 = vcombine.high %v220_v8, %v220_v8  ;;  %v511_v11 = vcombine.low %v219_v7, %v219_v7  ;;  %v513_v12 = vcombine.low %v220_v8, %v220_v8  ;;  %v571_v13 = vld [vmem:[%s190_s14 + $0x4] ss:$16 sps:$4 sm:$0xff]   ;;  %v573_v14 = vld [vmem:[%s190_s14 + $0xc] ss:$16 sps:$4 sm:$0xff]   ;;  %v575_v17 = vld [vmem:[%s190_s14] ss:$16 sps:$4 sm:$0xff]  }
  0x35   : > { %v576_v18 = vld [vmem:[%s190_s14 + $0x8] ss:$16 sps:$4 sm:$0xff]  }
  0x36   : > { %515 = vmatprep.subr.msk.bf16.mxu0 %vm272_vm0, %v512_v9  ;;  %517 = vmatprep.subr.msk.bf16.mxu1 %vm272_vm0, %v514_v10  ;;  %v274_v15 = vsel %vm272_vm0, %v511_v11, 0  ;;  %v280_v16 = vsel %vm272_vm0, %v513_v12, 0 }
  0x37   : > { %298 = vmatpush1.bf16.msra.mxu0 %v274_v15  ;;  %341 = vmatpush1.bf16.msra.mxu1 %v280_v16 }
  0x38   : > { %299 = vmatprep.subr.bf16.mxu0 %v571_v13  ;;  %342 = vmatprep.subr.bf16.mxu1 %v573_v14 }
  0x39   : > { %230 = vperm.xlu0 %566, %v222_v21  }
  0x3b   : > { %300 = vmatpush1.bf16.msra.mxu0 %v575_v17  ;;  %343 = vmatpush1.bf16.msra.mxu1 %v576_v18 }
  0x3e   : > { %516 = vmatmul.mubr.msk.bf16.vlgmr.msra.gmra.mxu0 %vm268_vm1, %v577_v20  ;;  %518 = vmatmul.mubr.msk.bf16.vlgmr.msra.gmra.mxu1 %vm268_vm1, %v577_v20 }
  0xad   : > { %v226_v22 = vpop.permute.xlu0 %225 }
  0xb4   : > { %v231_v31 = vpop.permute.xlu0 %230 }
  0xfe   : > { %v319_v23 = vpop.f32.mrf.mxu0  ;;  %v362_v24 = vpop.f32.mrf.mxu1 }
  0xff   : > { %v320_v25 = vadd.f32 %v319_v23, %v226_v22  ;;  %v363_v26 = vadd.f32 %v362_v24, %v226_v22 }
 0x100   : > { %v321_v27 = vpop.f32.mrf.mxu0  ;;  %v364_v28 = vpop.f32.mrf.mxu1 }
 0x101   : > { %v371_v29 = vmax.f32 %v320_v25, 0.0  ;;  %v373_v30 = vmax.f32 %v363_v26, 0.0  ;;  %v322_v32 = vadd.f32 %v321_v27, %v226_v22  ;;  %v365_v33 = vadd.f32 %v364_v28, %v226_v22 }
 0x102   : > { %v323_v34 = vpop.f32.mrf.mxu0  ;;  %v366_v35 = vpop.f32.mrf.mxu1 }
 0x103   : > { %379 = vst [vmem:[%s734_s24] sm:$0xff] %v371_v29  ;;  %381 = vst [vmem:[%s734_s24 + $0x10] sm:$0xff] %v373_v30  ;;  %v372_v36 = vmax.f32 %v322_v32, 0.0  ;;  %v374_v37 = vmax.f32 %v365_v33, 0.0  ;;  %v324_v38 = vadd.f32 %v323_v34, %v231_v31  ;;  %v367_v39 = vadd.f32 %v366_v35, %v231_v31 }
 0x104   : > { %v325_v40 = vpop.f32.mrf.mxu0  ;;  %v368_v41 = vpop.f32.mrf.mxu1 }
 0x105   : > { %380 = vst [vmem:[%s734_s24 + $0x8] sm:$0xff] %v372_v36  ;;  %382 = vst [vmem:[%s734_s24 + $0x18] sm:$0xff] %v374_v37  ;;  %v375_v42 = vmax.f32 %v324_v38, 0.0  ;;  %v377_v43 = vmax.f32 %v367_v39, 0.0  ;;  %v326_v44 = vadd.f32 %v325_v40, %v231_v31  ;;  %v369_v45 = vadd.f32 %v368_v41, %v231_v31  ;;  %393 = sbr.rel (!%p775_p4) target bundleno = 274 (0x112), region = 63 }
 0x107   : > { %383 = vst [vmem:[%s734_s24 + $0x20] sm:$0xff] %v375_v42  ;;  %385 = vst [vmem:[%s734_s24 + $0x30] sm:$0xff] %v377_v43  ;;  %v376_v46 = vmax.f32 %v326_v44, 0.0  ;;  %v378_v47 = vmax.f32 %v369_v45, 0.0 }
 0x109   : > { %384 = vst [vmem:[%s734_s24 + $0x28] sm:$0xff] %v376_v46  ;;  %386 = vst [vmem:[%s734_s24 + $0x38] sm:$0xff] %v378_v47 }
 0x10a   : > { %v409_v48 = vld [vmem:[%s734_s24] sm:$0xff]  ;;  %v413_v50 = vld [vmem:[%s734_s24 + $0x10] sm:$0xff] }
 0x10b   : > { %410 = vst [vmem:[%s396_s27] sm:$0xff] %v409_v48  ;;  %414 = vst [vmem:[%s396_s27 + $0x10] sm:$0xff] %v413_v50 }
 0x10c   : > { %v411_v49 = vld [vmem:[%s734_s24 + $0x8] sm:$0xff]  ;;  %v415_v51 = vld [vmem:[%s734_s24 + $0x18] sm:$0xff] }
 0x10d   : > { %412 = vst [vmem:[%s396_s27 + $0x8] sm:$0xff] %v411_v49  ;;  %416 = vst [vmem:[%s396_s27 + $0x18] sm:$0xff] %v415_v51 }
 0x10e   : > { %v417_v52 = vld [vmem:[%s734_s24 + $0x20] sm:$0xff]  ;;  %v421_v54 = vld [vmem:[%s734_s24 + $0x30] sm:$0xff] }
 0x10f   : > { %418 = vst [vmem:[%s396_s27 + $0x80] sm:$0xff] %v417_v52  ;;  %422 = vst [vmem:[%s396_s27 + $0x90] sm:$0xff] %v421_v54 }
 0x110   : > { %v419_v53 = vld [vmem:[%s734_s24 + $0x28] sm:$0xff]  ;;  %v423_v55 = vld [vmem:[%s734_s24 + $0x38] sm:$0xff] }
 0x111   : > { %420 = vst [vmem:[%s396_s27 + $0x88] sm:$0xff] %v419_v53  ;;  %424 = vst [vmem:[%s396_s27 + $0x98] sm:$0xff] %v423_v55 }
 0x112 PF: > { %p11_p5 = scmp.ge.s32.totalorder %s675_s16, 6   ;;  %s776_s12 = smov %s626_s13 }
 0x113   : > { %s777_s13 = smov %s685_s19  ;;  %s778_s14 = smov %s675_s16 }
 0x114   :  { %13 = sbr.rel (!%p11_p5) target bundleno = 2 (0x2), region = 118 }
 0x119   :  { %440 = vsyncpa [#allocation3], 1 }
 0x11a   :  { %442 = vsyncpa [#allocation3 + $0x1], 1 }

// kernel: sketch_depth_colorizer.16
= control target key start
LH: loop header
LB: loop body
LE: loop exit
PB: predicated region body
PF: predicated region fallthrough
CT: control target
= control target key end

     0   :  { %v761_v1 = vmov 0   ;;  %s1046_s1 = inlined_call_operand.vmem [shape: bf16[256,512], index: 1, kind: input, shape index: {}]   ;;  %s1047_s0 = inlined_call_operand.vmem [shape: bf16[32,256], index: 0, kind: input, shape index: {}]   ;;  %s1048_s2 = inlined_call_operand.vmem [shape: f32[32,1], index: 2, kind: input, shape index: {}]   ;;  %s1049_s3 = inlined_call_operand.vmem [shape: f32[32,512], index: 3, kind: output, shape index: {}]  }
   0x1   :  { %v659_v0 = vld [vmem:[%s1046_s1 + $0xe4] ss:$16 sps:$4 sm:$0xff]   ;;  %657 = vset.pattern.permute.xlu0 %v761_v1  ;;  %658 = vset.pattern.permute.xlu1 %v761_v1  ;;  %v661_v2 = vld [vmem:[%s1046_s1 + $0xec] ss:$16 sps:$4 sm:$0xff]   ;;  %v663_v3 = vld [vmem:[%s1046_s1 + $0xe0] ss:$16 sps:$4 sm:$0xff]  }
   0x2   :  { %446 = vmatprep.subr.bf16.mxu0 %v659_v0  ;;  %v664_v4 = vld [vmem:[%s1046_s1 + $0xe8] ss:$16 sps:$4 sm:$0xff]   ;;  %499 = vmatprep.subr.bf16.mxu1 %v661_v2  ;;  %v665_v5 = vld [vmem:[%s1046_s1 + $0xc4] ss:$16 sps:$4 sm:$0xff]   ;;  %v667_v6 = vld [vmem:[%s1046_s1 + $0xcc] ss:$16 sps:$4 sm:$0xff]  }
   0x3   :  { %447 = vmatpush1.bf16.msra.mxu0 %v663_v3  ;;  %500 = vmatpush1.bf16.msra.mxu1 %v664_v4  ;;  %v669_v7 = vld [vmem:[%s1046_s1 + $0xc0] ss:$16 sps:$4 sm:$0xff]   ;;  %v670_v8 = vld [vmem:[%s1046_s1 + $0xc8] ss:$16 sps:$4 sm:$0xff]   ;;  %v671_v9 = vld [vmem:[%s1046_s1 + $0xa4] ss:$16 sps:$4 sm:$0xff]  }
   0x4   :  { %448 = vmatprep.subr.bf16.mxu0 %v665_v5  ;;  %501 = vmatprep.subr.bf16.mxu1 %v667_v6  ;;  %v673_v10 = vld [vmem:[%s1046_s1 + $0xac] ss:$16 sps:$4 sm:$0xff]   ;;  %v675_v11 = vld [vmem:[%s1046_s1 + $0xa0] ss:$16 sps:$4 sm:$0xff]   ;;  %v676_v12 = vld [vmem:[%s1046_s1 + $0xa8] ss:$16 sps:$4 sm:$0xff]  }
   0x5   :  { %v677_v13 = vld [vmem:[%s1046_s1 + $0x84] ss:$16 sps:$4 sm:$0xff]   ;;  %v679_v14 = vld [vmem:[%s1046_s1 + $0x8c] ss:$16 sps:$4 sm:$0xff]   ;;  %v681_v15 = vld [vmem:[%s1046_s1 + $0x80] ss:$16 sps:$4 sm:$0xff]  }
   0x6   :  { %v682_v16 = vld [vmem:[%s1046_s1 + $0x88] ss:$16 sps:$4 sm:$0xff]   ;;  %v683_v17 = vld [vmem:[%s1046_s1 + $0x64] ss:$16 sps:$4 sm:$0xff]   ;;  %v685_v18 = vld [vmem:[%s1046_s1 + $0x6c] ss:$16 sps:$4 sm:$0xff]  }
   0x7   :  { %449 = vmatpush1.bf16.msra.mxu0 %v669_v7  ;;  %502 = vmatpush1.bf16.msra.mxu1 %v670_v8  ;;  %v687_v19 = vld [vmem:[%s1046_s1 + $0x60] ss:$16 sps:$4 sm:$0xff]   ;;  %v688_v20 = vld [vmem:[%s1046_s1 + $0x68] ss:$16 sps:$4 sm:$0xff]   ;;  %v689_v21 = vld [vmem:[%s1046_s1 + $0x44] ss:$16 sps:$4 sm:$0xff]  }
   0x8   :  { %450 = vmatprep.subr.bf16.mxu0 %v671_v9  ;;  %503 = vmatprep.subr.bf16.mxu1 %v673_v10  ;;  %v691_v22 = vld [vmem:[%s1046_s1 + $0x4c] ss:$16 sps:$4 sm:$0xff]   ;;  %v693_v23 = vld [vmem:[%s1046_s1 + $0x40] ss:$16 sps:$4 sm:$0xff]   ;;  %v694_v24 = vld [vmem:[%s1046_s1 + $0x48] ss:$16 sps:$4 sm:$0xff]  }
   0x9   :  { %v695_v25 = vld [vmem:[%s1046_s1 + $0x24] ss:$16 sps:$4 sm:$0xff]   ;;  %v697_v26 = vld [vmem:[%s1046_s1 + $0x2c] ss:$16 sps:$4 sm:$0xff]   ;;  %v699_v27 = vld [vmem:[%s1046_s1 + $0x20] ss:$16 sps:$4 sm:$0xff]  }
   0xa   :  { %v700_v28 = vld [vmem:[%s1046_s1 + $0x28] ss:$16 sps:$4 sm:$0xff]   ;;  %v701_v29 = vld [vmem:[%s1046_s1 + $0x4] ss:$16 sps:$4 sm:$0xff]   ;;  %v703_v30 = vld [vmem:[%s1046_s1 + $0xc] ss:$16 sps:$4 sm:$0xff]  }
   0xb   :  { %451 = vmatpush1.bf16.msra.mxu0 %v675_v11  ;;  %504 = vmatpush1.bf16.msra.mxu1 %v676_v12  ;;  %v705_v31 = vld [vmem:[%s1046_s1] ss:$16 sps:$4 sm:$0xff]   ;;  %v706_v32 = vld [vmem:[%s1046_s1 + $0x8] ss:$16 sps:$4 sm:$0xff]   ;;  %v707_v33 = vld [vmem:[%s1046_s1 + $0x1e4] ss:$16 sps:$4 sm:$0xff]  }
   0xc   :  { %452 = vmatprep.subr.bf16.mxu0 %v677_v13  ;;  %505 = vmatprep.subr.bf16.mxu1 %v679_v14  ;;  %v709_v34 = vld [vmem:[%s1046_s1 + $0x1ec] ss:$16 sps:$4 sm:$0xff]   ;;  %v711_v35 = vld [vmem:[%s1046_s1 + $0x1e0] ss:$16 sps:$4 sm:$0xff]   ;;  %v712_v36 = vld [vmem:[%s1046_s1 + $0x1e8] ss:$16 sps:$4 sm:$0xff]  }
   0xd   :  { %v713_v37 = vld [vmem:[%s1046_s1 + $0x1c4] ss:$16 sps:$4 sm:$0xff]   ;;  %v715_v38 = vld [vmem:[%s1046_s1 + $0x1cc] ss:$16 sps:$4 sm:$0xff]   ;;  %v717_v39 = vld [vmem:[%s1046_s1 + $0x1c0] ss:$16 sps:$4 sm:$0xff]  }
   0xe   :  { %v718_v40 = vld [vmem:[%s1046_s1 + $0x1c8] ss:$16 sps:$4 sm:$0xff]   ;;  %v719_v41 = vld [vmem:[%s1046_s1 + $0x1a4] ss:$16 sps:$4 sm:$0xff]   ;;  %v721_v42 = vld [vmem:[%s1046_s1 + $0x1ac] ss:$16 sps:$4 sm:$0xff]  }
   0xf   :  { %453 = vmatpush1.bf16.msra.mxu0 %v681_v15  ;;  %506 = vmatpush1.bf16.msra.mxu1 %v682_v16  ;;  %v723_v43 = vld [vmem:[%s1046_s1 + $0x1a0] ss:$16 sps:$4 sm:$0xff]   ;;  %v724_v44 = vld [vmem:[%s1046_s1 + $0x1a8] ss:$16 sps:$4 sm:$0xff]   ;;  %v725_v45 = vld [vmem:[%s1046_s1 + $0x184] ss:$16 sps:$4 sm:$0xff]  }
  0x10   :  { %454 = vmatprep.subr.bf16.mxu0 %v683_v17  ;;  %507 = vmatprep.subr.bf16.mxu1 %v685_v18  ;;  %v727_v46 = vld [vmem:[%s1046_s1 + $0x18c] ss:$16 sps:$4 sm:$0xff]   ;;  %v729_v47 = vld [vmem:[%s1046_s1 + $0x180] ss:$16 sps:$4 sm:$0xff]   ;;  %v730_v49 = vld [vmem:[%s1046_s1 + $0x188] ss:$16 sps:$4 sm:$0xff]  }
  0x11   :  { %v757_v48 = vld [vmem:[%s1047_s0 + $0x4] ss:$8 sps:$4 sm:$0xff]   ;;  %v84_v53 = vld [vmem:[%s1048_s2 + $0x10] sm:$0xff]  ;;  %v736_v55 = vld [vmem:[%s1046_s1 + $0x168] ss:$16 sps:$4 sm:$0xff]  }
  0x12   :  { %v731_v50 = vld [vmem:[%s1046_s1 + $0x164] ss:$16 sps:$4 sm:$0xff]   ;;  %v733_v51 = vld [vmem:[%s1046_s1 + $0x16c] ss:$16 sps:$4 sm:$0xff]   ;;  %478 = vmatprep.mubr.bf16.mxu0 %v757_v48  ;;  %531 = vmatprep.mubr.bf16.mxu1 %v757_v48  ;;  %v735_v54 = vld [vmem:[%s1046_s1 + $0x160] ss:$16 sps:$4 sm:$0xff]  }
  0x13   :  { %455 = vmatpush1.bf16.msra.mxu0 %v687_v19  ;;  %508 = vmatpush1.bf16.msra.mxu1 %v688_v20  ;;  %v82_v52 = vld [vmem:[%s1048_s2] sm:$0xff]  ;;  %v83_v56 = vld [vmem:[%s1048_s2 + $0x8] sm:$0xff]  ;;  %v85_v57 = vld [vmem:[%s1048_s2 + $0x18] sm:$0xff] }
  0x14   :  { %456 = vmatprep.subr.bf16.mxu0 %v689_v21  ;;  %509 = vmatprep.subr.bf16.mxu1 %v691_v22  ;;  %v737_v58 = vld [vmem:[%s1046_s1 + $0x144] ss:$16 sps:$4 sm:$0xff]   ;;  %v739_v59 = vld [vmem:[%s1046_s1 + $0x14c] ss:$16 sps:$4 sm:$0xff]   ;;  %v741_v60 = vld [vmem:[%s1046_s1 + $0x140] ss:$16 sps:$4 sm:$0xff]  }
  0x15   :  { %88 = vperm.xlu0 %657, %v82_v52   ;;  %98 = vperm.xlu1 %658, %v84_v53   ;;  %v742_v61 = vld [vmem:[%s1046_s1 + $0x148] ss:$16 sps:$4 sm:$0xff]   ;;  %v743_v62 = vld [vmem:[%s1046_s1 + $0x124] ss:$16 sps:$4 sm:$0xff]   ;;  %v745_v63 = vld [vmem:[%s1046_s1 + $0x12c] ss:$16 sps:$4 sm:$0xff]  }
  0x16   :  { %v747_v0 = vld [vmem:[%s1046_s1 + $0x120] ss:$16 sps:$4 sm:$0xff]   ;;  %v748_v1 = vld [vmem:[%s1046_s1 + $0x128] ss:$16 sps:$4 sm:$0xff]   ;;  %v749_v2 = vld [vmem:[%s1046_s1 + $0x104] ss:$16 sps:$4 sm:$0xff]  }
  0x17   :  { %457 = vmatpush1.bf16.msra.mxu0 %v693_v23  ;;  %510 = vmatpush1.bf16.msra.mxu1 %v694_v24  ;;  %v751_v3 = vld [vmem:[%s1046_s1 + $0x10c] ss:$16 sps:$4 sm:$0xff]   ;;  %v753_v4 = vld [vmem:[%s1046_s1 + $0x100] ss:$16 sps:$4 sm:$0xff]   ;;  %v754_v5 = vld [vmem:[%s1046_s1 + $0x108] ss:$16 sps:$4 sm:$0xff]  }
  0x18   :  { %458 = vmatprep.subr.bf16.mxu0 %v695_v25  ;;  %511 = vmatprep.subr.bf16.mxu1 %v697_v26  ;;  %v755_v6 = vld [vmem:[%s1047_s0] ss:$8 sps:$4 sm:$0xff]   ;;  %v758_v7 = vld [vmem:[%s1047_s0 + $0x14] ss:$8 sps:$4 sm:$0xff]   ;;  %v760_v8 = vld [vmem:[%s1047_s0 + $0x10] ss:$8 sps:$4 sm:$0xff]  }
  0x19   :  { %93 = vperm.xlu0 %657, %v83_v56   ;;  %103 = vperm.xlu1 %658, %v85_v57  }
  0x1b   :  { %459 = vmatpush1.bf16.msra.mxu0 %v699_v27  ;;  %512 = vmatpush1.bf16.msra.mxu1 %v700_v28 }
  0x1c   :  { %460 = vmatprep.subr.bf16.mxu0 %v701_v29  ;;  %513 = vmatprep.subr.bf16.mxu1 %v703_v30 }
  0x1f   :  { %461 = vmatpush1.bf16.msra.mxu0 %v705_v31  ;;  %514 = vmatpush1.bf16.msra.mxu1 %v706_v32 }
  0x20   :  { %462 = vmatprep.subr.bf16.mxu0 %v707_v33  ;;  %515 = vmatprep.subr.bf16.mxu1 %v709_v34 }
  0x23   :  { %463 = vmatpush2.bf16.msra.mxu0 %v711_v35  ;;  %516 = vmatpush2.bf16.msra.mxu1 %v712_v36 }
  0x24   :  { %464 = vmatprep.subr.bf16.mxu0 %v713_v37  ;;  %517 = vmatprep.subr.bf16.mxu1 %v715_v38 }
  0x27   :  { %465 = vmatpush2.bf16.msra.mxu0 %v717_v39  ;;  %518 = vmatpush2.bf16.msra.mxu1 %v718_v40 }
  0x28   :  { %466 = vmatprep.subr.bf16.mxu0 %v719_v41  ;;  %519 = vmatprep.subr.bf16.mxu1 %v721_v42 }
  0x2b   :  { %467 = vmatpush2.bf16.msra.mxu0 %v723_v43  ;;  %520 = vmatpush2.bf16.msra.mxu1 %v724_v44 }
  0x2c   :  { %468 = vmatprep.subr.bf16.mxu0 %v725_v45  ;;  %521 = vmatprep.subr.bf16.mxu1 %v727_v46 }
  0x2f   :  { %469 = vmatpush2.bf16.msra.mxu0 %v729_v47  ;;  %522 = vmatpush2.bf16.msra.mxu1 %v730_v49 }
  0x30   :  { %470 = vmatprep.subr.bf16.mxu0 %v731_v50  ;;  %523 = vmatprep.subr.bf16.mxu1 %v733_v51 }
  0x33   :  { %471 = vmatpush2.bf16.msra.mxu0 %v735_v54  ;;  %524 = vmatpush2.bf16.msra.mxu1 %v736_v55 }
  0x34   :  { %472 = vmatprep.subr.bf16.mxu0 %v737_v58  ;;  %525 = vmatprep.subr.bf16.mxu1 %v739_v59 }
  0x37   :  { %473 = vmatpush2.bf16.msra.mxu0 %v741_v60  ;;  %526 = vmatpush2.bf16.msra.mxu1 %v742_v61 }
  0x38   :  { %474 = vmatprep.subr.bf16.mxu0 %v743_v62  ;;  %527 = vmatprep.subr.bf16.mxu1 %v745_v63 }
  0x3b   :  { %475 = vmatpush2.bf16.msra.mxu0 %v747_v0  ;;  %528 = vmatpush2.bf16.msra.mxu1 %v748_v1 }
  0x3c   :  { %476 = vmatprep.subr.bf16.mxu0 %v749_v2  ;;  %529 = vmatprep.subr.bf16.mxu1 %v751_v3 }
  0x3f   :  { %477 = vmatpush2.bf16.msra.mxu0 %v753_v4  ;;  %530 = vmatpush2.bf16.msra.mxu1 %v754_v5 }
  0x42   :  { %479 = vmatmul.mubr.bf16.vlgmr.msra.gmra.mxu0 %v755_v6  ;;  %532 = vmatmul.mubr.bf16.vlgmr.msra.gmra.mxu1 %v755_v6 }
  0x43   :  { %488 = vmatprep.mubr.bf16.mxu0 %v758_v7  ;;  %541 = vmatprep.mubr.bf16.mxu1 %v758_v7 }
  0x4a   :  { %489 = vmatmul.mubr.bf16.gmra.mxu0 %v760_v8  ;;  %542 = vmatmul.mubr.bf16.gmra.mxu1 %v760_v8 }
  0x90   :  { %v89_v9 = vpop.permute.xlu0 %88  ;;  %v99_v27 = vpop.permute.xlu1 %98 }
  0x94   :  { %v94_v14 = vpop.permute.xlu0 %93  ;;  %v104_v44 = vpop.permute.xlu1 %103 }
 0x102   :  { %v480_v10 = vpop.f32.mrf.mxu0  ;;  %v533_v11 = vpop.f32.mrf.mxu1 }
 0x103   :  { %v481_v12 = vadd.f32 %v480_v10, %v89_v9  ;;  %v534_v13 = vadd.f32 %v533_v11, %v89_v9 }
 0x104   :  { %v482_v15 = vpop.f32.mrf.mxu0  ;;  %v535_v16 = vpop.f32.mrf.mxu1 }
 0x105   :  { %v552_v17 = vmax.f32 %v481_v12, 0.0  ;;  %v554_v18 = vmax.f32 %v534_v13, 0.0  ;;  %v483_v19 = vadd.f32 %v482_v15, %v89_v9  ;;  %v536_v20 = vadd.f32 %v535_v16, %v89_v9 }
 0x106   :  { %v484_v21 = vpop.f32.mrf.mxu0  ;;  %v537_v22 = vpop.f32.mrf.mxu1 }
 0x107   :  { %568 = vst [vmem:[%s1049_s3] sm:$0xff] %v552_v17  ;;  %570 = vst [vmem:[%s1049_s3 + $0x10] sm:$0xff] %v554_v18  ;;  %v553_v23 = vmax.f32 %v483_v19, 0.0  ;;  %v555_v24 = vmax.f32 %v536_v20, 0.0  ;;  %v485_v25 = vadd.f32 %v484_v21, %v94_v14  ;;  %v538_v26 = vadd.f32 %v537_v22, %v94_v14 }
 0x108   :  { %v486_v28 = vpop.f32.mrf.mxu0  ;;  %v539_v29 = vpop.f32.mrf.mxu1 }
 0x109   :  { %569 = vst [vmem:[%s1049_s3 + $0x8] sm:$0xff] %v553_v23  ;;  %571 = vst [vmem:[%s1049_s3 + $0x18] sm:$0xff] %v555_v24  ;;  %v556_v30 = vmax.f32 %v485_v25, 0.0  ;;  %v558_v31 = vmax.f32 %v538_v26, 0.0  ;;  %v487_v32 = vadd.f32 %v486_v28, %v94_v14  ;;  %v540_v33 = vadd.f32 %v539_v29, %v94_v14 }
 0x10a   :  { %v490_v34 = vpop.f32.mrf.mxu0  ;;  %v543_v35 = vpop.f32.mrf.mxu1 }
 0x10b   :  { %572 = vst [vmem:[%s1049_s3 + $0x20] sm:$0xff] %v556_v30  ;;  %574 = vst [vmem:[%s1049_s3 + $0x30] sm:$0xff] %v558_v31  ;;  %v557_v36 = vmax.f32 %v487_v32, 0.0  ;;  %v559_v37 = vmax.f32 %v540_v33, 0.0  ;;  %v491_v38 = vadd.f32 %v490_v34, %v99_v27  ;;  %v544_v39 = vadd.f32 %v543_v35, %v99_v27 }
 0x10c   :  { %v492_v40 = vpop.f32.mrf.mxu0  ;;  %v545_v41 = vpop.f32.mrf.mxu1 }
 0x10d   :  { %573 = vst [vmem:[%s1049_s3 + $0x28] sm:$0xff] %v557_v36  ;;  %575 = vst [vmem:[%s1049_s3 + $0x38] sm:$0xff] %v559_v37  ;;  %v560_v42 = vmax.f32 %v491_v38, 0.0  ;;  %v562_v43 = vmax.f32 %v544_v39, 0.0  ;;  %v493_v45 = vadd.f32 %v492_v40, %v99_v27  ;;  %v546_v46 = vadd.f32 %v545_v41, %v99_v27 }
 0x10e   :  { %v494_v47 = vpop.f32.mrf.mxu0  ;;  %v547_v48 = vpop.f32.mrf.mxu1 }
 0x10f   :  { %576 = vst [vmem:[%s1049_s3 + $0x40] sm:$0xff] %v560_v42  ;;  %578 = vst [vmem:[%s1049_s3 + $0x50] sm:$0xff] %v562_v43  ;;  %v561_v49 = vmax.f32 %v493_v45, 0.0  ;;  %v563_v50 = vmax.f32 %v546_v46, 0.0  ;;  %v495_v51 = vadd.f32 %v494_v47, %v104_v44  ;;  %v548_v52 = vadd.f32 %v547_v48, %v104_v44 }
 0x110   :  { %v496_v53 = vpop.f32.mrf.mxu0  ;;  %v549_v54 = vpop.f32.mrf.mxu1 }
 0x111   :  { %577 = vst [vmem:[%s1049_s3 + $0x48] sm:$0xff] %v561_v49  ;;  %579 = vst [vmem:[%s1049_s3 + $0x58] sm:$0xff] %v563_v50  ;;  %v564_v55 = vmax.f32 %v495_v51, 0.0  ;;  %v566_v56 = vmax.f32 %v548_v52, 0.0  ;;  %v497_v57 = vadd.f32 %v496_v53, %v104_v44  ;;  %v550_v58 = vadd.f32 %v549_v54, %v104_v44 }
 0x113   :  { %580 = vst [vmem:[%s1049_s3 + $0x60] sm:$0xff] %v564_v55  ;;  %582 = vst [vmem:[%s1049_s3 + $0x70] sm:$0xff] %v566_v56  ;;  %v565_v59 = vmax.f32 %v497_v57, 0.0  ;;  %v567_v60 = vmax.f32 %v550_v58, 0.0 }
 0x115   :  { %581 = vst [vmem:[%s1049_s3 + $0x68] sm:$0xff] %v565_v59  ;;  %583 = vst [vmem:[%s1049_s3 + $0x78] sm:$0xff] %v567_v60 }

// kernel: sketch_depth_colorizer.17
= control target key start
LH: loop header
LB: loop body
LE: loop exit
PB: predicated region body
PF: predicated region fallthrough
CT: control target
= control target key end

     0   :  { %v752_v1 = vmov 0   ;;  %s965_s1 = inlined_call_operand.vmem [shape: bf16[512,128], index: 1, kind: input, shape index: {}]   ;;  %s966_s0 = inlined_call_operand.vmem [shape: bf16[64,512], index: 0, kind: input, shape index: {}]   ;;  %s967_s2 = inlined_call_operand.vmem [shape: f32[64,1], index: 2, kind: input, shape index: {}]   ;;  %s968_s3 = inlined_call_operand.vmem [shape: f32[64,128], index: 3, kind: output, shape index: {}]  }
   0x1   :  { %v696_v0 = vld [vmem:[%s965_s1 + $0x78] sm:$0xff]   ;;  %694 = vset.pattern.permute.xlu0 %v752_v1  ;;  %695 = vset.pattern.permute.xlu1 %v752_v1  ;;  %v700_v5 = vld [vmem:[%s965_s1 + $0x70] sm:$0xff]   ;;  %v704_v9 = vld [vmem:[%s965_s1 + $0x68] sm:$0xff]  }
   0x2   :  { %v697_v2 = vld [vmem:[%s965_s1 + $0xf8] sm:$0xff]   ;;  %613 = vmatprep.subr.bf16.mxu0 %v696_v0  ;;  %v701_v6 = vld [vmem:[%s965_s1 + $0xf0] sm:$0xff]   ;;  %v705_v10 = vld [vmem:[%s965_s1 + $0xe8] sm:$0xff]  }
   0x3   :  { %v698_v3 = vld [vmem:[%s965_s1 + $0x38] sm:$0xff]   ;;  %653 = vmatprep.subr.bf16.mxu1 %v697_v2  ;;  %v702_v7 = vld [vmem:[%s965_s1 + $0x30] sm:$0xff]   ;;  %v706_v11 = vld [vmem:[%s965_s1 + $0x28] sm:$0xff]  }
   0x4   :  { %v699_v4 = vld [vmem:[%s965_s1 + $0xb8] sm:$0xff]   ;;  %614 = vmatpush3.bf16.msra.mxu0 %v698_v3  ;;  %v703_v8 = vld [vmem:[%s965_s1 + $0xb0] sm:$0xff]   ;;  %v707_v12 = vld [vmem:[%s965_s1 + $0xa8] sm:$0xff]  }
   0x5   :  { %654 = vmatpush3.bf16.msra.mxu1 %v699_v4  ;;  %615 = vmatprep.subr.bf16.mxu0 %v700_v5  ;;  %v708_v13 = vld [vmem:[%s965_s1 + $0x60] sm:$0xff]   ;;  %v712_v17 = vld [vmem:[%s965_s1 + $0x58] sm:$0xff]   ;;  %v716_v21 = vld [vmem:[%s965_s1 + $0x50] sm:$0xff]  }
   0x6   :  { %655 = vmatprep.subr.bf16.mxu1 %v701_v6  ;;  %v709_v14 = vld [vmem:[%s965_s1 + $0xe0] sm:$0xff]   ;;  %v713_v18 = vld [vmem:[%s965_s1 + $0xd8] sm:$0xff]   ;;  %v717_v22 = vld [vmem:[%s965_s1 + $0xd0] sm:$0xff]  }
   0x7   :  { %v710_v15 = vld [vmem:[%s965_s1 + $0x20] sm:$0xff]   ;;  %v714_v19 = vld [vmem:[%s965_s1 + $0x18] sm:$0xff]   ;;  %v718_v23 = vld [vmem:[%s965_s1 + $0x10] sm:$0xff]  }
   0x8   :  { %616 = vmatpush3.bf16.msra.mxu0 %v702_v7  ;;  %v711_v16 = vld [vmem:[%s965_s1 + $0xa0] sm:$0xff]   ;;  %v715_v20 = vld [vmem:[%s965_s1 + $0x98] sm:$0xff]   ;;  %v719_v24 = vld [vmem:[%s965_s1 + $0x90] sm:$0xff]  }
   0x9   :  { %656 = vmatpush3.bf16.msra.mxu1 %v703_v8  ;;  %617 = vmatprep.subr.bf16.mxu0 %v704_v9  ;;  %v720_v25 = vld [vmem:[%s965_s1 + $0x48] sm:$0xff]   ;;  %v724_v29 = vld [vmem:[%s965_s1 + $0x40] sm:$0xff]   ;;  %v97_v44 = vld [vmem:[%s967_s2 + $0x10] sm:$0xff] }
   0xa   :  { %657 = vmatprep.subr.bf16.mxu1 %v705_v10  ;;  %v721_v26 = vld [vmem:[%s965_s1 + $0xc8] sm:$0xff]   ;;  %v725_v30 = vld [vmem:[%s965_s1 + $0xc0] sm:$0xff]   ;;  %115 = vperm.xlu1 %695, %v97_v44   ;;  %v98_v46 = vld [vmem:[%s967_s2 + $0x18] sm:$0xff] }
   0xb   :  { %v722_v27 = vld [vmem:[%s965_s1 + $0x8] sm:$0xff]   ;;  %v726_v31 = vld [vmem:[%s965_s1] sm:$0xff]   ;;  %v101_v53 = vld [vmem:[%s967_s2 + $0x30] sm:$0xff] }
   0xc   :  { %618 = vmatpush3.bf16.msra.mxu0 %v706_v11  ;;  %v723_v28 = vld [vmem:[%s965_s1 + $0x88] sm:$0xff]   ;;  %v727_v32 = vld [vmem:[%s965_s1 + $0x80] sm:$0xff]   ;;  %v102_v54 = vld [vmem:[%s967_s2 + $0x38] sm:$0xff] }
   0xd   :  { %658 = vmatpush3.bf16.msra.mxu1 %v707_v12  ;;  %619 = vmatprep.subr.bf16.mxu0 %v708_v13  ;;  %v728_v33 = vld [vmem:[%s966_s0] ss:$16 sps:$4 sm:$0xff]   ;;  %v730_v34 = vld [vmem:[%s966_s0 + $0x4] ss:$16 sps:$4 sm:$0xff]   ;;  %v731_v35 = vld [vmem:[%s966_s0 + $0x8] ss:$16 sps:$4 sm:$0xff]  }
   0xe   :  { %659 = vmatprep.subr.bf16.mxu1 %v709_v14  ;;  %v733_v36 = vld [vmem:[%s966_s0 + $0xc] ss:$16 sps:$4 sm:$0xff]   ;;  %447 = vmatprep.mubr.bf16.mxu0 %v730_v34  ;;  %v734_v37 = vld [vmem:[%s966_s0 + $0x24] ss:$16 sps:$4 sm:$0xff]   ;;  %v738_v39 = vld [vmem:[%s966_s0 + $0x20] ss:$16 sps:$4 sm:$0xff]  }
   0xf   :  { %512 = vmatprep.mubr.bf16.mxu1 %v733_v36  ;;  %v736_v38 = vld [vmem:[%s966_s0 + $0x2c] ss:$16 sps:$4 sm:$0xff]   ;;  %v739_v40 = vld [vmem:[%s966_s0 + $0x28] ss:$16 sps:$4 sm:$0xff]   ;;  %v740_v41 = vld [vmem:[%s966_s0 + $0x44] ss:$16 sps:$4 sm:$0xff]   ;;  %120 = vperm.xlu1 %695, %v98_v46  }
  0x10   :  { %620 = vmatpush3.bf16.msra.mxu0 %v710_v15  ;;  %v742_v42 = vld [vmem:[%s966_s0 + $0x4c] ss:$16 sps:$4 sm:$0xff]   ;;  %v95_v43 = vld [vmem:[%s967_s2] sm:$0xff]  ;;  %v745_v49 = vld [vmem:[%s966_s0 + $0x48] ss:$16 sps:$4 sm:$0xff]  }
  0x11   :  { %660 = vmatpush3.bf16.msra.mxu1 %v711_v16  ;;  %621 = vmatprep.subr.bf16.mxu0 %v712_v17  ;;  %v96_v45 = vld [vmem:[%s967_s2 + $0x8] sm:$0xff]  ;;  %v744_v47 = vld [vmem:[%s966_s0 + $0x40] ss:$16 sps:$4 sm:$0xff]   ;;  %v746_v50 = vld [vmem:[%s966_s0 + $0x64] ss:$16 sps:$4 sm:$0xff]  }
  0x12   :  { %661 = vmatprep.subr.bf16.mxu1 %v713_v18  ;;  %105 = vperm.xlu0 %694, %v95_v43   ;;  %v99_v48 = vld [vmem:[%s967_s2 + $0x20] sm:$0xff]  ;;  %v100_v51 = vld [vmem:[%s967_s2 + $0x28] sm:$0xff] }
  0x13   :  { %v748_v52 = vld [vmem:[%s966_s0 + $0x6c] ss:$16 sps:$4 sm:$0xff]   ;;  %130 = vperm.xlu1 %695, %v100_v51   ;;  %v750_v55 = vld [vmem:[%s966_s0 + $0x60] ss:$16 sps:$4 sm:$0xff]   ;;  %v751_v56 = vld [vmem:[%s966_s0 + $0x68] ss:$16 sps:$4 sm:$0xff]  }
  0x14   :  { %622 = vmatpush3.bf16.msra.mxu0 %v714_v19 }
  0x15   :  { %662 = vmatpush3.bf16.msra.mxu1 %v715_v20  ;;  %623 = vmatprep.subr.bf16.mxu0 %v716_v21 }
  0x16   :  { %663 = vmatprep.subr.bf16.mxu1 %v717_v22  ;;  %110 = vperm.xlu0 %694, %v96_v45  }
  0x17   :  { %140 = vperm.xlu1 %695, %v102_v54  }
  0x18   :  { %624 = vmatpush3.bf16.msra.mxu0 %v718_v23 }
  0x19   :  { %664 = vmatpush3.bf16.msra.mxu1 %v719_v24  ;;  %625 = vmatprep.subr.bf16.mxu0 %v720_v25 }
  0x1a   :  { %665 = vmatprep.subr.bf16.mxu1 %v721_v26  ;;  %125 = vperm.xlu0 %694, %v99_v48  }
  0x1c   :  { %626 = vmatpush3.bf16.msra.mxu0 %v722_v27 }
  0x1d   :  { %666 = vmatpush3.bf16.msra.mxu1 %v723_v28  ;;  %627 = vmatprep.subr.bf16.mxu0 %v724_v29 }
  0x1e   :  { %667 = vmatprep.subr.bf16.mxu1 %v725_v30  ;;  %135 = vperm.xlu0 %694, %v101_v53  }
  0x20   :  { %628 = vmatpush3.bf16.msra.mxu0 %v726_v31 }
  0x21   :  { %668 = vmatpush3.bf16.msra.mxu1 %v727_v32 }
  0x23   :  { %448 = vmatmul.mubr.bf16.vlgmr.msra.gmra.mxu0 %v728_v33 }
  0x24   :  { %513 = vmatmul.mubr.bf16.vlgmr.msra.gmra.mxu1 %v731_v35  ;;  %455 = vmatprep.mubr.bf16.mxu0 %v734_v37 }
  0x25   :  { %520 = vmatprep.mubr.bf16.mxu1 %v736_v38 }
  0x2b   :  { %456 = vmatmul.mubr.bf16.gmra.mxu0 %v738_v39 }
  0x2c   :  { %521 = vmatmul.mubr.bf16.gmra.mxu1 %v739_v40  ;;  %463 = vmatprep.mubr.bf16.mxu0 %v740_v41 }
  0x2d   :  { %528 = vmatprep.mubr.bf16.mxu1 %v742_v42 }
  0x33   :  { %464 = vmatmul.mubr.bf16.gmra.mxu0 %v744_v47 }
  0x34   :  { %529 = vmatmul.mubr.bf16.gmra.mxu1 %v745_v49  ;;  %471 = vmatprep.mubr.bf16.mxu0 %v746_v50 }
  0x35   :  { %536 = vmatprep.mubr.bf16.mxu1 %v748_v52 }
  0x3b   :  { %472 = vmatmul.mubr.bf16.gmra.mxu0 %v750_v55 }
  0x3c   :  { %537 = vmatmul.mubr.bf16.gmra.mxu1 %v751_v56 }
  0x85   :  { %v116_v13 = vpop.permute.xlu1 %115 }
  0x8a   :  { %v121_v27 = vpop.permute.xlu1 %120 }
  0x8d   :  { %v106_v58 = vpop.permute.xlu0 %105 }
  0x8e   :  { %v131_v47 = vpop.permute.xlu1 %130 }
  0x91   :  { %v111_v4 = vpop.permute.xlu0 %110 }
  0x95   :  { %v126_v37 = vpop.permute.xlu0 %125 }
  0xe3   :  { %v629_v57 = vpop.f32.mrf.mxu0 }
  0xe4   :  { %v669_v59 = vpop.f32.mrf.mxu1 }
  0xe5   :  { %v630_v60 = vpop.f32.mrf.mxu0 }
  0xe6   :  { %v631_v61 = vadd.f32 %v630_v60, %v629_v57  ;;  %v670_v62 = vpop.f32.mrf.mxu1  ;;  %v136_v57 = vpop.permute.xlu0 %135 }
  0xe7   :  { %v632_v63 = vpop.f32.mrf.mxu0  ;;  %v671_v0 = vadd.f32 %v670_v62, %v669_v59 }
  0xe8   :  { %v450_v1 = vadd.f32 %v631_v61, %v106_v58  ;;  %v672_v2 = vpop.f32.mrf.mxu1 }
  0xe9   :  { %v633_v3 = vpop.f32.mrf.mxu0 }
  0xea   :  { %v515_v5 = vadd.f32 %v671_v0, %v450_v1  ;;  %v634_v6 = vadd.f32 %v633_v3, %v632_v63  ;;  %v673_v7 = vpop.f32.mrf.mxu1  ;;  %v141_v3 = vpop.permute.xlu1 %140 }
  0xeb   :  { %v635_v8 = vpop.f32.mrf.mxu0  ;;  %v674_v10 = vadd.f32 %v673_v7, %v672_v2 }
  0xec   :  { %v545_v9 = vmax.f32 %v515_v5, 0.0  ;;  %v453_v11 = vadd.f32 %v634_v6, %v111_v4  ;;  %v675_v12 = vpop.f32.mrf.mxu1 }
  0xed   :  { %v636_v14 = vpop.f32.mrf.mxu0 }
  0xee   :  { %553 = vst [vmem:[%s968_s3] sm:$0xff] %v545_v9  ;;  %v518_v15 = vadd.f32 %v674_v10, %v453_v11  ;;  %v637_v16 = vadd.f32 %v636_v14, %v635_v8  ;;  %v676_v17 = vpop.f32.mrf.mxu1 }
  0xef   :  { %v638_v18 = vpop.f32.mrf.mxu0  ;;  %v677_v21 = vadd.f32 %v676_v17, %v675_v12 }
  0xf0   :  { %v546_v19 = vmax.f32 %v518_v15, 0.0  ;;  %v458_v20 = vadd.f32 %v637_v16, %v116_v13  ;;  %v678_v22 = vpop.f32.mrf.mxu1 }
  0xf1   :  { %v639_v23 = vpop.f32.mrf.mxu0 }
  0xf2   :  { %554 = vst [vmem:[%s968_s3 + $0x8] sm:$0xff] %v546_v19  ;;  %v523_v24 = vadd.f32 %v677_v21, %v458_v20  ;;  %v640_v25 = vadd.f32 %v639_v23, %v638_v18  ;;  %v679_v26 = vpop.f32.mrf.mxu1 }
  0xf3   :  { %v641_v28 = vpop.f32.mrf.mxu0  ;;  %v680_v31 = vadd.f32 %v679_v26, %v678_v22 }
  0xf4   :  { %v547_v29 = vmax.f32 %v523_v24, 0.0  ;;  %v461_v30 = vadd.f32 %v640_v25, %v121_v27  ;;  %v681_v32 = vpop.f32.mrf.mxu1 }
  0xf5   :  { %v642_v33 = vpop.f32.mrf.mxu0 }
  0xf6   :  { %555 = vst [vmem:[%s968_s3 + $0x10] sm:$0xff] %v547_v29  ;;  %v526_v34 = vadd.f32 %v680_v31, %v461_v30  ;;  %v643_v35 = vadd.f32 %v642_v33, %v641_v28  ;;  %v682_v36 = vpop.f32.mrf.mxu1 }
  0xf7   :  { %v644_v38 = vpop.f32.mrf.mxu0  ;;  %v683_v41 = vadd.f32 %v682_v36, %v681_v32 }
  0xf8   :  { %v548_v39 = vmax.f32 %v526_v34, 0.0  ;;  %v466_v40 = vadd.f32 %v643_v35, %v126_v37  ;;  %v684_v42 = vpop.f32.mrf.mxu1 }
  0xf9   :  { %v645_v43 = vpop.f32.mrf.mxu0 }
  0xfa   :  { %556 = vst [vmem:[%s968_s3 + $0x18] sm:$0xff] %v548_v39  ;;  %v531_v44 = vadd.f32 %v683_v41, %v466_v40  ;;  %v646_v45 = vadd.f32 %v645_v43, %v644_v38  ;;  %v685_v46 = vpop.f32.mrf.mxu1 }
  0xfb   :  { %v647_v48 = vpop.f32.mrf.mxu0  ;;  %v686_v51 = vadd.f32 %v685_v46, %v684_v42 }
  0xfc   :  { %v549_v49 = vmax.f32 %v531_v44, 0.0  ;;  %v469_v50 = vadd.f32 %v646_v45, %v131_v47  ;;  %v687_v52 = vpop.f32.mrf.mxu1 }
  0xfd   :  { %v648_v53 = vpop.f32.mrf.mxu0 }
  0xfe   :  { %557 = vst [vmem:[%s968_s3 + $0x20] sm:$0xff] %v549_v49  ;;  %v534_v54 = vadd.f32 %v686_v51, %v469_v50  ;;  %v649_v55 = vadd.f32 %v648_v53, %v647_v48  ;;  %v688_v56 = vpop.f32.mrf.mxu1 }
  0xff   :  { %v650_v58 = vpop.f32.mrf.mxu0  ;;  %v689_v61 = vadd.f32 %v688_v56, %v687_v52 }
 0x100   :  { %v550_v59 = vmax.f32 %v534_v54, 0.0  ;;  %v474_v60 = vadd.f32 %v649_v55, %v136_v57  ;;  %v690_v62 = vpop.f32.mrf.mxu1 }
 0x101   :  { %v651_v63 = vpop.f32.mrf.mxu0 }
 0x102   :  { %558 = vst [vmem:[%s968_s3 + $0x28] sm:$0xff] %v550_v59  ;;  %v539_v0 = vadd.f32 %v689_v61, %v474_v60  ;;  %v652_v1 = vadd.f32 %v651_v63, %v650_v58  ;;  %v691_v2 = vpop.f32.mrf.mxu1 }
 0x103   :  { %v692_v6 = vadd.f32 %v691_v2, %v690_v62 }
 0x104   :  { %v551_v4 = vmax.f32 %v539_v0, 0.0  ;;  %v477_v5 = vadd.f32 %v652_v1, %v141_v3 }
 0x106   :  { %559 = vst [vmem:[%s968_s3 + $0x30] sm:$0xff] %v551_v4  ;;  %v542_v7 = vadd.f32 %v692_v6, %v477_v5 }
 0x108   :  { %v552_v8 = vmax.f32 %v542_v7, 0.0 }
 0x10a   :  { %560 = vst [vmem:[%s968_s3 + $0x38] sm:$0xff] %v552_v8 }

// kernel: sketch_depth_colorizer.18
= control target key start
LH: loop header
LB: loop body
LE: loop exit
PB: predicated region body
PF: predicated region fallthrough
CT: control target
= control target key end

     0   :  { %s598_s12 = smov 0   ;;  %s600_s13 = smov 0   ;;  %s689_s0 = inlined_call_operand.vmem [shape: bf16[16,27], index: 0, kind: input, shape index: {}]   ;;  %s690_s1 = inlined_call_operand.vmem [shape: bf16[27,2048], index: 1, kind: input, shape index: {}]   ;;  %s691_s2 = inlined_call_operand.vmem [shape: f32[16,1], index: 2, kind: input, shape index: {}]   ;;  %s692_s3 = inlined_call_operand.vmem [shape: f32[16,2048], index: 3, kind: output, shape index: {}]  }
   0x1   :  { %s602_s14 = smov 0  }
   0x2 LB: > { %s484_s15 = sadd.s32 4294967295, %s574_s14   ;;  %s615_s16 = sadd.s32 1, %s574_s14   ;;  %s574_s14 = sphi %s602_s14, %s696_s14   ;;  %s570_s13 = sphi %s600_s13, %s695_s13   ;;  %s566_s12 = sphi %s598_s12, %s694_s12  }
   0x3   : > { %s38_s17 = ssub.s32 %s574_s14, %s615_s16  ;;  %s41_s18 = sadd.s32 1, %s570_s13 }
   0x4   : > { %p39_p0 = scmp.eq.s32.totalorder %s38_s17, 0  ;;  %p48_p1 = scmp.ne.s32.totalorder %s570_s13, %s566_s12 }
   0x5   : > { %p49_p2 = scmp.eq.s32.totalorder %s574_s14, 0  ;;  %p99_p3 = scmp.eq.s32.totalorder %s484_s15, 3 }
   0x6   : > { %s626_s19 = scalar_select %p39_p0, %s570_s13, %s41_s18  }
   0x7   : > { %p50_p4 = por %p49_p2, %p48_p1  ;;  %p628_p5 = por %p99_p3, %p48_p1 }
   0x8   : > { %p487_p6 = scmp.ge.s32.totalorder %s574_s14, 4 }
   0xa   : > { %127 = sbr.rel (%p487_p6) target bundleno = 23 (0x17), region = 24 }
   0xf   : > { %130 = sbr.rel (!%p50_p4) target bundleno = 23 (0x17), region = 28  ;;  %s132_s21 = sand.u32 (%p50_p4), 1, %s570_s13  }
  0x10   : > { %s510_s22 = sshll.u32 (%p50_p4), %s574_s14, 4  ;;  %s488_s23 = sshll.u32 (%p50_p4), %s132_s21, 6 }
  0x11   : > { %s137_s26 = scalar_lea.vmem (%p50_p4), %s690_s1, %s510_s22  ;;  %s134_s27 = scalar_lea.vmem (%p50_p4), [#allocation2], %s488_s23 }
  0x12   : > { %v150_v0 = vld [vmem:[%s137_s26] sm:$0xff] (%p50_p4)  ;;  %v152_v1 = vld [vmem:[%s137_s26 + $0x8] sm:$0xff] (%p50_p4) }
  0x13   : > { %v154_v2 = vld [vmem:[%s137_s26 + $0x40] sm:$0xff] (%p50_p4)  ;;  %151 = vst [vmem:[%s134_s27] sm:$0xff] (%p50_p4), %v150_v0  ;;  %153 = vst [vmem:[%s134_s27 + $0x8] sm:$0xff] (%p50_p4), %v152_v1  ;;  %v156_v3 = vld [vmem:[%s137_s26 + $0x48] sm:$0xff] (%p50_p4) }
  0x14   : > { %155 = vst [vmem:[%s134_s27 + $0x10] sm:$0xff] %v154_v2  ;;  %v158_v4 = vld [vmem:[%s137_s26 + $0x80] sm:$0xff]  ;;  %v160_v5 = vld [vmem:[%s137_s26 + $0x88] sm:$0xff]  ;;  %157 = vst [vmem:[%s134_s27 + $0x18] sm:$0xff] %v156_v3 }
  0x15   : > { %159 = vst [vmem:[%s134_s27 + $0x20] sm:$0xff] %v158_v4  ;;  %161 = vst [vmem:[%s134_s27 + $0x28] sm:$0xff] %v160_v5  ;;  %v162_v6 = vld [vmem:[%s137_s26 + $0xc0] sm:$0xff]  ;;  %v164_v7 = vld [vmem:[%s137_s26 + $0xc8] sm:$0xff] }
  0x16   : > { %163 = vst [vmem:[%s134_s27 + $0x30] sm:$0xff] %v162_v6  ;;  %165 = vst [vmem:[%s134_s27 + $0x38] sm:$0xff] %v164_v7 }
  0x17 PF: > { %p491_p7 = scmp.ge.s32.totalorder %s574_s14, 1  ;;  %p170_p8 = scmp.lt.s32.totalorder %s574_s14, 5 }
  0x19   : > { %p171_p9 = pnand %p491_p7, %p170_p8 }
  0x1a   : > { %s177_s28 = sand.u32 (!%p171_p9), 1, %s566_s12  }
  0x1b   : > { %174 = sbr.rel (%p171_p9) target bundleno = 257 (0x101), region = 51  ;;  %s641_s29 = sshll.u32 (!%p171_p9), %s177_s28, 6 }
  0x1c   : > { %s179_s7 = scalar_lea.vmem (!%p171_p9), [#allocation2], %s641_s29  ;;  %s654_s10 = scalar_lea.vmem (!%p171_p9), [#allocation3], %s641_s29 }
  0x20   : > { %vm269_vm0 = vcmask 1044480   ;;  %vm270_vm1 = vcmask 1045504   ;;  %v576_v8 = vmov 65535   ;;  %v577_v10 = vmov 0   ;;  %v212_v12 = vld [vmem:[%s691_s2] sm:$0xff]  ;;  %v213_v13 = vld [vmem:[%s691_s2 + $0x8] sm:$0xff] }
  0x21   : > { %v271_v9 = vsel %vm269_vm0, 4294967295, %v576_v8  ;;  %317 = vmatprep.mubr.bf16.mxu0 %v577_v10  ;;  %360 = vmatprep.mubr.bf16.mxu1 %v577_v10  ;;  %v539_v14 = vld [vmem:[%s179_s7 + $0x24] ss:$16 sps:$4 sm:$0x3f]   ;;  %v547_v23 = vld [vmem:[%s179_s7 + $0xc] ss:$16 sps:$4 sm:$0xff]  }
  0x22   : > { %v272_v11 = vsel %vm270_vm1, %v271_v9, 0  ;;  %538 = vset.pattern.permute.xlu0 %v577_v10  ;;  %v541_v15 = vld [vmem:[%s179_s7 + $0x2c] ss:$16 sps:$4 sm:$0x3f]   ;;  %v545_v20 = vld [vmem:[%s179_s7 + $0x4] ss:$16 sps:$4 sm:$0xff]  }
  0x23   : > { %216 = vperm.xlu0 %538, %v212_v12   ;;  %v277_v16 = vand.u32 %v539_v14, %v272_v11  ;;  %v543_v17 = vld [vmem:[%s179_s7 + $0x20] ss:$16 sps:$4 sm:$0x3f]   ;;  %v544_v18 = vld [vmem:[%s179_s7 + $0x28] ss:$16 sps:$4 sm:$0x3f]   ;;  %v283_v19 = vand.u32 %v541_v15, %v272_v11 }
  0x24   : > { %v274_v21 = vand.u32 %v543_v17, %v272_v11  ;;  %v280_v22 = vand.u32 %v544_v18, %v272_v11  ;;  %v549_v24 = vld [vmem:[%s179_s7] ss:$16 sps:$4 sm:$0xff]   ;;  %v550_v25 = vld [vmem:[%s179_s7 + $0x8] ss:$16 sps:$4 sm:$0xff]   ;;  %vm265_vm2 = vcmask 220160   ;;  %s511_s11 = sshll.u32 (%p628_p5), %s484_s15, 5 }
  0x25   : > { %297 = vmatprep.subr.bf16.mxu0 %v277_v16  ;;  %340 = vmatprep.subr.bf16.mxu1 %v283_v19  ;;  %v551_v26 = vld [vmem:[%s689_s0] sm:$0xff]   ;;  %s396_s18 = scalar_lea.vmem (%p628_p5), %s692_s3, %s511_s11 }
  0x26   : > { %298 = vmatpush1.bf16.msra.mxu0 %v274_v21  ;;  %341 = vmatpush1.bf16.msra.mxu1 %v280_v22 }
  0x27   : > { %221 = vperm.xlu0 %538, %v213_v13   ;;  %299 = vmatprep.subr.bf16.mxu0 %v545_v20 }
  0x28   : > { %342 = vmatprep.subr.bf16.mxu1 %v547_v23 }
  0x2a   : > { %300 = vmatpush1.bf16.msra.mxu0 %v549_v24  ;;  %343 = vmatpush1.bf16.msra.mxu1 %v550_v25 }
  0x2d   : > { %503 = vmatmul.mubr.msk.bf16.vlgmr.msra.gmra.mxu0 %vm265_vm2, %v551_v26  ;;  %504 = vmatmul.mubr.msk.bf16.vlgmr.msra.gmra.mxu1 %vm265_vm2, %v551_v26 }
  0x9e   : > { %v217_v27 = vpop.permute.xlu0 %216 }
  0xa2   : > { %v222_v36 = vpop.permute.xlu0 %221 }
  0xed   : > { %v319_v28 = vpop.f32.mrf.mxu0  ;;  %v362_v29 = vpop.f32.mrf.mxu1 }
  0xee   : > { %v320_v30 = vadd.f32 %v319_v28, %v217_v27  ;;  %v363_v31 = vadd.f32 %v362_v29, %v217_v27 }
  0xef   : > { %v321_v32 = vpop.f32.mrf.mxu0  ;;  %v364_v33 = vpop.f32.mrf.mxu1 }
  0xf0   : > { %v371_v34 = vmax.f32 %v320_v30, 0.0  ;;  %v373_v35 = vmax.f32 %v363_v31, 0.0  ;;  %v322_v37 = vadd.f32 %v321_v32, %v217_v27  ;;  %v365_v38 = vadd.f32 %v364_v33, %v217_v27 }
  0xf1   : > { %v323_v39 = vpop.f32.mrf.mxu0  ;;  %v366_v40 = vpop.f32.mrf.mxu1 }
  0xf2   : > { %379 = vst [vmem:[%s654_s10] sm:$0xff] %v371_v34  ;;  %381 = vst [vmem:[%s654_s10 + $0x10] sm:$0xff] %v373_v35  ;;  %v372_v41 = vmax.f32 %v322_v37, 0.0  ;;  %v374_v42 = vmax.f32 %v365_v38, 0.0  ;;  %v324_v43 = vadd.f32 %v323_v39, %v222_v36  ;;  %v367_v44 = vadd.f32 %v366_v40, %v222_v36 }
  0xf3   : > { %v325_v45 = vpop.f32.mrf.mxu0  ;;  %v368_v46 = vpop.f32.mrf.mxu1 }
  0xf4   : > { %380 = vst [vmem:[%s654_s10 + $0x8] sm:$0xff] %v372_v41  ;;  %382 = vst [vmem:[%s654_s10 + $0x18] sm:$0xff] %v374_v42  ;;  %v375_v47 = vmax.f32 %v324_v43, 0.0  ;;  %v377_v48 = vmax.f32 %v367_v44, 0.0  ;;  %v326_v49 = vadd.f32 %v325_v45, %v222_v36  ;;  %v369_v50 = vadd.f32 %v368_v46, %v222_v36  ;;  %393 = sbr.rel (!%p628_p5) target bundleno = 257 (0x101), region = 59 }
  0xf6   : > { %383 = vst [vmem:[%s654_s10 + $0x20] sm:$0xff] %v375_v47  ;;  %385 = vst [vmem:[%s654_s10 + $0x30] sm:$0xff] %v377_v48  ;;  %v376_v51 = vmax.f32 %v326_v49, 0.0  ;;  %v378_v52 = vmax.f32 %v369_v50, 0.0 }
  0xf8   : > { %384 = vst [vmem:[%s654_s10 + $0x28] sm:$0xff] %v376_v51  ;;  %386 = vst [vmem:[%s654_s10 + $0x38] sm:$0xff] %v378_v52 }
  0xf9   : > { %v409_v53 = vld [vmem:[%s654_s10] sm:$0xff]  ;;  %v413_v55 = vld [vmem:[%s654_s10 + $0x10] sm:$0xff] }
  0xfa   : > { %410 = vst [vmem:[%s396_s18] sm:$0xff] %v409_v53  ;;  %414 = vst [vmem:[%s396_s18 + $0x10] sm:$0xff] %v413_v55 }
  0xfb   : > { %v411_v54 = vld [vmem:[%s654_s10 + $0x8] sm:$0xff]  ;;  %v415_v56 = vld [vmem:[%s654_s10 + $0x18] sm:$0xff] }
  0xfc   : > { %412 = vst [vmem:[%s396_s18 + $0x8] sm:$0xff] %v411_v54  ;;  %416 = vst [vmem:[%s396_s18 + $0x18] sm:$0xff] %v415_v56 }
  0xfd   : > { %v417_v57 = vld [vmem:[%s654_s10 + $0x20] sm:$0xff]  ;;  %v421_v59 = vld [vmem:[%s654_s10 + $0x30] sm:$0xff] }
  0xfe   : > { %418 = vst [vmem:[%s396_s18 + $0x80] sm:$0xff] %v417_v57  ;;  %422 = vst [vmem:[%s396_s18 + $0x90] sm:$0xff] %v421_v59 }
  0xff   : > { %v419_v58 = vld [vmem:[%s654_s10 + $0x28] sm:$0xff]  ;;  %v423_v60 = vld [vmem:[%s654_s10 + $0x38] sm:$0xff] }
 0x100   : > { %420 = vst [vmem:[%s396_s18 + $0x88] sm:$0xff] %v419_v58  ;;  %424 = vst [vmem:[%s396_s18 + $0x98] sm:$0xff] %v423_v60 }
 0x101 PF: > { %p10_p10 = scmp.ge.s32.totalorder %s615_s16, 6   ;;  %s694_s12 = smov %s570_s13 }
 0x102   : > { %s695_s13 = smov %s626_s19  ;;  %s696_s14 = smov %s615_s16 }
 0x103   :  { %12 = sbr.rel (!%p10_p10) target bundleno = 2 (0x2), region = 113 }

// kernel: sketch_depth_colorizer.22
= control target key start
LH: loop header
LB: loop body
LE: loop exit
PB: predicated region body
PF: predicated region fallthrough
CT: control target
= control target key end

     0   :  { %v276_v1 = vmov 0   ;;  %vm123_vm0 = vcmask 523264   ;;  %s373_s1 = inlined_call_operand.vmem [shape: bf16[64,128], index: 1, kind: input, shape index: {}]   ;;  %s374_s0 = inlined_call_operand.vmem [shape: bf16[64,64], index: 0, kind: input, shape index: {}]   ;;  %s375_s2 = inlined_call_operand.vmem [shape: f32[64,1], index: 2, kind: input, shape index: {}]   ;;  %s376_s3 = inlined_call_operand.vmem [shape: f32[64,128], index: 3, kind: output, shape index: {}]  }
   0x1   :  { %v268_v0 = vld [vmem:[%s373_s1 + $0x18] sm:$0xff]   ;;  %267 = vset.pattern.permute.xlu1 %v276_v1  ;;  %266 = vset.pattern.permute.xlu0 %v276_v1  ;;  %v269_v2 = vld [vmem:[%s373_s1 + $0x10] sm:$0xff]   ;;  %v270_v3 = vld [vmem:[%s373_s1 + $0x8] sm:$0xff]  }
   0x2   :  { %241 = vmatprep.subr.bf16.mxu0 %v268_v0  ;;  %257 = vmatprep.subr.bf16.mxu1 %v268_v0  ;;  %v272_v4 = vld [vmem:[%s374_s0] sm:$0xff]   ;;  %v273_v5 = vld [vmem:[%s374_s0 + $0x10] sm:$0xff]   ;;  %v34_v9 = vld [vmem:[%s375_s2 + $0x18] sm:$0xff] }
   0x3   :  { %242 = vmatpush3.bf16.msra.mxu0 %v268_v0  ;;  %261 = vmatpush3.bf16.msra.mxu1 %v268_v0  ;;  %v271_v6 = vld [vmem:[%s373_s1] sm:$0xff]   ;;  %v33_v7 = vld [vmem:[%s375_s2 + $0x10] sm:$0xff]  ;;  %v32_v10 = vld [vmem:[%s375_s2 + $0x8] sm:$0xff] }
   0x4   :  { %243 = vmatprep.subr.bf16.mxu0 %v269_v2  ;;  %258 = vmatprep.subr.bf16.mxu1 %v269_v2  ;;  %v31_v8 = vld [vmem:[%s375_s2] sm:$0xff]  ;;  %v274_v11 = vld [vmem:[%s374_s0 + $0x8] sm:$0xff]   ;;  %v275_v12 = vld [vmem:[%s374_s0 + $0x18] sm:$0xff]  }
   0x5   :  { %249 = vmatprep.mubr.msk.bf16.mxu0 %vm123_vm0, %v272_v4  ;;  %253 = vmatprep.mubr.msk.bf16.mxu1 %vm123_vm0, %v273_v5  ;;  %v36_v13 = vld [vmem:[%s375_s2 + $0x28] sm:$0xff]  ;;  %v35_v14 = vld [vmem:[%s375_s2 + $0x20] sm:$0xff]  ;;  %v38_v15 = vld [vmem:[%s375_s2 + $0x38] sm:$0xff] }
   0x6   :  { %51 = vperm.xlu1 %267, %v33_v7   ;;  %41 = vperm.xlu0 %266, %v31_v8   ;;  %v37_v16 = vld [vmem:[%s375_s2 + $0x30] sm:$0xff] }
   0x7   :  { %244 = vmatpush3.bf16.msra.mxu0 %v269_v2  ;;  %262 = vmatpush3.bf16.msra.mxu1 %v269_v2 }
   0x8   :  { %245 = vmatprep.subr.bf16.mxu0 %v270_v3  ;;  %259 = vmatprep.subr.bf16.mxu1 %v270_v3 }
   0xa   :  { %56 = vperm.xlu1 %267, %v34_v9   ;;  %46 = vperm.xlu0 %266, %v32_v10  }
   0xb   :  { %246 = vmatpush3.bf16.msra.mxu0 %v270_v3  ;;  %263 = vmatpush3.bf16.msra.mxu1 %v270_v3 }
   0xc   :  { %247 = vmatprep.subr.bf16.mxu0 %v271_v6  ;;  %260 = vmatprep.subr.bf16.mxu1 %v271_v6 }
   0xe   :  { %66 = vperm.xlu1 %267, %v36_v13   ;;  %61 = vperm.xlu0 %266, %v35_v14  }
   0xf   :  { %248 = vmatpush3.bf16.msra.mxu0 %v271_v6  ;;  %264 = vmatpush3.bf16.msra.mxu1 %v271_v6 }
  0x12   :  { %250 = vmatmul.mubr.msk.bf16.vlgmr.msra.gmra.mxu0 %vm123_vm0, %v274_v11  ;;  %254 = vmatmul.mubr.msk.bf16.vlgmr.msra.gmra.mxu1 %vm123_vm0, %v275_v12 }
  0x13   :  { %76 = vperm.xlu1 %267, %v38_v15   ;;  %71 = vperm.xlu0 %266, %v37_v16  }
  0x81   :  { %v42_v17 = vpop.permute.xlu0 %41  ;;  %v52_v18 = vpop.permute.xlu1 %51 }
  0x85   :  { %v47_v19 = vpop.permute.xlu0 %46  ;;  %v57_v20 = vpop.permute.xlu1 %56 }
  0x89   :  { %v62_v21 = vpop.permute.xlu0 %61  ;;  %v67_v22 = vpop.permute.xlu1 %66 }
  0x8e   :  { %v72_v23 = vpop.permute.xlu0 %71  ;;  %v77_v30 = vpop.permute.xlu1 %76 }
  0xd2   :  { %v251_v24 = vpop.f32.mrf.mxu0  ;;  %v255_v25 = vpop.f32.mrf.mxu1 }
  0xd3   :  { %v179_v26 = vadd.f32 %v251_v24, %v52_v18  ;;  %v195_v27 = vadd.f32 %v255_v25, %v72_v23 }
  0xd4   :  { %v170_v28 = vpop.f32.mrf.mxu0  ;;  %v186_v29 = vpop.f32.mrf.mxu1 }
  0xd5   :  { %v203_v31 = vmax.f32 %v179_v26, 0.0  ;;  %v207_v32 = vmax.f32 %v195_v27, 0.0  ;;  %v171_v33 = vadd.f32 %v170_v28, %v42_v17  ;;  %v187_v34 = vadd.f32 %v186_v29, %v62_v21 }
  0xd6   :  { %v252_v35 = vpop.f32.mrf.mxu0  ;;  %v256_v36 = vpop.f32.mrf.mxu1 }
  0xd7   :  { %211 = vst [vmem:[%s376_s3 + $0x10] sm:$0xff] %v203_v31  ;;  %215 = vst [vmem:[%s376_s3 + $0x30] sm:$0xff] %v207_v32  ;;  %v201_v37 = vmax.f32 %v171_v33, 0.0  ;;  %v205_v38 = vmax.f32 %v187_v34, 0.0  ;;  %v182_v39 = vadd.f32 %v252_v35, %v57_v20  ;;  %v198_v40 = vadd.f32 %v256_v36, %v77_v30 }
  0xd8   :  { %v173_v41 = vpop.f32.mrf.mxu0  ;;  %v189_v42 = vpop.f32.mrf.mxu1 }
  0xd9   :  { %209 = vst [vmem:[%s376_s3] sm:$0xff] %v201_v37  ;;  %213 = vst [vmem:[%s376_s3 + $0x20] sm:$0xff] %v205_v38  ;;  %v204_v43 = vmax.f32 %v182_v39, 0.0  ;;  %v208_v44 = vmax.f32 %v198_v40, 0.0  ;;  %v174_v45 = vadd.f32 %v173_v41, %v47_v19  ;;  %v190_v46 = vadd.f32 %v189_v42, %v67_v22 }
  0xdb   :  { %212 = vst [vmem:[%s376_s3 + $0x18] sm:$0xff] %v204_v43  ;;  %216 = vst [vmem:[%s376_s3 + $0x38] sm:$0xff] %v208_v44  ;;  %v202_v47 = vmax.f32 %v174_v45, 0.0  ;;  %v206_v48 = vmax.f32 %v190_v46, 0.0 }
  0xdd   :  { %210 = vst [vmem:[%s376_s3 + $0x8] sm:$0xff] %v202_v47  ;;  %214 = vst [vmem:[%s376_s3 + $0x28] sm:$0xff] %v206_v48 }

// kernel: sketch_depth_colorizer.21
= control target key start
LH: loop header
LB: loop body
LE: loop exit
PB: predicated region body
PF: predicated region fallthrough
CT: control target
= control target key end

     0   :  { %v5222_v1 = vmov 0   ;;  %s6707_s1 = inlined_call_operand.vmem [shape: bf16[4096,128], index: 1, kind: input, shape index: {}]   ;;  %s6708_s0 = inlined_call_operand.vmem [shape: bf16[64,4096], index: 0, kind: input, shape index: {}]   ;;  %s6709_s2 = inlined_call_operand.vmem [shape: f32[64,1], index: 2, kind: input, shape index: {}]   ;;  %s6710_s3 = inlined_call_operand.vmem [shape: f32[64,128], index: 3, kind: output, shape index: {}]  }
   0x1   :  { %v4966_v0 = vld [vmem:[%s6707_s1 + $0x78] sm:$0xff]   ;;  %4964 = vset.pattern.permute.xlu0 %v5222_v1  ;;  %4965 = vset.pattern.permute.xlu1 %v5222_v1  ;;  %v4970_v5 = vld [vmem:[%s6707_s1 + $0x70] sm:$0xff]   ;;  %v4974_v9 = vld [vmem:[%s6707_s1 + $0x68] sm:$0xff]  }
   0x2   :  { %v4967_v2 = vld [vmem:[%s6707_s1 + $0xf8] sm:$0xff]   ;;  %4323 = vmatprep.subr.bf16.mxu0 %v4966_v0  ;;  %v4971_v6 = vld [vmem:[%s6707_s1 + $0xf0] sm:$0xff]   ;;  %v4975_v10 = vld [vmem:[%s6707_s1 + $0xe8] sm:$0xff]  }
   0x3   :  { %v4968_v3 = vld [vmem:[%s6707_s1 + $0x38] sm:$0xff]   ;;  %4363 = vmatprep.subr.bf16.mxu1 %v4967_v2  ;;  %v4972_v7 = vld [vmem:[%s6707_s1 + $0x30] sm:$0xff]   ;;  %v4976_v11 = vld [vmem:[%s6707_s1 + $0x28] sm:$0xff]  }
   0x4   :  { %v4969_v4 = vld [vmem:[%s6707_s1 + $0xb8] sm:$0xff]   ;;  %4324 = vmatpush3.bf16.msra.mxu0 %v4968_v3  ;;  %v4973_v8 = vld [vmem:[%s6707_s1 + $0xb0] sm:$0xff]   ;;  %v4977_v12 = vld [vmem:[%s6707_s1 + $0xa8] sm:$0xff]  }
   0x5   :  { %4364 = vmatpush3.bf16.msra.mxu1 %v4969_v4  ;;  %4325 = vmatprep.subr.bf16.mxu0 %v4970_v5  ;;  %v4978_v13 = vld [vmem:[%s6707_s1 + $0x60] sm:$0xff]   ;;  %v4982_v17 = vld [vmem:[%s6707_s1 + $0x58] sm:$0xff]   ;;  %v4986_v21 = vld [vmem:[%s6707_s1 + $0x50] sm:$0xff]  }
   0x6   :  { %4365 = vmatprep.subr.bf16.mxu1 %v4971_v6  ;;  %v4979_v14 = vld [vmem:[%s6707_s1 + $0xe0] sm:$0xff]   ;;  %v4983_v18 = vld [vmem:[%s6707_s1 + $0xd8] sm:$0xff]   ;;  %v4987_v22 = vld [vmem:[%s6707_s1 + $0xd0] sm:$0xff]  }
   0x7   :  { %v4980_v15 = vld [vmem:[%s6707_s1 + $0x20] sm:$0xff]   ;;  %v4984_v19 = vld [vmem:[%s6707_s1 + $0x18] sm:$0xff]   ;;  %v4988_v23 = vld [vmem:[%s6707_s1 + $0x10] sm:$0xff]  }
   0x8   :  { %4326 = vmatpush3.bf16.msra.mxu0 %v4972_v7  ;;  %v4981_v16 = vld [vmem:[%s6707_s1 + $0xa0] sm:$0xff]   ;;  %v4985_v20 = vld [vmem:[%s6707_s1 + $0x98] sm:$0xff]   ;;  %v4989_v24 = vld [vmem:[%s6707_s1 + $0x90] sm:$0xff]  }
   0x9   :  { %4366 = vmatpush3.bf16.msra.mxu1 %v4973_v8  ;;  %4327 = vmatprep.subr.bf16.mxu0 %v4974_v9  ;;  %v4990_v25 = vld [vmem:[%s6707_s1 + $0x48] sm:$0xff]   ;;  %v4994_v29 = vld [vmem:[%s6707_s1 + $0x40] sm:$0xff]   ;;  %v4998_v41 = vld [vmem:[%s6707_s1 + $0x178] sm:$0xff]  }
   0xa   :  { %4367 = vmatprep.subr.bf16.mxu1 %v4975_v10  ;;  %v4991_v26 = vld [vmem:[%s6707_s1 + $0xc8] sm:$0xff]   ;;  %v4995_v30 = vld [vmem:[%s6707_s1 + $0xc0] sm:$0xff]   ;;  %v4999_v42 = vld [vmem:[%s6707_s1 + $0x1f8] sm:$0xff]  }
   0xb   :  { %v4992_v27 = vld [vmem:[%s6707_s1 + $0x8] sm:$0xff]   ;;  %v4996_v31 = vld [vmem:[%s6707_s1] sm:$0xff]   ;;  %v5000_v43 = vld [vmem:[%s6707_s1 + $0x138] sm:$0xff]  }
   0xc   :  { %4328 = vmatpush3.bf16.msra.mxu0 %v4976_v11  ;;  %v4993_v28 = vld [vmem:[%s6707_s1 + $0x88] sm:$0xff]   ;;  %v4997_v32 = vld [vmem:[%s6707_s1 + $0x80] sm:$0xff]   ;;  %v5001_v44 = vld [vmem:[%s6707_s1 + $0x1b8] sm:$0xff]  }
   0xd   :  { %4368 = vmatpush3.bf16.msra.mxu1 %v4977_v12  ;;  %4329 = vmatprep.subr.bf16.mxu0 %v4978_v13  ;;  %v15_v33 = vld [vmem:[%s6708_s0] sm:$0xff]  ;;  %v16_v35 = vld [vmem:[%s6708_s0 + $0x8] sm:$0xff]  ;;  %v5002_v45 = vld [vmem:[%s6707_s1 + $0x170] sm:$0xff]  }
   0xe   :  { %4369 = vmatprep.subr.bf16.mxu1 %v4979_v14  ;;  %v31_v34 = vld [vmem:[%s6708_s0 + $0x80] sm:$0xff]  ;;  %v32_v38 = vld [vmem:[%s6708_s0 + $0x88] sm:$0xff]  ;;  %v5003_v46 = vld [vmem:[%s6707_s1 + $0x1f0] sm:$0xff]  }
   0xf   :  { %v3939_v36 = vcombine.low %v15_v33, %v31_v34  ;;  %v3940_v37 = vcombine.high %v15_v33, %v31_v34  ;;  %v3941_v39 = vcombine.low %v16_v35, %v32_v38  ;;  %v3942_v40 = vcombine.high %v16_v35, %v32_v38  ;;  %v5004_v47 = vld [vmem:[%s6707_s1 + $0x130] sm:$0xff]   ;;  %v47_v49 = vld [vmem:[%s6708_s0 + $0x100] sm:$0xff]  ;;  %v48_v52 = vld [vmem:[%s6708_s0 + $0x108] sm:$0xff] }
  0x10   :  { %4330 = vmatpush3.bf16.msra.mxu0 %v4980_v15  ;;  %v5005_v48 = vld [vmem:[%s6707_s1 + $0x1b0] sm:$0xff]   ;;  %v63_v50 = vld [vmem:[%s6708_s0 + $0x180] sm:$0xff]  ;;  %v64_v53 = vld [vmem:[%s6708_s0 + $0x188] sm:$0xff] }
  0x11   :  { %4370 = vmatpush3.bf16.msra.mxu1 %v4981_v16  ;;  %4331 = vmatprep.subr.bf16.mxu0 %v4982_v17  ;;  %v3972_v51 = vcombine.high %v47_v49, %v63_v50  ;;  %v3971_v54 = vcombine.low %v47_v49, %v63_v50  ;;  %v3974_v55 = vcombine.high %v48_v52, %v64_v53  ;;  %v5006_v57 = vld [vmem:[%s6707_s1 + $0x168] sm:$0xff]   ;;  %v5010_v61 = vld [vmem:[%s6707_s1 + $0x160] sm:$0xff]   ;;  %v5014_v9 = vld [vmem:[%s6707_s1 + $0x158] sm:$0xff]  }
  0x12   :  { %4371 = vmatprep.subr.bf16.mxu1 %v4983_v18  ;;  %2911 = vmatprep.mubr.bf16.mxu0 %v3940_v37  ;;  %v3973_v56 = vcombine.low %v48_v52, %v64_v53  ;;  %v5007_v58 = vld [vmem:[%s6707_s1 + $0x1e8] sm:$0xff]   ;;  %v5011_v62 = vld [vmem:[%s6707_s1 + $0x1e0] sm:$0xff]   ;;  %v5015_v10 = vld [vmem:[%s6707_s1 + $0x1d8] sm:$0xff]  }
  0x13   :  { %2976 = vmatprep.mubr.bf16.mxu1 %v3942_v40  ;;  %v5008_v59 = vld [vmem:[%s6707_s1 + $0x128] sm:$0xff]   ;;  %v5012_v63 = vld [vmem:[%s6707_s1 + $0x120] sm:$0xff]   ;;  %v5016_v11 = vld [vmem:[%s6707_s1 + $0x118] sm:$0xff]  }
  0x14   :  { %4332 = vmatpush3.bf16.msra.mxu0 %v4984_v19  ;;  %v5009_v60 = vld [vmem:[%s6707_s1 + $0x1a8] sm:$0xff]   ;;  %v5013_v0 = vld [vmem:[%s6707_s1 + $0x1a0] sm:$0xff]   ;;  %v5017_v12 = vld [vmem:[%s6707_s1 + $0x198] sm:$0xff]  }
  0x15   :  { %4372 = vmatpush3.bf16.msra.mxu1 %v4985_v20  ;;  %4333 = vmatprep.subr.bf16.mxu0 %v4986_v21  ;;  %v79_v1 = vld [vmem:[%s6708_s0 + $0x200] sm:$0xff]  ;;  %v80_v3 = vld [vmem:[%s6708_s0 + $0x208] sm:$0xff]  ;;  %v5018_v13 = vld [vmem:[%s6707_s1 + $0x150] sm:$0xff]  }
  0x16   :  { %4373 = vmatprep.subr.bf16.mxu1 %v4987_v22  ;;  %v95_v2 = vld [vmem:[%s6708_s0 + $0x280] sm:$0xff]  ;;  %v96_v4 = vld [vmem:[%s6708_s0 + $0x288] sm:$0xff]  ;;  %v5019_v14 = vld [vmem:[%s6707_s1 + $0x1d0] sm:$0xff]  }
  0x17   :  { %v4004_v5 = vcombine.high %v79_v1, %v95_v2  ;;  %v4006_v6 = vcombine.high %v80_v3, %v96_v4  ;;  %v4003_v7 = vcombine.low %v79_v1, %v95_v2  ;;  %v4005_v8 = vcombine.low %v80_v3, %v96_v4  ;;  %v5020_v15 = vld [vmem:[%s6707_s1 + $0x110] sm:$0xff]   ;;  %v111_v17 = vld [vmem:[%s6708_s0 + $0x300] sm:$0xff]  ;;  %v112_v19 = vld [vmem:[%s6708_s0 + $0x308] sm:$0xff] }
  0x18   :  { %4334 = vmatpush3.bf16.msra.mxu0 %v4988_v23  ;;  %v5021_v16 = vld [vmem:[%s6707_s1 + $0x190] sm:$0xff]   ;;  %v127_v18 = vld [vmem:[%s6708_s0 + $0x380] sm:$0xff]  ;;  %v128_v21 = vld [vmem:[%s6708_s0 + $0x388] sm:$0xff] }
  0x19   :  { %4374 = vmatpush3.bf16.msra.mxu1 %v4989_v24  ;;  %4335 = vmatprep.subr.bf16.mxu0 %v4990_v25  ;;  %v4036_v20 = vcombine.high %v111_v17, %v127_v18  ;;  %v4035_v22 = vcombine.low %v111_v17, %v127_v18  ;;  %v4038_v23 = vcombine.high %v112_v19, %v128_v21  ;;  %v5022_v25 = vld [vmem:[%s6707_s1 + $0x148] sm:$0xff]   ;;  %v17_v33 = vld [vmem:[%s6708_s0 + $0x10] sm:$0xff]  ;;  %v18_v37 = vld [vmem:[%s6708_s0 + $0x18] sm:$0xff] }
  0x1a   :  { %4375 = vmatprep.subr.bf16.mxu1 %v4991_v26  ;;  %v4037_v24 = vcombine.low %v112_v19, %v128_v21  ;;  %v5023_v26 = vld [vmem:[%s6707_s1 + $0x1c8] sm:$0xff]   ;;  %v33_v34 = vld [vmem:[%s6708_s0 + $0x90] sm:$0xff]  ;;  %v34_v38 = vld [vmem:[%s6708_s0 + $0x98] sm:$0xff] }
  0x1b   :  { %v3943_v35 = vcombine.low %v17_v33, %v33_v34  ;;  %v3946_v40 = vcombine.high %v18_v37, %v34_v38  ;;  %v49_v49 = vld [vmem:[%s6708_s0 + $0x110] sm:$0xff]  ;;  %v66_v52 = vld [vmem:[%s6708_s0 + $0x198] sm:$0xff] }
  0x1c   :  { %4336 = vmatpush3.bf16.msra.mxu0 %v4992_v27  ;;  %v5024_v27 = vld [vmem:[%s6707_s1 + $0x108] sm:$0xff]   ;;  %v65_v50 = vld [vmem:[%s6708_s0 + $0x190] sm:$0xff]  ;;  %v82_v3 = vld [vmem:[%s6708_s0 + $0x218] sm:$0xff] }
  0x1d   :  { %4376 = vmatpush3.bf16.msra.mxu1 %v4993_v28  ;;  %4337 = vmatprep.subr.bf16.mxu0 %v4994_v29  ;;  %v5025_v28 = vld [vmem:[%s6707_s1 + $0x188] sm:$0xff]   ;;  %v5026_v29 = vld [vmem:[%s6707_s1 + $0x140] sm:$0xff]   ;;  %v3976_v53 = vcombine.high %v49_v49, %v65_v50  ;;  %v81_v1 = vld [vmem:[%s6708_s0 + $0x210] sm:$0xff] }
  0x1e   :  { %4377 = vmatprep.subr.bf16.mxu1 %v4995_v30  ;;  %v5027_v30 = vld [vmem:[%s6707_s1 + $0x1c0] sm:$0xff]   ;;  %v97_v2 = vld [vmem:[%s6708_s0 + $0x290] sm:$0xff]  ;;  %v130_v21 = vld [vmem:[%s6708_s0 + $0x398] sm:$0xff] }
  0x1f   :  { %v4008_v4 = vcombine.high %v81_v1, %v97_v2  ;;  %v113_v17 = vld [vmem:[%s6708_s0 + $0x310] sm:$0xff] }
  0x20   :  { %4338 = vmatpush3.bf16.msra.mxu0 %v4996_v31  ;;  %v5028_v31 = vld [vmem:[%s6707_s1 + $0x100] sm:$0xff]   ;;  %v129_v18 = vld [vmem:[%s6708_s0 + $0x390] sm:$0xff] }
  0x21   :  { %4378 = vmatpush3.bf16.msra.mxu1 %v4997_v32  ;;  %4403 = vmatprep.subr.bf16.mxu0 %v4998_v41  ;;  %v5029_v32 = vld [vmem:[%s6707_s1 + $0x180] sm:$0xff]   ;;  %v5030_v41 = vld [vmem:[%s6707_s1 + $0x278] sm:$0xff]   ;;  %v4040_v19 = vcombine.high %v113_v17, %v129_v18 }
  0x22   :  { %4443 = vmatprep.subr.bf16.mxu1 %v4999_v42  ;;  %v5031_v42 = vld [vmem:[%s6707_s1 + $0x2f8] sm:$0xff]  }
  0x23   :  { %2912 = vmatmul.mubr.bf16.vlgmr.msra.gmra.mxu0 %v3939_v36  ;;  %v3944_v36 = vcombine.high %v17_v33, %v33_v34  ;;  %v19_v33 = vld [vmem:[%s6708_s0 + $0x20] sm:$0xff] }
  0x24   :  { %2977 = vmatmul.mubr.bf16.vlgmr.msra.gmra.mxu1 %v3941_v39  ;;  %4404 = vmatpush3.bf16.msra.mxu0 %v5000_v43  ;;  %v3945_v39 = vcombine.low %v18_v37, %v34_v38  ;;  %v5032_v43 = vld [vmem:[%s6707_s1 + $0x238] sm:$0xff]   ;;  %v35_v34 = vld [vmem:[%s6708_s0 + $0xa0] sm:$0xff] }
  0x25   :  { %4444 = vmatpush3.bf16.msra.mxu1 %v5001_v44  ;;  %4405 = vmatprep.subr.bf16.mxu0 %v5002_v45  ;;  %v5033_v44 = vld [vmem:[%s6707_s1 + $0x2b8] sm:$0xff]   ;;  %v5034_v45 = vld [vmem:[%s6707_s1 + $0x270] sm:$0xff]   ;;  %v3947_v37 = vcombine.low %v19_v33, %v35_v34  ;;  %v3948_v38 = vcombine.high %v19_v33, %v35_v34  ;;  %v5089_v33 = vld [vmem:[%s6707_s1 + $0x388] sm:$0xff]  }
  0x26   :  { %4445 = vmatprep.subr.bf16.mxu1 %v5003_v46  ;;  %2919 = vmatprep.mubr.bf16.mxu0 %v3972_v51  ;;  %v5035_v46 = vld [vmem:[%s6707_s1 + $0x2f0] sm:$0xff]   ;;  %v50_v51 = vld [vmem:[%s6708_s0 + $0x118] sm:$0xff]  ;;  %v5090_v34 = vld [vmem:[%s6707_s1 + $0x340] sm:$0xff]  }
  0x27   :  { %2984 = vmatprep.mubr.bf16.mxu1 %v3974_v55  ;;  %v3975_v55 = vcombine.low %v49_v49, %v65_v50  ;;  %v51_v49 = vld [vmem:[%s6708_s0 + $0x120] sm:$0xff] }
  0x28   :  { %4406 = vmatpush3.bf16.msra.mxu0 %v5004_v47  ;;  %v5036_v47 = vld [vmem:[%s6707_s1 + $0x230] sm:$0xff]   ;;  %v67_v50 = vld [vmem:[%s6708_s0 + $0x1a0] sm:$0xff] }
  0x29   :  { %4446 = vmatpush3.bf16.msra.mxu1 %v5005_v48  ;;  %4407 = vmatprep.subr.bf16.mxu0 %v5006_v57  ;;  %v5037_v48 = vld [vmem:[%s6707_s1 + $0x2b0] sm:$0xff]   ;;  %v5038_v57 = vld [vmem:[%s6707_s1 + $0x268] sm:$0xff]  }
  0x2a   :  { %4447 = vmatprep.subr.bf16.mxu1 %v5007_v58  ;;  %v5039_v58 = vld [vmem:[%s6707_s1 + $0x2e8] sm:$0xff]  }
  0x2b   :  { %2920 = vmatmul.mubr.bf16.gmra.mxu0 %v3971_v54  ;;  %v3978_v54 = vcombine.high %v50_v51, %v66_v52 }
  0x2c   :  { %2985 = vmatmul.mubr.bf16.gmra.mxu1 %v3973_v56  ;;  %4408 = vmatpush3.bf16.msra.mxu0 %v5008_v59  ;;  %v3977_v56 = vcombine.low %v50_v51, %v66_v52  ;;  %v5040_v59 = vld [vmem:[%s6707_s1 + $0x228] sm:$0xff]   ;;  %v3980_v52 = vcombine.high %v51_v49, %v67_v50 }
  0x2d   :  { %4448 = vmatpush3.bf16.msra.mxu1 %v5009_v60  ;;  %4409 = vmatprep.subr.bf16.mxu0 %v5010_v61  ;;  %v5041_v60 = vld [vmem:[%s6707_s1 + $0x2a8] sm:$0xff]   ;;  %v5042_v61 = vld [vmem:[%s6707_s1 + $0x260] sm:$0xff]  }
  0x2e   :  { %4449 = vmatprep.subr.bf16.mxu1 %v5011_v62  ;;  %2927 = vmatprep.mubr.bf16.mxu0 %v4004_v5  ;;  %v5043_v62 = vld [vmem:[%s6707_s1 + $0x2e0] sm:$0xff]   ;;  %v98_v5 = vld [vmem:[%s6708_s0 + $0x298] sm:$0xff]  ;;  %v52_v51 = vld [vmem:[%s6708_s0 + $0x128] sm:$0xff] }
  0x2f   :  { %2992 = vmatprep.mubr.bf16.mxu1 %v4006_v6  ;;  %v4007_v6 = vcombine.low %v81_v1, %v97_v2  ;;  %v5076_v1 = vld [vmem:[%s6707_s1 + $0x320] sm:$0xff]  }
  0x30   :  { %4410 = vmatpush3.bf16.msra.mxu0 %v5012_v63  ;;  %v5044_v63 = vld [vmem:[%s6707_s1 + $0x220] sm:$0xff]  }
  0x31   :  { %4450 = vmatpush3.bf16.msra.mxu1 %v5013_v0  ;;  %4411 = vmatprep.subr.bf16.mxu0 %v5014_v9  ;;  %v5045_v0 = vld [vmem:[%s6707_s1 + $0x2a0] sm:$0xff]   ;;  %v5046_v9 = vld [vmem:[%s6707_s1 + $0x258] sm:$0xff]  }
  0x32   :  { %4451 = vmatprep.subr.bf16.mxu1 %v5015_v10  ;;  %v5047_v10 = vld [vmem:[%s6707_s1 + $0x2d8] sm:$0xff]   ;;  %v5077_v2 = vld [vmem:[%s6707_s1 + $0x3a0] sm:$0xff]  }
  0x33   :  { %2928 = vmatmul.mubr.bf16.gmra.mxu0 %v4003_v7  ;;  %v4010_v7 = vcombine.high %v82_v3, %v98_v5 }
  0x34   :  { %2993 = vmatmul.mubr.bf16.gmra.mxu1 %v4005_v8  ;;  %4412 = vmatpush3.bf16.msra.mxu0 %v5016_v11  ;;  %v4009_v8 = vcombine.low %v82_v3, %v98_v5  ;;  %v5048_v11 = vld [vmem:[%s6707_s1 + $0x218] sm:$0xff]   ;;  %v83_v3 = vld [vmem:[%s6708_s0 + $0x220] sm:$0xff]  ;;  %v84_v5 = vld [vmem:[%s6708_s0 + $0x228] sm:$0xff] }
  0x35   :  { %4452 = vmatpush3.bf16.msra.mxu1 %v5017_v12  ;;  %4413 = vmatprep.subr.bf16.mxu0 %v5018_v13  ;;  %v5049_v12 = vld [vmem:[%s6707_s1 + $0x298] sm:$0xff]   ;;  %v5050_v13 = vld [vmem:[%s6707_s1 + $0x250] sm:$0xff]  }
  0x36   :  { %4453 = vmatprep.subr.bf16.mxu1 %v5019_v14  ;;  %2935 = vmatprep.mubr.bf16.mxu0 %v4036_v20  ;;  %v5051_v14 = vld [vmem:[%s6707_s1 + $0x2d0] sm:$0xff]   ;;  %v114_v20 = vld [vmem:[%s6708_s0 + $0x318] sm:$0xff] }
  0x37   :  { %3000 = vmatprep.mubr.bf16.mxu1 %v4038_v23  ;;  %v4042_v23 = vcombine.high %v114_v20, %v130_v21 }
  0x38   :  { %4414 = vmatpush3.bf16.msra.mxu0 %v5020_v15  ;;  %v5052_v15 = vld [vmem:[%s6707_s1 + $0x210] sm:$0xff]  }
  0x39   :  { %4454 = vmatpush3.bf16.msra.mxu1 %v5021_v16  ;;  %4415 = vmatprep.subr.bf16.mxu0 %v5022_v25  ;;  %v5053_v16 = vld [vmem:[%s6707_s1 + $0x290] sm:$0xff]   ;;  %v5054_v25 = vld [vmem:[%s6707_s1 + $0x248] sm:$0xff]  }
  0x3a   :  { %4455 = vmatprep.subr.bf16.mxu1 %v5023_v26  ;;  %v5055_v26 = vld [vmem:[%s6707_s1 + $0x2c8] sm:$0xff]  }
  0x3b   :  { %2936 = vmatmul.mubr.bf16.gmra.mxu0 %v4035_v22  ;;  %v4039_v22 = vcombine.low %v113_v17, %v129_v18  ;;  %v5083_v17 = vld [vmem:[%s6707_s1 + $0x3d0] sm:$0xff]   ;;  %v658_v18 = vld [vmem:[%s6709_s2 + $0x18] sm:$0xff] }
  0x3c   :  { %3001 = vmatmul.mubr.bf16.gmra.mxu1 %v4037_v24  ;;  %4416 = vmatpush3.bf16.msra.mxu0 %v5024_v27  ;;  %v4041_v24 = vcombine.low %v114_v20, %v130_v21  ;;  %v5056_v27 = vld [vmem:[%s6707_s1 + $0x208] sm:$0xff]   ;;  %v5085_v20 = vld [vmem:[%s6707_s1 + $0x390] sm:$0xff]   ;;  %v115_v21 = vld [vmem:[%s6708_s0 + $0x320] sm:$0xff] }
  0x3d   :  { %4456 = vmatpush3.bf16.msra.mxu1 %v5025_v28  ;;  %4417 = vmatprep.subr.bf16.mxu0 %v5026_v29  ;;  %v5057_v28 = vld [vmem:[%s6707_s1 + $0x288] sm:$0xff]   ;;  %v5058_v29 = vld [vmem:[%s6707_s1 + $0x240] sm:$0xff]  }
  0x3e   :  { %4457 = vmatprep.subr.bf16.mxu1 %v5027_v30  ;;  %3041 = vmatprep.mubr.bf16.mxu0 %v3944_v36  ;;  %v5059_v30 = vld [vmem:[%s6707_s1 + $0x2c0] sm:$0xff]   ;;  %v36_v36 = vld [vmem:[%s6708_s0 + $0xa8] sm:$0xff] }
  0x3f   :  { %3106 = vmatprep.mubr.bf16.mxu1 %v3946_v40 }
  0x40   :  { %4418 = vmatpush3.bf16.msra.mxu0 %v5028_v31  ;;  %v5060_v31 = vld [vmem:[%s6707_s1 + $0x200] sm:$0xff]  }
  0x41   :  { %4458 = vmatpush3.bf16.msra.mxu1 %v5029_v32  ;;  %4483 = vmatprep.subr.bf16.mxu0 %v5030_v41  ;;  %v5061_v32 = vld [vmem:[%s6707_s1 + $0x280] sm:$0xff]   ;;  %v5062_v41 = vld [vmem:[%s6707_s1 + $0x378] sm:$0xff]  }
  0x42   :  { %4523 = vmatprep.subr.bf16.mxu1 %v5031_v42  ;;  %v5063_v42 = vld [vmem:[%s6707_s1 + $0x3f8] sm:$0xff]  }
  0x43   :  { %3042 = vmatmul.mubr.bf16.vlgmr.msra.gmra.mxu0 %v3943_v35  ;;  %v20_v35 = vld [vmem:[%s6708_s0 + $0x28] sm:$0xff] }
  0x44   :  { %3107 = vmatmul.mubr.bf16.vlgmr.msra.gmra.mxu1 %v3945_v39  ;;  %4484 = vmatpush3.bf16.msra.mxu0 %v5032_v43  ;;  %v3949_v39 = vcombine.low %v20_v35, %v36_v36  ;;  %v3950_v40 = vcombine.high %v20_v35, %v36_v36  ;;  %v5064_v43 = vld [vmem:[%s6707_s1 + $0x338] sm:$0xff]   ;;  %v5091_v35 = vld [vmem:[%s6707_s1 + $0x3c0] sm:$0xff]   ;;  %v660_v36 = vld [vmem:[%s6709_s2 + $0x28] sm:$0xff] }
  0x45   :  { %4524 = vmatpush3.bf16.msra.mxu1 %v5033_v44  ;;  %4485 = vmatprep.subr.bf16.mxu0 %v5034_v45  ;;  %v5065_v44 = vld [vmem:[%s6707_s1 + $0x3b8] sm:$0xff]   ;;  %v5066_v45 = vld [vmem:[%s6707_s1 + $0x370] sm:$0xff]  }
  0x46   :  { %4525 = vmatprep.subr.bf16.mxu1 %v5035_v46  ;;  %3049 = vmatprep.mubr.bf16.mxu0 %v3976_v53  ;;  %v5067_v46 = vld [vmem:[%s6707_s1 + $0x3f0] sm:$0xff]   ;;  %v68_v53 = vld [vmem:[%s6708_s0 + $0x1a8] sm:$0xff] }
  0x47   :  { %3114 = vmatprep.mubr.bf16.mxu1 %v3978_v54  ;;  %v3979_v54 = vcombine.low %v51_v49, %v67_v50  ;;  %v661_v49 = vld [vmem:[%s6709_s2 + $0x30] sm:$0xff]  ;;  %v5096_v50 = vld [vmem:[%s6707_s1 + $0x438] sm:$0xff]  }
  0x48   :  { %4486 = vmatpush3.bf16.msra.mxu0 %v5036_v47  ;;  %v5068_v47 = vld [vmem:[%s6707_s1 + $0x330] sm:$0xff]  }
  0x49   :  { %4526 = vmatpush3.bf16.msra.mxu1 %v5037_v48  ;;  %4487 = vmatprep.subr.bf16.mxu0 %v5038_v57  ;;  %v5069_v48 = vld [vmem:[%s6707_s1 + $0x3b0] sm:$0xff]   ;;  %v5070_v57 = vld [vmem:[%s6707_s1 + $0x368] sm:$0xff]  }
  0x4a   :  { %4527 = vmatprep.subr.bf16.mxu1 %v5039_v58  ;;  %v5071_v58 = vld [vmem:[%s6707_s1 + $0x3e8] sm:$0xff]  }
  0x4b   :  { %3050 = vmatmul.mubr.bf16.gmra.mxu0 %v3975_v55  ;;  %v3982_v55 = vcombine.high %v52_v51, %v68_v53 }
  0x4c   :  { %3115 = vmatmul.mubr.bf16.gmra.mxu1 %v3977_v56  ;;  %4488 = vmatpush3.bf16.msra.mxu0 %v5040_v59  ;;  %v3981_v56 = vcombine.low %v52_v51, %v68_v53  ;;  %v655_v59 = vld [vmem:[%s6709_s2] sm:$0xff]  ;;  %v5097_v51 = vld [vmem:[%s6707_s1 + $0x4b8] sm:$0xff]   ;;  %v5099_v53 = vld [vmem:[%s6707_s1 + $0x4f0] sm:$0xff]  }
  0x4d   :  { %4528 = vmatpush3.bf16.msra.mxu1 %v5041_v60  ;;  %4489 = vmatprep.subr.bf16.mxu0 %v5042_v61  ;;  %v5072_v60 = vld [vmem:[%s6707_s1 + $0x328] sm:$0xff]  }
  0x4e   :  { %4529 = vmatprep.subr.bf16.mxu1 %v5043_v62  ;;  %3057 = vmatprep.mubr.bf16.mxu0 %v4008_v4  ;;  %v5073_v61 = vld [vmem:[%s6707_s1 + $0x3a8] sm:$0xff]   ;;  %v5074_v62 = vld [vmem:[%s6707_s1 + $0x360] sm:$0xff]  }
  0x4f   :  { %3122 = vmatprep.mubr.bf16.mxu1 %v4010_v7  ;;  %665 = vperm.xlu0 %4964, %v655_v59   ;;  %v99_v4 = vld [vmem:[%s6708_s0 + $0x2a0] sm:$0xff]  ;;  %v100_v7 = vld [vmem:[%s6708_s0 + $0x2a8] sm:$0xff]  ;;  %v54_v59 = vld [vmem:[%s6708_s0 + $0x138] sm:$0xff] }
  0x50   :  { %4490 = vmatpush3.bf16.msra.mxu0 %v5044_v63  ;;  %v5075_v63 = vld [vmem:[%s6707_s1 + $0x3e0] sm:$0xff]  }
  0x51   :  { %4530 = vmatpush3.bf16.msra.mxu1 %v5045_v0  ;;  %4491 = vmatprep.subr.bf16.mxu0 %v5046_v9  ;;  %v656_v0 = vld [vmem:[%s6709_s2 + $0x8] sm:$0xff]  ;;  %v4014_v9 = vcombine.high %v84_v5, %v100_v7 }
  0x52   :  { %4531 = vmatprep.subr.bf16.mxu1 %v5047_v10  ;;  %v4013_v10 = vcombine.low %v84_v5, %v100_v7  ;;  %v5106_v5 = vld [vmem:[%s6707_s1 + $0x460] sm:$0xff]  }
  0x53   :  { %3058 = vmatmul.mubr.bf16.gmra.mxu0 %v4007_v6  ;;  %670 = vperm.xlu0 %4964, %v656_v0   ;;  %v4012_v6 = vcombine.high %v83_v3, %v99_v4  ;;  %v5108_v7 = vld [vmem:[%s6707_s1 + $0x420] sm:$0xff]  }
  0x54   :  { %3123 = vmatmul.mubr.bf16.gmra.mxu1 %v4009_v8  ;;  %4492 = vmatpush3.bf16.msra.mxu0 %v5048_v11  ;;  %v4011_v8 = vcombine.low %v83_v3, %v99_v4  ;;  %v5078_v11 = vld [vmem:[%s6707_s1 + $0x358] sm:$0xff]   ;;  %v5104_v3 = vld [vmem:[%s6707_s1 + $0x428] sm:$0xff]  }
  0x55   :  { %4532 = vmatpush3.bf16.msra.mxu1 %v5049_v12  ;;  %4493 = vmatprep.subr.bf16.mxu0 %v5050_v13  ;;  %v5079_v12 = vld [vmem:[%s6707_s1 + $0x3d8] sm:$0xff]   ;;  %v657_v13 = vld [vmem:[%s6709_s2 + $0x10] sm:$0xff]  ;;  %v5105_v4 = vld [vmem:[%s6707_s1 + $0x4a8] sm:$0xff]  }
  0x56   :  { %4533 = vmatprep.subr.bf16.mxu1 %v5051_v14  ;;  %3065 = vmatprep.mubr.bf16.mxu0 %v4040_v19  ;;  %v5080_v14 = vld [vmem:[%s6707_s1 + $0x318] sm:$0xff]   ;;  %v5084_v19 = vld [vmem:[%s6707_s1 + $0x310] sm:$0xff]  }
  0x57   :  { %3130 = vmatprep.mubr.bf16.mxu1 %v4042_v23  ;;  %675 = vperm.xlu1 %4965, %v657_v13   ;;  %v116_v23 = vld [vmem:[%s6708_s0 + $0x328] sm:$0xff]  ;;  %v102_v13 = vld [vmem:[%s6708_s0 + $0x2b8] sm:$0xff] }
  0x58   :  { %4494 = vmatpush3.bf16.msra.mxu0 %v5052_v15  ;;  %v5081_v15 = vld [vmem:[%s6707_s1 + $0x398] sm:$0xff]  }
  0x59   :  { %4534 = vmatpush3.bf16.msra.mxu1 %v5053_v16  ;;  %4495 = vmatprep.subr.bf16.mxu0 %v5054_v25  ;;  %v5082_v16 = vld [vmem:[%s6707_s1 + $0x350] sm:$0xff]   ;;  %v132_v25 = vld [vmem:[%s6708_s0 + $0x3a8] sm:$0xff] }
  0x5a   :  { %4535 = vmatprep.subr.bf16.mxu1 %v5055_v26 }
  0x5b   :  { %3066 = vmatmul.mubr.bf16.gmra.mxu0 %v4039_v22  ;;  %680 = vperm.xlu1 %4965, %v658_v18   ;;  %v131_v22 = vld [vmem:[%s6708_s0 + $0x3a0] sm:$0xff]  ;;  %v5111_v18 = vld [vmem:[%s6707_s1 + $0x4d8] sm:$0xff]  }
  0x5c   :  { %3131 = vmatmul.mubr.bf16.gmra.mxu1 %v4041_v24  ;;  %4496 = vmatpush3.bf16.msra.mxu0 %v5056_v27  ;;  %v4044_v24 = vcombine.high %v115_v21, %v131_v22  ;;  %v4043_v26 = vcombine.low %v115_v21, %v131_v22  ;;  %v4046_v27 = vcombine.high %v116_v23, %v132_v25  ;;  %v5114_v21 = vld [vmem:[%s6707_s1 + $0x450] sm:$0xff]  }
  0x5d   :  { %4536 = vmatpush3.bf16.msra.mxu1 %v5057_v28  ;;  %4497 = vmatprep.subr.bf16.mxu0 %v5058_v29  ;;  %v4045_v28 = vcombine.low %v116_v23, %v132_v25  ;;  %v5086_v29 = vld [vmem:[%s6707_s1 + $0x348] sm:$0xff]   ;;  %v5115_v22 = vld [vmem:[%s6707_s1 + $0x4d0] sm:$0xff]  }
  0x5e   :  { %4537 = vmatprep.subr.bf16.mxu1 %v5059_v30  ;;  %3171 = vmatprep.mubr.bf16.mxu0 %v3948_v38  ;;  %v5087_v30 = vld [vmem:[%s6707_s1 + $0x3c8] sm:$0xff]   ;;  %v5093_v38 = vld [vmem:[%s6707_s1 + $0x380] sm:$0xff]   ;;  %v5116_v23 = vld [vmem:[%s6707_s1 + $0x410] sm:$0xff]  }
  0x5f   :  { %3236 = vmatprep.mubr.bf16.mxu1 %v3950_v40  ;;  %690 = vperm.xlu1 %4965, %v660_v36   ;;  %v37_v40 = vld [vmem:[%s6708_s0 + $0xb0] sm:$0xff]  ;;  %v5121_v36 = vld [vmem:[%s6707_s1 + $0x488] sm:$0xff]  }
  0x60   :  { %4498 = vmatpush3.bf16.msra.mxu0 %v5060_v31  ;;  %v659_v31 = vld [vmem:[%s6709_s2 + $0x20] sm:$0xff]  ;;  %v117_v25 = vld [vmem:[%s6708_s0 + $0x330] sm:$0xff] }
  0x61   :  { %4538 = vmatpush3.bf16.msra.mxu1 %v5061_v32  ;;  %4563 = vmatprep.subr.bf16.mxu0 %v5062_v41  ;;  %v5088_v32 = vld [vmem:[%s6707_s1 + $0x308] sm:$0xff]   ;;  %v22_v41 = vld [vmem:[%s6708_s0 + $0x38] sm:$0xff] }
  0x62   :  { %4603 = vmatprep.subr.bf16.mxu1 %v5063_v42  ;;  %685 = vperm.xlu0 %4964, %v659_v31  }
  0x63   :  { %3172 = vmatmul.mubr.bf16.vlgmr.msra.gmra.mxu0 %v3947_v37  ;;  %v5092_v37 = vld [vmem:[%s6707_s1 + $0x300] sm:$0xff]  }
  0x64   :  { %3237 = vmatmul.mubr.bf16.vlgmr.msra.gmra.mxu1 %v3949_v39  ;;  %4564 = vmatpush3.bf16.msra.mxu0 %v5064_v43  ;;  %v21_v39 = vld [vmem:[%s6708_s0 + $0x30] sm:$0xff] }
  0x65   :  { %4604 = vmatpush3.bf16.msra.mxu1 %v5065_v44  ;;  %4565 = vmatprep.subr.bf16.mxu0 %v5066_v45  ;;  %v3951_v42 = vcombine.low %v21_v39, %v37_v40  ;;  %v3952_v43 = vcombine.high %v21_v39, %v37_v40  ;;  %v38_v44 = vld [vmem:[%s6708_s0 + $0xb8] sm:$0xff]  ;;  %v5124_v39 = vld [vmem:[%s6707_s1 + $0x400] sm:$0xff]  }
  0x66   :  { %4605 = vmatprep.subr.bf16.mxu1 %v5067_v46  ;;  %3179 = vmatprep.mubr.bf16.mxu0 %v3980_v52  ;;  %v3953_v45 = vcombine.low %v22_v41, %v38_v44  ;;  %v3954_v46 = vcombine.high %v22_v41, %v38_v44  ;;  %v5098_v52 = vld [vmem:[%s6707_s1 + $0x470] sm:$0xff]   ;;  %v5125_v40 = vld [vmem:[%s6707_s1 + $0x480] sm:$0xff]  }
  0x67   :  { %3244 = vmatprep.mubr.bf16.mxu1 %v3982_v55  ;;  %695 = vperm.xlu0 %4964, %v661_v49   ;;  %v5100_v55 = vld [vmem:[%s6707_s1 + $0x430] sm:$0xff]   ;;  %v23_v41 = vld [vmem:[%s6708_s0 + $0x40] sm:$0xff]  ;;  %v5126_v49 = vld [vmem:[%s6707_s1 + $0x578] sm:$0xff]  }
  0x68   :  { %4566 = vmatpush3.bf16.msra.mxu0 %v5068_v47  ;;  %v5094_v47 = vld [vmem:[%s6707_s1 + $0x478] sm:$0xff]  }
  0x69   :  { %4606 = vmatpush3.bf16.msra.mxu1 %v5069_v48  ;;  %4567 = vmatprep.subr.bf16.mxu0 %v5070_v57  ;;  %v5095_v48 = vld [vmem:[%s6707_s1 + $0x4f8] sm:$0xff]   ;;  %v53_v57 = vld [vmem:[%s6708_s0 + $0x130] sm:$0xff] }
  0x6a   :  { %4607 = vmatprep.subr.bf16.mxu1 %v5071_v58  ;;  %v69_v58 = vld [vmem:[%s6708_s0 + $0x1b0] sm:$0xff] }
  0x6b   :  { %3180 = vmatmul.mubr.bf16.gmra.mxu0 %v3979_v54  ;;  %v662_v54 = vld [vmem:[%s6709_s2 + $0x38] sm:$0xff] }
  0x6c   :  { %3245 = vmatmul.mubr.bf16.gmra.mxu1 %v3981_v56  ;;  %4568 = vmatpush3.bf16.msra.mxu0 %v5072_v60  ;;  %v5101_v56 = vld [vmem:[%s6707_s1 + $0x4b0] sm:$0xff]   ;;  %v3984_v60 = vcombine.high %v53_v57, %v69_v58 }
  0x6d   :  { %4608 = vmatpush3.bf16.msra.mxu1 %v5073_v61  ;;  %4569 = vmatprep.subr.bf16.mxu0 %v5074_v62  ;;  %v70_v61 = vld [vmem:[%s6708_s0 + $0x1b8] sm:$0xff]  ;;  %v3983_v62 = vcombine.low %v53_v57, %v69_v58  ;;  %v55_v57 = vld [vmem:[%s6708_s0 + $0x140] sm:$0xff] }
  0x6e   :  { %4609 = vmatprep.subr.bf16.mxu1 %v5075_v63  ;;  %3187 = vmatprep.mubr.bf16.mxu0 %v4012_v6  ;;  %v3986_v63 = vcombine.high %v54_v59, %v70_v61  ;;  %v3985_v0 = vcombine.low %v54_v59, %v70_v61  ;;  %v5107_v6 = vld [vmem:[%s6707_s1 + $0x4e0] sm:$0xff]   ;;  %v72_v61 = vld [vmem:[%s6708_s0 + $0x1c8] sm:$0xff] }
  0x6f   :  { %3252 = vmatprep.mubr.bf16.mxu1 %v4014_v9  ;;  %700 = vperm.xlu1 %4965, %v662_v54   ;;  %v85_v9 = vld [vmem:[%s6708_s0 + $0x230] sm:$0xff]  ;;  %v71_v58 = vld [vmem:[%s6708_s0 + $0x1c0] sm:$0xff] }
  0x70   :  { %4570 = vmatpush3.bf16.msra.mxu0 %v5076_v1  ;;  %v5102_v1 = vld [vmem:[%s6707_s1 + $0x468] sm:$0xff]   ;;  %v5131_v54 = vld [vmem:[%s6707_s1 + $0x5f0] sm:$0xff]   ;;  %v3988_v59 = vcombine.high %v55_v57, %v71_v58 }
  0x71   :  { %4610 = vmatpush3.bf16.msra.mxu1 %v5077_v2  ;;  %4571 = vmatprep.subr.bf16.mxu0 %v5078_v11  ;;  %v5103_v2 = vld [vmem:[%s6707_s1 + $0x4e8] sm:$0xff]  }
  0x72   :  { %4611 = vmatprep.subr.bf16.mxu1 %v5079_v12  ;;  %v86_v12 = vld [vmem:[%s6708_s0 + $0x238] sm:$0xff] }
  0x73   :  { %3188 = vmatmul.mubr.bf16.gmra.mxu0 %v4011_v8  ;;  %v5109_v8 = vld [vmem:[%s6707_s1 + $0x4a0] sm:$0xff]  }
  0x74   :  { %3253 = vmatmul.mubr.bf16.gmra.mxu1 %v4013_v10  ;;  %4572 = vmatpush3.bf16.msra.mxu0 %v5080_v14  ;;  %v101_v10 = vld [vmem:[%s6708_s0 + $0x2b0] sm:$0xff] }
  0x75   :  { %4612 = vmatpush3.bf16.msra.mxu1 %v5081_v15  ;;  %4573 = vmatprep.subr.bf16.mxu0 %v5082_v16  ;;  %v4016_v11 = vcombine.high %v85_v9, %v101_v10  ;;  %v4015_v14 = vcombine.low %v85_v9, %v101_v10  ;;  %v4018_v15 = vcombine.high %v86_v12, %v102_v13  ;;  %v87_v9 = vld [vmem:[%s6708_s0 + $0x240] sm:$0xff] }
  0x76   :  { %4613 = vmatprep.subr.bf16.mxu1 %v5083_v17  ;;  %3195 = vmatprep.mubr.bf16.mxu0 %v4044_v24  ;;  %v4017_v16 = vcombine.low %v86_v12, %v102_v13  ;;  %v5110_v17 = vld [vmem:[%s6707_s1 + $0x458] sm:$0xff]   ;;  %v5117_v24 = vld [vmem:[%s6707_s1 + $0x490] sm:$0xff]   ;;  %v103_v10 = vld [vmem:[%s6708_s0 + $0x2c0] sm:$0xff] }
  0x77   :  { %3260 = vmatprep.mubr.bf16.mxu1 %v4046_v27  ;;  %v118_v27 = vld [vmem:[%s6708_s0 + $0x338] sm:$0xff]  ;;  %v104_v12 = vld [vmem:[%s6708_s0 + $0x2c8] sm:$0xff]  ;;  %v4020_v13 = vcombine.high %v87_v9, %v103_v10 }
  0x78   :  { %4574 = vmatpush3.bf16.msra.mxu0 %v5084_v19  ;;  %v5112_v19 = vld [vmem:[%s6707_s1 + $0x418] sm:$0xff]  }
  0x79   :  { %4614 = vmatpush3.bf16.msra.mxu1 %v5085_v20  ;;  %4575 = vmatprep.subr.bf16.mxu0 %v5086_v29  ;;  %v5113_v20 = vld [vmem:[%s6707_s1 + $0x498] sm:$0xff]  }
  0x7a   :  { %4615 = vmatprep.subr.bf16.mxu1 %v5087_v30 }
  0x7b   :  { %3196 = vmatmul.mubr.bf16.gmra.mxu0 %v4043_v26  ;;  %v133_v26 = vld [vmem:[%s6708_s0 + $0x3b0] sm:$0xff] }
  0x7c   :  { %3261 = vmatmul.mubr.bf16.gmra.mxu1 %v4045_v28  ;;  %4576 = vmatpush3.bf16.msra.mxu0 %v5088_v32  ;;  %v134_v28 = vld [vmem:[%s6708_s0 + $0x3b8] sm:$0xff]  ;;  %v4048_v29 = vcombine.high %v117_v25, %v133_v26  ;;  %v4047_v31 = vcombine.low %v117_v25, %v133_v26  ;;  %v119_v25 = vld [vmem:[%s6708_s0 + $0x340] sm:$0xff] }
  0x7d   :  { %4616 = vmatpush3.bf16.msra.mxu1 %v5089_v33  ;;  %4577 = vmatprep.subr.bf16.mxu0 %v5090_v34  ;;  %v4050_v30 = vcombine.high %v118_v27, %v134_v28  ;;  %v4049_v32 = vcombine.low %v118_v27, %v134_v28  ;;  %v5118_v33 = vld [vmem:[%s6707_s1 + $0x448] sm:$0xff]   ;;  %v135_v26 = vld [vmem:[%s6708_s0 + $0x3c0] sm:$0xff] }
  0x7e   :  { %4617 = vmatprep.subr.bf16.mxu1 %v5091_v35  ;;  %3301 = vmatprep.mubr.bf16.mxu0 %v3952_v43  ;;  %v5119_v34 = vld [vmem:[%s6707_s1 + $0x4c8] sm:$0xff]   ;;  %v4052_v28 = vcombine.high %v119_v25, %v135_v26 }
  0x7f   :  { %3366 = vmatprep.mubr.bf16.mxu1 %v3954_v46  ;;  %v5120_v35 = vld [vmem:[%s6707_s1 + $0x408] sm:$0xff]  }
  0x80   :  { %4578 = vmatpush3.bf16.msra.mxu0 %v5092_v37  ;;  %v5122_v37 = vld [vmem:[%s6707_s1 + $0x440] sm:$0xff]   ;;  %v24_v43 = vld [vmem:[%s6708_s0 + $0x48] sm:$0xff] }
  0x81   :  { %4618 = vmatpush3.bf16.msra.mxu1 %v5093_v38  ;;  %4643 = vmatprep.subr.bf16.mxu0 %v5094_v47  ;;  %v5123_v38 = vld [vmem:[%s6707_s1 + $0x4c0] sm:$0xff]   ;;  %v40_v46 = vld [vmem:[%s6708_s0 + $0xc8] sm:$0xff] }
  0x82   :  { %4683 = vmatprep.subr.bf16.mxu1 %v5095_v48  ;;  %v3957_v47 = vcombine.low %v24_v43, %v40_v46  ;;  %v3958_v48 = vcombine.high %v24_v43, %v40_v46  ;;  %v120_v27 = vld [vmem:[%s6708_s0 + $0x348] sm:$0xff]  ;;  %v42_v46 = vld [vmem:[%s6708_s0 + $0xd8] sm:$0xff] }
  0x83   :  { %3302 = vmatmul.mubr.bf16.vlgmr.msra.gmra.mxu0 %v3951_v42  ;;  %v39_v42 = vld [vmem:[%s6708_s0 + $0xc0] sm:$0xff] }
  0x84   :  { %3367 = vmatmul.mubr.bf16.vlgmr.msra.gmra.mxu1 %v3953_v45  ;;  %4644 = vmatpush3.bf16.msra.mxu0 %v5096_v50  ;;  %v3955_v44 = vcombine.low %v23_v41, %v39_v42  ;;  %v3956_v45 = vcombine.high %v23_v41, %v39_v42  ;;  %v5127_v50 = vld [vmem:[%s6707_s1 + $0x5f8] sm:$0xff]   ;;  %v25_v41 = vld [vmem:[%s6708_s0 + $0x50] sm:$0xff] }
  0x85   :  { %4684 = vmatpush3.bf16.msra.mxu1 %v5097_v51  ;;  %4645 = vmatprep.subr.bf16.mxu0 %v5098_v52  ;;  %v5128_v51 = vld [vmem:[%s6707_s1 + $0x538] sm:$0xff]   ;;  %v41_v42 = vld [vmem:[%s6708_s0 + $0xd0] sm:$0xff] }
  0x86   :  { %4685 = vmatprep.subr.bf16.mxu1 %v5099_v53  ;;  %3309 = vmatprep.mubr.bf16.mxu0 %v3984_v60  ;;  %v5129_v52 = vld [vmem:[%s6707_s1 + $0x5b8] sm:$0xff]   ;;  %v5130_v53 = vld [vmem:[%s6707_s1 + $0x570] sm:$0xff]   ;;  %v56_v60 = vld [vmem:[%s6708_s0 + $0x148] sm:$0xff]  ;;  %v3959_v43 = vcombine.low %v25_v41, %v41_v42 }
  0x87   :  { %3374 = vmatprep.mubr.bf16.mxu1 %v3986_v63  ;;  %v3990_v63 = vcombine.high %v56_v60, %v72_v61 }
  0x88   :  { %4646 = vmatpush3.bf16.msra.mxu0 %v5100_v55  ;;  %v5132_v55 = vld [vmem:[%s6707_s1 + $0x530] sm:$0xff]  }
  0x89   :  { %4686 = vmatpush3.bf16.msra.mxu1 %v5101_v56  ;;  %4647 = vmatprep.subr.bf16.mxu0 %v5102_v1  ;;  %v5133_v56 = vld [vmem:[%s6707_s1 + $0x5b0] sm:$0xff]   ;;  %v5134_v1 = vld [vmem:[%s6707_s1 + $0x568] sm:$0xff]  }
  0x8a   :  { %4687 = vmatprep.subr.bf16.mxu1 %v5103_v2  ;;  %v5135_v2 = vld [vmem:[%s6707_s1 + $0x5e8] sm:$0xff]  }
  0x8b   :  { %3310 = vmatmul.mubr.bf16.gmra.mxu0 %v3983_v62  ;;  %v3987_v62 = vcombine.low %v55_v57, %v71_v58  ;;  %v5165_v58 = vld [vmem:[%s6707_s1 + $0x6b0] sm:$0xff]  }
  0x8c   :  { %3375 = vmatmul.mubr.bf16.gmra.mxu1 %v3985_v0  ;;  %4648 = vmatpush3.bf16.msra.mxu0 %v5104_v3  ;;  %v3989_v0 = vcombine.low %v56_v60, %v72_v61  ;;  %v5136_v3 = vld [vmem:[%s6707_s1 + $0x528] sm:$0xff]   ;;  %v73_v61 = vld [vmem:[%s6708_s0 + $0x1d0] sm:$0xff] }
  0x8d   :  { %4688 = vmatpush3.bf16.msra.mxu1 %v5105_v4  ;;  %4649 = vmatprep.subr.bf16.mxu0 %v5106_v5  ;;  %v5137_v4 = vld [vmem:[%s6707_s1 + $0x5a8] sm:$0xff]   ;;  %v5138_v5 = vld [vmem:[%s6707_s1 + $0x560] sm:$0xff]  }
  0x8e   :  { %4689 = vmatprep.subr.bf16.mxu1 %v5107_v6  ;;  %3317 = vmatprep.mubr.bf16.mxu0 %v4016_v11  ;;  %v5139_v6 = vld [vmem:[%s6707_s1 + $0x5e0] sm:$0xff]   ;;  %v88_v11 = vld [vmem:[%s6708_s0 + $0x248] sm:$0xff] }
  0x8f   :  { %3382 = vmatprep.mubr.bf16.mxu1 %v4018_v15  ;;  %v4019_v15 = vcombine.low %v87_v9, %v103_v10 }
  0x90   :  { %4650 = vmatpush3.bf16.msra.mxu0 %v5108_v7  ;;  %v5140_v7 = vld [vmem:[%s6707_s1 + $0x520] sm:$0xff]  }
  0x91   :  { %4690 = vmatpush3.bf16.msra.mxu1 %v5109_v8  ;;  %4651 = vmatprep.subr.bf16.mxu0 %v5110_v17  ;;  %v5141_v8 = vld [vmem:[%s6707_s1 + $0x5a0] sm:$0xff]   ;;  %v5142_v17 = vld [vmem:[%s6707_s1 + $0x558] sm:$0xff]  }
  0x92   :  { %4691 = vmatprep.subr.bf16.mxu1 %v5111_v18  ;;  %v5143_v18 = vld [vmem:[%s6707_s1 + $0x5d8] sm:$0xff]  }
  0x93   :  { %3318 = vmatmul.mubr.bf16.gmra.mxu0 %v4015_v14  ;;  %v4022_v14 = vcombine.high %v88_v11, %v104_v12 }
  0x94   :  { %3383 = vmatmul.mubr.bf16.gmra.mxu1 %v4017_v16  ;;  %4652 = vmatpush3.bf16.msra.mxu0 %v5112_v19  ;;  %v4021_v16 = vcombine.low %v88_v11, %v104_v12  ;;  %v5144_v19 = vld [vmem:[%s6707_s1 + $0x518] sm:$0xff]   ;;  %v5168_v11 = vld [vmem:[%s6707_s1 + $0x628] sm:$0xff]  }
  0x95   :  { %4692 = vmatpush3.bf16.msra.mxu1 %v5113_v20  ;;  %4653 = vmatprep.subr.bf16.mxu0 %v5114_v21  ;;  %v5145_v20 = vld [vmem:[%s6707_s1 + $0x598] sm:$0xff]   ;;  %v5146_v21 = vld [vmem:[%s6707_s1 + $0x550] sm:$0xff]  }
  0x96   :  { %4693 = vmatprep.subr.bf16.mxu1 %v5115_v22  ;;  %3325 = vmatprep.mubr.bf16.mxu0 %v4048_v29  ;;  %v5147_v22 = vld [vmem:[%s6707_s1 + $0x5d0] sm:$0xff]   ;;  %v136_v29 = vld [vmem:[%s6708_s0 + $0x3c8] sm:$0xff] }
  0x97   :  { %3390 = vmatprep.mubr.bf16.mxu1 %v4050_v30  ;;  %v4051_v30 = vcombine.low %v119_v25, %v135_v26 }
  0x98   :  { %4654 = vmatpush3.bf16.msra.mxu0 %v5116_v23  ;;  %v5148_v23 = vld [vmem:[%s6707_s1 + $0x510] sm:$0xff]  }
  0x99   :  { %4694 = vmatpush3.bf16.msra.mxu1 %v5117_v24  ;;  %4655 = vmatprep.subr.bf16.mxu0 %v5118_v33  ;;  %v5149_v24 = vld [vmem:[%s6707_s1 + $0x590] sm:$0xff]   ;;  %v5150_v33 = vld [vmem:[%s6707_s1 + $0x548] sm:$0xff]  }
  0x9a   :  { %4695 = vmatprep.subr.bf16.mxu1 %v5119_v34  ;;  %v5151_v34 = vld [vmem:[%s6707_s1 + $0x5c8] sm:$0xff]  }
  0x9b   :  { %3326 = vmatmul.mubr.bf16.gmra.mxu0 %v4047_v31  ;;  %v4054_v31 = vcombine.high %v120_v27, %v136_v29 }
  0x9c   :  { %3391 = vmatmul.mubr.bf16.gmra.mxu1 %v4049_v32  ;;  %4656 = vmatpush3.bf16.msra.mxu0 %v5120_v35  ;;  %v4053_v32 = vcombine.low %v120_v27, %v136_v29  ;;  %v5152_v35 = vld [vmem:[%s6707_s1 + $0x508] sm:$0xff]  }
  0x9d   :  { %4696 = vmatpush3.bf16.msra.mxu1 %v5121_v36  ;;  %4657 = vmatprep.subr.bf16.mxu0 %v5122_v37  ;;  %v5153_v36 = vld [vmem:[%s6707_s1 + $0x588] sm:$0xff]   ;;  %v5154_v37 = vld [vmem:[%s6707_s1 + $0x540] sm:$0xff]  }
  0x9e   :  { %4697 = vmatprep.subr.bf16.mxu1 %v5123_v38  ;;  %3431 = vmatprep.mubr.bf16.mxu0 %v3956_v45  ;;  %v5155_v38 = vld [vmem:[%s6707_s1 + $0x5c0] sm:$0xff]   ;;  %v26_v45 = vld [vmem:[%s6708_s0 + $0x58] sm:$0xff] }
  0x9f   :  { %3496 = vmatprep.mubr.bf16.mxu1 %v3958_v48  ;;  %v3962_v48 = vcombine.high %v26_v45, %v42_v46 }
  0xa0   :  { %4658 = vmatpush3.bf16.msra.mxu0 %v5124_v39  ;;  %v5156_v39 = vld [vmem:[%s6707_s1 + $0x500] sm:$0xff]  }
  0xa1   :  { %4698 = vmatpush3.bf16.msra.mxu1 %v5125_v40  ;;  %4723 = vmatprep.subr.bf16.mxu0 %v5126_v49  ;;  %v5157_v40 = vld [vmem:[%s6707_s1 + $0x580] sm:$0xff]   ;;  %v5158_v49 = vld [vmem:[%s6707_s1 + $0x678] sm:$0xff]  }
  0xa2   :  { %4763 = vmatprep.subr.bf16.mxu1 %v5127_v50  ;;  %v5159_v50 = vld [vmem:[%s6707_s1 + $0x6f8] sm:$0xff]  }
  0xa3   :  { %3432 = vmatmul.mubr.bf16.vlgmr.msra.gmra.mxu0 %v3955_v44  ;;  %v3960_v44 = vcombine.high %v25_v41, %v41_v42  ;;  %v5177_v41 = vld [vmem:[%s6707_s1 + $0x698] sm:$0xff]  }
  0xa4   :  { %3497 = vmatmul.mubr.bf16.vlgmr.msra.gmra.mxu1 %v3957_v47  ;;  %4724 = vmatpush3.bf16.msra.mxu0 %v5128_v51  ;;  %v3961_v47 = vcombine.low %v26_v45, %v42_v46  ;;  %v5160_v51 = vld [vmem:[%s6707_s1 + $0x638] sm:$0xff]  }
  0xa5   :  { %4764 = vmatpush3.bf16.msra.mxu1 %v5129_v52  ;;  %4725 = vmatprep.subr.bf16.mxu0 %v5130_v53  ;;  %v5161_v52 = vld [vmem:[%s6707_s1 + $0x6b8] sm:$0xff]   ;;  %v5162_v53 = vld [vmem:[%s6707_s1 + $0x670] sm:$0xff]  }
  0xa6   :  { %4765 = vmatprep.subr.bf16.mxu1 %v5131_v54  ;;  %3439 = vmatprep.mubr.bf16.mxu0 %v3988_v59  ;;  %v5163_v54 = vld [vmem:[%s6707_s1 + $0x6f0] sm:$0xff]  }
  0xa7   :  { %3504 = vmatprep.mubr.bf16.mxu1 %v3990_v63  ;;  %v57_v59 = vld [vmem:[%s6708_s0 + $0x150] sm:$0xff]  ;;  %v74_v63 = vld [vmem:[%s6708_s0 + $0x1d8] sm:$0xff] }
  0xa8   :  { %4726 = vmatpush3.bf16.msra.mxu0 %v5132_v55 }
  0xa9   :  { %4766 = vmatpush3.bf16.msra.mxu1 %v5133_v56  ;;  %4727 = vmatprep.subr.bf16.mxu0 %v5134_v1  ;;  %v5164_v56 = vld [vmem:[%s6707_s1 + $0x630] sm:$0xff]  }
  0xaa   :  { %4767 = vmatprep.subr.bf16.mxu1 %v5135_v2  ;;  %v3992_v2 = vcombine.high %v57_v59, %v73_v61 }
  0xab   :  { %3440 = vmatmul.mubr.bf16.gmra.mxu0 %v3987_v62  ;;  %v58_v62 = vld [vmem:[%s6708_s0 + $0x158] sm:$0xff] }
  0xac   :  { %3505 = vmatmul.mubr.bf16.gmra.mxu1 %v3989_v0  ;;  %4728 = vmatpush3.bf16.msra.mxu0 %v5136_v3  ;;  %v3994_v3 = vcombine.high %v58_v62, %v74_v63 }
  0xad   :  { %4768 = vmatpush3.bf16.msra.mxu1 %v5137_v4  ;;  %4729 = vmatprep.subr.bf16.mxu0 %v5138_v5  ;;  %v3991_v4 = vcombine.low %v57_v59, %v73_v61  ;;  %v3993_v5 = vcombine.low %v58_v62, %v74_v63  ;;  %v122_v59 = vld [vmem:[%s6708_s0 + $0x358] sm:$0xff] }
  0xae   :  { %4769 = vmatprep.subr.bf16.mxu1 %v5139_v6  ;;  %3447 = vmatprep.mubr.bf16.mxu0 %v4020_v13  ;;  %v5166_v6 = vld [vmem:[%s6707_s1 + $0x668] sm:$0xff]  }
  0xaf   :  { %3512 = vmatprep.mubr.bf16.mxu1 %v4022_v14  ;;  %v5169_v13 = vld [vmem:[%s6707_s1 + $0x6a8] sm:$0xff]  }
  0xb0   :  { %4730 = vmatpush3.bf16.msra.mxu0 %v5140_v7 }
  0xb1   :  { %4770 = vmatpush3.bf16.msra.mxu1 %v5141_v8  ;;  %4731 = vmatprep.subr.bf16.mxu0 %v5142_v17  ;;  %v5167_v8 = vld [vmem:[%s6707_s1 + $0x6e8] sm:$0xff]  }
  0xb2   :  { %4771 = vmatprep.subr.bf16.mxu1 %v5143_v18  ;;  %v5172_v18 = vld [vmem:[%s6707_s1 + $0x620] sm:$0xff]  }
  0xb3   :  { %3448 = vmatmul.mubr.bf16.gmra.mxu0 %v4019_v15  ;;  %v5170_v15 = vld [vmem:[%s6707_s1 + $0x660] sm:$0xff]  }
  0xb4   :  { %3513 = vmatmul.mubr.bf16.gmra.mxu1 %v4021_v16  ;;  %4732 = vmatpush3.bf16.msra.mxu0 %v5144_v19  ;;  %v5171_v16 = vld [vmem:[%s6707_s1 + $0x6e0] sm:$0xff]  }
  0xb5   :  { %4772 = vmatpush3.bf16.msra.mxu1 %v5145_v20  ;;  %4733 = vmatprep.subr.bf16.mxu0 %v5146_v21  ;;  %v5173_v20 = vld [vmem:[%s6707_s1 + $0x6a0] sm:$0xff]  }
  0xb6   :  { %4773 = vmatprep.subr.bf16.mxu1 %v5147_v22  ;;  %3455 = vmatprep.mubr.bf16.mxu0 %v4052_v28  ;;  %v89_v22 = vld [vmem:[%s6708_s0 + $0x250] sm:$0xff]  ;;  %v106_v28 = vld [vmem:[%s6708_s0 + $0x2d8] sm:$0xff] }
  0xb7   :  { %3520 = vmatprep.mubr.bf16.mxu1 %v4054_v31 }
  0xb8   :  { %4734 = vmatpush3.bf16.msra.mxu0 %v5148_v23  ;;  %v105_v23 = vld [vmem:[%s6708_s0 + $0x2d0] sm:$0xff] }
  0xb9   :  { %4774 = vmatpush3.bf16.msra.mxu1 %v5149_v24  ;;  %4735 = vmatprep.subr.bf16.mxu0 %v5150_v33  ;;  %v90_v24 = vld [vmem:[%s6708_s0 + $0x258] sm:$0xff]  ;;  %v4024_v27 = vcombine.high %v89_v22, %v105_v23  ;;  %v4023_v29 = vcombine.low %v89_v22, %v105_v23  ;;  %v5189_v22 = vld [vmem:[%s6707_s1 + $0x680] sm:$0xff]  }
  0xba   :  { %4775 = vmatprep.subr.bf16.mxu1 %v5151_v34  ;;  %v4025_v33 = vcombine.low %v90_v24, %v106_v28  ;;  %v5174_v34 = vld [vmem:[%s6707_s1 + $0x658] sm:$0xff]   ;;  %v27_v23 = vld [vmem:[%s6708_s0 + $0x60] sm:$0xff] }
  0xbb   :  { %3456 = vmatmul.mubr.bf16.gmra.mxu0 %v4051_v30 }
  0xbc   :  { %3521 = vmatmul.mubr.bf16.gmra.mxu1 %v4053_v32  ;;  %4736 = vmatpush3.bf16.msra.mxu0 %v5152_v35  ;;  %v4026_v32 = vcombine.high %v90_v24, %v106_v28  ;;  %v44_v28 = vld [vmem:[%s6708_s0 + $0xe8] sm:$0xff] }
  0xbd   :  { %4776 = vmatpush3.bf16.msra.mxu1 %v5153_v36  ;;  %4737 = vmatprep.subr.bf16.mxu0 %v5154_v37  ;;  %v5175_v36 = vld [vmem:[%s6707_s1 + $0x6d8] sm:$0xff]  }
  0xbe   :  { %4777 = vmatprep.subr.bf16.mxu1 %v5155_v38  ;;  %3561 = vmatprep.mubr.bf16.mxu0 %v3960_v44  ;;  %v5176_v38 = vld [vmem:[%s6707_s1 + $0x618] sm:$0xff]   ;;  %v5178_v44 = vld [vmem:[%s6707_s1 + $0x650] sm:$0xff]  }
  0xbf   :  { %3626 = vmatprep.mubr.bf16.mxu1 %v3962_v48 }
  0xc0   :  { %4738 = vmatpush3.bf16.msra.mxu0 %v5156_v39 }
  0xc1   :  { %4778 = vmatpush3.bf16.msra.mxu1 %v5157_v40  ;;  %4803 = vmatprep.subr.bf16.mxu0 %v5158_v49 }
  0xc2   :  { %4843 = vmatprep.subr.bf16.mxu1 %v5159_v50  ;;  %v5180_v50 = vld [vmem:[%s6707_s1 + $0x610] sm:$0xff]  }
  0xc3   :  { %3562 = vmatmul.mubr.bf16.vlgmr.msra.gmra.mxu0 %v3959_v43 }
  0xc4   :  { %3627 = vmatmul.mubr.bf16.vlgmr.msra.gmra.mxu1 %v3961_v47  ;;  %4804 = vmatpush3.bf16.msra.mxu0 %v5160_v51  ;;  %v5179_v47 = vld [vmem:[%s6707_s1 + $0x6d0] sm:$0xff]  }
  0xc5   :  { %4844 = vmatpush3.bf16.msra.mxu1 %v5161_v52  ;;  %4805 = vmatprep.subr.bf16.mxu0 %v5162_v53  ;;  %v5181_v52 = vld [vmem:[%s6707_s1 + $0x690] sm:$0xff]  }
  0xc6   :  { %4845 = vmatprep.subr.bf16.mxu1 %v5163_v54  ;;  %3569 = vmatprep.mubr.bf16.mxu0 %v3992_v2  ;;  %v121_v53 = vld [vmem:[%s6708_s0 + $0x350] sm:$0xff] }
  0xc7   :  { %3634 = vmatprep.mubr.bf16.mxu1 %v3994_v3  ;;  %v137_v54 = vld [vmem:[%s6708_s0 + $0x3d0] sm:$0xff]  ;;  %v5182_v3 = vld [vmem:[%s6707_s1 + $0x648] sm:$0xff]  }
  0xc8   :  { %4806 = vmatpush3.bf16.msra.mxu0 %v5164_v56  ;;  %v4055_v61 = vcombine.low %v121_v53, %v137_v54 }
  0xc9   :  { %4846 = vmatpush3.bf16.msra.mxu1 %v5165_v58  ;;  %4807 = vmatprep.subr.bf16.mxu0 %v5166_v6  ;;  %v4056_v58 = vcombine.high %v121_v53, %v137_v54  ;;  %v5183_v6 = vld [vmem:[%s6707_s1 + $0x6c8] sm:$0xff]   ;;  %v5196_v54 = vld [vmem:[%s6707_s1 + $0x730] sm:$0xff]  }
  0xca   :  { %4847 = vmatprep.subr.bf16.mxu1 %v5167_v8  ;;  %v666_v42 = vpop.permute.xlu0 %665 }
  0xcb   :  { %3570 = vmatmul.mubr.bf16.gmra.mxu0 %v3991_v4 }
  0xcc   :  { %3635 = vmatmul.mubr.bf16.gmra.mxu1 %v3993_v5  ;;  %4808 = vmatpush3.bf16.msra.mxu0 %v5168_v11  ;;  %v5185_v11 = vld [vmem:[%s6707_s1 + $0x688] sm:$0xff]  }
  0xcd   :  { %4848 = vmatpush3.bf16.msra.mxu1 %v5169_v13  ;;  %4809 = vmatprep.subr.bf16.mxu0 %v5170_v15 }
  0xce   :  { %4849 = vmatprep.subr.bf16.mxu1 %v5171_v16  ;;  %3577 = vmatprep.mubr.bf16.mxu0 %v4024_v27  ;;  %v671_v56 = vpop.permute.xlu0 %670  ;;  %v28_v27 = vld [vmem:[%s6708_s0 + $0x68] sm:$0xff] }
  0xcf   :  { %3642 = vmatprep.mubr.bf16.mxu1 %v4026_v32 }
  0xd0   :  { %4810 = vmatpush3.bf16.msra.mxu0 %v5172_v18 }
  0xd1   :  { %4850 = vmatpush3.bf16.msra.mxu1 %v5173_v20  ;;  %4811 = vmatprep.subr.bf16.mxu0 %v5174_v34  ;;  %v5188_v20 = vld [vmem:[%s6707_s1 + $0x600] sm:$0xff]   ;;  %v3965_v34 = vcombine.low %v28_v27, %v44_v28 }
  0xd2   :  { %4851 = vmatprep.subr.bf16.mxu1 %v5175_v36  ;;  %v676_v15 = vpop.permute.xlu1 %675  ;;  %v5190_v36 = vld [vmem:[%s6707_s1 + $0x778] sm:$0xff]  }
  0xd3   :  { %3578 = vmatmul.mubr.bf16.gmra.mxu0 %v4023_v29 }
  0xd4   :  { %3643 = vmatmul.mubr.bf16.gmra.mxu1 %v4025_v33  ;;  %4812 = vmatpush3.bf16.msra.mxu0 %v5176_v38  ;;  %v5191_v38 = vld [vmem:[%s6707_s1 + $0x7f8] sm:$0xff]  }
  0xd5   :  { %4852 = vmatpush3.bf16.msra.mxu1 %v5177_v41  ;;  %4813 = vmatprep.subr.bf16.mxu0 %v5178_v44  ;;  %v5192_v44 = vld [vmem:[%s6707_s1 + $0x738] sm:$0xff]  }
  0xd6   :  { %4853 = vmatprep.subr.bf16.mxu1 %v5179_v47  ;;  %3585 = vmatprep.mubr.bf16.mxu0 %v4056_v58  ;;  %v681_v29 = vpop.permute.xlu1 %680 }
  0xd8   :  { %4814 = vmatpush3.bf16.msra.mxu0 %v5180_v50 }
  0xd9   :  { %4854 = vmatpush3.bf16.msra.mxu1 %v5181_v52  ;;  %4815 = vmatprep.subr.bf16.mxu0 %v5182_v3  ;;  %v5195_v52 = vld [vmem:[%s6707_s1 + $0x7f0] sm:$0xff]  }
  0xda   :  { %4855 = vmatprep.subr.bf16.mxu1 %v5183_v6  ;;  %v691_v58 = vpop.permute.xlu1 %690 }
  0xdb   :  { %3586 = vmatmul.mubr.bf16.gmra.mxu0 %v4055_v61  ;;  %v75_v61 = vld [vmem:[%s6708_s0 + $0x1e0] sm:$0xff] }
  0xdd   :  { %4856 = vmatpush3.bf16.msra.mxu1 %v5185_v11  ;;  %v686_v53 = vpop.permute.xlu0 %685 }
  0xe3   :  { %v4339_v55 = vpop.f32.mrf.mxu0 }
  0xe4   :  { %v4379_v57 = vpop.f32.mrf.mxu1 }
  0xe5   :  { %v4340_v60 = vpop.f32.mrf.mxu0 }
  0xe6   :  { %v6131_v0 = vadd.f32 %v4340_v60, %v4339_v55  ;;  %v4380_v1 = vpop.f32.mrf.mxu1  ;;  %v138_v60 = vld [vmem:[%s6708_s0 + $0x3d8] sm:$0xff] }
  0xe7   :  { %v4342_v7 = vpop.f32.mrf.mxu0  ;;  %v6139_v9 = vadd.f32 %v4380_v1, %v4379_v57  ;;  %v4058_v1 = vcombine.high %v122_v59, %v138_v60  ;;  %v4057_v2 = vcombine.low %v122_v59, %v138_v60  ;;  %v59_v60 = vld [vmem:[%s6708_s0 + $0x160] sm:$0xff] }
  0xe8   :  { %v6141_v10 = vpop.f32.mrf.mxu1  ;;  %v2914_v45 = vadd.f32 %v6131_v0, %v666_v42  ;;  %v3996_v3 = vcombine.high %v59_v60, %v75_v61  ;;  %v3995_v6 = vcombine.low %v59_v60, %v75_v61 }
  0xe9   :  { %v4343_v12 = vpop.f32.mrf.mxu0  ;;  %3650 = vmatprep.mubr.bf16.mxu1 %v4058_v1 }
  0xea   :  { %v4383_v14 = vpop.f32.mrf.mxu1  ;;  %v4344_v46 = vadd.f32 %v4343_v12, %v4342_v7  ;;  %v6204_v51 = vadd.f32 %v6139_v9, %v2914_v45  ;;  %v5184_v9 = vld [vmem:[%s6707_s1 + $0x608] sm:$0xff]   ;;  %3651 = vmatmul.mubr.bf16.gmra.mxu1 %v4057_v2 }
  0xeb   :  { %v4345_v17 = vpop.f32.mrf.mxu0  ;;  %v4384_v55 = vadd.f32 %v4383_v14, %v6141_v10  ;;  %4816 = vmatpush3.bf16.msra.mxu0 %v5184_v9  ;;  %v5186_v14 = vld [vmem:[%s6707_s1 + $0x640] sm:$0xff]  }
  0xec   :  { %v4385_v19 = vpop.f32.mrf.mxu1  ;;  %v2917_v62 = vadd.f32 %v4344_v46, %v671_v56  ;;  %4817 = vmatprep.subr.bf16.mxu0 %v5186_v14  ;;  %v5193_v46 = vld [vmem:[%s6707_s1 + $0x7b8] sm:$0xff]  }
  0xed   :  { %v4346_v21 = vpop.f32.mrf.mxu0 }
  0xee   :  { %v6170_v25 = vadd.f32 %v4346_v21, %v4345_v17  ;;  %v4386_v26 = vpop.f32.mrf.mxu1  ;;  %v6232_v7 = vadd.f32 %v4384_v55, %v2917_v62  ;;  %v5187_v17 = vld [vmem:[%s6707_s1 + $0x6c0] sm:$0xff]   ;;  %v60_v62 = vld [vmem:[%s6708_s0 + $0x168] sm:$0xff] }
  0xef   :  { %v6175_v30 = vadd.f32 %v4386_v26, %v4385_v19  ;;  %v4348_v31 = vpop.f32.mrf.mxu0  ;;  %4857 = vmatprep.subr.bf16.mxu1 %v5187_v17  ;;  %4818 = vmatpush3.bf16.msra.mxu0 %v5188_v20  ;;  %v43_v26 = vld [vmem:[%s6708_s0 + $0xe0] sm:$0xff] }
  0xf0   :  { %v4388_v35 = vpop.f32.mrf.mxu1  ;;  %v2922_v18 = vadd.f32 %v6170_v25, %v676_v15  ;;  %4858 = vmatpush3.bf16.msra.mxu1 %v5189_v22  ;;  %v3964_v33 = vcombine.high %v27_v23, %v43_v26  ;;  %4883 = vmatprep.subr.bf16.mxu0 %v5190_v36  ;;  %v5199_v15 = vld [vmem:[%s6707_s1 + $0x7e8] sm:$0xff]   ;;  %v5202_v22 = vld [vmem:[%s6707_s1 + $0x760] sm:$0xff]  }
  0xf1   :  { %v4349_v37 = vpop.f32.mrf.mxu0  ;;  %4923 = vmatprep.subr.bf16.mxu1 %v5191_v38  ;;  %v108_v38 = vld [vmem:[%s6708_s0 + $0x2e8] sm:$0xff] }
  0xf2   :  { %v6186_v39 = vadd.f32 %v4349_v37, %v4348_v31  ;;  %v4389_v40 = vpop.f32.mrf.mxu1  ;;  %v6261_v24 = vadd.f32 %v6175_v30, %v2922_v18  ;;  %v3963_v30 = vcombine.low %v27_v23, %v43_v26  ;;  %3691 = vmatprep.mubr.bf16.mxu0 %v3964_v33  ;;  %v5200_v18 = vld [vmem:[%s6707_s1 + $0x728] sm:$0xff]   ;;  %v696_v26 = vpop.permute.xlu0 %695  ;;  %v91_v33 = vld [vmem:[%s6708_s0 + $0x260] sm:$0xff] }
  0xf3   :  { %v6191_v43 = vadd.f32 %v4389_v40, %v4388_v35  ;;  %v4351_v48 = vpop.f32.mrf.mxu0  ;;  %v3966_v35 = vcombine.high %v28_v27, %v44_v28  ;;  %v5204_v28 = vld [vmem:[%s6707_s1 + $0x720] sm:$0xff]  }
  0xf4   :  { %v4391_v49 = vpop.f32.mrf.mxu1  ;;  %v2925_v40 = vadd.f32 %v6186_v39, %v681_v29  ;;  %3692 = vmatmul.mubr.bf16.vlgmr.msra.gmra.mxu0 %v3963_v30 }
  0xf5   :  { %v4352_v57 = vpop.f32.mrf.mxu0  ;;  %3756 = vmatprep.mubr.bf16.mxu1 %v3966_v35  ;;  %4884 = vmatpush3.bf16.msra.mxu0 %v5192_v44  ;;  %v701_v35 = vpop.permute.xlu1 %700 }
  0xf6   :  { %v6222_v63 = vadd.f32 %v4352_v57, %v4351_v48  ;;  %v4392_v0 = vpop.f32.mrf.mxu1  ;;  %3757 = vmatmul.mubr.bf16.vlgmr.msra.gmra.mxu1 %v3965_v34  ;;  %v6290_v47 = vadd.f32 %v6191_v43, %v2925_v40  ;;  %v5197_v57 = vld [vmem:[%s6707_s1 + $0x7b0] sm:$0xff]   ;;  %3699 = vmatprep.mubr.bf16.mxu0 %v3996_v3  ;;  %v107_v34 = vld [vmem:[%s6708_s0 + $0x2e0] sm:$0xff] }
  0xf7   :  { %v6227_v4 = vadd.f32 %v4392_v0, %v4391_v49  ;;  %v4354_v5 = vpop.f32.mrf.mxu0  ;;  %v5194_v49 = vld [vmem:[%s6707_s1 + $0x770] sm:$0xff]   ;;  %4924 = vmatpush3.bf16.msra.mxu1 %v5193_v46  ;;  %v4027_v40 = vcombine.low %v91_v33, %v107_v34 }
  0xf8   :  { %v4394_v8 = vpop.f32.mrf.mxu1  ;;  %4885 = vmatprep.subr.bf16.mxu0 %v5194_v49  ;;  %v2930_v55 = vadd.f32 %v6222_v63, %v686_v53  ;;  %4925 = vmatprep.subr.bf16.mxu1 %v5195_v52  ;;  %v5206_v49 = vld [vmem:[%s6707_s1 + $0x758] sm:$0xff]  }
  0xf9   :  { %v4355_v10 = vpop.f32.mrf.mxu0  ;;  %4886 = vmatpush3.bf16.msra.mxu0 %v5196_v54  ;;  %v5207_v54 = vld [vmem:[%s6707_s1 + $0x7d8] sm:$0xff]  }
  0xfa   :  { %v6240_v12 = vadd.f32 %v4355_v10, %v4354_v5  ;;  %v4395_v13 = vpop.f32.mrf.mxu1  ;;  %v6319_v63 = vadd.f32 %v6227_v4, %v2930_v55  ;;  %v76_v5 = vld [vmem:[%s6708_s0 + $0x1e8] sm:$0xff]  ;;  %v5208_v55 = vld [vmem:[%s6707_s1 + $0x718] sm:$0xff]  }
  0xfb   :  { %v6245_v16 = vadd.f32 %v4395_v13, %v4394_v8  ;;  %v4357_v19 = vpop.f32.mrf.mxu0  ;;  %4926 = vmatpush3.bf16.msra.mxu1 %v5197_v57  ;;  %v3998_v10 = vcombine.high %v60_v62, %v76_v5  ;;  %v3997_v11 = vcombine.low %v60_v62, %v76_v5  ;;  %v5198_v4 = vld [vmem:[%s6707_s1 + $0x768] sm:$0xff]   ;;  %v5213_v5 = vld [vmem:[%s6707_s1 + $0x790] sm:$0xff]  }
  0xfc   :  { %v4397_v21 = vpop.f32.mrf.mxu1  ;;  %v2933_v0 = vadd.f32 %v6240_v12, %v691_v58  ;;  %3700 = vmatmul.mubr.bf16.gmra.mxu0 %v3995_v6  ;;  %4887 = vmatprep.subr.bf16.mxu0 %v5198_v4  ;;  %v5209_v58 = vld [vmem:[%s6707_s1 + $0x798] sm:$0xff]   ;;  %v123_v6 = vld [vmem:[%s6708_s0 + $0x360] sm:$0xff] }
  0xfd   :  { %v4358_v25 = vpop.f32.mrf.mxu0  ;;  %3764 = vmatprep.mubr.bf16.mxu1 %v3998_v10  ;;  %4927 = vmatprep.subr.bf16.mxu1 %v5199_v15  ;;  %v124_v10 = vld [vmem:[%s6708_s0 + $0x368] sm:$0xff] }
  0xfe   :  { %v6272_v31 = vadd.f32 %v4358_v25, %v4357_v19  ;;  %v4398_v32 = vpop.f32.mrf.mxu1  ;;  %v6329_v12 = vadd.f32 %v6245_v16, %v2933_v0  ;;  %3765 = vmatmul.mubr.bf16.gmra.mxu1 %v3997_v11  ;;  %4888 = vmatpush3.bf16.msra.mxu0 %v5200_v18  ;;  %v5203_v25 = vld [vmem:[%s6707_s1 + $0x7e0] sm:$0xff]   ;;  %v140_v11 = vld [vmem:[%s6708_s0 + $0x3e8] sm:$0xff] }
  0xff   :  { %v4360_v37 = vpop.f32.mrf.mxu0  ;;  %v6281_v41 = vadd.f32 %v4398_v32, %v4397_v21  ;;  %4889 = vmatprep.subr.bf16.mxu0 %v5202_v22  ;;  %v4062_v15 = vcombine.high %v124_v10, %v140_v11  ;;  %v4061_v18 = vcombine.low %v124_v10, %v140_v11 }
 0x100   :  { %v4400_v42 = vpop.f32.mrf.mxu1  ;;  %v2938_v29 = vadd.f32 %v6272_v31, %v696_v26  ;;  %v4028_v31 = vcombine.high %v91_v33, %v107_v34  ;;  %v5219_v33 = vld [vmem:[%s6707_s1 + $0x7c0] sm:$0xff]  }
 0x101   :  { %v4361_v45 = vpop.f32.mrf.mxu0 }
 0x102   :  { %v6292_v39 = vadd.f32 %v4361_v45, %v4360_v37  ;;  %v4401_v48 = vpop.f32.mrf.mxu1  ;;  %4890 = vmatpush3.bf16.msra.mxu0 %v5204_v28  ;;  %v92_v37 = vld [vmem:[%s6708_s0 + $0x268] sm:$0xff]  ;;  %3707 = vmatprep.mubr.bf16.mxu0 %v4028_v31 }
 0x103   :  { %v6297_v50 = vadd.f32 %v4401_v48, %v4400_v42  ;;  %v4419_v43 = vpop.f32.mrf.mxu0  ;;  %v6372_v42 = vadd.f32 %v6281_v41, %v2938_v29  ;;  %v4030_v46 = vcombine.high %v92_v37, %v108_v38  ;;  %v4029_v48 = vcombine.low %v92_v37, %v108_v38  ;;  %4891 = vmatprep.subr.bf16.mxu0 %v5206_v49  ;;  %v5221_v37 = vld [vmem:[%s6707_s1 + $0x780] sm:$0xff]  }
 0x104   :  { %v4459_v56 = vpop.f32.mrf.mxu1  ;;  %v2941_v44 = vadd.f32 %v6292_v39, %v701_v35  ;;  %3708 = vmatmul.mubr.bf16.gmra.mxu0 %v4027_v40 }
 0x105   :  { %v4420_v59 = vpop.f32.mrf.mxu0  ;;  %3772 = vmatprep.mubr.bf16.mxu1 %v4030_v46 }
 0x106   :  { %v4421_v1 = vadd.f32 %v4420_v59, %v4419_v43  ;;  %v4460_v2 = vpop.f32.mrf.mxu1  ;;  %v6382_v41 = vadd.f32 %v6297_v50, %v2941_v44  ;;  %3773 = vmatmul.mubr.bf16.gmra.mxu1 %v4029_v48  ;;  %4892 = vmatpush3.bf16.msra.mxu0 %v5208_v55  ;;  %v5210_v50 = vld [vmem:[%s6707_s1 + $0x750] sm:$0xff]  }
 0x107   :  { %v4461_v8 = vadd.f32 %v4460_v2, %v4459_v56  ;;  %v4422_v9 = vpop.f32.mrf.mxu0  ;;  %4893 = vmatprep.subr.bf16.mxu0 %v5210_v50  ;;  %v5212_v2 = vld [vmem:[%s6707_s1 + $0x710] sm:$0xff]   ;;  %3780 = vmatprep.mubr.bf16.mxu1 %v4062_v15 }
 0x108   :  { %v3044_v13 = vadd.f32 %v4421_v1, %v6204_v51  ;;  %v4462_v14 = vpop.f32.mrf.mxu1  ;;  %v5201_v51 = vld [vmem:[%s6707_s1 + $0x7a8] sm:$0xff]   ;;  %v29_v44 = vld [vmem:[%s6708_s0 + $0x70] sm:$0xff] }
 0x109   :  { %v4423_v17 = vpop.f32.mrf.mxu0  ;;  %4928 = vmatpush3.bf16.msra.mxu1 %v5201_v51  ;;  %v5215_v51 = vld [vmem:[%s6707_s1 + $0x7c8] sm:$0xff]  }
 0x10a   :  { %v6338_v19 = vadd.f32 %v4461_v8, %v3044_v13  ;;  %v4424_v20 = vadd.f32 %v4423_v17, %v4422_v9  ;;  %v4463_v16 = vpop.f32.mrf.mxu1  ;;  %4929 = vmatprep.subr.bf16.mxu1 %v5203_v25  ;;  %4894 = vmatpush3.bf16.msra.mxu0 %v5212_v2  ;;  %v5216_v25 = vld [vmem:[%s6707_s1 + $0x708] sm:$0xff]   ;;  %v93_v2 = vld [vmem:[%s6708_s0 + $0x270] sm:$0xff] }
 0x10b   :  { %v4464_v21 = vadd.f32 %v4463_v16, %v4462_v14  ;;  %v4425_v27 = vpop.f32.mrf.mxu0 }
 0x10c   :  { %v3047_v23 = vadd.f32 %v4424_v20, %v6232_v7  ;;  %v4465_v30 = vpop.f32.mrf.mxu1  ;;  %v5205_v7 = vld [vmem:[%s6707_s1 + $0x7a0] sm:$0xff]   ;;  %v5214_v20 = vld [vmem:[%s6707_s1 + $0x748] sm:$0xff]  }
 0x10d   :  { %v4426_v36 = vpop.f32.mrf.mxu0  ;;  %4930 = vmatpush3.bf16.msra.mxu1 %v5205_v7  ;;  %4895 = vmatprep.subr.bf16.mxu0 %v5214_v20 }
 0x10e   :  { %v6354_v32 = vadd.f32 %v4464_v21, %v3047_v23  ;;  %v4466_v45 = vpop.f32.mrf.mxu1  ;;  %v4427_v52 = vadd.f32 %v4426_v36, %v4425_v27  ;;  %4931 = vmatprep.subr.bf16.mxu1 %v5207_v54  ;;  %3781 = vmatmul.mubr.bf16.gmra.mxu1 %v4061_v18  ;;  %v5217_v27 = vld [vmem:[%s6707_s1 + $0x788] sm:$0xff]   ;;  %v5220_v36 = vld [vmem:[%s6707_s1 + $0x700] sm:$0xff]   ;;  %v77_v54 = vld [vmem:[%s6708_s0 + $0x1f0] sm:$0xff] }
 0x10f   :  { %v4467_v53 = vadd.f32 %v4466_v45, %v4465_v30  ;;  %v4428_v43 = vpop.f32.mrf.mxu0  ;;  %4896 = vmatpush3.bf16.msra.mxu0 %v5216_v25  ;;  %v30_v45 = vld [vmem:[%s6708_s0 + $0x78] sm:$0xff] }
 0x110   :  { %v4468_v39 = vpop.f32.mrf.mxu1  ;;  %v3052_v56 = vadd.f32 %v4427_v52, %v6261_v24  ;;  %v5211_v24 = vld [vmem:[%s6707_s1 + $0x7d0] sm:$0xff]  }
 0x111   :  { %v4429_v57 = vpop.f32.mrf.mxu0  ;;  %4932 = vmatpush3.bf16.msra.mxu1 %v5209_v58 }
 0x112   :  { %v4430_v59 = vadd.f32 %v4429_v57, %v4428_v43  ;;  %v4469_v60 = vpop.f32.mrf.mxu1  ;;  %v6394_v61 = vadd.f32 %v4467_v53, %v3052_v56  ;;  %4933 = vmatprep.subr.bf16.mxu1 %v5211_v24  ;;  %v46_v53 = vld [vmem:[%s6708_s0 + $0xf8] sm:$0xff]  ;;  %v61_v43 = vld [vmem:[%s6708_s0 + $0x170] sm:$0xff] }
 0x113   :  { %v4470_v62 = vadd.f32 %v4469_v60, %v4468_v39  ;;  %v4431_v1 = vpop.f32.mrf.mxu0  ;;  %v3969_v56 = vcombine.low %v30_v45, %v46_v53  ;;  %v3970_v57 = vcombine.high %v30_v45, %v46_v53  ;;  %v4000_v58 = vcombine.high %v61_v43, %v77_v54  ;;  %v78_v60 = vld [vmem:[%s6708_s0 + $0x1f8] sm:$0xff] }
 0x114   :  { %v3055_v0 = vadd.f32 %v4430_v59, %v6290_v47  ;;  %v4471_v3 = vpop.f32.mrf.mxu1  ;;  %v139_v47 = vld [vmem:[%s6708_s0 + $0x3e0] sm:$0xff]  ;;  %v62_v59 = vld [vmem:[%s6708_s0 + $0x178] sm:$0xff] }
 0x115   :  { %v4432_v9 = vpop.f32.mrf.mxu0  ;;  %4934 = vmatpush3.bf16.msra.mxu1 %v5213_v5  ;;  %v4060_v14 = vcombine.high %v123_v6, %v139_v47  ;;  %v4059_v17 = vcombine.low %v123_v6, %v139_v47  ;;  %3886 = vmatprep.mubr.bf16.mxu1 %v3970_v57 }
 0x116   :  { %v6409_v8 = vadd.f32 %v4470_v62, %v3055_v0  ;;  %v4433_v4 = vadd.f32 %v4432_v9, %v4431_v1  ;;  %v4472_v13 = vpop.f32.mrf.mxu1  ;;  %4935 = vmatprep.subr.bf16.mxu1 %v5215_v51  ;;  %v4002_v62 = vcombine.high %v62_v59, %v78_v60  ;;  %v110_v9 = vld [vmem:[%s6708_s0 + $0x2f8] sm:$0xff] }
 0x117   :  { %v4434_v16 = vpop.f32.mrf.mxu0  ;;  %v4473_v22 = vadd.f32 %v4472_v13, %v4471_v3  ;;  %3715 = vmatprep.mubr.bf16.mxu0 %v4060_v14  ;;  %v109_v3 = vld [vmem:[%s6708_s0 + $0x2f0] sm:$0xff]  ;;  %v4001_v14 = vcombine.low %v62_v59, %v78_v60 }
 0x118   :  { %v3060_v21 = vadd.f32 %v4433_v4, %v6319_v63  ;;  %v4474_v23 = vpop.f32.mrf.mxu1  ;;  %3716 = vmatmul.mubr.bf16.gmra.mxu0 %v4059_v17  ;;  %v5218_v63 = vld [vmem:[%s6707_s1 + $0x740] sm:$0xff]   ;;  %v3999_v4 = vcombine.low %v61_v43, %v77_v54  ;;  %v4032_v15 = vcombine.high %v93_v2, %v109_v3 }
 0x119   :  { %v4435_v26 = vpop.f32.mrf.mxu0  ;;  %4936 = vmatpush3.bf16.msra.mxu1 %v5217_v27  ;;  %4897 = vmatprep.subr.bf16.mxu0 %v5218_v63 }
 0x11a   :  { %v6433_v28 = vadd.f32 %v4473_v22, %v3060_v21  ;;  %v4436_v29 = vadd.f32 %v4435_v26, %v4434_v16  ;;  %v4475_v30 = vpop.f32.mrf.mxu1  ;;  %4937 = vmatprep.subr.bf16.mxu1 %v5219_v33  ;;  %4898 = vmatpush3.bf16.msra.mxu0 %v5220_v36  ;;  %v142_v33 = vld [vmem:[%s6708_s0 + $0x3f8] sm:$0xff] }
 0x11b   :  { %v4476_v7 = vadd.f32 %v4475_v30, %v4474_v23  ;;  %v4437_v35 = vpop.f32.mrf.mxu0 }
 0x11c   :  { %v3063_v34 = vadd.f32 %v4436_v29, %v6329_v12  ;;  %v4477_v31 = vpop.f32.mrf.mxu1  ;;  %v45_v12 = vld [vmem:[%s6708_s0 + $0xf0] sm:$0xff] }
 0x11d   :  { %v4438_v40 = vpop.f32.mrf.mxu0  ;;  %4938 = vmatpush3.bf16.msra.mxu1 %v5221_v37  ;;  %v3967_v49 = vcombine.low %v29_v44, %v45_v12  ;;  %v3968_v52 = vcombine.high %v29_v44, %v45_v12  ;;  %v141_v29 = vld [vmem:[%s6708_s0 + $0x3f0] sm:$0xff] }
 0x11e   :  { %v6448_v38 = vadd.f32 %v4476_v7, %v3063_v34  ;;  %v4439_v46 = vadd.f32 %v4438_v40, %v4437_v35  ;;  %v4478_v48 = vpop.f32.mrf.mxu1  ;;  %v4031_v34 = vcombine.low %v93_v2, %v109_v3 }
 0x11f   :  { %v4479_v39 = vadd.f32 %v4478_v48, %v4477_v31  ;;  %v4440_v55 = vpop.f32.mrf.mxu0  ;;  %3821 = vmatprep.mubr.bf16.mxu0 %v3968_v52 }
 0x120   :  { %v4480_v50 = vpop.f32.mrf.mxu1  ;;  %v3068_v24 = vadd.f32 %v4439_v46, %v6372_v42  ;;  %3822 = vmatmul.mubr.bf16.vlgmr.msra.gmra.mxu0 %v3967_v49  ;;  %3887 = vmatmul.mubr.bf16.vlgmr.msra.gmra.mxu1 %v3969_v56  ;;  %v94_v42 = vld [vmem:[%s6708_s0 + $0x278] sm:$0xff] }
 0x121   :  { %v4441_v0 = vpop.f32.mrf.mxu0  ;;  %3829 = vmatprep.mubr.bf16.mxu0 %v4000_v58  ;;  %3894 = vmatprep.mubr.bf16.mxu1 %v4002_v62  ;;  %v4034_v20 = vcombine.high %v94_v42, %v110_v9  ;;  %v4033_v31 = vcombine.low %v94_v42, %v110_v9 }
 0x122   :  { %v4481_v1 = vpop.f32.mrf.mxu1  ;;  %v6481_v5 = vadd.f32 %v4479_v39, %v3068_v24  ;;  %v4442_v6 = vadd.f32 %v4441_v0, %v4440_v55 }
 0x123   :  { %v4482_v47 = vadd.f32 %v4481_v1, %v4480_v50  ;;  %v4499_v10 = vpop.f32.mrf.mxu0 }
 0x124   :  { %v4539_v11 = vpop.f32.mrf.mxu1  ;;  %v3071_v13 = vadd.f32 %v4442_v6, %v6382_v41  ;;  %v125_v41 = vld [vmem:[%s6708_s0 + $0x370] sm:$0xff] }
 0x125   :  { %v4500_v17 = vpop.f32.mrf.mxu0  ;;  %v4064_v37 = vcombine.high %v125_v41, %v141_v29  ;;  %v4063_v56 = vcombine.low %v125_v41, %v141_v29 }
 0x126   :  { %v4540_v18 = vpop.f32.mrf.mxu1  ;;  %v6490_v16 = vadd.f32 %v4482_v47, %v3071_v13  ;;  %v4501_v51 = vadd.f32 %v4500_v17, %v4499_v10 }
 0x127   :  { %v4541_v21 = vadd.f32 %v4540_v18, %v4539_v11  ;;  %v4502_v22 = vpop.f32.mrf.mxu0 }
 0x128   :  { %v4542_v23 = vpop.f32.mrf.mxu1  ;;  %3830 = vmatmul.mubr.bf16.gmra.mxu0 %v3999_v4  ;;  %v3174_v25 = vadd.f32 %v4501_v51, %v6338_v19  ;;  %3895 = vmatmul.mubr.bf16.gmra.mxu1 %v4001_v14  ;;  %v126_v19 = vld [vmem:[%s6708_s0 + $0x378] sm:$0xff] }
 0x129   :  { %3837 = vmatprep.mubr.bf16.mxu0 %v4032_v15  ;;  %v4503_v26 = vpop.f32.mrf.mxu0  ;;  %3902 = vmatprep.mubr.bf16.mxu1 %v4034_v20  ;;  %v4066_v44 = vcombine.high %v126_v19, %v142_v33  ;;  %v4065_v58 = vcombine.low %v126_v19, %v142_v33 }
 0x12a   :  { %v4543_v27 = vpop.f32.mrf.mxu1  ;;  %v6499_v30 = vadd.f32 %v4541_v21, %v3174_v25  ;;  %v4504_v63 = vadd.f32 %v4503_v26, %v4502_v22 }
 0x12b   :  { %v4544_v7 = vadd.f32 %v4543_v27, %v4542_v23  ;;  %v4505_v36 = vpop.f32.mrf.mxu0 }
 0x12c   :  { %v3177_v35 = vadd.f32 %v4504_v63, %v6354_v32  ;;  %v4545_v40 = vpop.f32.mrf.mxu1 }
 0x12d   :  { %v4506_v45 = vpop.f32.mrf.mxu0 }
 0x12e   :  { %v6508_v12 = vadd.f32 %v4544_v7, %v3177_v35  ;;  %v4507_v46 = vadd.f32 %v4506_v45, %v4505_v36  ;;  %v4546_v48 = vpop.f32.mrf.mxu1 }
 0x12f   :  { %v4547_v49 = vadd.f32 %v4546_v48, %v4545_v40  ;;  %v4508_v52 = vpop.f32.mrf.mxu0 }
 0x130   :  { %3838 = vmatmul.mubr.bf16.gmra.mxu0 %v4031_v34  ;;  %3903 = vmatmul.mubr.bf16.gmra.mxu1 %v4033_v31  ;;  %v3182_v53 = vadd.f32 %v4507_v46, %v6394_v61  ;;  %v4548_v43 = vpop.f32.mrf.mxu1 }
 0x131   :  { %3845 = vmatprep.mubr.bf16.mxu0 %v4064_v37  ;;  %3910 = vmatprep.mubr.bf16.mxu1 %v4066_v44  ;;  %v4509_v32 = vpop.f32.mrf.mxu0 }
 0x132   :  { %v6511_v54 = vadd.f32 %v4547_v49, %v3182_v53  ;;  %v4510_v39 = vadd.f32 %v4509_v32, %v4508_v52  ;;  %v4549_v55 = vpop.f32.mrf.mxu1 }
 0x133   :  { %v4550_v57 = vadd.f32 %v4549_v55, %v4548_v43  ;;  %v4511_v60 = vpop.f32.mrf.mxu0 }
 0x134   :  { %v3185_v59 = vadd.f32 %v4510_v39, %v6409_v8  ;;  %v4551_v62 = vpop.f32.mrf.mxu1 }
 0x135   :  { %v4512_v24 = vpop.f32.mrf.mxu0 }
 0x136   :  { %v6514_v50 = vadd.f32 %v4550_v57, %v3185_v59  ;;  %v4513_v61 = vadd.f32 %v4512_v24, %v4511_v60  ;;  %v4552_v0 = vpop.f32.mrf.mxu1 }
 0x137   :  { %v4553_v1 = vadd.f32 %v4552_v0, %v4551_v62  ;;  %v4514_v2 = vpop.f32.mrf.mxu0 }
 0x138   :  { %3846 = vmatmul.mubr.bf16.gmra.mxu0 %v4063_v56  ;;  %3911 = vmatmul.mubr.bf16.gmra.mxu1 %v4065_v58  ;;  %v3190_v3 = vadd.f32 %v4513_v61, %v6433_v28  ;;  %v4554_v6 = vpop.f32.mrf.mxu1 }
 0x139   :  { %v4515_v42 = vpop.f32.mrf.mxu0 }
 0x13a   :  { %v3255_v9 = vadd.f32 %v4553_v1, %v3190_v3  ;;  %v4516_v47 = vadd.f32 %v4515_v42, %v4514_v2  ;;  %v4555_v10 = vpop.f32.mrf.mxu1 }
 0x13b   :  { %v4556_v11 = vadd.f32 %v4555_v10, %v4554_v6  ;;  %v4517_v4 = vpop.f32.mrf.mxu0 }
 0x13c   :  { %v3193_v8 = vadd.f32 %v4516_v47, %v6448_v38  ;;  %v4557_v14 = vpop.f32.mrf.mxu1 }
 0x13d   :  { %v4518_v15 = vpop.f32.mrf.mxu0 }
 0x13e   :  { %v3258_v13 = vadd.f32 %v4556_v11, %v3193_v8  ;;  %v4519_v17 = vadd.f32 %v4518_v15, %v4517_v4  ;;  %v4558_v18 = vpop.f32.mrf.mxu1 }
 0x13f   :  { %v4559_v20 = vadd.f32 %v4558_v18, %v4557_v14  ;;  %v4520_v51 = vpop.f32.mrf.mxu0 }
 0x140   :  { %v3198_v21 = vadd.f32 %v4519_v17, %v6481_v5  ;;  %v4560_v22 = vpop.f32.mrf.mxu1 }
 0x141   :  { %v4521_v28 = vpop.f32.mrf.mxu0 }
 0x142   :  { %v3263_v23 = vadd.f32 %v4559_v20, %v3198_v21  ;;  %v4522_v25 = vadd.f32 %v4521_v28, %v4520_v51  ;;  %v4561_v26 = vpop.f32.mrf.mxu1 }
 0x143   :  { %v4562_v27 = vadd.f32 %v4561_v26, %v4560_v22  ;;  %v4579_v29 = vpop.f32.mrf.mxu0 }
 0x144   :  { %v3201_v41 = vadd.f32 %v4522_v25, %v6490_v16  ;;  %v4619_v63 = vpop.f32.mrf.mxu1 }
 0x145   :  { %v4580_v7 = vpop.f32.mrf.mxu0 }
 0x146   :  { %v3266_v38 = vadd.f32 %v4562_v27, %v3201_v41  ;;  %v4581_v19 = vadd.f32 %v4580_v7, %v4579_v29  ;;  %v4620_v33 = vpop.f32.mrf.mxu1 }
 0x147   :  { %v4621_v34 = vadd.f32 %v4620_v33, %v4619_v63  ;;  %v4582_v35 = vpop.f32.mrf.mxu0 }
 0x148   :  { %v3304_v36 = vadd.f32 %v4581_v19, %v6499_v30  ;;  %v4622_v31 = vpop.f32.mrf.mxu1 }
 0x149   :  { %v4583_v5 = vpop.f32.mrf.mxu0 }
 0x14a   :  { %v3369_v37 = vadd.f32 %v4621_v34, %v3304_v36  ;;  %v4584_v40 = vadd.f32 %v4583_v5, %v4582_v35  ;;  %v4623_v44 = vpop.f32.mrf.mxu1 }
 0x14b   :  { %v4624_v45 = vadd.f32 %v4623_v44, %v4622_v31  ;;  %v4585_v48 = vpop.f32.mrf.mxu0 }
 0x14c   :  { %v3307_v46 = vadd.f32 %v4584_v40, %v6508_v12  ;;  %v4625_v49 = vpop.f32.mrf.mxu1 }
 0x14d   :  { %v4586_v52 = vpop.f32.mrf.mxu0 }
 0x14e   :  { %v3372_v16 = vadd.f32 %v4624_v45, %v3307_v46  ;;  %v4587_v53 = vadd.f32 %v4586_v52, %v4585_v48  ;;  %v4626_v43 = vpop.f32.mrf.mxu1 }
 0x14f   :  { %v4627_v32 = vadd.f32 %v4626_v43, %v4625_v49  ;;  %v4588_v39 = vpop.f32.mrf.mxu0 }
 0x150   :  { %v3312_v55 = vadd.f32 %v4587_v53, %v6511_v54  ;;  %v4628_v56 = vpop.f32.mrf.mxu1 }
 0x151   :  { %v4589_v30 = vpop.f32.mrf.mxu0 }
 0x152   :  { %v3377_v57 = vadd.f32 %v4627_v32, %v3312_v55  ;;  %v4590_v58 = vadd.f32 %v4589_v30, %v4588_v39  ;;  %v4629_v59 = vpop.f32.mrf.mxu1 }
 0x153   :  { %v4630_v60 = vadd.f32 %v4629_v59, %v4628_v56  ;;  %v4591_v24 = vpop.f32.mrf.mxu0 }
 0x154   :  { %v3315_v62 = vadd.f32 %v4590_v58, %v6514_v50  ;;  %v4631_v12 = vpop.f32.mrf.mxu1 }
 0x155   :  { %v4592_v0 = vpop.f32.mrf.mxu0 }
 0x156   :  { %v3380_v61 = vadd.f32 %v4630_v60, %v3315_v62  ;;  %v4593_v1 = vadd.f32 %v4592_v0, %v4591_v24  ;;  %v4632_v2 = vpop.f32.mrf.mxu1 }
 0x157   :  { %v4633_v3 = vadd.f32 %v4632_v2, %v4631_v12  ;;  %v4594_v6 = vpop.f32.mrf.mxu0 }
 0x158   :  { %v3320_v42 = vadd.f32 %v4593_v1, %v3255_v9  ;;  %v4634_v47 = vpop.f32.mrf.mxu1 }
 0x159   :  { %v4595_v10 = vpop.f32.mrf.mxu0 }
 0x15a   :  { %v3385_v54 = vadd.f32 %v4633_v3, %v3320_v42  ;;  %v4596_v11 = vadd.f32 %v4595_v10, %v4594_v6  ;;  %v4635_v8 = vpop.f32.mrf.mxu1 }
 0x15b   :  { %v4636_v4 = vadd.f32 %v4635_v8, %v4634_v47  ;;  %v4597_v15 = vpop.f32.mrf.mxu0 }
 0x15c   :  { %v3323_v14 = vadd.f32 %v4596_v11, %v3258_v13  ;;  %v4637_v17 = vpop.f32.mrf.mxu1 }
 0x15d   :  { %v4598_v50 = vpop.f32.mrf.mxu0 }
 0x15e   :  { %v3388_v18 = vadd.f32 %v4636_v4, %v3323_v14  ;;  %v4638_v20 = vpop.f32.mrf.mxu1  ;;  %v4599_v51 = vadd.f32 %v4598_v50, %v4597_v15 }
 0x15f   :  { %v4639_v21 = vadd.f32 %v4638_v20, %v4637_v17  ;;  %v4600_v22 = vpop.f32.mrf.mxu0 }
 0x160   :  { %v4640_v28 = vpop.f32.mrf.mxu1  ;;  %v3328_v25 = vadd.f32 %v4599_v51, %v3263_v23 }
 0x161   :  { %v4601_v26 = vpop.f32.mrf.mxu0 }
 0x162   :  { %v4641_v27 = vpop.f32.mrf.mxu1  ;;  %v3393_v9 = vadd.f32 %v4639_v21, %v3328_v25  ;;  %v4602_v41 = vadd.f32 %v4601_v26, %v4600_v22 }
 0x163   :  { %v4642_v29 = vadd.f32 %v4641_v27, %v4640_v28  ;;  %v4659_v7 = vpop.f32.mrf.mxu0 }
 0x164   :  { %v3331_v63 = vadd.f32 %v4602_v41, %v3266_v38  ;;  %v4699_v19 = vpop.f32.mrf.mxu1 }
 0x165   :  { %v4660_v13 = vpop.f32.mrf.mxu0 }
 0x166   :  { %v3396_v33 = vadd.f32 %v4642_v29, %v3331_v63  ;;  %v4661_v34 = vadd.f32 %v4660_v13, %v4659_v7  ;;  %v4700_v35 = vpop.f32.mrf.mxu1 }
 0x167   :  { %v4701_v36 = vadd.f32 %v4700_v35, %v4699_v19  ;;  %v4662_v31 = vpop.f32.mrf.mxu0 }
 0x168   :  { %v3434_v5 = vadd.f32 %v4661_v34, %v3369_v37  ;;  %v4702_v40 = vpop.f32.mrf.mxu1 }
 0x169   :  { %v4663_v44 = vpop.f32.mrf.mxu0 }
 0x16a   :  { %v6524_v45 = vadd.f32 %v4701_v36, %v3434_v5  ;;  %v4664_v23 = vadd.f32 %v4663_v44, %v4662_v31  ;;  %v4703_v46 = vpop.f32.mrf.mxu1 }
 0x16b   :  { %v4704_v48 = vadd.f32 %v4703_v46, %v4702_v40  ;;  %v4665_v52 = vpop.f32.mrf.mxu0 }
 0x16c   :  { %v3437_v49 = vadd.f32 %v4664_v23, %v3372_v16  ;;  %v4705_v53 = vpop.f32.mrf.mxu1 }
 0x16d   :  { %v4666_v43 = vpop.f32.mrf.mxu0 }
 0x16e   :  { %v6526_v38 = vadd.f32 %v4704_v48, %v3437_v49  ;;  %v4667_v32 = vadd.f32 %v4666_v43, %v4665_v52  ;;  %v4706_v39 = vpop.f32.mrf.mxu1 }
 0x16f   :  { %v4707_v55 = vadd.f32 %v4706_v39, %v4705_v53  ;;  %v4668_v56 = vpop.f32.mrf.mxu0 }
 0x170   :  { %v3442_v30 = vadd.f32 %v4667_v32, %v3377_v57  ;;  %v4708_v58 = vpop.f32.mrf.mxu1 }
 0x171   :  { %v4669_v37 = vpop.f32.mrf.mxu0 }
 0x172   :  { %v6528_v59 = vadd.f32 %v4707_v55, %v3442_v30  ;;  %v4670_v60 = vadd.f32 %v4669_v37, %v4668_v56  ;;  %v4709_v62 = vpop.f32.mrf.mxu1 }
 0x173   :  { %v4710_v24 = vadd.f32 %v4709_v62, %v4708_v58  ;;  %v4671_v0 = vpop.f32.mrf.mxu0 }
 0x174   :  { %v3445_v12 = vadd.f32 %v4670_v60, %v3380_v61  ;;  %v4711_v16 = vpop.f32.mrf.mxu1 }
 0x175   :  { %v4672_v2 = vpop.f32.mrf.mxu0 }
 0x176   :  { %v6530_v1 = vadd.f32 %v4710_v24, %v3445_v12  ;;  %v4712_v3 = vpop.f32.mrf.mxu1  ;;  %v4673_v6 = vadd.f32 %v4672_v2, %v4671_v0 }
 0x177   :  { %v4713_v42 = vadd.f32 %v4712_v3, %v4711_v16  ;;  %v4674_v47 = vpop.f32.mrf.mxu0 }
 0x178   :  { %v4714_v10 = vpop.f32.mrf.mxu1  ;;  %v3450_v11 = vadd.f32 %v4673_v6, %v3385_v54 }
 0x179   :  { %v4675_v57 = vpop.f32.mrf.mxu0 }
 0x17a   :  { %v4715_v8 = vpop.f32.mrf.mxu1  ;;  %v6532_v4 = vadd.f32 %v4713_v42, %v3450_v11  ;;  %v4676_v14 = vadd.f32 %v4675_v57, %v4674_v47 }
 0x17b   :  { %v4716_v15 = vadd.f32 %v4715_v8, %v4714_v10  ;;  %v4677_v50 = vpop.f32.mrf.mxu0 }
 0x17c   :  { %v3453_v17 = vadd.f32 %v4676_v14, %v3388_v18  ;;  %v4717_v61 = vpop.f32.mrf.mxu1 }
 0x17d   :  { %v4678_v51 = vpop.f32.mrf.mxu0 }
 0x17e   :  { %v6534_v20 = vadd.f32 %v4716_v15, %v3453_v17  ;;  %v4679_v21 = vadd.f32 %v4678_v51, %v4677_v50  ;;  %v4718_v22 = vpop.f32.mrf.mxu1 }
 0x17f   :  { %v4719_v28 = vadd.f32 %v4718_v22, %v4717_v61  ;;  %v4680_v25 = vpop.f32.mrf.mxu0 }
 0x180   :  { %v3458_v26 = vadd.f32 %v4679_v21, %v3393_v9  ;;  %v4720_v27 = vpop.f32.mrf.mxu1 }
 0x181   :  { %v4681_v41 = vpop.f32.mrf.mxu0 }
 0x182   :  { %v6536_v54 = vadd.f32 %v4719_v28, %v3458_v26  ;;  %v4682_v29 = vadd.f32 %v4681_v41, %v4680_v25  ;;  %v4721_v63 = vpop.f32.mrf.mxu1 }
 0x183   :  { %v4722_v7 = vadd.f32 %v4721_v63, %v4720_v27  ;;  %v4739_v13 = vpop.f32.mrf.mxu0 }
 0x184   :  { %6711 = vst [vmem:[#allocation2_spill] sm:$0xff] %v6536_v54  ;;  %v3461_v19 = vadd.f32 %v4682_v29, %v3396_v33  ;;  %v6538_v18 = vpop.f32.mrf.mxu1 }
 0x185   :  { %v4740_v35 = vpop.f32.mrf.mxu0 }
 0x186   :  { %v6540_v34 = vadd.f32 %v4722_v7, %v3461_v19  ;;  %v4780_v36 = vpop.f32.mrf.mxu1 }
 0x187   :  { %v4742_v31 = vpop.f32.mrf.mxu0 }
 0x188   :  { %6712 = vst [vmem:[#allocation3_spill] sm:$0xff] %v6540_v34  ;;  %v6542_v5 = vpop.f32.mrf.mxu1 }
 0x189   :  { %v4743_v40 = vpop.f32.mrf.mxu0 }
 0x18a   :  { %v6544_v9 = vpop.f32.mrf.mxu1 }
 0x18b   :  { %v4745_v44 = vpop.f32.mrf.mxu0 }
 0x18c   :  { %v6546_v23 = vpop.f32.mrf.mxu1 }
 0x18d   :  { %v4746_v46 = vpop.f32.mrf.mxu0 }
 0x18e   :  { %v6548_v48 = vpop.f32.mrf.mxu1 }
 0x18f   :  { %v6550_v33 = vpop.f32.mrf.mxu0 }
 0x190   :  { %v6552_v49 = vpop.f32.mrf.mxu1 }
 0x191   :  { %v6554_v52 = vpop.f32.mrf.mxu0 }
 0x192   :  { %v6556_v53 = vpop.f32.mrf.mxu1 }
 0x193   :  { %v6558_v43 = vpop.f32.mrf.mxu0 }
 0x194   :  { %v6560_v32 = vpop.f32.mrf.mxu1 }
 0x195   :  { %v6562_v39 = vpop.f32.mrf.mxu0 }
 0x196   :  { %v6564_v55 = vpop.f32.mrf.mxu1 }
 0x197   :  { %v6566_v56 = vpop.f32.mrf.mxu0 }
 0x198   :  { %v6568_v30 = vpop.f32.mrf.mxu1 }
 0x199   :  { %v6570_v58 = vpop.f32.mrf.mxu0 }
 0x19a   :  { %v6572_v37 = vpop.f32.mrf.mxu1 }
 0x19b   :  { %v6574_v60 = vpop.f32.mrf.mxu0 }
 0x19d   :  { %v6578_v24 = vpop.f32.mrf.mxu0 }
 0x19f   :  { %v6582_v0 = vpop.f32.mrf.mxu0 }
 0x1a0   :  { %6715 = vst [vmem:[#allocation6_spill] sm:$0xff] %v6582_v0 }
 0x1a1   :  { %v6586_v2 = vpop.f32.mrf.mxu0 }
 0x1a2   :  { %6717 = vst [vmem:[#allocation8_spill] sm:$0xff] %v6586_v2 }
 0x1aa   :  { %v6576_v62 = vpop.f32.mrf.mxu1 }
 0x1ab   :  { %6713 = vst [vmem:[#allocation4_spill] sm:$0xff] %v6576_v62  ;;  %v4744_v62 = vadd.f32 %v4743_v40, %v4742_v31 }
 0x1ac   :  { %v6580_v12 = vpop.f32.mrf.mxu1 }
 0x1ad   :  { %6714 = vst [vmem:[#allocation5_spill] sm:$0xff] %v6580_v12 }
 0x1ae   :  { %v6584_v16 = vpop.f32.mrf.mxu1 }
 0x1af   :  { %6716 = vst [vmem:[#allocation7_spill] sm:$0xff] %v6584_v16 }
 0x1b0   :  { %v6588_v3 = vpop.f32.mrf.mxu1 }
 0x1b1   :  { %6718 = vst [vmem:[#allocation9_spill] sm:$0xff] %v6588_v3  ;;  %v4741_v3 = vadd.f32 %v4740_v35, %v4739_v13  ;;  %v3567_v35 = vadd.f32 %v4744_v62, %v6526_v38  ;;  %v4787_v38 = vadd.f32 %v6548_v48, %v6546_v23  ;;  %v4790_v23 = vadd.f32 %v6556_v53, %v6552_v49 }
 0x1b3   :  { %v3564_v12 = vadd.f32 %v4741_v3, %v6524_v45  ;;  %v4784_v45 = vadd.f32 %v6544_v9, %v6542_v5 }
 0x1b4   :  { %v4819_v6 = vpop.f32.mrf.mxu0 }
 0x1b5   :  { %v3632_v3 = vadd.f32 %v4784_v45, %v3567_v35 }
 0x1b6   :  { %v4859_v42 = vpop.f32.mrf.mxu1  ;;  %v4820_v47 = vpop.f32.mrf.mxu0 }
 0x1b7   :  { %v4821_v0 = vadd.f32 %v4820_v47, %v4819_v6  ;;  %v4750_v6 = vadd.f32 %v6554_v52, %v6550_v33 }
 0x1b8   :  { %v4860_v10 = vpop.f32.mrf.mxu1  ;;  %v4822_v11 = vpop.f32.mrf.mxu0 }
 0x1ba   :  { %v4862_v57 = vpop.f32.mrf.mxu1  ;;  %v4823_v8 = vpop.f32.mrf.mxu0 }
 0x1bb   :  { %v4824_v40 = vadd.f32 %v4823_v8, %v4822_v11  ;;  %v3575_v11 = vadd.f32 %v4750_v6, %v6530_v1 }
 0x1bc   :  { %v4863_v14 = vpop.f32.mrf.mxu1  ;;  %v4825_v15 = vpop.f32.mrf.mxu0 }
 0x1bd   :  { %v4864_v8 = vadd.f32 %v4863_v14, %v4862_v57 }
 0x1be   :  { %v6590_v17 = vpop.f32.mrf.mxu1  ;;  %v4826_v50 = vpop.f32.mrf.mxu0 }
 0x1bf   :  { %v4827_v62 = vadd.f32 %v4826_v50, %v4825_v15 }
 0x1c0   :  { %v6592_v61 = vpop.f32.mrf.mxu1  ;;  %v4828_v51 = vpop.f32.mrf.mxu0 }
 0x1c1   :  { %v4867_v1 = vadd.f32 %v6592_v61, %v6590_v17 }
 0x1c2   :  { %v6594_v21 = vpop.f32.mrf.mxu1  ;;  %v4829_v22 = vpop.f32.mrf.mxu0 }
 0x1c3   :  { %v4830_v50 = vadd.f32 %v4829_v22, %v4828_v51  ;;  %v4793_v51 = vadd.f32 %v6564_v55, %v6560_v32 }
 0x1c4   :  { %v6596_v28 = vpop.f32.mrf.mxu1  ;;  %v6598_v25 = vpop.f32.mrf.mxu0 }
 0x1c5   :  { %v4870_v55 = vadd.f32 %v6596_v28, %v6594_v21 }
 0x1c6   :  { %v6600_v26 = vpop.f32.mrf.mxu1  ;;  %v6602_v27 = vpop.f32.mrf.mxu0 }
 0x1c7   :  { %6719 = vst [vmem:[#allocation10_spill] sm:$0xff] %v6600_v26 }
 0x1c8   :  { %v6604_v41 = vpop.f32.mrf.mxu1  ;;  %v6606_v29 = vpop.f32.mrf.mxu0 }
 0x1c9   :  { %6720 = vst [vmem:[#allocation11_spill] sm:$0xff] %v6604_v41  ;;  %v4781_v41 = vadd.f32 %v4780_v36, %v6538_v18 }
 0x1ca   :  { %v6608_v63 = vpop.f32.mrf.mxu1  ;;  %v6610_v7 = vpop.f32.mrf.mxu0 }
 0x1cb   :  { %6721 = vst [vmem:[#allocation12_spill] sm:$0xff] %v6608_v63  ;;  %v3629_v13 = vadd.f32 %v4781_v41, %v3564_v12  ;;  %v3697_v41 = vadd.f32 %v4824_v40, %v3632_v3 }
 0x1cc   :  { %v6612_v19 = vpop.f32.mrf.mxu1 }
 0x1cd   :  { %6722 = vst [vmem:[#allocation13_spill] sm:$0xff] %v6612_v19  ;;  %v4747_v19 = vadd.f32 %v4746_v46, %v4745_v44  ;;  %v3694_v31 = vadd.f32 %v4821_v0, %v3629_v13  ;;  %v4861_v44 = vadd.f32 %v4860_v10, %v4859_v42  ;;  %v3762_v15 = vadd.f32 %v4864_v8, %v3697_v41  ;;  %v6727_v41 = vld [vmem:[#allocation6_spill] sm:$0xff] }
 0x1ce   :  { %v6616_v34 = vpop.f32.mrf.mxu1 }
 0x1cf   :  { %6724 = vst [vmem:[#allocation15_spill] sm:$0xff] %v6616_v34  ;;  %v3572_v18 = vadd.f32 %v4747_v19, %v6528_v59  ;;  %v3759_v47 = vadd.f32 %v4861_v44, %v3694_v31  ;;  %v4753_v59 = vadd.f32 %v6562_v39, %v6558_v43  ;;  %v4756_v43 = vadd.f32 %v6570_v58, %v6566_v56 }
 0x1d0   :  { %v6621_v2 = vpop.f32.mrf.mxu1  ;;  %v3640_v39 = vadd.f32 %v4790_v23, %v3575_v11  ;;  %v4796_v44 = vadd.f32 %v6572_v37, %v6568_v30  ;;  %v6729_v37 = vld [vmem:[#allocation10_spill] sm:$0xff] }
 0x1d1   :  { %v3637_v9 = vadd.f32 %v4787_v38, %v3572_v18  ;;  %v3580_v45 = vadd.f32 %v4753_v59, %v6532_v4  ;;  %v4833_v4 = vadd.f32 %v6602_v27, %v6598_v25  ;;  %v3583_v18 = vadd.f32 %v4756_v43, %v6534_v20  ;;  %v6730_v59 = vld [vmem:[#allocation11_spill] sm:$0xff] }
 0x1d2   :  { %v6626_v54 = vpop.f32.mrf.mxu1  ;;  %v3705_v40 = vadd.f32 %v4830_v50, %v3640_v39 }
 0x1d3   :  { %v3702_v48 = vadd.f32 %v4827_v62, %v3637_v9  ;;  %v3645_v61 = vadd.f32 %v4793_v51, %v3580_v45  ;;  %v3648_v28 = vadd.f32 %v4796_v44, %v3583_v18  ;;  %v6734_v45 = vld [vmem:[#allocation3_spill] sm:$0xff] }
 0x1d4   :  { %v6631_v34 = vpop.f32.mrf.mxu1  ;;  %v3770_v62 = vadd.f32 %v4870_v55, %v3705_v40 }
 0x1d5   :  { %6725 = vst [vmem:[#allocation16_spill] sm:$0xff] %v6631_v34  ;;  %v3767_v22 = vadd.f32 %v4867_v1, %v3702_v48  ;;  %v3710_v20 = vadd.f32 %v4833_v4, %v3645_v61  ;;  %v6735_v1 = vld [vmem:[#allocation12_spill] sm:$0xff] }
 0x1d8   :  { %v6614_v16 = vpop.f32.mrf.mxu0 }
 0x1d9   :  { %6723 = vst [vmem:[#allocation14_spill] sm:$0xff] %v6614_v16 }
 0x1da   :  { %v6619_v26 = vpop.f32.mrf.mxu0 }
 0x1dc   :  { %v6624_v63 = vpop.f32.mrf.mxu0 }
 0x1de   :  { %v6629_v16 = vpop.f32.mrf.mxu0 }
 0x1e0   :  { %v4899_v36 = vpop.f32.mrf.mxu0  ;;  %v4939_v46 = vpop.f32.mrf.mxu1 }
 0x1e2   :  { %v4900_v12 = vpop.f32.mrf.mxu0  ;;  %v4940_v5 = vpop.f32.mrf.mxu1 }
 0x1e3   :  { %v4901_v34 = vadd.f32 %v4900_v12, %v4899_v36  ;;  %v4941_v52 = vadd.f32 %v4940_v5, %v4939_v46  ;;  %v4759_v36 = vadd.f32 %v6578_v24, %v6574_v60  ;;  %v4836_v46 = vadd.f32 %v6610_v7, %v6606_v29  ;;  %v6726_v12 = vld [vmem:[#allocation2_spill] sm:$0xff]  ;;  %v6728_v5 = vld [vmem:[#allocation8_spill] sm:$0xff] }
 0x1e4   :  { %v4902_v0 = vpop.f32.mrf.mxu0  ;;  %v4942_v42 = vpop.f32.mrf.mxu1  ;;  %v4762_v9 = vadd.f32 %v6728_v5, %v6727_v41  ;;  %v4873_v29 = vadd.f32 %v6730_v59, %v6729_v37 }
 0x1e5   :  { %v3824_v33 = vadd.f32 %v4901_v34, %v3759_v47  ;;  %v3588_v47 = vadd.f32 %v4759_v36, %v6726_v12  ;;  %v3713_v23 = vadd.f32 %v4836_v46, %v3648_v28 }
 0x1e6   :  { %v4903_v10 = vpop.f32.mrf.mxu0  ;;  %v4943_v35 = vpop.f32.mrf.mxu1  ;;  %v3591_v43 = vadd.f32 %v4762_v9, %v6734_v45 }
 0x1e7   :  { %v3889_v19 = vadd.f32 %v4941_v52, %v3824_v33  ;;  %v4904_v13 = vadd.f32 %v4903_v10, %v4902_v0  ;;  %v4944_v49 = vadd.f32 %v4943_v35, %v4942_v42  ;;  %v6731_v33 = vld [vmem:[#allocation4_spill] sm:$0xff]  ;;  %v6732_v52 = vld [vmem:[#allocation5_spill] sm:$0xff]  ;;  %v3775_v10 = vadd.f32 %v4873_v29, %v3710_v20 }
 0x1e8   :  { %v4905_v34 = vpop.f32.mrf.mxu0  ;;  %v4945_v53 = vpop.f32.mrf.mxu1  ;;  %v4799_v42 = vadd.f32 %v6732_v52, %v6731_v33 }
 0x1e9   :  { %v3919_v57 = vmax.f32 %v3889_v19, 0.0  ;;  %v3827_v14 = vadd.f32 %v4904_v13, %v3762_v15  ;;  %v6733_v15 = vld [vmem:[#allocation14_spill] sm:$0xff] }
 0x1ea   :  { %v4906_v31 = vpop.f32.mrf.mxu0  ;;  %v4946_v17 = vpop.f32.mrf.mxu1  ;;  %v4839_v50 = vadd.f32 %v6619_v26, %v6733_v15  ;;  %v6738_v26 = vld [vmem:[#allocation9_spill] sm:$0xff] }
 0x1eb   :  { %3927 = vst [vmem:[%s6710_s3] sm:$0xff] %v3919_v57  ;;  %v3892_v56 = vadd.f32 %v4944_v49, %v3827_v14  ;;  %v4907_v58 = vadd.f32 %v4906_v31, %v4905_v34  ;;  %v4947_v25 = vadd.f32 %v4946_v17, %v4945_v53  ;;  %v6736_v34 = vld [vmem:[#allocation13_spill] sm:$0xff]  ;;  %v3653_v14 = vadd.f32 %v4799_v42, %v3588_v47  ;;  %v6737_v31 = vld [vmem:[#allocation7_spill] sm:$0xff] }
 0x1ec   :  { %v4908_v32 = vpop.f32.mrf.mxu0  ;;  %v4948_v27 = vpop.f32.mrf.mxu1  ;;  %v4876_v39 = vadd.f32 %v6736_v34, %v6735_v1  ;;  %v4802_v40 = vadd.f32 %v6738_v26, %v6737_v31  ;;  %v4842_v17 = vadd.f32 %v6629_v16, %v6624_v63 }
 0x1ed   :  { %v3920_v3 = vmax.f32 %v3892_v56, 0.0  ;;  %v3832_v6 = vadd.f32 %v4907_v58, %v3767_v22  ;;  %v3718_v58 = vadd.f32 %v4839_v50, %v3653_v14 }
 0x1ee   :  { %v4909_v38 = vpop.f32.mrf.mxu0  ;;  %v4949_v21 = vpop.f32.mrf.mxu1  ;;  %v3778_v4 = vadd.f32 %v4876_v39, %v3713_v23 }
 0x1ef   :  { %3928 = vst [vmem:[%s6710_s3 + $0x8] sm:$0xff] %v3920_v3  ;;  %v3897_v60 = vadd.f32 %v4947_v25, %v3832_v6  ;;  %v4910_v24 = vadd.f32 %v4909_v38, %v4908_v32  ;;  %v4950_v11 = vadd.f32 %v4949_v21, %v4948_v27  ;;  %v3656_v32 = vadd.f32 %v4802_v40, %v3591_v43  ;;  %v6739_v3 = vld [vmem:[#allocation15_spill] sm:$0xff]  ;;  %v6740_v21 = vld [vmem:[#allocation16_spill] sm:$0xff] }
 0x1f0   :  { %v4911_v30 = vpop.f32.mrf.mxu0  ;;  %v4951_v8 = vpop.f32.mrf.mxu1  ;;  %v4879_v6 = vadd.f32 %v6621_v2, %v6739_v3  ;;  %v4882_v28 = vadd.f32 %v6740_v21, %v6626_v54 }
 0x1f1   :  { %v3921_v7 = vmax.f32 %v3897_v60, 0.0  ;;  %v3835_v0 = vadd.f32 %v4910_v24, %v3770_v62  ;;  %v3721_v20 = vadd.f32 %v4842_v17, %v3656_v32 }
 0x1f2   :  { %v4912_v48 = vpop.f32.mrf.mxu0  ;;  %v4952_v35 = vpop.f32.mrf.mxu1  ;;  %v3783_v62 = vadd.f32 %v4879_v6, %v3718_v58 }
 0x1f3   :  { %3929 = vst [vmem:[%s6710_s3 + $0x10] sm:$0xff] %v3921_v7  ;;  %v3900_v19 = vadd.f32 %v4950_v11, %v3835_v0  ;;  %v4913_v13 = vadd.f32 %v4912_v48, %v4911_v30  ;;  %v4953_v51 = vadd.f32 %v4952_v35, %v4951_v8  ;;  %v3786_v9 = vadd.f32 %v4882_v28, %v3721_v20 }
 0x1f4   :  { %v4914_v57 = vpop.f32.mrf.mxu0  ;;  %v4954_v22 = vpop.f32.mrf.mxu1 }
 0x1f5   :  { %v3922_v49 = vmax.f32 %v3900_v19, 0.0  ;;  %v3840_v53 = vadd.f32 %v4913_v13, %v3775_v10 }
 0x1f6   :  { %v4915_v56 = vpop.f32.mrf.mxu0  ;;  %v4955_v36 = vpop.f32.mrf.mxu1 }
 0x1f7   :  { %3930 = vst [vmem:[%s6710_s3 + $0x18] sm:$0xff] %v3922_v49  ;;  %v3905_v61 = vadd.f32 %v4953_v51, %v3840_v53  ;;  %v4916_v18 = vadd.f32 %v4915_v56, %v4914_v57  ;;  %v4956_v44 = vadd.f32 %v4955_v36, %v4954_v22 }
 0x1f8   :  { %v4917_v55 = vpop.f32.mrf.mxu0  ;;  %v4957_v46 = vpop.f32.mrf.mxu1 }
 0x1f9   :  { %v3923_v25 = vmax.f32 %v3905_v61, 0.0  ;;  %v3843_v27 = vadd.f32 %v4916_v18, %v3778_v4 }
 0x1fa   :  { %v4918_v38 = vpop.f32.mrf.mxu0  ;;  %v4958_v60 = vpop.f32.mrf.mxu1 }
 0x1fb   :  { %3931 = vst [vmem:[%s6710_s3 + $0x20] sm:$0xff] %v3923_v25  ;;  %v3908_v16 = vadd.f32 %v4956_v44, %v3843_v27  ;;  %v4919_v63 = vadd.f32 %v4918_v38, %v4917_v55  ;;  %v4959_v47 = vadd.f32 %v4958_v60, %v4957_v46 }
 0x1fc   :  { %v4920_v24 = vpop.f32.mrf.mxu0  ;;  %v4960_v41 = vpop.f32.mrf.mxu1 }
 0x1fd   :  { %v3924_v12 = vmax.f32 %v3908_v16, 0.0  ;;  %v3848_v2 = vadd.f32 %v4919_v63, %v3783_v62 }
 0x1fe   :  { %v4921_v5 = vpop.f32.mrf.mxu0  ;;  %v4961_v59 = vpop.f32.mrf.mxu1 }
 0x1ff   :  { %3932 = vst [vmem:[%s6710_s3 + $0x28] sm:$0xff] %v3924_v12  ;;  %v3913_v30 = vadd.f32 %v4959_v47, %v3848_v2  ;;  %v4922_v37 = vadd.f32 %v4921_v5, %v4920_v24  ;;  %v4962_v0 = vadd.f32 %v4961_v59, %v4960_v41 }
 0x201   :  { %v3925_v29 = vmax.f32 %v3913_v30, 0.0  ;;  %v3851_v7 = vadd.f32 %v4922_v37, %v3786_v9 }
 0x203   :  { %3933 = vst [vmem:[%s6710_s3 + $0x30] sm:$0xff] %v3925_v29  ;;  %v3916_v54 = vadd.f32 %v4962_v0, %v3851_v7 }
 0x205   :  { %v3926_v11 = vmax.f32 %v3916_v54, 0.0 }
 0x207   :  { %3934 = vst [vmem:[%s6710_s3 + $0x38] sm:$0xff] %v3926_v11 }

// kernel: sketch_depth_colorizer.24
= control target key start
LH: loop header
LB: loop body
LE: loop exit
PB: predicated region body
PF: predicated region fallthrough
CT: control target
= control target key end

     0   :  { %s1281_s29 = smov 0   ;;  %s1467_s0 = inlined_call_operand.vmem [shape: f32[2,64,64], index: 0, kind: input, shape index: {}]   ;;  %s1468_s1 = inlined_call_operand.vmem [shape: bf16[64,8], index: 1, kind: input, shape index: {}]   ;;  %s1469_s2 = inlined_call_operand.vmem [shape: f32[1,8], index: 2, kind: input, shape index: {}]   ;;  %s1470_s3 = inlined_call_operand.vmem [shape: bf16[64,8], index: 3, kind: input, shape index: {}]   ;;  %s1471_s4 = inlined_call_operand.vmem [shape: f32[1,8], index: 4, kind: input, shape index: {}]   ;;  %s1472_s5 = inlined_call_operand.vmem [shape: bf16[64,64], index: 5, kind: input, shape index: {}]   ;;  %s1473_s6 = inlined_call_operand.vmem [shape: f32[1,64], index: 6, kind: input, shape index: {}]   ;;  %s1474_s7 = inlined_call_operand.<no memory space> [shape: f32[1,1], index: 7, kind: input, shape index: {}]   ;;  %s1475_s8 = inlined_call_operand.vmem [shape: f32[2,64,64], index: 8, kind: output, shape index: {}]  }
   0x1   :  { %v13_v0 = vstv %s1474_s7 }
   0x2   :  { %14 = vst [vmem:[#allocation2] sm:$0x1] %v13_v0 }
   0x3 LB: > { %s999_s30 = sadd.s32 4294967295, %s1231_s29   ;;  %p1003_p0 = scmp.ge.s32.totalorder %s1231_s29, 1  ;;  %s1231_s29 = sphi %s1281_s29, %s20_s29  }
   0x4   : > { %p264_p1 = scmp.lt.s32.totalorder %s1231_s29, 3 }
   0x6   : > { %p265_p2 = pnand %p1003_p0, %p264_p1 }
   0x7   : > { %p298_p3 = scmp.lt.s32.totalorder (!%p265_p2), %s999_s30, 1 }
   0x8   : > { %268 = sbr.rel (%p265_p2) target bundleno = 1001 (0x3e9), region = 52 }
   0xd   : > { %v1181_v1 = vld [vmem:[%s1470_s3 + $0x18] sm:$0xff]   ;;  %v1182_v2 = vld [vmem:[%s1470_s3 + $0x10] sm:$0xff]   ;;  %s1477_s30 = smov (!%p298_p3, %s999_s30), 1  ;;  %v1183_v3 = vld [vmem:[%s1470_s3 + $0x8] sm:$0xff]   ;;  %vm360_vm0 = vcmask 523264   ;;  %vm654_vm1 = vcmask 64512  }
   0xe   : > { %1103 = vmatprep.subr.bf16.mxu1 %v1181_v1  ;;  %s1045_s14 = sshll.u32 %s1477_s30, 6  ;;  %v1185_v4 = vld [vmem:[%s1468_s1 + $0x18] sm:$0xff]   ;;  %v1186_v5 = vld [vmem:[%s1468_s1 + $0x10] sm:$0xff]   ;;  %v1184_v9 = vld [vmem:[%s1470_s3] sm:$0xff]  }
   0xf   : > { %1104 = vmatpush3.bf16.msra.mxu1 %v1181_v1  ;;  %s1309_s19 = scalar_lea.vmem %s1467_s0, %s1045_s14  ;;  %1087 = vmatprep.subr.bf16.mxu0 %v1185_v4  ;;  %v1187_v12 = vld [vmem:[%s1468_s1 + $0x8] sm:$0xff]   ;;  %v1188_v15 = vld [vmem:[%s1468_s1] sm:$0xff]   ;;  %s307_s25 = scalar_lea.vmem %s1475_s8, %s1045_s14 }
  0x10   : > { %1105 = vmatprep.subr.bf16.mxu1 %v1182_v2  ;;  %v1315_v6 = vld [vmem:[%s1309_s19] sm:$0xff]  ;;  %v1318_v7 = vld [vmem:[%s1309_s19 + $0x8] sm:$0xff]  ;;  %1088 = vmatpush3.bf16.msra.mxu0 %v1185_v4  ;;  %v1327_v10 = vld [vmem:[%s1309_s19 + $0x10] sm:$0xff] }
  0x11   : > { %v317_v8 = vpack.c.bf16 %v1318_v7, %v1315_v6  ;;  %1089 = vmatprep.subr.bf16.mxu0 %v1186_v5  ;;  %v1330_v11 = vld [vmem:[%s1309_s19 + $0x18] sm:$0xff]  ;;  %v1337_v13 = vld [vmem:[%s1309_s19 + $0x20] sm:$0xff]  ;;  %v1340_v14 = vld [vmem:[%s1309_s19 + $0x28] sm:$0xff] }
  0x12   : > { %v1347_v16 = vpack.c.bf16 %v1330_v11, %v1327_v10  ;;  %v1351_v17 = vpack.c.bf16 %v1340_v14, %v1337_v13  ;;  %v1358_v18 = vld [vmem:[%s1309_s19 + $0x30] sm:$0xff]  ;;  %v1361_v19 = vld [vmem:[%s1309_s19 + $0x38] sm:$0xff]  ;;  %v1008_v26 = vld [vmem:[%s1469_s2] ss:$0 sm:$0xff] }
  0x13   : > { %1106 = vmatpush3.bf16.msra.mxu1 %v1182_v2  ;;  %1111 = vmatprep.mubr.msk.bf16.mxu1 %vm360_vm0, %v317_v8  ;;  %v1365_v20 = vpack.c.bf16 %v1361_v19, %v1358_v18  ;;  %v1017_v34 = vld [vmem:[%s1471_s4] ss:$0 sm:$0xff]  ;;  %v1190_v4 = vld [vmem:[%s1472_s5 + $0x10] sm:$0xff]  }
  0x14   : > { %1107 = vmatprep.subr.bf16.mxu1 %v1183_v3  ;;  %1095 = vmatprep.mubr.msk.bf16.mxu0 %vm360_vm0, %v317_v8 }
  0x15   : > { %1090 = vmatpush3.bf16.msra.mxu0 %v1186_v5  ;;  %v1191_v5 = vld [vmem:[%s1472_s5 + $0x8] sm:$0xff]  }
  0x16   : > { %1091 = vmatprep.subr.bf16.mxu0 %v1187_v12 }
  0x17   : > { %1108 = vmatpush3.bf16.msra.mxu1 %v1183_v3  ;;  %v1189_v3 = vld [vmem:[%s1472_s5 + $0x18] sm:$0xff]  }
  0x18   : > { %1109 = vmatprep.subr.bf16.mxu1 %v1184_v9 }
  0x19   : > { %1092 = vmatpush3.bf16.msra.mxu0 %v1187_v12 }
  0x1a   : > { %1093 = vmatprep.subr.bf16.mxu0 %v1188_v15 }
  0x1b   : > { %1110 = vmatpush3.bf16.msra.mxu1 %v1184_v9 }
  0x1d   : > { %1094 = vmatpush3.bf16.msra.mxu0 %v1188_v15 }
  0x1e   : > { %1112 = vmatmul.mubr.msk.bf16.vlgmr.msra.gmra.mxu1 %vm360_vm0, %v1347_v16  ;;  %1119 = vmatprep.subr.bf16.mxu0 %v1189_v3 }
  0x1f   : > { %1115 = vmatprep.mubr.msk.bf16.mxu1 %vm360_vm0, %v1351_v17 }
  0x20   : > { %1096 = vmatmul.mubr.msk.bf16.vlgmr.msra.gmra.mxu0 %vm360_vm0, %v1347_v16 }
  0x21   : > { %1099 = vmatprep.mubr.msk.bf16.mxu0 %vm360_vm0, %v1351_v17  ;;  %1120 = vmatpush3.bf16.msra.mxu0 %v1189_v3 }
  0x22   : > { %1121 = vmatprep.subr.bf16.mxu0 %v1190_v4 }
  0x25   : > { %1122 = vmatpush3.bf16.msra.mxu0 %v1190_v4 }
  0x26   : > { %1116 = vmatmul.mubr.msk.bf16.gmra.mxu1 %vm360_vm0, %v1365_v20  ;;  %1123 = vmatprep.subr.bf16.mxu0 %v1191_v5 }
  0x28   : > { %1100 = vmatmul.mubr.msk.bf16.gmra.mxu0 %vm360_vm0, %v1365_v20 }
  0x29   : > { %1127 = vmatprep.mubr.msk.bf16.mxu0 %vm360_vm0, %v317_v8  ;;  %v1192_v8 = vld [vmem:[%s1472_s5] sm:$0xff]   ;;  %1124 = vmatpush3.bf16.msra.mxu0 %v1191_v5 }
  0x2a   : > { %1125 = vmatprep.subr.bf16.mxu0 %v1192_v8 }
  0x2d   : > { %1126 = vmatpush3.bf16.msra.mxu0 %v1192_v8 }
  0x30   : > { %1128 = vmatmul.mubr.msk.bf16.vlgmr.msra.gmra.mxu0 %vm360_vm0, %v1347_v16 }
  0x31   : > { %1131 = vmatprep.mubr.msk.bf16.mxu0 %vm360_vm0, %v1351_v17 }
  0x38   : > { %1132 = vmatmul.mubr.msk.bf16.gmra.mxu0 %vm360_vm0, %v1365_v20 }
  0xde   : > { %v1113_v21 = vpop.f32.mrf.mxu1 }
  0xdf   : > { %v520_v46 = vadd.f32 %v1113_v21, %v1017_v34 }
  0xe0   : > { %v511_v22 = vpop.f32.mrf.mxu1  ;;  %v1097_v24 = vpop.f32.mrf.mxu0 }
  0xe1   : > { %v512_v51 = vadd.f32 %v1017_v34, %v511_v22  ;;  %v416_v60 = vadd.f32 %v1097_v24, %v1008_v26 }
  0xe2   : > { %v1114_v23 = vpop.f32.mrf.mxu1  ;;  %v407_v27 = vpop.f32.mrf.mxu0 }
  0xe3   : > { %v408_v30 = vadd.f32 %v1008_v26, %v407_v27  ;;  %v523_v45 = vadd.f32 %v1114_v23, %v1017_v34 }
  0xe4   : > { %v514_v25 = vpop.f32.mrf.mxu1  ;;  %v1098_v29 = vpop.f32.mrf.mxu0 }
  0xe5   : > { %v651_v47 = vpack.c.bf16 %v523_v45, %v520_v46  ;;  %v515_v50 = vadd.f32 %v1017_v34, %v514_v25  ;;  %v419_v61 = vadd.f32 %v1098_v29, %v1008_v26 }
  0xe6   : > { %v1117_v28 = vpop.f32.mrf.mxu1  ;;  %v410_v32 = vpop.f32.mrf.mxu0 }
  0xe7   : > { %v411_v33 = vadd.f32 %v1008_v26, %v410_v32  ;;  %v536_v36 = vadd.f32 %v1117_v28, %v1017_v34  ;;  %v650_v53 = vpack.c.bf16 %v515_v50, %v512_v51  ;;  %v671_v54 = vsel %vm654_vm1, %v651_v47, 0 }
  0xe8   : > { %v527_v31 = vpop.f32.mrf.mxu1  ;;  %v1101_v49 = vpop.f32.mrf.mxu0  ;;  %v647_v63 = vpack.c.bf16 %v419_v61, %v416_v60 }
  0xe9   : > { %v646_v38 = vpack.c.bf16 %v411_v33, %v408_v30  ;;  %v528_v40 = vadd.f32 %v1017_v34, %v527_v31  ;;  %v668_v57 = vsel %vm654_vm1, %v650_v53, 0  ;;  %v432_v0 = vadd.f32 %v1101_v49, %v1008_v26 }
  0xea   : > { %v1118_v35 = vpop.f32.mrf.mxu1  ;;  %v423_v52 = vpop.f32.mrf.mxu0 }
  0xeb   : > { %v539_v37 = vadd.f32 %v1118_v35, %v1017_v34  ;;  %1143 = vmatprep.mubr.msk.bf16.mxu1 %vm654_vm1, %v646_v38  ;;  %v424_v58 = vadd.f32 %v1008_v26, %v423_v52  ;;  %v1026_v35 = vld [vmem:[%s1473_s6] ss:$0 sm:$0xff] }
  0xec   : > { %v530_v39 = vpop.f32.mrf.mxu1  ;;  %v1102_v55 = vpop.f32.mrf.mxu0 }
  0xed   : > { %v653_v41 = vpack.c.bf16 %v539_v37, %v536_v36  ;;  %v531_v42 = vadd.f32 %v1017_v34, %v530_v39  ;;  %v435_v1 = vadd.f32 %v1102_v55, %v1008_v26 }
  0xee   : > { %v426_v56 = vpop.f32.mrf.mxu0 }
  0xef   : > { %v652_v43 = vpack.c.bf16 %v531_v42, %v528_v40  ;;  %1167 = vmatprep.subr.msk.bf16.mxu1 %vm654_vm1, %v653_v41  ;;  %v677_v44 = vsel %vm654_vm1, %v653_v41, 0  ;;  %v427_v59 = vadd.f32 %v1008_v26, %v426_v56  ;;  %v649_v2 = vpack.c.bf16 %v435_v1, %v432_v0 }
  0xf0   : > { %1136 = vmatpush3.bf16.xpose.msra.mxu1 %v677_v44  ;;  %v1129_v31 = vpop.f32.mrf.mxu0 }
  0xf1   : > { %1168 = vmatprep.subr.msk.bf16.mxu1 %vm654_vm1, %v652_v43  ;;  %v674_v48 = vsel %vm654_vm1, %v652_v43, 0  ;;  %v648_v62 = vpack.c.bf16 %v427_v59, %v424_v58  ;;  %v624_v43 = vadd.f32 %v1129_v31, %v1026_v35 }
  0xf2   : > { %v615_v32 = vpop.f32.mrf.mxu0 }
  0xf4   : > { %v1130_v33 = vpop.f32.mrf.mxu0 }
  0xf5   : > { %v627_v44 = vadd.f32 %v1130_v33, %v1026_v35 }
  0xf6   : > { %v618_v34 = vpop.f32.mrf.mxu0 }
  0xf7   : > { %v837_v49 = vpack.c.bf16 %v627_v44, %v624_v43  ;;  %v619_v50 = vadd.f32 %v1026_v35, %v618_v34 }
  0xf8   : > { %1138 = vmatpush3.bf16.xpose.msra.mxu1 %v674_v48  ;;  %v1133_v36 = vpop.f32.mrf.mxu0  ;;  %v616_v48 = vadd.f32 %v1026_v35, %v615_v32 }
  0xf9   : > { %1169 = vmatprep.subr.msk.bf16.mxu1 %vm654_vm1, %v651_v47  ;;  %v640_v38 = vadd.f32 %v1133_v36, %v1026_v35  ;;  %v917_v36 = vld [vmem:[#allocation2] sm:$0x1] }
  0xfa   : > { %v631_v37 = vpop.f32.mrf.mxu0  ;;  %v836_v51 = vpack.c.bf16 %v619_v50, %v616_v48  ;;  %1171 = vpush %v917_v36 }
  0xfb   : > { %v632_v40 = vadd.f32 %v1026_v35, %v631_v37 }
  0xfc   : > { %v1134_v39 = vpop.f32.mrf.mxu0 }
  0xfd   : > { %v643_v41 = vadd.f32 %v1134_v39, %v1026_v35 }
  0xfe   : > { %v634_v42 = vpop.f32.mrf.mxu0 }
  0xff   : > { %v839_v45 = vpack.c.bf16 %v643_v41, %v640_v38  ;;  %v635_v46 = vadd.f32 %v1026_v35, %v634_v42 }
 0x100   : > { %1140 = vmatpush3.bf16.xpose.msra.mxu1 %v671_v54 }
 0x101   : > { %1170 = vmatprep.subr.msk.bf16.mxu1 %vm654_vm1, %v650_v53  ;;  %v838_v47 = vpack.c.bf16 %v635_v46, %v632_v40  ;;  %1151 = vmatprep.subr.bf16.mxu0 %v839_v45 }
 0x102   : > { %1152 = vmatpush3.bf16.msra.mxu0 %v839_v45 }
 0x103   : > { %1153 = vmatprep.subr.bf16.mxu0 %v838_v47 }
 0x106   : > { %1154 = vmatpush3.bf16.msra.mxu0 %v838_v47 }
 0x107   : > { %1155 = vmatprep.subr.bf16.mxu0 %v837_v49 }
 0x108   : > { %1142 = vmatpush3.bf16.xpose.msra.mxu1 %v668_v57 }
 0x10a   : > { %1156 = vmatpush3.bf16.msra.mxu0 %v837_v49 }
 0x10b   : > { %1157 = vmatprep.subr.bf16.mxu0 %v836_v51 }
 0x10e   : > { %1158 = vmatpush3.bf16.msra.mxu0 %v836_v51 }
 0x10f   : > { %1144 = vmatmul.mubr.msk.bf16.vlgmr.msra.gmra.mxu1 %vm654_vm1, %v647_v63 }
 0x110   : > { %1147 = vmatprep.mubr.msk.bf16.mxu1 %vm654_vm1, %v648_v62 }
 0x117   : > { %1148 = vmatmul.mubr.msk.bf16.gmra.mxu1 %vm654_vm1, %v649_v2 }
 0x12b   : > { %s1172_s22 = spop %1171 }
 0x1cf   : > { %v1145_v9 = vpop.f32.mrf.mxu1 }
 0x1d0   : > { %v750_v12 = vsel %vm360_vm0, %v1145_v9, -inf }
 0x1d1   : > { %751 = vmax.xlane.f32.xlu1 %v750_v12  ;;  %v713_v15 = vpop.f32.mrf.mxu1 }
 0x1d2   : > { %v744_v21 = vsel %vm360_vm0, %v713_v15, -inf }
 0x1d3   : > { %745 = vmax.xlane.f32.xlu0 %v744_v21  ;;  %v1146_v22 = vpop.f32.mrf.mxu1 }
 0x1d4   : > { %v753_v23 = vsel %vm360_vm0, %v1146_v22, -inf }
 0x1d5   : > { %754 = vmax.xlane.f32.xlu1 %v753_v23  ;;  %v716_v24 = vpop.f32.mrf.mxu1 }
 0x1d6   : > { %v747_v16 = vsel %vm360_vm0, %v716_v24, -inf }
 0x1d7   : > { %748 = vmax.xlane.f32.xlu0 %v747_v16  ;;  %v1416_v17 = vpop.f32.mrf.mxu1 }
 0x1d8   : > { %v762_v28 = vsel %vm360_vm0, %v1416_v17, -inf }
 0x1d9   : > { %v729_v25 = vpop.f32.mrf.mxu1 }
 0x1da   : > { %v756_v20 = vsel %vm360_vm0, %v729_v25, -inf }
 0x1db   : > { %757 = vmax.xlane.f32.xlu0 %v756_v20  ;;  %v1419_v26 = vpop.f32.mrf.mxu1 }
 0x1dc   : > { %v765_v30 = vsel %vm360_vm0, %v1419_v26, -inf }
 0x1dd   : > { %v732_v27 = vpop.f32.mrf.mxu1 }
 0x1de   : > { %v759_v29 = vsel %vm360_vm0, %v732_v27, -inf }
 0x1df   : > { %763 = vmax.xlane.f32.xlu0 %v762_v28  ;;  %760 = vmax.xlane.f32.xlu1 %v759_v29 }
 0x1e3   : > { %766 = vmax.xlane.f32.xlu1 %v765_v30 }
 0x25a   : > { %v752_v52 = vpop.xlane.xlu1 %751 }
 0x25b   : > { %v770_v53 = vsub.f32 %v1145_v9, %v752_v52 }
 0x25c   : > { %v746_v54 = vpop.xlane.xlu0 %745 }
 0x25d   : > { %v768_v55 = vsub.f32 %v713_v15, %v746_v54  ;;  %v780_v57 = vmul.f32 1.442695, %v770_v53 }
 0x25e   : > { %v755_v56 = vpop.xlane.xlu1 %754 }
 0x25f   : > { %v776_v58 = vmul.f32 1.442695, %v768_v55  ;;  %v771_v59 = vsub.f32 %v1146_v22, %v755_v56 }
 0x260   : > { %v749_v60 = vpop.xlane.xlu0 %748 }
 0x261   : > { %1193 = vpow2.f32 %v776_v58  ;;  %v769_v61 = vsub.f32 %v716_v24, %v749_v60  ;;  %v782_v62 = vmul.f32 1.442695, %v771_v59 }
 0x262   : > { %1195 = vpow2.f32 %v780_v57 }
 0x263   : > { %v778_v63 = vmul.f32 1.442695, %v769_v61 }
 0x264   : > { %v758_v0 = vpop.xlane.xlu0 %757 }
 0x265   : > { %1197 = vpow2.f32 %v778_v63  ;;  %v772_v1 = vsub.f32 %v729_v25, %v758_v0 }
 0x266   : > { %1199 = vpow2.f32 %v782_v62 }
 0x267   : > { %v784_v2 = vmul.f32 1.442695, %v772_v1  ;;  %v919_v1 = vstv %s1172_s22 }
 0x268   : > { %v764_v3 = vpop.xlane.xlu0 %763  ;;  %v761_v4 = vpop.xlane.xlu1 %760 }
 0x269   : > { %1201 = vpow2.f32 %v784_v2  ;;  %v774_v5 = vsub.f32 %v1416_v17, %v764_v3  ;;  %v773_v8 = vsub.f32 %v732_v27, %v761_v4 }
 0x26b   : > { %v788_v9 = vmul.f32 1.442695, %v774_v5  ;;  %v786_v12 = vmul.f32 1.442695, %v773_v8 }
 0x26c   : > { %v767_v15 = vpop.xlane.xlu1 %766 }
 0x26d   : > { %1203 = vpow2.f32 %v788_v9  ;;  %v775_v21 = vsub.f32 %v1419_v26, %v767_v15 }
 0x26e   : > { %v1194_v22 = vpop.eup %1193  ;;  %1205 = vpow2.f32 %v786_v12 }
 0x26f   : > { %v790_v23 = vmul.f32 1.442695, %v775_v21  ;;  %v792_v24 = vsel %vm360_vm0, %v1194_v22, 0.0  ;;  %v1196_v16 = vpop.eup %1195 }
 0x270   : > { %793 = vadd.xlane.f32.xlu0 %v792_v24  ;;  %v798_v20 = vsel %vm360_vm0, %v1196_v16, 0.0 }
 0x271   : > { %1207 = vpow2.f32 %v790_v23 }
 0x272   : > { %v1198_v25 = vpop.eup %1197 }
 0x273   : > { %v795_v17 = vsel %vm360_vm0, %v1198_v25, 0.0  ;;  %v1200_v27 = vpop.eup %1199 }
 0x274   : > { %799 = vadd.xlane.f32.xlu0 %v798_v20  ;;  %796 = vadd.xlane.f32.xlu1 %v795_v17  ;;  %v801_v26 = vsel %vm360_vm0, %v1200_v27, 0.0 }
 0x276   : > { %v1202_v28 = vpop.eup %1201 }
 0x277   : > { %v804_v29 = vsel %vm360_vm0, %v1202_v28, 0.0 }
 0x278   : > { %805 = vadd.xlane.f32.xlu0 %v804_v29  ;;  %802 = vadd.xlane.f32.xlu1 %v801_v26 }
 0x27a   : > { %v1204_v30 = vpop.eup %1203 }
 0x27b   : > { %v1206_v31 = vpop.eup %1205  ;;  %v810_v32 = vsel %vm360_vm0, %v1204_v30, 0.0 }
 0x27c   : > { %811 = vadd.xlane.f32.xlu0 %v810_v32  ;;  %v807_v33 = vsel %vm360_vm0, %v1206_v31, 0.0 }
 0x27d   : > { %808 = vadd.xlane.f32.xlu1 %v807_v33 }
 0x27e   : > { %v1208_v34 = vpop.eup %1207 }
 0x27f   : > { %v813_v35 = vsel %vm360_vm0, %v1208_v34, 0.0 }
 0x281   : > { %814 = vadd.xlane.f32.xlu1 %v813_v35 }
 0x2f9   : > { %v794_v37 = vpop.xlane.xlu0 %793 }
 0x2fa   : > { %1209 = vrcp.f32 %v794_v37 }
 0x2fd   : > { %v800_v38 = vpop.xlane.xlu0 %799  ;;  %v797_v39 = vpop.xlane.xlu1 %796 }
 0x2fe   : > { %1211 = vrcp.f32 %v797_v39 }
 0x2ff   : > { %1213 = vrcp.f32 %v800_v38 }
 0x301   : > { %v806_v40 = vpop.xlane.xlu0 %805  ;;  %v803_v41 = vpop.xlane.xlu1 %802 }
 0x302   : > { %1215 = vrcp.f32 %v803_v41 }
 0x303   : > { %1217 = vrcp.f32 %v806_v40 }
 0x305   : > { %v812_v42 = vpop.xlane.xlu0 %811 }
 0x306   : > { %v809_v43 = vpop.xlane.xlu1 %808 }
 0x307   : > { %1219 = vrcp.f32 %v809_v43  ;;  %v1210_v44 = vpop.eup %1209 }
 0x308   : > { %1221 = vrcp.f32 %v812_v42  ;;  %v824_v47 = vmul.f32 %v1210_v44, %v1194_v22 }
 0x30a   : > { %v815_v45 = vpop.xlane.xlu1 %814 }
 0x30b   : > { %1223 = vrcp.f32 %v815_v45  ;;  %v1212_v46 = vpop.eup %1211 }
 0x30c   : > { %v825_v48 = vmul.f32 %v1212_v46, %v1198_v25  ;;  %v1214_v49 = vpop.eup %1213 }
 0x30d   : > { %v826_v52 = vmul.f32 %v1214_v49, %v1196_v16 }
 0x30e   : > { %v832_v50 = vpack.c.bf16 %v825_v48, %v824_v47 }
 0x30f   : > { %v1216_v51 = vpop.eup %1215 }
 0x310   : > { %v827_v53 = vmul.f32 %v1216_v51, %v1200_v27  ;;  %1159 = vmatprep.mubr.msk.bf16.mxu0 %vm360_vm0, %v832_v50  ;;  %v1218_v54 = vpop.eup %1217 }
 0x311   : > { %v828_v57 = vmul.f32 %v1218_v54, %v1202_v28 }
 0x312   : > { %v833_v55 = vpack.c.bf16 %v827_v53, %v826_v52 }
 0x314   : > { %v1220_v56 = vpop.eup %1219  ;;  %1160 = vmatmul.mubr.msk.bf16.vlgmr.msra.gmra.mxu0 %vm360_vm0, %v833_v55 }
 0x315   : > { %v829_v58 = vmul.f32 %v1220_v56, %v1206_v31  ;;  %v1222_v59 = vpop.eup %1221 }
 0x316   : > { %v830_v62 = vmul.f32 %v1222_v59, %v1204_v30 }
 0x317   : > { %v834_v60 = vpack.c.bf16 %v829_v58, %v828_v57 }
 0x318   : > { %v1224_v61 = vpop.eup %1223 }
 0x319   : > { %1163 = vmatprep.mubr.msk.bf16.mxu0 %vm360_vm0, %v834_v60  ;;  %v831_v63 = vmul.f32 %v1224_v61, %v1208_v34 }
 0x31b   : > { %v835_v0 = vpack.c.bf16 %v831_v63, %v830_v62 }
 0x31d   : > { %1164 = vmatmul.mubr.msk.bf16.gmra.mxu0 %vm360_vm0, %v835_v0 }
 0x3d4   : > { %v1161_v2 = vpop.f32.mrf.mxu0 }
 0x3d5   : > { %v922_v3 = vmul.f32 %v1161_v2, %v919_v1 }
 0x3d6   : > { %v886_v4 = vpop.f32.mrf.mxu0 }
 0x3d7   : > { %v930_v5 = vadd.f32 %v922_v3, %v1327_v10  ;;  %v920_v8 = vmul.f32 %v919_v1, %v886_v4 }
 0x3d8   : > { %v1162_v9 = vpop.f32.mrf.mxu0 }
 0x3d9   : > { %938 = vst.msk [vmem:[%s307_s25 + $0x10] sm:$0xff] %vm360_vm0, %v930_v5  ;;  %v928_v12 = vadd.f32 %v920_v8, %v1315_v6  ;;  %v923_v15 = vmul.f32 %v1162_v9, %v919_v1 }
 0x3da   : > { %v889_v21 = vpop.f32.mrf.mxu0 }
 0x3db   : > { %936 = vst.msk [vmem:[%s307_s25] sm:$0xff] %vm360_vm0, %v928_v12  ;;  %v931_v22 = vadd.f32 %v923_v15, %v1330_v11  ;;  %v921_v23 = vmul.f32 %v919_v1, %v889_v21 }
 0x3dd   : > { %v1165_v24 = vpop.f32.mrf.mxu0  ;;  %939 = vst.msk [vmem:[%s307_s25 + $0x18] sm:$0xff] %vm360_vm0, %v931_v22  ;;  %v929_v16 = vadd.f32 %v921_v23, %v1318_v7 }
 0x3de   : > { %v926_v25 = vmul.f32 %v1165_v24, %v919_v1 }
 0x3df   : > { %v902_v10 = vpop.f32.mrf.mxu0  ;;  %937 = vst.msk [vmem:[%s307_s25 + $0x8] sm:$0xff] %vm360_vm0, %v929_v16 }
 0x3e0   : > { %v934_v20 = vadd.f32 %v926_v25, %v1358_v18  ;;  %v924_v17 = vmul.f32 %v919_v1, %v902_v10 }
 0x3e1   : > { %v1166_v6 = vpop.f32.mrf.mxu0 }
 0x3e2   : > { %942 = vst.msk [vmem:[%s307_s25 + $0x30] sm:$0xff] %vm360_vm0, %v934_v20  ;;  %v932_v27 = vadd.f32 %v924_v17, %v1337_v13  ;;  %v927_v28 = vmul.f32 %v1166_v6, %v919_v1 }
 0x3e3   : > { %v905_v11 = vpop.f32.mrf.mxu0 }
 0x3e4   : > { %940 = vst.msk [vmem:[%s307_s25 + $0x20] sm:$0xff] %vm360_vm0, %v932_v27  ;;  %v935_v29 = vadd.f32 %v927_v28, %v1361_v19  ;;  %v925_v26 = vmul.f32 %v919_v1, %v905_v11 }
 0x3e6   : > { %943 = vst.msk [vmem:[%s307_s25 + $0x38] sm:$0xff] %vm360_vm0, %v935_v29  ;;  %v933_v7 = vadd.f32 %v925_v26, %v1340_v14 }
 0x3e8   : > { %941 = vst.msk [vmem:[%s307_s25 + $0x28] sm:$0xff] %vm360_vm0, %v933_v7 }
 0x3e9 PF: > { %s20_s29 = sadd.s32 1, %s1231_s29  }
 0x3ea   : > { %p17_p4 = scmp.ge.s32.totalorder %s20_s29, 4  }
 0x3ec   :  { %19 = sbr.rel (!%p17_p4) target bundleno = 3 (0x3), region = 82 }

// kernel: sketch_depth_colorizer.23
= control target key start
LH: loop header
LB: loop body
LE: loop exit
PB: predicated region body
PF: predicated region fallthrough
CT: control target
= control target key end

     0   :  { %v1655_v1 = vmov 0   ;;  %s2135_s1 = inlined_call_operand.vmem [shape: bf16[1152,128], index: 1, kind: input, shape index: {}]   ;;  %s2136_s0 = inlined_call_operand.vmem [shape: bf16[64,1152], index: 0, kind: input, shape index: {}]   ;;  %s2137_s2 = inlined_call_operand.vmem [shape: f32[64,1], index: 2, kind: input, shape index: {}]   ;;  %s2138_s3 = inlined_call_operand.vmem [shape: f32[64,128], index: 3, kind: output, shape index: {}]  }
   0x1   :  { %v1531_v0 = vld [vmem:[%s2135_s1 + $0x78] sm:$0xff]   ;;  %1529 = vset.pattern.permute.xlu0 %v1655_v1  ;;  %1530 = vset.pattern.permute.xlu1 %v1655_v1  ;;  %v1535_v5 = vld [vmem:[%s2135_s1 + $0x70] sm:$0xff]   ;;  %v1539_v9 = vld [vmem:[%s2135_s1 + $0x68] sm:$0xff]  }
   0x2   :  { %v1532_v2 = vld [vmem:[%s2135_s1 + $0xf8] sm:$0xff]   ;;  %1316 = vmatprep.subr.bf16.mxu0 %v1531_v0  ;;  %v1536_v6 = vld [vmem:[%s2135_s1 + $0xf0] sm:$0xff]   ;;  %v1540_v10 = vld [vmem:[%s2135_s1 + $0xe8] sm:$0xff]  }
   0x3   :  { %v1533_v3 = vld [vmem:[%s2135_s1 + $0x38] sm:$0xff]   ;;  %1356 = vmatprep.subr.bf16.mxu1 %v1532_v2  ;;  %v1537_v7 = vld [vmem:[%s2135_s1 + $0x30] sm:$0xff]   ;;  %v1541_v11 = vld [vmem:[%s2135_s1 + $0x28] sm:$0xff]  }
   0x4   :  { %v1534_v4 = vld [vmem:[%s2135_s1 + $0xb8] sm:$0xff]   ;;  %1317 = vmatpush3.bf16.msra.mxu0 %v1533_v3  ;;  %v1538_v8 = vld [vmem:[%s2135_s1 + $0xb0] sm:$0xff]   ;;  %v1542_v12 = vld [vmem:[%s2135_s1 + $0xa8] sm:$0xff]  }
   0x5   :  { %1357 = vmatpush3.bf16.msra.mxu1 %v1534_v4  ;;  %1318 = vmatprep.subr.bf16.mxu0 %v1535_v5  ;;  %v1543_v13 = vld [vmem:[%s2135_s1 + $0x60] sm:$0xff]   ;;  %v1547_v17 = vld [vmem:[%s2135_s1 + $0x58] sm:$0xff]   ;;  %v1551_v21 = vld [vmem:[%s2135_s1 + $0x50] sm:$0xff]  }
   0x6   :  { %1358 = vmatprep.subr.bf16.mxu1 %v1536_v6  ;;  %v1544_v14 = vld [vmem:[%s2135_s1 + $0xe0] sm:$0xff]   ;;  %v1548_v18 = vld [vmem:[%s2135_s1 + $0xd8] sm:$0xff]   ;;  %v1552_v22 = vld [vmem:[%s2135_s1 + $0xd0] sm:$0xff]  }
   0x7   :  { %v1545_v15 = vld [vmem:[%s2135_s1 + $0x20] sm:$0xff]   ;;  %v1549_v19 = vld [vmem:[%s2135_s1 + $0x18] sm:$0xff]   ;;  %v1553_v23 = vld [vmem:[%s2135_s1 + $0x10] sm:$0xff]  }
   0x8   :  { %1319 = vmatpush3.bf16.msra.mxu0 %v1537_v7  ;;  %v1546_v16 = vld [vmem:[%s2135_s1 + $0xa0] sm:$0xff]   ;;  %v1550_v20 = vld [vmem:[%s2135_s1 + $0x98] sm:$0xff]   ;;  %v1554_v24 = vld [vmem:[%s2135_s1 + $0x90] sm:$0xff]  }
   0x9   :  { %1359 = vmatpush3.bf16.msra.mxu1 %v1538_v8  ;;  %1320 = vmatprep.subr.bf16.mxu0 %v1539_v9  ;;  %v1555_v25 = vld [vmem:[%s2135_s1 + $0x48] sm:$0xff]   ;;  %v1559_v29 = vld [vmem:[%s2135_s1 + $0x40] sm:$0xff]   ;;  %v1569_v37 = vld [vmem:[%s2135_s1 + $0x178] sm:$0xff]  }
   0xa   :  { %1360 = vmatprep.subr.bf16.mxu1 %v1540_v10  ;;  %v1556_v26 = vld [vmem:[%s2135_s1 + $0xc8] sm:$0xff]   ;;  %v1560_v30 = vld [vmem:[%s2135_s1 + $0xc0] sm:$0xff]   ;;  %v1570_v38 = vld [vmem:[%s2135_s1 + $0x1f8] sm:$0xff]  }
   0xb   :  { %v1557_v27 = vld [vmem:[%s2135_s1 + $0x8] sm:$0xff]   ;;  %v1561_v31 = vld [vmem:[%s2135_s1] sm:$0xff]   ;;  %v1571_v39 = vld [vmem:[%s2135_s1 + $0x138] sm:$0xff]  }
   0xc   :  { %1321 = vmatpush3.bf16.msra.mxu0 %v1541_v11  ;;  %v1558_v28 = vld [vmem:[%s2135_s1 + $0x88] sm:$0xff]   ;;  %v1562_v32 = vld [vmem:[%s2135_s1 + $0x80] sm:$0xff]   ;;  %v1572_v40 = vld [vmem:[%s2135_s1 + $0x1b8] sm:$0xff]  }
   0xd   :  { %1361 = vmatpush3.bf16.msra.mxu1 %v1542_v12  ;;  %1322 = vmatprep.subr.bf16.mxu0 %v1543_v13  ;;  %v1563_v33 = vld [vmem:[%s2136_s0] ss:$36 sps:$4 sm:$0xff]   ;;  %v1566_v35 = vld [vmem:[%s2136_s0 + $0x8] ss:$36 sps:$4 sm:$0xff]   ;;  %v1573_v41 = vld [vmem:[%s2135_s1 + $0x170] sm:$0xff]  }
   0xe   :  { %1362 = vmatprep.subr.bf16.mxu1 %v1544_v14  ;;  %v1565_v34 = vld [vmem:[%s2136_s0 + $0x4] ss:$36 sps:$4 sm:$0xff]   ;;  %v1568_v36 = vld [vmem:[%s2136_s0 + $0xc] ss:$36 sps:$4 sm:$0xff]   ;;  %v1579_v46 = vld [vmem:[%s2136_s0 + $0x54] ss:$36 sps:$4 sm:$0xff]  }
   0xf   :  { %895 = vmatprep.mubr.bf16.mxu0 %v1565_v34  ;;  %960 = vmatprep.mubr.bf16.mxu1 %v1568_v36  ;;  %v1574_v42 = vld [vmem:[%s2135_s1 + $0x1f0] sm:$0xff]   ;;  %v1581_v47 = vld [vmem:[%s2136_s0 + $0x48] ss:$36 sps:$4 sm:$0xff]   ;;  %v1587_v53 = vld [vmem:[%s2135_s1 + $0x160] sm:$0xff]  }
  0x10   :  { %1323 = vmatpush3.bf16.msra.mxu0 %v1545_v15  ;;  %v1575_v43 = vld [vmem:[%s2135_s1 + $0x130] sm:$0xff]   ;;  %v1583_v49 = vld [vmem:[%s2135_s1 + $0x168] sm:$0xff]   ;;  %v1588_v54 = vld [vmem:[%s2135_s1 + $0x1e0] sm:$0xff]  }
  0x11   :  { %1363 = vmatpush3.bf16.msra.mxu1 %v1546_v16  ;;  %1324 = vmatprep.subr.bf16.mxu0 %v1547_v17  ;;  %v1576_v44 = vld [vmem:[%s2135_s1 + $0x1b0] sm:$0xff]   ;;  %v1584_v50 = vld [vmem:[%s2135_s1 + $0x1e8] sm:$0xff]   ;;  %v1589_v55 = vld [vmem:[%s2135_s1 + $0x120] sm:$0xff]  }
  0x12   :  { %1364 = vmatprep.subr.bf16.mxu1 %v1548_v18  ;;  %v1577_v45 = vld [vmem:[%s2136_s0 + $0x4c] ss:$36 sps:$4 sm:$0xff]   ;;  %v1590_v56 = vld [vmem:[%s2135_s1 + $0x1a0] sm:$0xff]   ;;  %v1591_v57 = vld [vmem:[%s2136_s0 + $0x94] ss:$36 sps:$4 sm:$0xff]  }
  0x13   :  { %v1582_v48 = vld [vmem:[%s2136_s0 + $0x50] ss:$36 sps:$4 sm:$0xff]   ;;  %v1585_v51 = vld [vmem:[%s2135_s1 + $0x128] sm:$0xff]   ;;  %v1593_v58 = vld [vmem:[%s2136_s0 + $0x9c] ss:$36 sps:$4 sm:$0xff]  }
  0x14   :  { %1325 = vmatpush3.bf16.msra.mxu0 %v1549_v19  ;;  %v1586_v52 = vld [vmem:[%s2135_s1 + $0x1a8] sm:$0xff]   ;;  %v1595_v59 = vld [vmem:[%s2136_s0 + $0x90] ss:$36 sps:$4 sm:$0xff]   ;;  %v1596_v60 = vld [vmem:[%s2136_s0 + $0x98] ss:$36 sps:$4 sm:$0xff]  }
  0x15   :  { %1365 = vmatpush3.bf16.msra.mxu1 %v1550_v20  ;;  %1326 = vmatprep.subr.bf16.mxu0 %v1551_v21  ;;  %v1597_v61 = vld [vmem:[%s2135_s1 + $0x158] sm:$0xff]   ;;  %v1601_v1 = vld [vmem:[%s2135_s1 + $0x150] sm:$0xff]   ;;  %v1607_v6 = vld [vmem:[%s2136_s0 + $0xe4] ss:$36 sps:$4 sm:$0xff]  }
  0x16   :  { %1366 = vmatprep.subr.bf16.mxu1 %v1552_v22  ;;  %v1598_v62 = vld [vmem:[%s2135_s1 + $0x1d8] sm:$0xff]   ;;  %v1602_v2 = vld [vmem:[%s2135_s1 + $0x1d0] sm:$0xff]   ;;  %v1610_v8 = vld [vmem:[%s2136_s0 + $0xe0] ss:$36 sps:$4 sm:$0xff]  }
  0x17   :  { %v1599_v63 = vld [vmem:[%s2135_s1 + $0x118] sm:$0xff]   ;;  %v1603_v3 = vld [vmem:[%s2135_s1 + $0x110] sm:$0xff]   ;;  %v1611_v9 = vld [vmem:[%s2135_s1 + $0x148] sm:$0xff]  }
  0x18   :  { %1327 = vmatpush3.bf16.msra.mxu0 %v1553_v23  ;;  %v1600_v0 = vld [vmem:[%s2135_s1 + $0x198] sm:$0xff]   ;;  %v1604_v4 = vld [vmem:[%s2135_s1 + $0x190] sm:$0xff]   ;;  %v1612_v10 = vld [vmem:[%s2135_s1 + $0x1c8] sm:$0xff]  }
  0x19   :  { %1367 = vmatpush3.bf16.msra.mxu1 %v1554_v24  ;;  %1328 = vmatprep.subr.bf16.mxu0 %v1555_v25  ;;  %v1605_v5 = vld [vmem:[%s2136_s0 + $0xdc] ss:$36 sps:$4 sm:$0xff]   ;;  %v1613_v11 = vld [vmem:[%s2135_s1 + $0x108] sm:$0xff]   ;;  %v1619_v17 = vld [vmem:[%s2136_s0 + $0x10] ss:$36 sps:$4 sm:$0xff]  }
  0x1a   :  { %1368 = vmatprep.subr.bf16.mxu1 %v1556_v26  ;;  %v1609_v7 = vld [vmem:[%s2136_s0 + $0xd8] ss:$36 sps:$4 sm:$0xff]   ;;  %v1614_v12 = vld [vmem:[%s2135_s1 + $0x188] sm:$0xff]   ;;  %v1615_v13 = vld [vmem:[%s2135_s1 + $0x140] sm:$0xff]  }
  0x1b   :  { %v1616_v14 = vld [vmem:[%s2135_s1 + $0x1c0] sm:$0xff]   ;;  %v1621_v18 = vld [vmem:[%s2136_s0 + $0x14] ss:$36 sps:$4 sm:$0xff]   ;;  %v1643_v34 = vld [vmem:[%s2136_s0 + $0xec] ss:$36 sps:$4 sm:$0xff]  }
  0x1c   :  { %1329 = vmatpush3.bf16.msra.mxu0 %v1557_v27  ;;  %v1617_v15 = vld [vmem:[%s2135_s1 + $0x100] sm:$0xff]   ;;  %v1622_v19 = vld [vmem:[%s2136_s0 + $0x18] ss:$36 sps:$4 sm:$0xff]   ;;  %v1626_v22 = vld [vmem:[%s2135_s1 + $0x230] sm:$0xff]  }
  0x1d   :  { %1369 = vmatpush3.bf16.msra.mxu1 %v1558_v28  ;;  %1330 = vmatprep.subr.bf16.mxu0 %v1559_v29  ;;  %v1618_v16 = vld [vmem:[%s2135_s1 + $0x180] sm:$0xff]   ;;  %v1625_v21 = vld [vmem:[%s2135_s1 + $0x238] sm:$0xff]   ;;  %v1633_v27 = vld [vmem:[%s2135_s1 + $0x228] sm:$0xff]  }
  0x1e   :  { %1370 = vmatprep.subr.bf16.mxu1 %v1560_v30  ;;  %v1624_v20 = vld [vmem:[%s2136_s0 + $0x1c] ss:$36 sps:$4 sm:$0xff]   ;;  %v1629_v24 = vld [vmem:[%s2136_s0 + $0x64] ss:$36 sps:$4 sm:$0xff]   ;;  %v1637_v29 = vld [vmem:[%s2136_s0 + $0xac] ss:$36 sps:$4 sm:$0xff]  }
  0x1f   :  { %v1627_v23 = vld [vmem:[%s2136_s0 + $0x5c] ss:$36 sps:$4 sm:$0xff]   ;;  %v1635_v28 = vld [vmem:[%s2136_s0 + $0xa4] ss:$36 sps:$4 sm:$0xff]   ;;  %v1642_v36 = vld [vmem:[%s2135_s1 + $0x210] sm:$0xff]  }
  0x20   :  { %1331 = vmatpush3.bf16.msra.mxu0 %v1561_v31  ;;  %v1631_v25 = vld [vmem:[%s2136_s0 + $0x58] ss:$36 sps:$4 sm:$0xff]   ;;  %v1632_v26 = vld [vmem:[%s2136_s0 + $0x60] ss:$36 sps:$4 sm:$0xff]  }
  0x21   :  { %1371 = vmatpush3.bf16.msra.mxu1 %v1562_v32  ;;  %1396 = vmatprep.subr.bf16.mxu0 %v1569_v37  ;;  %v1634_v30 = vld [vmem:[%s2135_s1 + $0x220] sm:$0xff]   ;;  %v1640_v32 = vld [vmem:[%s2136_s0 + $0xa8] ss:$36 sps:$4 sm:$0xff]  }
  0x22   :  { %1436 = vmatprep.subr.bf16.mxu1 %v1570_v38  ;;  %v1639_v31 = vld [vmem:[%s2136_s0 + $0xa0] ss:$36 sps:$4 sm:$0xff]   ;;  %v1647_v38 = vld [vmem:[%s2136_s0 + $0xe8] ss:$36 sps:$4 sm:$0xff]  }
  0x23   :  { %896 = vmatmul.mubr.bf16.vlgmr.msra.gmra.mxu0 %v1563_v33  ;;  %v1641_v33 = vld [vmem:[%s2135_s1 + $0x218] sm:$0xff]   ;;  %v199_v37 = vld [vmem:[%s2137_s2] sm:$0xff] }
  0x24   :  { %961 = vmatmul.mubr.bf16.vlgmr.msra.gmra.mxu1 %v1566_v35  ;;  %1397 = vmatpush3.bf16.msra.mxu0 %v1571_v39  ;;  %v1645_v35 = vld [vmem:[%s2136_s0 + $0xf4] ss:$36 sps:$4 sm:$0xff]  }
  0x25   :  { %1437 = vmatpush3.bf16.msra.mxu1 %v1572_v40  ;;  %1398 = vmatprep.subr.bf16.mxu0 %v1573_v41  ;;  %v201_v39 = vld [vmem:[%s2137_s2 + $0x10] sm:$0xff]  ;;  %v1649_v40 = vld [vmem:[%s2135_s1 + $0x208] sm:$0xff]  }
  0x26   :  { %1438 = vmatprep.subr.bf16.mxu1 %v1574_v42  ;;  %903 = vmatprep.mubr.bf16.mxu0 %v1577_v45  ;;  %v1648_v41 = vld [vmem:[%s2136_s0 + $0xf0] ss:$36 sps:$4 sm:$0xff]   ;;  %v1651_v42 = vld [vmem:[%s2136_s0 + $0x20] ss:$36 sps:$4 sm:$0xff]   ;;  %v200_v45 = vld [vmem:[%s2137_s2 + $0x8] sm:$0xff] }
  0x27   :  { %968 = vmatprep.mubr.bf16.mxu1 %v1579_v46  ;;  %209 = vperm.xlu0 %1529, %v199_v37   ;;  %v202_v46 = vld [vmem:[%s2137_s2 + $0x18] sm:$0xff] }
  0x28   :  { %1399 = vmatpush3.bf16.msra.mxu0 %v1575_v43  ;;  %219 = vperm.xlu1 %1530, %v201_v39   ;;  %v1652_v43 = vld [vmem:[%s2136_s0 + $0xb0] ss:$36 sps:$4 sm:$0xff]  }
  0x29   :  { %1439 = vmatpush3.bf16.msra.mxu1 %v1576_v44  ;;  %1400 = vmatprep.subr.bf16.mxu0 %v1583_v49  ;;  %v1650_v44 = vld [vmem:[%s2135_s1 + $0x200] sm:$0xff]   ;;  %v1654_v49 = vld [vmem:[%s2136_s0 + $0xf8] ss:$36 sps:$4 sm:$0xff]  }
  0x2a   :  { %1440 = vmatprep.subr.bf16.mxu1 %v1584_v50  ;;  %v204_v50 = vld [vmem:[%s2137_s2 + $0x28] sm:$0xff] }
  0x2b   :  { %904 = vmatmul.mubr.bf16.gmra.mxu0 %v1581_v47  ;;  %214 = vperm.xlu0 %1529, %v200_v45   ;;  %v1653_v47 = vld [vmem:[%s2136_s0 + $0x68] ss:$36 sps:$4 sm:$0xff]  }
  0x2c   :  { %969 = vmatmul.mubr.bf16.gmra.mxu1 %v1582_v48  ;;  %1401 = vmatpush3.bf16.msra.mxu0 %v1585_v51  ;;  %v203_v48 = vld [vmem:[%s2137_s2 + $0x20] sm:$0xff]  ;;  %v205_v51 = vld [vmem:[%s2137_s2 + $0x30] sm:$0xff] }
  0x2d   :  { %1441 = vmatpush3.bf16.msra.mxu1 %v1586_v52  ;;  %1402 = vmatprep.subr.bf16.mxu0 %v1587_v53  ;;  %v206_v52 = vld [vmem:[%s2137_s2 + $0x38] sm:$0xff] }
  0x2e   :  { %1442 = vmatprep.subr.bf16.mxu1 %v1588_v54  ;;  %911 = vmatprep.mubr.bf16.mxu0 %v1591_v57 }
  0x2f   :  { %976 = vmatprep.mubr.bf16.mxu1 %v1593_v58  ;;  %224 = vperm.xlu1 %1530, %v202_v46  }
  0x30   :  { %1403 = vmatpush3.bf16.msra.mxu0 %v1589_v55  ;;  %229 = vperm.xlu0 %1529, %v203_v48  }
  0x31   :  { %1443 = vmatpush3.bf16.msra.mxu1 %v1590_v56  ;;  %1404 = vmatprep.subr.bf16.mxu0 %v1597_v61 }
  0x32   :  { %1444 = vmatprep.subr.bf16.mxu1 %v1598_v62 }
  0x33   :  { %912 = vmatmul.mubr.bf16.gmra.mxu0 %v1595_v59  ;;  %234 = vperm.xlu1 %1530, %v204_v50  }
  0x34   :  { %977 = vmatmul.mubr.bf16.gmra.mxu1 %v1596_v60  ;;  %1405 = vmatpush3.bf16.msra.mxu0 %v1599_v63 }
  0x35   :  { %1445 = vmatpush3.bf16.msra.mxu1 %v1600_v0  ;;  %1406 = vmatprep.subr.bf16.mxu0 %v1601_v1 }
  0x36   :  { %1446 = vmatprep.subr.bf16.mxu1 %v1602_v2  ;;  %919 = vmatprep.mubr.bf16.mxu0 %v1605_v5 }
  0x37   :  { %984 = vmatprep.mubr.bf16.mxu1 %v1607_v6  ;;  %239 = vperm.xlu0 %1529, %v205_v51  }
  0x38   :  { %1407 = vmatpush3.bf16.msra.mxu0 %v1603_v3  ;;  %244 = vperm.xlu1 %1530, %v206_v52  }
  0x39   :  { %1447 = vmatpush3.bf16.msra.mxu1 %v1604_v4  ;;  %1408 = vmatprep.subr.bf16.mxu0 %v1611_v9 }
  0x3a   :  { %1448 = vmatprep.subr.bf16.mxu1 %v1612_v10 }
  0x3b   :  { %920 = vmatmul.mubr.bf16.gmra.mxu0 %v1609_v7 }
  0x3c   :  { %985 = vmatmul.mubr.bf16.gmra.mxu1 %v1610_v8  ;;  %1409 = vmatpush3.bf16.msra.mxu0 %v1613_v11 }
  0x3d   :  { %1449 = vmatpush3.bf16.msra.mxu1 %v1614_v12  ;;  %1410 = vmatprep.subr.bf16.mxu0 %v1615_v13 }
  0x3e   :  { %1450 = vmatprep.subr.bf16.mxu1 %v1616_v14  ;;  %1025 = vmatprep.mubr.bf16.mxu0 %v1621_v18 }
  0x3f   :  { %1090 = vmatprep.mubr.bf16.mxu1 %v1624_v20 }
  0x40   :  { %1411 = vmatpush3.bf16.msra.mxu0 %v1617_v15 }
  0x41   :  { %1451 = vmatpush3.bf16.msra.mxu1 %v1618_v16  ;;  %1488 = vmatprep.subr.bf16.mxu0 %v1625_v21 }
  0x42   :  { %1512 = vmatprep.subr.bf16.mxu1 %v1625_v21 }
  0x43   :  { %1026 = vmatmul.mubr.bf16.vlgmr.msra.gmra.mxu0 %v1619_v17 }
  0x44   :  { %1091 = vmatmul.mubr.bf16.vlgmr.msra.gmra.mxu1 %v1622_v19  ;;  %1489 = vmatpush3.bf16.msra.mxu0 %v1625_v21 }
  0x45   :  { %1520 = vmatpush3.bf16.msra.mxu1 %v1625_v21  ;;  %1490 = vmatprep.subr.bf16.mxu0 %v1626_v22 }
  0x46   :  { %1513 = vmatprep.subr.bf16.mxu1 %v1626_v22  ;;  %1033 = vmatprep.mubr.bf16.mxu0 %v1627_v23 }
  0x47   :  { %1098 = vmatprep.mubr.bf16.mxu1 %v1629_v24 }
  0x48   :  { %1491 = vmatpush3.bf16.msra.mxu0 %v1626_v22 }
  0x49   :  { %1521 = vmatpush3.bf16.msra.mxu1 %v1626_v22  ;;  %1492 = vmatprep.subr.bf16.mxu0 %v1633_v27 }
  0x4a   :  { %1514 = vmatprep.subr.bf16.mxu1 %v1633_v27 }
  0x4b   :  { %1034 = vmatmul.mubr.bf16.gmra.mxu0 %v1631_v25 }
  0x4c   :  { %1099 = vmatmul.mubr.bf16.gmra.mxu1 %v1632_v26  ;;  %1041 = vmatprep.mubr.bf16.mxu0 %v1635_v28 }
  0x4d   :  { %1493 = vmatpush3.bf16.msra.mxu0 %v1633_v27  ;;  %1106 = vmatprep.mubr.bf16.mxu1 %v1637_v29 }
  0x4e   :  { %1522 = vmatpush3.bf16.msra.mxu1 %v1633_v27  ;;  %1494 = vmatprep.subr.bf16.mxu0 %v1634_v30 }
  0x4f   :  { %1515 = vmatprep.subr.bf16.mxu1 %v1634_v30 }
  0x51   :  { %1495 = vmatpush3.bf16.msra.mxu0 %v1634_v30 }
  0x52   :  { %1523 = vmatpush3.bf16.msra.mxu1 %v1634_v30  ;;  %1496 = vmatprep.subr.bf16.mxu0 %v1641_v33 }
  0x53   :  { %1042 = vmatmul.mubr.bf16.gmra.mxu0 %v1639_v31  ;;  %1516 = vmatprep.subr.bf16.mxu1 %v1641_v33 }
  0x54   :  { %1107 = vmatmul.mubr.bf16.gmra.mxu1 %v1640_v32  ;;  %1049 = vmatprep.mubr.bf16.mxu0 %v1643_v34 }
  0x55   :  { %1497 = vmatpush3.bf16.msra.mxu0 %v1641_v33  ;;  %1114 = vmatprep.mubr.bf16.mxu1 %v1645_v35 }
  0x56   :  { %1524 = vmatpush3.bf16.msra.mxu1 %v1641_v33  ;;  %1498 = vmatprep.subr.bf16.mxu0 %v1642_v36 }
  0x57   :  { %1517 = vmatprep.subr.bf16.mxu1 %v1642_v36 }
  0x59   :  { %1499 = vmatpush3.bf16.msra.mxu0 %v1642_v36 }
  0x5a   :  { %1525 = vmatpush3.bf16.msra.mxu1 %v1642_v36  ;;  %1500 = vmatprep.subr.bf16.mxu0 %v1649_v40 }
  0x5b   :  { %1050 = vmatmul.mubr.bf16.gmra.mxu0 %v1647_v38  ;;  %1518 = vmatprep.subr.bf16.mxu1 %v1649_v40 }
  0x5c   :  { %1115 = vmatmul.mubr.bf16.gmra.mxu1 %v1648_v41  ;;  %1504 = vmatprep.mubr.bf16.mxu0 %v1651_v42 }
  0x5d   :  { %1501 = vmatpush3.bf16.msra.mxu0 %v1649_v40  ;;  %1508 = vmatprep.mubr.bf16.mxu1 %v1652_v43 }
  0x5e   :  { %1526 = vmatpush3.bf16.msra.mxu1 %v1649_v40  ;;  %1502 = vmatprep.subr.bf16.mxu0 %v1650_v44 }
  0x5f   :  { %1519 = vmatprep.subr.bf16.mxu1 %v1650_v44 }
  0x61   :  { %1503 = vmatpush3.bf16.msra.mxu0 %v1650_v44 }
  0x62   :  { %1527 = vmatpush3.bf16.msra.mxu1 %v1650_v44 }
  0x64   :  { %1505 = vmatmul.mubr.bf16.vlgmr.msra.gmra.mxu0 %v1653_v47 }
  0x65   :  { %1509 = vmatmul.mubr.bf16.vlgmr.msra.gmra.mxu1 %v1654_v49 }
  0xa2   :  { %v210_v26 = vpop.permute.xlu0 %209 }
  0xa3   :  { %v220_v31 = vpop.permute.xlu1 %219 }
  0xa6   :  { %v215_v34 = vpop.permute.xlu0 %214 }
  0xaa   :  { %v225_v39 = vpop.permute.xlu1 %224 }
  0xab   :  { %v230_v40 = vpop.permute.xlu0 %229 }
  0xae   :  { %v235_v47 = vpop.permute.xlu1 %234 }
  0xb2   :  { %v240_v49 = vpop.permute.xlu0 %239 }
  0xe3   :  { %v1332_v53 = vpop.f32.mrf.mxu0 }
  0xe4   :  { %v2024_v54 = vpop.f32.mrf.mxu1 }
  0xe5   :  { %v1333_v55 = vpop.f32.mrf.mxu0 }
  0xe6   :  { %v2026_v56 = vpop.f32.mrf.mxu1  ;;  %v1334_v41 = vadd.f32 %v1333_v55, %v1332_v53 }
  0xe7   :  { %v1335_v57 = vpop.f32.mrf.mxu0 }
  0xe8   :  { %v2028_v58 = vpop.f32.mrf.mxu1  ;;  %v898_v50 = vadd.f32 %v1334_v41, %v210_v26 }
  0xe9   :  { %v1336_v59 = vpop.f32.mrf.mxu0 }
  0xea   :  { %v2030_v60 = vpop.f32.mrf.mxu1  ;;  %v1337_v51 = vadd.f32 %v1336_v59, %v1335_v57 }
  0xeb   :  { %v1338_v61 = vpop.f32.mrf.mxu0 }
  0xec   :  { %v2032_v62 = vpop.f32.mrf.mxu1 }
  0xed   :  { %v1339_v63 = vpop.f32.mrf.mxu0 }
  0xee   :  { %v2034_v0 = vpop.f32.mrf.mxu1  ;;  %v1340_v44 = vadd.f32 %v1339_v63, %v1338_v61 }
  0xef   :  { %v1341_v1 = vpop.f32.mrf.mxu0 }
  0xf0   :  { %v2036_v2 = vpop.f32.mrf.mxu1 }
  0xf1   :  { %v1342_v3 = vpop.f32.mrf.mxu0 }
  0xf2   :  { %v2038_v4 = vpop.f32.mrf.mxu1 }
  0xf3   :  { %v1344_v5 = vpop.f32.mrf.mxu0 }
  0xf4   :  { %v2040_v6 = vpop.f32.mrf.mxu1 }
  0xf5   :  { %v1345_v7 = vpop.f32.mrf.mxu0 }
  0xf6   :  { %v2042_v8 = vpop.f32.mrf.mxu1  ;;  %v1346_v53 = vadd.f32 %v1345_v7, %v1344_v5 }
  0xf7   :  { %v2044_v9 = vpop.f32.mrf.mxu0 }
  0xf8   :  { %v2046_v10 = vpop.f32.mrf.mxu1  ;;  %v914_v7 = vadd.f32 %v1346_v53, %v230_v40 }
  0xf9   :  { %v2048_v11 = vpop.f32.mrf.mxu0 }
  0xfa   :  { %v2050_v12 = vpop.f32.mrf.mxu1 }
  0xfb   :  { %2139 = vst [vmem:[#allocation2_spill] sm:$0xff] %v2050_v12  ;;  %v1350_v13 = vpop.f32.mrf.mxu0  ;;  %v901_v12 = vadd.f32 %v1337_v51, %v215_v34 }
  0xfc   :  { %v1390_v14 = vpop.f32.mrf.mxu1 }
  0xfd   :  { %v1351_v15 = vpop.f32.mrf.mxu0 }
  0xfe   :  { %v1391_v16 = vpop.f32.mrf.mxu1  ;;  %v1352_v48 = vadd.f32 %v1351_v15, %v1350_v13  ;;  %v1380_v13 = vadd.f32 %v2034_v0, %v2032_v62  ;;  %v1349_v15 = vadd.f32 %v2048_v11, %v2044_v9  ;;  %v1383_v62 = vadd.f32 %v2038_v4, %v2036_v2 }
  0xff   :  { %v1353_v17 = vpop.f32.mrf.mxu0 }
 0x100   :  { %v2052_v18 = vpop.f32.mrf.mxu1  ;;  %v922_v63 = vadd.f32 %v1352_v48, %v240_v49 }
 0x101   :  { %v1354_v19 = vpop.f32.mrf.mxu0 }
 0x102   :  { %v2054_v20 = vpop.f32.mrf.mxu1  ;;  %v1355_v55 = vadd.f32 %v1354_v19, %v1353_v17 }
 0x103   :  { %v1412_v21 = vpop.f32.mrf.mxu0 }
 0x104   :  { %v2056_v22 = vpop.f32.mrf.mxu1 }
 0x105   :  { %2140 = vst [vmem:[#allocation3_spill] sm:$0xff] %v2056_v22  ;;  %v1413_v23 = vpop.f32.mrf.mxu0 }
 0x106   :  { %v2058_v24 = vpop.f32.mrf.mxu1 }
 0x107   :  { %2141 = vst [vmem:[#allocation4_spill] sm:$0xff] %v2058_v24  ;;  %v2060_v25 = vpop.f32.mrf.mxu0  ;;  %v906_v24 = vadd.f32 %v1340_v44, %v220_v31  ;;  %v1414_v31 = vadd.f32 %v1413_v23, %v1412_v21 }
 0x108   :  { %v2062_v27 = vpop.f32.mrf.mxu1 }
 0x109   :  { %2142 = vst [vmem:[#allocation5_spill] sm:$0xff] %v2062_v27  ;;  %v2064_v28 = vpop.f32.mrf.mxu0  ;;  %v1343_v27 = vadd.f32 %v1342_v3, %v1341_v1  ;;  %v1377_v1 = vadd.f32 %v2030_v60, %v2028_v58  ;;  %v971_v5 = vadd.f32 %v1380_v13, %v906_v24  ;;  %v1386_v58 = vadd.f32 %v2042_v8, %v2040_v6 }
 0x10a   :  { %v2066_v29 = vpop.f32.mrf.mxu1  ;;  %v1395_v60 = vadd.f32 %v2054_v20, %v2052_v18  ;;  %v1417_v6 = vadd.f32 %v2064_v28, %v2060_v25  ;;  %v2147_v20 = vld [vmem:[#allocation2_spill] sm:$0xff] }
 0x10b   :  { %2143 = vst [vmem:[#allocation6_spill] sm:$0xff] %v2066_v29  ;;  %v1418_v30 = vpop.f32.mrf.mxu0  ;;  %v1389_v40 = vadd.f32 %v2147_v20, %v2046_v10 }
 0x10c   :  { %v2068_v32 = vpop.f32.mrf.mxu1  ;;  %v2148_v44 = vld [vmem:[#allocation3_spill] sm:$0xff] }
 0x10d   :  { %v1419_v33 = vpop.f32.mrf.mxu0 }
 0x10e   :  { %v2070_v35 = vpop.f32.mrf.mxu1  ;;  %v1420_v3 = vadd.f32 %v1419_v33, %v1418_v30  ;;  %v979_v33 = vadd.f32 %v1386_v58, %v914_v7 }
 0x10f   :  { %v1421_v36 = vpop.f32.mrf.mxu0  ;;  %v1460_v8 = vadd.f32 %v2070_v35, %v2068_v32 }
 0x110   :  { %v2072_v37 = vpop.f32.mrf.mxu1  ;;  %v1036_v11 = vadd.f32 %v1420_v3, %v971_v5 }
 0x111   :  { %2144 = vst [vmem:[#allocation7_spill] sm:$0xff] %v2072_v37  ;;  %v1422_v38 = vpop.f32.mrf.mxu0  ;;  %v1374_v37 = vadd.f32 %v2026_v56, %v2024_v54  ;;  %v909_v54 = vadd.f32 %v1343_v27, %v225_v39  ;;  %v1392_v56 = vadd.f32 %v1391_v16, %v1390_v14  ;;  %v917_v39 = vadd.f32 %v1349_v15, %v235_v47 }
 0x112   :  { %v2074_v42 = vpop.f32.mrf.mxu1  ;;  %v1423_v27 = vadd.f32 %v1422_v38, %v1421_v36  ;;  %v2154_v3 = vld [vmem:[#allocation6_spill] sm:$0xff] }
 0x113   :  { %2145 = vst [vmem:[#allocation8_spill] sm:$0xff] %v2074_v42  ;;  %v1424_v43 = vpop.f32.mrf.mxu0  ;;  %v963_v22 = vadd.f32 %v1374_v37, %v898_v50  ;;  %v987_v0 = vadd.f32 %v1392_v56, %v922_v63  ;;  %v966_v37 = vadd.f32 %v1377_v1, %v901_v12  ;;  %v974_v9 = vadd.f32 %v1383_v62, %v909_v54  ;;  %v2153_v56 = vld [vmem:[#allocation5_spill] sm:$0xff] }
 0x114   :  { %v2076_v45 = vpop.f32.mrf.mxu1  ;;  %v982_v49 = vadd.f32 %v1389_v40, %v917_v39  ;;  %v1457_v5 = vadd.f32 %v2154_v3, %v2153_v56 }
 0x115   :  { %2146 = vst [vmem:[#allocation9_spill] sm:$0xff] %v2076_v45  ;;  %v1425_v46 = vpop.f32.mrf.mxu0  ;;  %v245_v45 = vpop.permute.xlu1 %244  ;;  %v1028_v12 = vadd.f32 %v1414_v31, %v963_v22  ;;  %v1039_v47 = vadd.f32 %v1423_v27, %v974_v9  ;;  %v1101_v22 = vadd.f32 %v1460_v8, %v1036_v11  ;;  %v1031_v32 = vadd.f32 %v1417_v6, %v966_v37 }
 0x116   :  { %v1465_v52 = vpop.f32.mrf.mxu1  ;;  %v925_v17 = vadd.f32 %v1355_v55, %v245_v45  ;;  %v1426_v14 = vadd.f32 %v1425_v46, %v1424_v43  ;;  %v2149_v45 = vld [vmem:[#allocation4_spill] sm:$0xff] }
 0x117   :  { %v1427_v29 = vpop.f32.mrf.mxu0  ;;  %v1454_v46 = vadd.f32 %v2149_v45, %v2148_v44  ;;  %v1096_v58 = vadd.f32 %v1457_v5, %v1031_v32 }
 0x118   :  { %v2080_v42 = vpop.f32.mrf.mxu1  ;;  %v990_v2 = vadd.f32 %v1395_v60, %v925_v17  ;;  %v1044_v41 = vadd.f32 %v1426_v14, %v979_v33  ;;  %v2151_v35 = vld [vmem:[#allocation7_spill] sm:$0xff] }
 0x119   :  { %v1428_v61 = vpop.f32.mrf.mxu0 }
 0x11a   :  { %v2084_v57 = vpop.f32.mrf.mxu1  ;;  %v1429_v36 = vadd.f32 %v1428_v61, %v1427_v29  ;;  %v2152_v53 = vld [vmem:[#allocation8_spill] sm:$0xff]  ;;  %v1093_v29 = vadd.f32 %v1454_v46, %v1028_v12 }
 0x11b   :  { %v1430_v59 = vpop.f32.mrf.mxu0  ;;  %v1463_v55 = vadd.f32 %v2152_v53, %v2151_v35 }
 0x11c   :  { %v1470_v19 = vpop.f32.mrf.mxu1  ;;  %v2150_v50 = vld [vmem:[#allocation9_spill] sm:$0xff]  ;;  %v1047_v61 = vadd.f32 %v1429_v36, %v982_v49 }
 0x11d   :  { %v1431_v26 = vpop.f32.mrf.mxu0  ;;  %v1466_v25 = vadd.f32 %v1465_v52, %v2150_v50  ;;  %v1104_v17 = vadd.f32 %v1463_v55, %v1039_v47 }
 0x11e   :  { %v1432_v34 = vadd.f32 %v1431_v26, %v1430_v59  ;;  %v1471_v16 = vpop.f32.mrf.mxu1 }
 0x11f   :  { %v1433_v24 = vpop.f32.mrf.mxu0  ;;  %v1472_v4 = vadd.f32 %v1471_v16, %v1470_v19  ;;  %v1109_v1 = vadd.f32 %v1466_v25, %v1044_v41  ;;  %v1469_v19 = vadd.f32 %v2084_v57, %v2080_v42 }
 0x120   :  { %v1052_v30 = vadd.f32 %v1432_v34, %v987_v0  ;;  %v1473_v21 = vpop.f32.mrf.mxu1 }
 0x121   :  { %v1434_v23 = vpop.f32.mrf.mxu0 }
 0x122   :  { %v1435_v18 = vadd.f32 %v1434_v23, %v1433_v24  ;;  %v1474_v38 = vpop.f32.mrf.mxu1  ;;  %v1117_v43 = vadd.f32 %v1472_v4, %v1052_v30  ;;  %v1112_v24 = vadd.f32 %v1469_v19, %v1047_v61 }
 0x123   :  { %v1475_v28 = vadd.f32 %v1474_v38, %v1473_v21 }
 0x124   :  { %v1055_v48 = vadd.f32 %v1435_v18, %v990_v2  ;;  %v1506_v51 = vpop.f32.mrf.mxu0 }
 0x125   :  { %v1166_v10 = vadd.f32 %v1506_v51, %v1101_v22  ;;  %v1510_v63 = vpop.f32.mrf.mxu1 }
 0x126   :  { %v1182_v13 = vadd.f32 %v1510_v63, %v1117_v43  ;;  %v1157_v59 = vpop.f32.mrf.mxu0  ;;  %v1120_v54 = vadd.f32 %v1475_v28, %v1055_v48 }
 0x127   :  { %v1190_v7 = vmax.f32 %v1166_v10, 0.0  ;;  %v1158_v15 = vadd.f32 %v1157_v59, %v1093_v29  ;;  %v1173_v52 = vpop.f32.mrf.mxu1 }
 0x128   :  { %v1194_v26 = vmax.f32 %v1182_v13, 0.0  ;;  %v1174_v62 = vadd.f32 %v1173_v52, %v1109_v1  ;;  %v1507_v0 = vpop.f32.mrf.mxu0 }
 0x129   :  { %1198 = vst [vmem:[%s2138_s3 + $0x10] sm:$0xff] %v1190_v7  ;;  %v1188_v31 = vmax.f32 %v1158_v15, 0.0  ;;  %v1169_v34 = vadd.f32 %v1507_v0, %v1104_v17  ;;  %v1511_v37 = vpop.f32.mrf.mxu1 }
 0x12a   :  { %1202 = vst [vmem:[%s2138_s3 + $0x30] sm:$0xff] %v1194_v26  ;;  %v1192_v60 = vmax.f32 %v1174_v62, 0.0  ;;  %v1185_v14 = vadd.f32 %v1511_v37, %v1120_v54  ;;  %v1160_v16 = vpop.f32.mrf.mxu0 }
 0x12b   :  { %1196 = vst [vmem:[%s2138_s3] sm:$0xff] %v1188_v31  ;;  %v1191_v42 = vmax.f32 %v1169_v34, 0.0  ;;  %v1161_v57 = vadd.f32 %v1160_v16, %v1096_v58  ;;  %v1176_v9 = vpop.f32.mrf.mxu1 }
 0x12c   :  { %1200 = vst [vmem:[%s2138_s3 + $0x20] sm:$0xff] %v1192_v60  ;;  %v1195_v11 = vmax.f32 %v1185_v14, 0.0  ;;  %v1177_v27 = vadd.f32 %v1176_v9, %v1112_v24 }
 0x12d   :  { %1199 = vst [vmem:[%s2138_s3 + $0x18] sm:$0xff] %v1191_v42  ;;  %v1189_v30 = vmax.f32 %v1161_v57, 0.0 }
 0x12e   :  { %1203 = vst [vmem:[%s2138_s3 + $0x38] sm:$0xff] %v1195_v11  ;;  %v1193_v33 = vmax.f32 %v1177_v27, 0.0 }
 0x12f   :  { %1197 = vst [vmem:[%s2138_s3 + $0x8] sm:$0xff] %v1189_v30 }
 0x130   :  { %1201 = vst [vmem:[%s2138_s3 + $0x28] sm:$0xff] %v1193_v33 }

// kernel: sketch_depth_colorizer.25
= control target key start
LH: loop header
LB: loop body
LE: loop exit
PB: predicated region body
PF: predicated region fallthrough
CT: control target
= control target key end

     0   :  { %v942_v1 = vmov 0   ;;  %vm475_vm0 = vcmask 523264   ;;  %s1183_s1 = inlined_call_operand.vmem [shape: bf16[576,128], index: 1, kind: input, shape index: {}]   ;;  %s1184_s0 = inlined_call_operand.vmem [shape: bf16[64,576], index: 0, kind: input, shape index: {}]   ;;  %s1185_s2 = inlined_call_operand.vmem [shape: f32[64,1], index: 2, kind: input, shape index: {}]   ;;  %s1186_s3 = inlined_call_operand.vmem [shape: f32[64,128], index: 3, kind: output, shape index: {}]  }
   0x1   :  { %v878_v0 = vld [vmem:[%s1183_s1 + $0x78] sm:$0xff]   ;;  %876 = vset.pattern.permute.xlu0 %v942_v1  ;;  %877 = vset.pattern.permute.xlu1 %v942_v1  ;;  %v882_v5 = vld [vmem:[%s1183_s1 + $0x70] sm:$0xff]   ;;  %v886_v9 = vld [vmem:[%s1183_s1 + $0x68] sm:$0xff]  }
   0x2   :  { %v879_v2 = vld [vmem:[%s1183_s1 + $0xf8] sm:$0xff]   ;;  %763 = vmatprep.subr.bf16.mxu0 %v878_v0  ;;  %v883_v6 = vld [vmem:[%s1183_s1 + $0xf0] sm:$0xff]   ;;  %v887_v10 = vld [vmem:[%s1183_s1 + $0xe8] sm:$0xff]  }
   0x3   :  { %v880_v3 = vld [vmem:[%s1183_s1 + $0x38] sm:$0xff]   ;;  %803 = vmatprep.subr.bf16.mxu1 %v879_v2  ;;  %v884_v7 = vld [vmem:[%s1183_s1 + $0x30] sm:$0xff]   ;;  %v888_v11 = vld [vmem:[%s1183_s1 + $0x28] sm:$0xff]  }
   0x4   :  { %v881_v4 = vld [vmem:[%s1183_s1 + $0xb8] sm:$0xff]   ;;  %764 = vmatpush3.bf16.msra.mxu0 %v880_v3  ;;  %v885_v8 = vld [vmem:[%s1183_s1 + $0xb0] sm:$0xff]   ;;  %v889_v12 = vld [vmem:[%s1183_s1 + $0xa8] sm:$0xff]  }
   0x5   :  { %804 = vmatpush3.bf16.msra.mxu1 %v881_v4  ;;  %765 = vmatprep.subr.bf16.mxu0 %v882_v5  ;;  %v890_v13 = vld [vmem:[%s1183_s1 + $0x60] sm:$0xff]   ;;  %v894_v17 = vld [vmem:[%s1183_s1 + $0x58] sm:$0xff]   ;;  %v898_v21 = vld [vmem:[%s1183_s1 + $0x50] sm:$0xff]  }
   0x6   :  { %805 = vmatprep.subr.bf16.mxu1 %v883_v6  ;;  %v891_v14 = vld [vmem:[%s1183_s1 + $0xe0] sm:$0xff]   ;;  %v895_v18 = vld [vmem:[%s1183_s1 + $0xd8] sm:$0xff]   ;;  %v899_v22 = vld [vmem:[%s1183_s1 + $0xd0] sm:$0xff]  }
   0x7   :  { %v892_v15 = vld [vmem:[%s1183_s1 + $0x20] sm:$0xff]   ;;  %v896_v19 = vld [vmem:[%s1183_s1 + $0x18] sm:$0xff]   ;;  %v900_v23 = vld [vmem:[%s1183_s1 + $0x10] sm:$0xff]  }
   0x8   :  { %766 = vmatpush3.bf16.msra.mxu0 %v884_v7  ;;  %v893_v16 = vld [vmem:[%s1183_s1 + $0xa0] sm:$0xff]   ;;  %v897_v20 = vld [vmem:[%s1183_s1 + $0x98] sm:$0xff]   ;;  %v901_v24 = vld [vmem:[%s1183_s1 + $0x90] sm:$0xff]  }
   0x9   :  { %806 = vmatpush3.bf16.msra.mxu1 %v885_v8  ;;  %767 = vmatprep.subr.bf16.mxu0 %v886_v9  ;;  %v902_v25 = vld [vmem:[%s1183_s1 + $0x48] sm:$0xff]   ;;  %v906_v29 = vld [vmem:[%s1183_s1 + $0x40] sm:$0xff]   ;;  %v916_v37 = vld [vmem:[%s1183_s1 + $0x118] sm:$0xff]  }
   0xa   :  { %807 = vmatprep.subr.bf16.mxu1 %v887_v10  ;;  %v903_v26 = vld [vmem:[%s1183_s1 + $0xc8] sm:$0xff]   ;;  %v907_v30 = vld [vmem:[%s1183_s1 + $0xc0] sm:$0xff]   ;;  %v923_v40 = vld [vmem:[%s1183_s1 + $0x110] sm:$0xff]  }
   0xb   :  { %v904_v27 = vld [vmem:[%s1183_s1 + $0x8] sm:$0xff]   ;;  %v908_v31 = vld [vmem:[%s1183_s1] sm:$0xff]   ;;  %v926_v44 = vld [vmem:[%s1184_s0 + $0x5c] ss:$20 sps:$4 sm:$0xff]  }
   0xc   :  { %768 = vmatpush3.bf16.msra.mxu0 %v888_v11  ;;  %v905_v28 = vld [vmem:[%s1183_s1 + $0x88] sm:$0xff]   ;;  %v909_v32 = vld [vmem:[%s1183_s1 + $0x80] sm:$0xff]   ;;  %v931_v49 = vld [vmem:[%s1184_s0 + $0x7c] ss:$20 sps:$4 sm:$0xff]  }
   0xd   :  { %808 = vmatpush3.bf16.msra.mxu1 %v889_v12  ;;  %769 = vmatprep.subr.bf16.mxu0 %v890_v13  ;;  %v910_v33 = vld [vmem:[%s1184_s0] ss:$20 sps:$4 sm:$0xff]   ;;  %v912_v34 = vld [vmem:[%s1184_s0 + $0x4] ss:$20 sps:$4 sm:$0xff]   ;;  %v913_v35 = vld [vmem:[%s1184_s0 + $0x8] ss:$20 sps:$4 sm:$0xff]  }
   0xe   :  { %809 = vmatprep.subr.bf16.mxu1 %v891_v14  ;;  %v915_v36 = vld [vmem:[%s1184_s0 + $0xc] ss:$20 sps:$4 sm:$0xff]   ;;  %520 = vmatprep.mubr.bf16.mxu0 %v912_v34  ;;  %v919_v39 = vld [vmem:[%s1184_s0 + $0x34] ss:$20 sps:$4 sm:$0xff]   ;;  %v922_v42 = vld [vmem:[%s1184_s0 + $0x30] ss:$20 sps:$4 sm:$0xff]  }
   0xf   :  { %585 = vmatprep.mubr.bf16.mxu1 %v915_v36  ;;  %v917_v38 = vld [vmem:[%s1184_s0 + $0x2c] ss:$20 sps:$4 sm:$0xff]   ;;  %v921_v41 = vld [vmem:[%s1184_s0 + $0x28] ss:$20 sps:$4 sm:$0xff]   ;;  %v928_v47 = vld [vmem:[%s1184_s0 + $0x50] ss:$20 sps:$4 sm:$0xff]  }
  0x10   :  { %770 = vmatpush3.bf16.msra.mxu0 %v892_v15  ;;  %v924_v43 = vld [vmem:[%s1184_s0 + $0x54] ss:$20 sps:$4 sm:$0xff]   ;;  %v937_v46 = vld [vmem:[%s1183_s1 + $0x100] sm:$0xff]   ;;  %v929_v48 = vld [vmem:[%s1184_s0 + $0x58] ss:$20 sps:$4 sm:$0xff]  }
  0x11   :  { %810 = vmatpush3.bf16.msra.mxu1 %v893_v16  ;;  %771 = vmatprep.subr.bf16.mxu0 %v894_v17  ;;  %v930_v45 = vld [vmem:[%s1183_s1 + $0x108] sm:$0xff]   ;;  %v933_v50 = vld [vmem:[%s1184_s0 + $0x84] ss:$20 sps:$4 sm:$0xff]   ;;  %v113_v52 = vld [vmem:[%s1185_s2 + $0x10] sm:$0xff] }
  0x12   :  { %811 = vmatprep.subr.bf16.mxu1 %v895_v18  ;;  %v111_v51 = vld [vmem:[%s1185_s2] sm:$0xff]  ;;  %v112_v53 = vld [vmem:[%s1185_s2 + $0x8] sm:$0xff]  ;;  %131 = vperm.xlu1 %877, %v113_v52   ;;  %v114_v54 = vld [vmem:[%s1185_s2 + $0x18] sm:$0xff] }
  0x13   :  { %121 = vperm.xlu0 %876, %v111_v51   ;;  %v935_v55 = vld [vmem:[%s1184_s0 + $0x78] ss:$20 sps:$4 sm:$0xff]   ;;  %v936_v56 = vld [vmem:[%s1184_s0 + $0x80] ss:$20 sps:$4 sm:$0xff]   ;;  %v938_v57 = vld [vmem:[%s1184_s0 + $0x10] ss:$20 sps:$4 sm:$0xff]  }
  0x14   :  { %772 = vmatpush3.bf16.msra.mxu0 %v896_v19  ;;  %v115_v58 = vld [vmem:[%s1185_s2 + $0x20] sm:$0xff]  ;;  %v116_v60 = vld [vmem:[%s1185_s2 + $0x28] sm:$0xff]  ;;  %v117_v61 = vld [vmem:[%s1185_s2 + $0x30] sm:$0xff] }
  0x15   :  { %812 = vmatpush3.bf16.msra.mxu1 %v897_v20  ;;  %773 = vmatprep.subr.bf16.mxu0 %v898_v21  ;;  %v939_v59 = vld [vmem:[%s1184_s0 + $0x60] ss:$20 sps:$4 sm:$0xff]   ;;  %v118_v62 = vld [vmem:[%s1185_s2 + $0x38] sm:$0xff] }
  0x16   :  { %813 = vmatprep.subr.bf16.mxu1 %v899_v22  ;;  %136 = vperm.xlu1 %877, %v114_v54   ;;  %v940_v63 = vld [vmem:[%s1184_s0 + $0x38] ss:$20 sps:$4 sm:$0xff]   ;;  %v941_v0 = vld [vmem:[%s1184_s0 + $0x88] ss:$20 sps:$4 sm:$0xff]  }
  0x17   :  { %126 = vperm.xlu0 %876, %v112_v53  }
  0x18   :  { %774 = vmatpush3.bf16.msra.mxu0 %v900_v23 }
  0x19   :  { %814 = vmatpush3.bf16.msra.mxu1 %v901_v24  ;;  %775 = vmatprep.subr.bf16.mxu0 %v902_v25 }
  0x1a   :  { %815 = vmatprep.subr.bf16.mxu1 %v903_v26  ;;  %146 = vperm.xlu1 %877, %v116_v60  }
  0x1b   :  { %141 = vperm.xlu0 %876, %v115_v58  }
  0x1c   :  { %776 = vmatpush3.bf16.msra.mxu0 %v904_v27 }
  0x1d   :  { %816 = vmatpush3.bf16.msra.mxu1 %v905_v28  ;;  %777 = vmatprep.subr.bf16.mxu0 %v906_v29 }
  0x1e   :  { %817 = vmatprep.subr.bf16.mxu1 %v907_v30  ;;  %156 = vperm.xlu1 %877, %v118_v62  }
  0x1f   :  { %151 = vperm.xlu0 %876, %v117_v61  }
  0x20   :  { %778 = vmatpush3.bf16.msra.mxu0 %v908_v31 }
  0x21   :  { %818 = vmatpush3.bf16.msra.mxu1 %v909_v32  ;;  %851 = vmatprep.subr.bf16.mxu0 %v916_v37 }
  0x22   :  { %867 = vmatprep.subr.bf16.mxu1 %v916_v37 }
  0x23   :  { %521 = vmatmul.mubr.bf16.vlgmr.msra.gmra.mxu0 %v910_v33 }
  0x24   :  { %586 = vmatmul.mubr.bf16.vlgmr.msra.gmra.mxu1 %v913_v35  ;;  %852 = vmatpush3.bf16.msra.mxu0 %v916_v37 }
  0x25   :  { %871 = vmatpush3.bf16.msra.mxu1 %v916_v37  ;;  %528 = vmatprep.mubr.bf16.mxu0 %v917_v38 }
  0x26   :  { %593 = vmatprep.mubr.bf16.mxu1 %v919_v39  ;;  %853 = vmatprep.subr.bf16.mxu0 %v923_v40 }
  0x27   :  { %868 = vmatprep.subr.bf16.mxu1 %v923_v40 }
  0x28   :  { %854 = vmatpush3.bf16.msra.mxu0 %v923_v40 }
  0x29   :  { %872 = vmatpush3.bf16.msra.mxu1 %v923_v40  ;;  %855 = vmatprep.subr.bf16.mxu0 %v930_v45 }
  0x2a   :  { %869 = vmatprep.subr.bf16.mxu1 %v930_v45 }
  0x2b   :  { %529 = vmatmul.mubr.bf16.gmra.mxu0 %v921_v41 }
  0x2c   :  { %594 = vmatmul.mubr.bf16.gmra.mxu1 %v922_v42  ;;  %536 = vmatprep.mubr.bf16.mxu0 %v924_v43 }
  0x2d   :  { %601 = vmatprep.mubr.bf16.mxu1 %v926_v44  ;;  %856 = vmatpush3.bf16.msra.mxu0 %v930_v45 }
  0x2e   :  { %873 = vmatpush3.bf16.msra.mxu1 %v930_v45  ;;  %857 = vmatprep.subr.bf16.mxu0 %v937_v46 }
  0x2f   :  { %870 = vmatprep.subr.bf16.mxu1 %v937_v46 }
  0x31   :  { %858 = vmatpush3.bf16.msra.mxu0 %v937_v46 }
  0x32   :  { %874 = vmatpush3.bf16.msra.mxu1 %v937_v46 }
  0x33   :  { %537 = vmatmul.mubr.bf16.gmra.mxu0 %v928_v47 }
  0x34   :  { %602 = vmatmul.mubr.bf16.gmra.mxu1 %v929_v48  ;;  %544 = vmatprep.mubr.bf16.mxu0 %v931_v49 }
  0x35   :  { %609 = vmatprep.mubr.bf16.mxu1 %v933_v50 }
  0x3b   :  { %545 = vmatmul.mubr.bf16.gmra.mxu0 %v935_v55 }
  0x3c   :  { %610 = vmatmul.mubr.bf16.gmra.mxu1 %v936_v56  ;;  %859 = vmatprep.mubr.msk.bf16.mxu0 %vm475_vm0, %v938_v57 }
  0x3d   :  { %863 = vmatprep.mubr.msk.bf16.mxu1 %vm475_vm0, %v939_v59 }
  0x43   :  { %860 = vmatmul.mubr.msk.bf16.vlgmr.msra.gmra.mxu0 %vm475_vm0, %v940_v63 }
  0x44   :  { %864 = vmatmul.mubr.msk.bf16.vlgmr.msra.gmra.mxu1 %vm475_vm0, %v941_v0 }
  0x8d   :  { %v132_v16 = vpop.permute.xlu1 %131 }
  0x8e   :  { %v122_v13 = vpop.permute.xlu0 %121 }
  0x91   :  { %v137_v24 = vpop.permute.xlu1 %136 }
  0x92   :  { %v127_v21 = vpop.permute.xlu0 %126 }
  0x95   :  { %v147_v35 = vpop.permute.xlu1 %146 }
  0x96   :  { %v142_v27 = vpop.permute.xlu0 %141 }
  0x99   :  { %v157_v60 = vpop.permute.xlu1 %156 }
  0x9a   :  { %v152_v43 = vpop.permute.xlu0 %151 }
  0xe3   :  { %v779_v1 = vpop.f32.mrf.mxu0 }
  0xe4   :  { %v819_v2 = vpop.f32.mrf.mxu1 }
  0xe5   :  { %v780_v3 = vpop.f32.mrf.mxu0 }
  0xe6   :  { %v820_v4 = vpop.f32.mrf.mxu1  ;;  %v781_v31 = vadd.f32 %v780_v3, %v779_v1 }
  0xe7   :  { %v782_v5 = vpop.f32.mrf.mxu0  ;;  %v821_v49 = vadd.f32 %v820_v4, %v819_v2 }
  0xe8   :  { %v822_v6 = vpop.f32.mrf.mxu1  ;;  %v523_v41 = vadd.f32 %v781_v31, %v122_v13 }
  0xe9   :  { %v783_v7 = vpop.f32.mrf.mxu0 }
  0xea   :  { %v823_v8 = vpop.f32.mrf.mxu1  ;;  %v784_v42 = vadd.f32 %v783_v7, %v782_v5  ;;  %v588_v62 = vadd.f32 %v821_v49, %v523_v41 }
  0xeb   :  { %v785_v9 = vpop.f32.mrf.mxu0  ;;  %v824_v7 = vadd.f32 %v823_v8, %v822_v6 }
  0xec   :  { %v825_v10 = vpop.f32.mrf.mxu1  ;;  %v526_v58 = vadd.f32 %v784_v42, %v127_v21 }
  0xed   :  { %v786_v11 = vpop.f32.mrf.mxu0 }
  0xee   :  { %v826_v12 = vpop.f32.mrf.mxu1  ;;  %v787_v29 = vadd.f32 %v786_v11, %v785_v9  ;;  %v591_v8 = vadd.f32 %v824_v7, %v526_v58 }
  0xef   :  { %v788_v14 = vpop.f32.mrf.mxu0  ;;  %v827_v45 = vadd.f32 %v826_v12, %v825_v10 }
  0xf0   :  { %v828_v15 = vpop.f32.mrf.mxu1  ;;  %v531_v37 = vadd.f32 %v787_v29, %v132_v16 }
  0xf1   :  { %v789_v17 = vpop.f32.mrf.mxu0 }
  0xf2   :  { %v829_v18 = vpop.f32.mrf.mxu1  ;;  %v790_v38 = vadd.f32 %v789_v17, %v788_v14  ;;  %v596_v56 = vadd.f32 %v827_v45, %v531_v37 }
  0xf3   :  { %v791_v19 = vpop.f32.mrf.mxu0  ;;  %v830_v63 = vadd.f32 %v829_v18, %v828_v15 }
  0xf4   :  { %v831_v20 = vpop.f32.mrf.mxu1  ;;  %v534_v53 = vadd.f32 %v790_v38, %v137_v24 }
  0xf5   :  { %v792_v22 = vpop.f32.mrf.mxu0 }
  0xf6   :  { %v832_v23 = vpop.f32.mrf.mxu1  ;;  %v793_v34 = vadd.f32 %v792_v22, %v791_v19  ;;  %v599_v14 = vadd.f32 %v830_v63, %v534_v53 }
  0xf7   :  { %v794_v25 = vpop.f32.mrf.mxu0  ;;  %v833_v59 = vadd.f32 %v832_v23, %v831_v20 }
  0xf8   :  { %v834_v26 = vpop.f32.mrf.mxu1  ;;  %v539_v50 = vadd.f32 %v793_v34, %v142_v27 }
  0xf9   :  { %v795_v28 = vpop.f32.mrf.mxu0 }
  0xfa   :  { %v835_v30 = vpop.f32.mrf.mxu1  ;;  %v796_v51 = vadd.f32 %v795_v28, %v794_v25  ;;  %v604_v10 = vadd.f32 %v833_v59, %v539_v50 }
  0xfb   :  { %v797_v32 = vpop.f32.mrf.mxu0  ;;  %v836_v17 = vadd.f32 %v835_v30, %v834_v26 }
  0xfc   :  { %v837_v33 = vpop.f32.mrf.mxu1  ;;  %v542_v2 = vadd.f32 %v796_v51, %v147_v35 }
  0xfd   :  { %v798_v36 = vpop.f32.mrf.mxu0 }
  0xfe   :  { %v799_v39 = vadd.f32 %v798_v36, %v797_v32  ;;  %v838_v40 = vpop.f32.mrf.mxu1  ;;  %v607_v25 = vadd.f32 %v836_v17, %v542_v2 }
  0xff   :  { %v800_v44 = vpop.f32.mrf.mxu0  ;;  %v839_v47 = vadd.f32 %v838_v40, %v837_v33 }
 0x100   :  { %v547_v46 = vadd.f32 %v799_v39, %v152_v43  ;;  %v840_v48 = vpop.f32.mrf.mxu1 }
 0x101   :  { %v801_v52 = vpop.f32.mrf.mxu0 }
 0x102   :  { %v802_v54 = vadd.f32 %v801_v52, %v800_v44  ;;  %v841_v55 = vpop.f32.mrf.mxu1  ;;  %v612_v57 = vadd.f32 %v839_v47, %v547_v46 }
 0x103   :  { %v861_v61 = vpop.f32.mrf.mxu0  ;;  %v842_v1 = vadd.f32 %v841_v55, %v840_v48 }
 0x104   :  { %v550_v0 = vadd.f32 %v802_v54, %v157_v60  ;;  %v661_v3 = vadd.f32 %v861_v61, %v596_v56  ;;  %v865_v5 = vpop.f32.mrf.mxu1 }
 0x105   :  { %v677_v4 = vadd.f32 %v865_v5, %v612_v57  ;;  %v652_v9 = vpop.f32.mrf.mxu0 }
 0x106   :  { %v685_v11 = vmax.f32 %v661_v3, 0.0  ;;  %v653_v12 = vadd.f32 %v652_v9, %v588_v62  ;;  %v668_v13 = vpop.f32.mrf.mxu1  ;;  %v615_v16 = vadd.f32 %v842_v1, %v550_v0 }
 0x107   :  { %v689_v19 = vmax.f32 %v677_v4, 0.0  ;;  %v669_v20 = vadd.f32 %v668_v13, %v604_v10  ;;  %v862_v21 = vpop.f32.mrf.mxu0 }
 0x108   :  { %693 = vst [vmem:[%s1186_s3 + $0x10] sm:$0xff] %v685_v11  ;;  %v683_v15 = vmax.f32 %v653_v12, 0.0  ;;  %v664_v18 = vadd.f32 %v862_v21, %v599_v14  ;;  %v866_v6 = vpop.f32.mrf.mxu1 }
 0x109   :  { %697 = vst [vmem:[%s1186_s3 + $0x30] sm:$0xff] %v689_v19  ;;  %v687_v22 = vmax.f32 %v669_v20, 0.0  ;;  %v680_v23 = vadd.f32 %v866_v6, %v615_v16  ;;  %v655_v24 = vpop.f32.mrf.mxu0 }
 0x10a   :  { %691 = vst [vmem:[%s1186_s3] sm:$0xff] %v683_v15  ;;  %v686_v26 = vmax.f32 %v664_v18, 0.0  ;;  %v656_v27 = vadd.f32 %v655_v24, %v591_v8  ;;  %v671_v28 = vpop.f32.mrf.mxu1 }
 0x10b   :  { %695 = vst [vmem:[%s1186_s3 + $0x20] sm:$0xff] %v687_v22  ;;  %v690_v29 = vmax.f32 %v680_v23, 0.0  ;;  %v672_v30 = vadd.f32 %v671_v28, %v607_v25 }
 0x10c   :  { %694 = vst [vmem:[%s1186_s3 + $0x18] sm:$0xff] %v686_v26  ;;  %v684_v31 = vmax.f32 %v656_v27, 0.0 }
 0x10d   :  { %698 = vst [vmem:[%s1186_s3 + $0x38] sm:$0xff] %v690_v29  ;;  %v688_v32 = vmax.f32 %v672_v30, 0.0 }
 0x10e   :  { %692 = vst [vmem:[%s1186_s3 + $0x8] sm:$0xff] %v684_v31 }
 0x10f   :  { %696 = vst [vmem:[%s1186_s3 + $0x28] sm:$0xff] %v688_v32 }

// kernel: sketch_depth_colorizer.26
= control target key start
LH: loop header
LB: loop body
LE: loop exit
PB: predicated region body
PF: predicated region fallthrough
CT: control target
= control target key end

     0   :  { %v1223_v1 = vmov 0   ;;  %s1676_s1 = inlined_call_operand.vmem [shape: bf16[512,256], index: 1, kind: input, shape index: {}]   ;;  %s1677_s0 = inlined_call_operand.vmem [shape: bf16[128,512], index: 0, kind: input, shape index: {}]   ;;  %s1678_s2 = inlined_call_operand.vmem [shape: f32[128,1], index: 2, kind: input, shape index: {}]   ;;  %s1679_s3 = inlined_call_operand.vmem [shape: f32[128,256], index: 3, kind: output, shape index: {}]  }
   0x1   :  { %v1079_v0 = vld [vmem:[%s1676_s1 + $0x74] ss:$8 sps:$4 sm:$0xff]   ;;  %1077 = vset.pattern.permute.xlu0 %v1223_v1  ;;  %1078 = vset.pattern.permute.xlu1 %v1223_v1  ;;  %v1083_v3 = vld [vmem:[%s1676_s1 + $0x70] ss:$8 sps:$4 sm:$0xff]   ;;  %v1085_v5 = vld [vmem:[%s1676_s1 + $0x64] ss:$8 sps:$4 sm:$0xff]  }
   0x2   :  { %v1081_v2 = vld [vmem:[%s1676_s1 + $0x174] ss:$8 sps:$4 sm:$0xff]   ;;  %686 = vmatprep.subr.bf16.mxu0 %v1079_v0  ;;  %v1084_v4 = vld [vmem:[%s1676_s1 + $0x170] ss:$8 sps:$4 sm:$0xff]   ;;  %v1087_v6 = vld [vmem:[%s1676_s1 + $0x164] ss:$8 sps:$4 sm:$0xff]  }
   0x3   :  { %799 = vmatprep.subr.bf16.mxu1 %v1081_v2  ;;  %687 = vmatpush1.bf16.msra.mxu0 %v1083_v3  ;;  %v1089_v7 = vld [vmem:[%s1676_s1 + $0x60] ss:$8 sps:$4 sm:$0xff]   ;;  %v1091_v9 = vld [vmem:[%s1676_s1 + $0x54] ss:$8 sps:$4 sm:$0xff]   ;;  %v1095_v11 = vld [vmem:[%s1676_s1 + $0x50] ss:$8 sps:$4 sm:$0xff]  }
   0x4   :  { %800 = vmatpush1.bf16.msra.mxu1 %v1084_v4  ;;  %688 = vmatprep.subr.bf16.mxu0 %v1085_v5  ;;  %v1090_v8 = vld [vmem:[%s1676_s1 + $0x160] ss:$8 sps:$4 sm:$0xff]   ;;  %v1093_v10 = vld [vmem:[%s1676_s1 + $0x154] ss:$8 sps:$4 sm:$0xff]   ;;  %v1096_v12 = vld [vmem:[%s1676_s1 + $0x150] ss:$8 sps:$4 sm:$0xff]  }
   0x5   :  { %801 = vmatprep.subr.bf16.mxu1 %v1087_v6  ;;  %v1097_v13 = vld [vmem:[%s1676_s1 + $0x44] ss:$8 sps:$4 sm:$0xff]   ;;  %v1101_v15 = vld [vmem:[%s1676_s1 + $0x40] ss:$8 sps:$4 sm:$0xff]   ;;  %v1103_v17 = vld [vmem:[%s1676_s1 + $0x34] ss:$8 sps:$4 sm:$0xff]  }
   0x6   :  { %v1099_v14 = vld [vmem:[%s1676_s1 + $0x144] ss:$8 sps:$4 sm:$0xff]   ;;  %v1102_v16 = vld [vmem:[%s1676_s1 + $0x140] ss:$8 sps:$4 sm:$0xff]   ;;  %v1105_v18 = vld [vmem:[%s1676_s1 + $0x134] ss:$8 sps:$4 sm:$0xff]  }
   0x7   :  { %689 = vmatpush1.bf16.msra.mxu0 %v1089_v7  ;;  %v1107_v19 = vld [vmem:[%s1676_s1 + $0x30] ss:$8 sps:$4 sm:$0xff]   ;;  %v1109_v21 = vld [vmem:[%s1676_s1 + $0x24] ss:$8 sps:$4 sm:$0xff]   ;;  %v1113_v23 = vld [vmem:[%s1676_s1 + $0x20] ss:$8 sps:$4 sm:$0xff]  }
   0x8   :  { %802 = vmatpush1.bf16.msra.mxu1 %v1090_v8  ;;  %690 = vmatprep.subr.bf16.mxu0 %v1091_v9  ;;  %v1108_v20 = vld [vmem:[%s1676_s1 + $0x130] ss:$8 sps:$4 sm:$0xff]   ;;  %v1111_v22 = vld [vmem:[%s1676_s1 + $0x124] ss:$8 sps:$4 sm:$0xff]   ;;  %v1114_v24 = vld [vmem:[%s1676_s1 + $0x120] ss:$8 sps:$4 sm:$0xff]  }
   0x9   :  { %803 = vmatprep.subr.bf16.mxu1 %v1093_v10  ;;  %v1115_v25 = vld [vmem:[%s1676_s1 + $0x14] ss:$8 sps:$4 sm:$0xff]   ;;  %v1119_v27 = vld [vmem:[%s1676_s1 + $0x10] ss:$8 sps:$4 sm:$0xff]   ;;  %v1121_v29 = vld [vmem:[%s1676_s1 + $0x4] ss:$8 sps:$4 sm:$0xff]  }
   0xa   :  { %v1117_v26 = vld [vmem:[%s1676_s1 + $0x114] ss:$8 sps:$4 sm:$0xff]   ;;  %v1120_v28 = vld [vmem:[%s1676_s1 + $0x110] ss:$8 sps:$4 sm:$0xff]   ;;  %v1123_v30 = vld [vmem:[%s1676_s1 + $0x104] ss:$8 sps:$4 sm:$0xff]  }
   0xb   :  { %691 = vmatpush1.bf16.msra.mxu0 %v1095_v11  ;;  %v1125_v31 = vld [vmem:[%s1676_s1] ss:$8 sps:$4 sm:$0xff]   ;;  %v1127_v33 = vld [vmem:[%s1676_s1 + $0xf4] ss:$8 sps:$4 sm:$0xff]   ;;  %v1131_v35 = vld [vmem:[%s1676_s1 + $0xf0] ss:$8 sps:$4 sm:$0xff]  }
   0xc   :  { %804 = vmatpush1.bf16.msra.mxu1 %v1096_v12  ;;  %692 = vmatprep.subr.bf16.mxu0 %v1097_v13  ;;  %v1126_v32 = vld [vmem:[%s1676_s1 + $0x100] ss:$8 sps:$4 sm:$0xff]   ;;  %v1129_v34 = vld [vmem:[%s1676_s1 + $0x1f4] ss:$8 sps:$4 sm:$0xff]   ;;  %v1132_v36 = vld [vmem:[%s1676_s1 + $0x1f0] ss:$8 sps:$4 sm:$0xff]  }
   0xd   :  { %805 = vmatprep.subr.bf16.mxu1 %v1099_v14  ;;  %v1133_v37 = vld [vmem:[%s1676_s1 + $0xe4] ss:$8 sps:$4 sm:$0xff]   ;;  %v1137_v39 = vld [vmem:[%s1676_s1 + $0xe0] ss:$8 sps:$4 sm:$0xff]   ;;  %v1139_v41 = vld [vmem:[%s1676_s1 + $0xd4] ss:$8 sps:$4 sm:$0xff]  }
   0xe   :  { %v1135_v38 = vld [vmem:[%s1676_s1 + $0x1e4] ss:$8 sps:$4 sm:$0xff]   ;;  %v1138_v40 = vld [vmem:[%s1676_s1 + $0x1e0] ss:$8 sps:$4 sm:$0xff]   ;;  %v1141_v42 = vld [vmem:[%s1676_s1 + $0x1d4] ss:$8 sps:$4 sm:$0xff]  }
   0xf   :  { %693 = vmatpush1.bf16.msra.mxu0 %v1101_v15  ;;  %v1143_v43 = vld [vmem:[%s1676_s1 + $0xd0] ss:$8 sps:$4 sm:$0xff]   ;;  %v1145_v45 = vld [vmem:[%s1676_s1 + $0xc4] ss:$8 sps:$4 sm:$0xff]   ;;  %v1149_v47 = vld [vmem:[%s1676_s1 + $0xc0] ss:$8 sps:$4 sm:$0xff]  }
  0x10   :  { %806 = vmatpush1.bf16.msra.mxu1 %v1102_v16  ;;  %694 = vmatprep.subr.bf16.mxu0 %v1103_v17  ;;  %v1144_v44 = vld [vmem:[%s1676_s1 + $0x1d0] ss:$8 sps:$4 sm:$0xff]   ;;  %v1147_v46 = vld [vmem:[%s1676_s1 + $0x1c4] ss:$8 sps:$4 sm:$0xff]   ;;  %v1150_v48 = vld [vmem:[%s1676_s1 + $0x1c0] ss:$8 sps:$4 sm:$0xff]  }
  0x11   :  { %807 = vmatprep.subr.bf16.mxu1 %v1105_v18  ;;  %v1151_v49 = vld [vmem:[%s1676_s1 + $0xb4] ss:$8 sps:$4 sm:$0xff]   ;;  %v1155_v53 = vld [vmem:[%s1676_s1 + $0xb0] ss:$8 sps:$4 sm:$0xff]   ;;  %v1157_v55 = vld [vmem:[%s1676_s1 + $0xa4] ss:$8 sps:$4 sm:$0xff]  }
  0x12   :  { %v1177_v50 = vld [vmem:[%s1677_s0 + $0x4] ss:$16 sps:$4 sm:$0xff]   ;;  %v1180_v52 = vld [vmem:[%s1677_s0 + $0xc] ss:$16 sps:$4 sm:$0xff]   ;;  %v1156_v54 = vld [vmem:[%s1676_s1 + $0x1b0] ss:$8 sps:$4 sm:$0xff]  }
  0x13   :  { %695 = vmatpush1.bf16.msra.mxu0 %v1107_v19  ;;  %v1153_v51 = vld [vmem:[%s1676_s1 + $0x1b4] ss:$8 sps:$4 sm:$0xff]   ;;  %718 = vmatprep.mubr.bf16.mxu0 %v1177_v50  ;;  %v1159_v56 = vld [vmem:[%s1676_s1 + $0x1a4] ss:$8 sps:$4 sm:$0xff]   ;;  %v1161_v57 = vld [vmem:[%s1676_s1 + $0xa0] ss:$8 sps:$4 sm:$0xff]  }
  0x14   :  { %808 = vmatpush1.bf16.msra.mxu1 %v1108_v20  ;;  %696 = vmatprep.subr.bf16.mxu0 %v1109_v21  ;;  %v1162_v58 = vld [vmem:[%s1676_s1 + $0x1a0] ss:$8 sps:$4 sm:$0xff]   ;;  %v1163_v59 = vld [vmem:[%s1676_s1 + $0x94] ss:$8 sps:$4 sm:$0xff]   ;;  %v1167_v61 = vld [vmem:[%s1676_s1 + $0x90] ss:$8 sps:$4 sm:$0xff]  }
  0x15   :  { %809 = vmatprep.subr.bf16.mxu1 %v1111_v22  ;;  %831 = vmatprep.mubr.bf16.mxu1 %v1180_v52  ;;  %v1165_v60 = vld [vmem:[%s1676_s1 + $0x194] ss:$8 sps:$4 sm:$0xff]   ;;  %v1168_v62 = vld [vmem:[%s1676_s1 + $0x190] ss:$8 sps:$4 sm:$0xff]   ;;  %v1169_v63 = vld [vmem:[%s1676_s1 + $0x84] ss:$8 sps:$4 sm:$0xff]  }
  0x16   :  { %v1171_v0 = vld [vmem:[%s1676_s1 + $0x184] ss:$8 sps:$4 sm:$0xff]   ;;  %v1173_v1 = vld [vmem:[%s1676_s1 + $0x80] ss:$8 sps:$4 sm:$0xff]   ;;  %v112_v8 = vld [vmem:[%s1678_s2 + $0x10] sm:$0xff] }
  0x17   :  { %697 = vmatpush1.bf16.msra.mxu0 %v1113_v23  ;;  %v1174_v2 = vld [vmem:[%s1676_s1 + $0x180] ss:$8 sps:$4 sm:$0xff]   ;;  %v1181_v5 = vld [vmem:[%s1677_s0 + $0x24] ss:$16 sps:$4 sm:$0xff]   ;;  %v1183_v6 = vld [vmem:[%s1677_s0 + $0x2c] ss:$16 sps:$4 sm:$0xff]   ;;  %138 = vperm.xlu1 %1078, %v112_v8  }
  0x18   :  { %810 = vmatpush1.bf16.msra.mxu1 %v1114_v24  ;;  %698 = vmatprep.subr.bf16.mxu0 %v1115_v25  ;;  %v1175_v3 = vld [vmem:[%s1677_s0] ss:$16 sps:$4 sm:$0xff]   ;;  %v1178_v4 = vld [vmem:[%s1677_s0 + $0x8] ss:$16 sps:$4 sm:$0xff]   ;;  %v1187_v15 = vld [vmem:[%s1677_s0 + $0x44] ss:$16 sps:$4 sm:$0xff]  }
  0x19   :  { %811 = vmatprep.subr.bf16.mxu1 %v1117_v26  ;;  %v110_v7 = vld [vmem:[%s1678_s2] sm:$0xff]  ;;  %v111_v9 = vld [vmem:[%s1678_s2 + $0x8] sm:$0xff]  ;;  %v113_v10 = vld [vmem:[%s1678_s2 + $0x18] sm:$0xff] }
  0x1a   :  { %128 = vperm.xlu0 %1077, %v110_v7   ;;  %v115_v11 = vld [vmem:[%s1678_s2 + $0x28] sm:$0xff]  ;;  %v114_v12 = vld [vmem:[%s1678_s2 + $0x20] sm:$0xff]  ;;  %v117_v17 = vld [vmem:[%s1678_s2 + $0x38] sm:$0xff] }
  0x1b   :  { %699 = vmatpush1.bf16.msra.mxu0 %v1119_v27  ;;  %143 = vperm.xlu1 %1078, %v113_v10   ;;  %v1185_v13 = vld [vmem:[%s1677_s0 + $0x20] ss:$16 sps:$4 sm:$0xff]   ;;  %v1186_v14 = vld [vmem:[%s1677_s0 + $0x28] ss:$16 sps:$4 sm:$0xff]   ;;  %v1189_v16 = vld [vmem:[%s1677_s0 + $0x4c] ss:$16 sps:$4 sm:$0xff]  }
  0x1c   :  { %812 = vmatpush1.bf16.msra.mxu1 %v1120_v28  ;;  %700 = vmatprep.subr.bf16.mxu0 %v1121_v29  ;;  %v116_v18 = vld [vmem:[%s1678_s2 + $0x30] sm:$0xff]  ;;  %v119_v19 = vld [vmem:[%s1678_s2 + $0x48] sm:$0xff]  ;;  %v118_v20 = vld [vmem:[%s1678_s2 + $0x40] sm:$0xff] }
  0x1d   :  { %813 = vmatprep.subr.bf16.mxu1 %v1123_v30  ;;  %v1191_v21 = vld [vmem:[%s1677_s0 + $0x40] ss:$16 sps:$4 sm:$0xff]   ;;  %v1192_v22 = vld [vmem:[%s1677_s0 + $0x48] ss:$16 sps:$4 sm:$0xff]   ;;  %v1193_v23 = vld [vmem:[%s1677_s0 + $0x64] ss:$16 sps:$4 sm:$0xff]  }
  0x1e   :  { %133 = vperm.xlu0 %1077, %v111_v9   ;;  %v1195_v24 = vld [vmem:[%s1677_s0 + $0x6c] ss:$16 sps:$4 sm:$0xff]   ;;  %v120_v26 = vld [vmem:[%s1678_s2 + $0x50] sm:$0xff]  ;;  %v122_v28 = vld [vmem:[%s1678_s2 + $0x60] sm:$0xff] }
  0x1f   :  { %701 = vmatpush1.bf16.msra.mxu0 %v1125_v31  ;;  %153 = vperm.xlu1 %1078, %v115_v11   ;;  %v121_v25 = vld [vmem:[%s1678_s2 + $0x58] sm:$0xff]  ;;  %v123_v27 = vld [vmem:[%s1678_s2 + $0x68] sm:$0xff]  ;;  %v1197_v29 = vld [vmem:[%s1677_s0 + $0x60] ss:$16 sps:$4 sm:$0xff]  }
  0x20   :  { %814 = vmatpush1.bf16.msra.mxu1 %v1126_v32  ;;  %702 = vmatprep.subr.bf16.mxu0 %v1127_v33  ;;  %v1198_v30 = vld [vmem:[%s1677_s0 + $0x68] ss:$16 sps:$4 sm:$0xff]   ;;  %v1199_v31 = vld [vmem:[%s1677_s0 + $0x84] ss:$16 sps:$4 sm:$0xff]   ;;  %v1201_v32 = vld [vmem:[%s1677_s0 + $0x8c] ss:$16 sps:$4 sm:$0xff]  }
  0x21   :  { %815 = vmatprep.subr.bf16.mxu1 %v1129_v34  ;;  %v125_v33 = vld [vmem:[%s1678_s2 + $0x78] sm:$0xff]  ;;  %v124_v34 = vld [vmem:[%s1678_s2 + $0x70] sm:$0xff] }
  0x22   :  { %148 = vperm.xlu0 %1077, %v114_v12  }
  0x23   :  { %703 = vmatpush2.bf16.msra.mxu0 %v1131_v35  ;;  %163 = vperm.xlu1 %1078, %v117_v17   ;;  %v1203_v35 = vld [vmem:[%s1677_s0 + $0x80] ss:$16 sps:$4 sm:$0xff]  }
  0x24   :  { %816 = vmatpush2.bf16.msra.mxu1 %v1132_v36  ;;  %704 = vmatprep.subr.bf16.mxu0 %v1133_v37  ;;  %v1204_v36 = vld [vmem:[%s1677_s0 + $0x88] ss:$16 sps:$4 sm:$0xff]   ;;  %v1205_v37 = vld [vmem:[%s1677_s0 + $0xa4] ss:$16 sps:$4 sm:$0xff]  }
  0x25   :  { %817 = vmatprep.subr.bf16.mxu1 %v1135_v38  ;;  %v1207_v38 = vld [vmem:[%s1677_s0 + $0xac] ss:$16 sps:$4 sm:$0xff]  }
  0x26   :  { %158 = vperm.xlu0 %1077, %v116_v18  }
  0x27   :  { %705 = vmatpush2.bf16.msra.mxu0 %v1137_v39  ;;  %173 = vperm.xlu1 %1078, %v119_v19   ;;  %v1209_v39 = vld [vmem:[%s1677_s0 + $0xa0] ss:$16 sps:$4 sm:$0xff]  }
  0x28   :  { %818 = vmatpush2.bf16.msra.mxu1 %v1138_v40  ;;  %706 = vmatprep.subr.bf16.mxu0 %v1139_v41  ;;  %v1210_v40 = vld [vmem:[%s1677_s0 + $0xa8] ss:$16 sps:$4 sm:$0xff]   ;;  %v1211_v41 = vld [vmem:[%s1677_s0 + $0xc4] ss:$16 sps:$4 sm:$0xff]  }
  0x29   :  { %819 = vmatprep.subr.bf16.mxu1 %v1141_v42  ;;  %v1213_v42 = vld [vmem:[%s1677_s0 + $0xcc] ss:$16 sps:$4 sm:$0xff]  }
  0x2a   :  { %168 = vperm.xlu0 %1077, %v118_v20  }
  0x2b   :  { %707 = vmatpush2.bf16.msra.mxu0 %v1143_v43  ;;  %183 = vperm.xlu1 %1078, %v121_v25   ;;  %v1215_v43 = vld [vmem:[%s1677_s0 + $0xc0] ss:$16 sps:$4 sm:$0xff]  }
  0x2c   :  { %820 = vmatpush2.bf16.msra.mxu1 %v1144_v44  ;;  %708 = vmatprep.subr.bf16.mxu0 %v1145_v45  ;;  %v1216_v44 = vld [vmem:[%s1677_s0 + $0xc8] ss:$16 sps:$4 sm:$0xff]   ;;  %v1217_v45 = vld [vmem:[%s1677_s0 + $0xe4] ss:$16 sps:$4 sm:$0xff]  }
  0x2d   :  { %821 = vmatprep.subr.bf16.mxu1 %v1147_v46  ;;  %v1219_v46 = vld [vmem:[%s1677_s0 + $0xec] ss:$16 sps:$4 sm:$0xff]  }
  0x2e   :  { %178 = vperm.xlu0 %1077, %v120_v26  }
  0x2f   :  { %709 = vmatpush2.bf16.msra.mxu0 %v1149_v47  ;;  %193 = vperm.xlu1 %1078, %v123_v27   ;;  %v1221_v47 = vld [vmem:[%s1677_s0 + $0xe0] ss:$16 sps:$4 sm:$0xff]  }
  0x30   :  { %822 = vmatpush2.bf16.msra.mxu1 %v1150_v48  ;;  %710 = vmatprep.subr.bf16.mxu0 %v1151_v49  ;;  %v1222_v48 = vld [vmem:[%s1677_s0 + $0xe8] ss:$16 sps:$4 sm:$0xff]  }
  0x31   :  { %823 = vmatprep.subr.bf16.mxu1 %v1153_v51 }
  0x32   :  { %188 = vperm.xlu0 %1077, %v122_v28  }
  0x33   :  { %711 = vmatpush2.bf16.msra.mxu0 %v1155_v53  ;;  %203 = vperm.xlu1 %1078, %v125_v33  }
  0x34   :  { %824 = vmatpush2.bf16.msra.mxu1 %v1156_v54  ;;  %712 = vmatprep.subr.bf16.mxu0 %v1157_v55 }
  0x35   :  { %825 = vmatprep.subr.bf16.mxu1 %v1159_v56 }
  0x36   :  { %198 = vperm.xlu0 %1077, %v124_v34  }
  0x37   :  { %713 = vmatpush2.bf16.msra.mxu0 %v1161_v57 }
  0x38   :  { %826 = vmatpush2.bf16.msra.mxu1 %v1162_v58  ;;  %714 = vmatprep.subr.bf16.mxu0 %v1163_v59 }
  0x39   :  { %827 = vmatprep.subr.bf16.mxu1 %v1165_v60 }
  0x3b   :  { %715 = vmatpush2.bf16.msra.mxu0 %v1167_v61 }
  0x3c   :  { %828 = vmatpush2.bf16.msra.mxu1 %v1168_v62  ;;  %716 = vmatprep.subr.bf16.mxu0 %v1169_v63 }
  0x3d   :  { %829 = vmatprep.subr.bf16.mxu1 %v1171_v0 }
  0x3f   :  { %717 = vmatpush2.bf16.msra.mxu0 %v1173_v1 }
  0x40   :  { %830 = vmatpush2.bf16.msra.mxu1 %v1174_v2 }
  0x42   :  { %719 = vmatmul.mubr.bf16.vlgmr.msra.gmra.mxu0 %v1175_v3 }
  0x43   :  { %832 = vmatmul.mubr.bf16.vlgmr.msra.gmra.mxu1 %v1178_v4  ;;  %728 = vmatprep.mubr.bf16.mxu0 %v1181_v5 }
  0x44   :  { %841 = vmatprep.mubr.bf16.mxu1 %v1183_v6 }
  0x4a   :  { %729 = vmatmul.mubr.bf16.gmra.mxu0 %v1185_v13 }
  0x4b   :  { %842 = vmatmul.mubr.bf16.gmra.mxu1 %v1186_v14  ;;  %738 = vmatprep.mubr.bf16.mxu0 %v1187_v15 }
  0x4c   :  { %851 = vmatprep.mubr.bf16.mxu1 %v1189_v16 }
  0x52   :  { %739 = vmatmul.mubr.bf16.gmra.mxu0 %v1191_v21 }
  0x53   :  { %852 = vmatmul.mubr.bf16.gmra.mxu1 %v1192_v22  ;;  %748 = vmatprep.mubr.bf16.mxu0 %v1193_v23 }
  0x54   :  { %861 = vmatprep.mubr.bf16.mxu1 %v1195_v24 }
  0x5a   :  { %749 = vmatmul.mubr.bf16.gmra.mxu0 %v1197_v29 }
  0x5b   :  { %862 = vmatmul.mubr.bf16.gmra.mxu1 %v1198_v30  ;;  %758 = vmatprep.mubr.bf16.mxu0 %v1199_v31 }
  0x5c   :  { %871 = vmatprep.mubr.bf16.mxu1 %v1201_v32 }
  0x62   :  { %759 = vmatmul.mubr.bf16.gmra.mxu0 %v1203_v35 }
  0x63   :  { %872 = vmatmul.mubr.bf16.gmra.mxu1 %v1204_v36  ;;  %768 = vmatprep.mubr.bf16.mxu0 %v1205_v37 }
  0x64   :  { %881 = vmatprep.mubr.bf16.mxu1 %v1207_v38 }
  0x6a   :  { %769 = vmatmul.mubr.bf16.gmra.mxu0 %v1209_v39 }
  0x6b   :  { %882 = vmatmul.mubr.bf16.gmra.mxu1 %v1210_v40  ;;  %778 = vmatprep.mubr.bf16.mxu0 %v1211_v41 }
  0x6c   :  { %891 = vmatprep.mubr.bf16.mxu1 %v1213_v42 }
  0x72   :  { %779 = vmatmul.mubr.bf16.gmra.mxu0 %v1215_v43 }
  0x73   :  { %892 = vmatmul.mubr.bf16.gmra.mxu1 %v1216_v44  ;;  %788 = vmatprep.mubr.bf16.mxu0 %v1217_v45 }
  0x74   :  { %901 = vmatprep.mubr.bf16.mxu1 %v1219_v46 }
  0x7a   :  { %789 = vmatmul.mubr.bf16.gmra.mxu0 %v1221_v47 }
  0x7b   :  { %902 = vmatmul.mubr.bf16.gmra.mxu1 %v1222_v48 }
  0x92   :  { %v139_v63 = vpop.permute.xlu1 %138 }
  0x95   :  { %v129_v49 = vpop.permute.xlu0 %128 }
  0x96   :  { %v144_v14 = vpop.permute.xlu1 %143 }
  0x99   :  { %v134_v53 = vpop.permute.xlu0 %133 }
  0x9a   :  { %v154_v34 = vpop.permute.xlu1 %153 }
  0x9d   :  { %v149_v25 = vpop.permute.xlu0 %148 }
  0xa1   :  { %v159_v45 = vpop.permute.xlu0 %158 }
 0x102   :  { %v720_v50 = vpop.f32.mrf.mxu0 }
 0x103   :  { %v833_v51 = vpop.f32.mrf.mxu1  ;;  %v721_v52 = vadd.f32 %v720_v50, %v129_v49 }
 0x104   :  { %v722_v54 = vpop.f32.mrf.mxu0 }
 0x105   :  { %v835_v55 = vpop.f32.mrf.mxu1  ;;  %v834_v56 = vadd.f32 %v833_v51, %v721_v52  ;;  %v723_v57 = vadd.f32 %v722_v54, %v129_v49 }
 0x106   :  { %v724_v58 = vpop.f32.mrf.mxu0 }
 0x107   :  { %v837_v59 = vpop.f32.mrf.mxu1  ;;  %v912_v60 = vmax.f32 %v834_v56, 0.0  ;;  %v836_v61 = vadd.f32 %v835_v55, %v723_v57  ;;  %v725_v62 = vadd.f32 %v724_v58, %v134_v53  ;;  %v164_v56 = vpop.permute.xlu1 %163 }
 0x108   :  { %v726_v0 = vpop.f32.mrf.mxu0 }
 0x109   :  { %v839_v1 = vpop.f32.mrf.mxu1  ;;  %944 = vst [vmem:[%s1679_s3] sm:$0xff] %v912_v60  ;;  %v913_v2 = vmax.f32 %v836_v61, 0.0  ;;  %v838_v3 = vadd.f32 %v837_v59, %v725_v62  ;;  %v727_v4 = vadd.f32 %v726_v0, %v134_v53 }
 0x10a   :  { %v730_v5 = vpop.f32.mrf.mxu0 }
 0x10b   :  { %v843_v6 = vpop.f32.mrf.mxu1  ;;  %945 = vst [vmem:[%s1679_s3 + $0x8] sm:$0xff] %v913_v2  ;;  %v914_v7 = vmax.f32 %v838_v3, 0.0  ;;  %v840_v8 = vadd.f32 %v839_v1, %v727_v4  ;;  %v731_v9 = vadd.f32 %v730_v5, %v139_v63  ;;  %v169_v3 = vpop.permute.xlu0 %168 }
 0x10c   :  { %v732_v10 = vpop.f32.mrf.mxu0 }
 0x10d   :  { %v845_v11 = vpop.f32.mrf.mxu1  ;;  %946 = vst [vmem:[%s1679_s3 + $0x10] sm:$0xff] %v914_v7  ;;  %v915_v12 = vmax.f32 %v840_v8, 0.0  ;;  %v844_v13 = vadd.f32 %v843_v6, %v731_v9  ;;  %v733_v15 = vadd.f32 %v732_v10, %v139_v63 }
 0x10e   :  { %v734_v16 = vpop.f32.mrf.mxu0 }
 0x10f   :  { %v847_v17 = vpop.f32.mrf.mxu1  ;;  %947 = vst [vmem:[%s1679_s3 + $0x18] sm:$0xff] %v915_v12  ;;  %v916_v18 = vmax.f32 %v844_v13, 0.0  ;;  %v846_v19 = vadd.f32 %v845_v11, %v733_v15  ;;  %v735_v20 = vadd.f32 %v734_v16, %v144_v14 }
 0x110   :  { %v736_v21 = vpop.f32.mrf.mxu0 }
 0x111   :  { %v849_v22 = vpop.f32.mrf.mxu1  ;;  %948 = vst [vmem:[%s1679_s3 + $0x20] sm:$0xff] %v916_v18  ;;  %v917_v23 = vmax.f32 %v846_v19, 0.0  ;;  %v848_v24 = vadd.f32 %v847_v17, %v735_v20  ;;  %v737_v26 = vadd.f32 %v736_v21, %v144_v14  ;;  %v174_v14 = vpop.permute.xlu1 %173 }
 0x112   :  { %v740_v27 = vpop.f32.mrf.mxu0 }
 0x113   :  { %v853_v28 = vpop.f32.mrf.mxu1  ;;  %949 = vst [vmem:[%s1679_s3 + $0x28] sm:$0xff] %v917_v23  ;;  %v918_v29 = vmax.f32 %v848_v24, 0.0  ;;  %v850_v30 = vadd.f32 %v849_v22, %v737_v26  ;;  %v741_v31 = vadd.f32 %v740_v27, %v149_v25 }
 0x114   :  { %v742_v32 = vpop.f32.mrf.mxu0 }
 0x115   :  { %v855_v33 = vpop.f32.mrf.mxu1  ;;  %950 = vst [vmem:[%s1679_s3 + $0x30] sm:$0xff] %v918_v29  ;;  %v919_v35 = vmax.f32 %v850_v30, 0.0  ;;  %v854_v36 = vadd.f32 %v853_v28, %v741_v31  ;;  %v743_v37 = vadd.f32 %v742_v32, %v149_v25  ;;  %v179_v25 = vpop.permute.xlu0 %178 }
 0x116   :  { %v744_v38 = vpop.f32.mrf.mxu0 }
 0x117   :  { %v857_v39 = vpop.f32.mrf.mxu1  ;;  %951 = vst [vmem:[%s1679_s3 + $0x38] sm:$0xff] %v919_v35  ;;  %v920_v40 = vmax.f32 %v854_v36, 0.0  ;;  %v856_v41 = vadd.f32 %v855_v33, %v743_v37  ;;  %v745_v42 = vadd.f32 %v744_v38, %v154_v34  ;;  %v184_v36 = vpop.permute.xlu1 %183 }
 0x118   :  { %v746_v43 = vpop.f32.mrf.mxu0 }
 0x119   :  { %v859_v44 = vpop.f32.mrf.mxu1  ;;  %952 = vst [vmem:[%s1679_s3 + $0x40] sm:$0xff] %v920_v40  ;;  %v921_v46 = vmax.f32 %v856_v41, 0.0  ;;  %v858_v47 = vadd.f32 %v857_v39, %v745_v42  ;;  %v747_v48 = vadd.f32 %v746_v43, %v154_v34 }
 0x11a   :  { %v750_v49 = vpop.f32.mrf.mxu0 }
 0x11b   :  { %v863_v50 = vpop.f32.mrf.mxu1  ;;  %953 = vst [vmem:[%s1679_s3 + $0x48] sm:$0xff] %v921_v46  ;;  %v922_v51 = vmax.f32 %v858_v47, 0.0  ;;  %v860_v52 = vadd.f32 %v859_v44, %v747_v48  ;;  %v751_v53 = vadd.f32 %v750_v49, %v159_v45  ;;  %v189_v47 = vpop.permute.xlu0 %188 }
 0x11c   :  { %v752_v54 = vpop.f32.mrf.mxu0 }
 0x11d   :  { %v865_v55 = vpop.f32.mrf.mxu1  ;;  %954 = vst [vmem:[%s1679_s3 + $0x50] sm:$0xff] %v922_v51  ;;  %v923_v57 = vmax.f32 %v860_v52, 0.0  ;;  %v864_v58 = vadd.f32 %v863_v50, %v751_v53  ;;  %v753_v59 = vadd.f32 %v752_v54, %v159_v45 }
 0x11e   :  { %v754_v60 = vpop.f32.mrf.mxu0 }
 0x11f   :  { %v867_v61 = vpop.f32.mrf.mxu1  ;;  %955 = vst [vmem:[%s1679_s3 + $0x58] sm:$0xff] %v923_v57  ;;  %v924_v62 = vmax.f32 %v864_v58, 0.0  ;;  %v866_v63 = vadd.f32 %v865_v55, %v753_v59  ;;  %v755_v0 = vadd.f32 %v754_v60, %v164_v56  ;;  %v194_v58 = vpop.permute.xlu1 %193 }
 0x120   :  { %v756_v1 = vpop.f32.mrf.mxu0 }
 0x121   :  { %v869_v2 = vpop.f32.mrf.mxu1  ;;  %956 = vst [vmem:[%s1679_s3 + $0x60] sm:$0xff] %v924_v62  ;;  %v925_v4 = vmax.f32 %v866_v63, 0.0  ;;  %v868_v5 = vadd.f32 %v867_v61, %v755_v0  ;;  %v757_v6 = vadd.f32 %v756_v1, %v164_v56 }
 0x122   :  { %v760_v7 = vpop.f32.mrf.mxu0 }
 0x123   :  { %v873_v8 = vpop.f32.mrf.mxu1  ;;  %957 = vst [vmem:[%s1679_s3 + $0x68] sm:$0xff] %v925_v4  ;;  %v926_v9 = vmax.f32 %v868_v5, 0.0  ;;  %v870_v10 = vadd.f32 %v869_v2, %v757_v6  ;;  %v761_v11 = vadd.f32 %v760_v7, %v169_v3  ;;  %v199_v5 = vpop.permute.xlu0 %198 }
 0x124   :  { %v762_v12 = vpop.f32.mrf.mxu0 }
 0x125   :  { %v875_v13 = vpop.f32.mrf.mxu1  ;;  %958 = vst [vmem:[%s1679_s3 + $0x70] sm:$0xff] %v926_v9  ;;  %v927_v15 = vmax.f32 %v870_v10, 0.0  ;;  %v874_v16 = vadd.f32 %v873_v8, %v761_v11  ;;  %v763_v17 = vadd.f32 %v762_v12, %v169_v3 }
 0x126   :  { %v764_v18 = vpop.f32.mrf.mxu0 }
 0x127   :  { %v877_v19 = vpop.f32.mrf.mxu1  ;;  %959 = vst [vmem:[%s1679_s3 + $0x78] sm:$0xff] %v927_v15  ;;  %v928_v20 = vmax.f32 %v874_v16, 0.0  ;;  %v876_v21 = vadd.f32 %v875_v13, %v763_v17  ;;  %v765_v22 = vadd.f32 %v764_v18, %v174_v14  ;;  %v204_v16 = vpop.permute.xlu1 %203 }
 0x128   :  { %v766_v23 = vpop.f32.mrf.mxu0 }
 0x129   :  { %v879_v24 = vpop.f32.mrf.mxu1  ;;  %960 = vst [vmem:[%s1679_s3 + $0x80] sm:$0xff] %v928_v20  ;;  %v929_v26 = vmax.f32 %v876_v21, 0.0  ;;  %v878_v27 = vadd.f32 %v877_v19, %v765_v22  ;;  %v767_v28 = vadd.f32 %v766_v23, %v174_v14 }
 0x12a   :  { %v770_v29 = vpop.f32.mrf.mxu0 }
 0x12b   :  { %v883_v30 = vpop.f32.mrf.mxu1  ;;  %961 = vst [vmem:[%s1679_s3 + $0x88] sm:$0xff] %v929_v26  ;;  %v930_v31 = vmax.f32 %v878_v27, 0.0  ;;  %v880_v32 = vadd.f32 %v879_v24, %v767_v28  ;;  %v771_v33 = vadd.f32 %v770_v29, %v179_v25 }
 0x12c   :  { %v772_v34 = vpop.f32.mrf.mxu0 }
 0x12d   :  { %v885_v35 = vpop.f32.mrf.mxu1  ;;  %962 = vst [vmem:[%s1679_s3 + $0x90] sm:$0xff] %v930_v31  ;;  %v931_v37 = vmax.f32 %v880_v32, 0.0  ;;  %v884_v38 = vadd.f32 %v883_v30, %v771_v33  ;;  %v773_v39 = vadd.f32 %v772_v34, %v179_v25 }
 0x12e   :  { %v774_v40 = vpop.f32.mrf.mxu0 }
 0x12f   :  { %v887_v41 = vpop.f32.mrf.mxu1  ;;  %963 = vst [vmem:[%s1679_s3 + $0x98] sm:$0xff] %v931_v37  ;;  %v932_v42 = vmax.f32 %v884_v38, 0.0  ;;  %v886_v43 = vadd.f32 %v885_v35, %v773_v39  ;;  %v775_v44 = vadd.f32 %v774_v40, %v184_v36 }
 0x130   :  { %v776_v45 = vpop.f32.mrf.mxu0 }
 0x131   :  { %v889_v46 = vpop.f32.mrf.mxu1  ;;  %964 = vst [vmem:[%s1679_s3 + $0xa0] sm:$0xff] %v932_v42  ;;  %v933_v48 = vmax.f32 %v886_v43, 0.0  ;;  %v888_v49 = vadd.f32 %v887_v41, %v775_v44  ;;  %v777_v50 = vadd.f32 %v776_v45, %v184_v36 }
 0x132   :  { %v780_v51 = vpop.f32.mrf.mxu0 }
 0x133   :  { %v893_v52 = vpop.f32.mrf.mxu1  ;;  %965 = vst [vmem:[%s1679_s3 + $0xa8] sm:$0xff] %v933_v48  ;;  %v934_v53 = vmax.f32 %v888_v49, 0.0  ;;  %v890_v54 = vadd.f32 %v889_v46, %v777_v50  ;;  %v781_v55 = vadd.f32 %v780_v51, %v189_v47 }
 0x134   :  { %v782_v56 = vpop.f32.mrf.mxu0 }
 0x135   :  { %v895_v57 = vpop.f32.mrf.mxu1  ;;  %966 = vst [vmem:[%s1679_s3 + $0xb0] sm:$0xff] %v934_v53  ;;  %v935_v59 = vmax.f32 %v890_v54, 0.0  ;;  %v894_v60 = vadd.f32 %v893_v52, %v781_v55  ;;  %v783_v61 = vadd.f32 %v782_v56, %v189_v47 }
 0x136   :  { %v784_v62 = vpop.f32.mrf.mxu0 }
 0x137   :  { %v897_v63 = vpop.f32.mrf.mxu1  ;;  %967 = vst [vmem:[%s1679_s3 + $0xb8] sm:$0xff] %v935_v59  ;;  %v936_v0 = vmax.f32 %v894_v60, 0.0  ;;  %v896_v1 = vadd.f32 %v895_v57, %v783_v61  ;;  %v785_v2 = vadd.f32 %v784_v62, %v194_v58 }
 0x138   :  { %v786_v3 = vpop.f32.mrf.mxu0 }
 0x139   :  { %v899_v4 = vpop.f32.mrf.mxu1  ;;  %968 = vst [vmem:[%s1679_s3 + $0xc0] sm:$0xff] %v936_v0  ;;  %v937_v6 = vmax.f32 %v896_v1, 0.0  ;;  %v898_v7 = vadd.f32 %v897_v63, %v785_v2  ;;  %v787_v8 = vadd.f32 %v786_v3, %v194_v58 }
 0x13a   :  { %v790_v9 = vpop.f32.mrf.mxu0 }
 0x13b   :  { %v903_v10 = vpop.f32.mrf.mxu1  ;;  %969 = vst [vmem:[%s1679_s3 + $0xc8] sm:$0xff] %v937_v6  ;;  %v938_v11 = vmax.f32 %v898_v7, 0.0  ;;  %v900_v12 = vadd.f32 %v899_v4, %v787_v8  ;;  %v791_v13 = vadd.f32 %v790_v9, %v199_v5 }
 0x13c   :  { %v792_v14 = vpop.f32.mrf.mxu0 }
 0x13d   :  { %v905_v15 = vpop.f32.mrf.mxu1  ;;  %970 = vst [vmem:[%s1679_s3 + $0xd0] sm:$0xff] %v938_v11  ;;  %v939_v17 = vmax.f32 %v900_v12, 0.0  ;;  %v904_v18 = vadd.f32 %v903_v10, %v791_v13  ;;  %v793_v19 = vadd.f32 %v792_v14, %v199_v5 }
 0x13e   :  { %v794_v20 = vpop.f32.mrf.mxu0 }
 0x13f   :  { %v907_v21 = vpop.f32.mrf.mxu1  ;;  %971 = vst [vmem:[%s1679_s3 + $0xd8] sm:$0xff] %v939_v17  ;;  %v940_v22 = vmax.f32 %v904_v18, 0.0  ;;  %v906_v23 = vadd.f32 %v905_v15, %v793_v19  ;;  %v795_v24 = vadd.f32 %v794_v20, %v204_v16 }
 0x140   :  { %v796_v25 = vpop.f32.mrf.mxu0 }
 0x141   :  { %972 = vst [vmem:[%s1679_s3 + $0xe0] sm:$0xff] %v940_v22  ;;  %v941_v26 = vmax.f32 %v906_v23, 0.0  ;;  %v908_v27 = vadd.f32 %v907_v21, %v795_v24  ;;  %v797_v28 = vadd.f32 %v796_v25, %v204_v16  ;;  %v909_v29 = vpop.f32.mrf.mxu1 }
 0x143   :  { %973 = vst [vmem:[%s1679_s3 + $0xe8] sm:$0xff] %v941_v26  ;;  %v942_v30 = vmax.f32 %v908_v27, 0.0  ;;  %v910_v31 = vadd.f32 %v909_v29, %v797_v28 }
 0x145   :  { %974 = vst [vmem:[%s1679_s3 + $0xf0] sm:$0xff] %v942_v30  ;;  %v943_v32 = vmax.f32 %v910_v31, 0.0 }
 0x147   :  { %975 = vst [vmem:[%s1679_s3 + $0xf8] sm:$0xff] %v943_v32 }

// kernel: sketch_depth_colorizer.27
= control target key start
LH: loop header
LB: loop body
LE: loop exit
PB: predicated region body
PF: predicated region fallthrough
CT: control target
= control target key end

     0   :  { %s957_s12 = smov 0   ;;  %s959_s13 = smov 0   ;;  %s1173_s0 = inlined_call_operand.vmem [shape: bf16[64,256], index: 0, kind: input, shape index: {}]   ;;  %s1174_s1 = inlined_call_operand.vmem [shape: bf16[256,640], index: 1, kind: input, shape index: {}]   ;;  %s1175_s2 = inlined_call_operand.vmem [shape: f32[64,1], index: 2, kind: input, shape index: {}]   ;;  %s1176_s3 = inlined_call_operand.vmem [shape: f32[64,640], index: 3, kind: output, shape index: {}]  }
   0x1   :  { %s961_s14 = smov 0  }
   0x2 LB: > { %s764_s15 = sadd.s32 4294967295, %s934_s14   ;;  %s974_s16 = sadd.s32 1, %s934_s14   ;;  %s934_s14 = sphi %s961_s14, %s1180_s14   ;;  %s930_s13 = sphi %s959_s13, %s1179_s13   ;;  %s926_s12 = sphi %s957_s12, %s1178_s12  }
   0x3   : > { %s38_s17 = ssub.s32 %s934_s14, %s974_s16  ;;  %s41_s18 = sadd.s32 1, %s930_s13 }
   0x4   : > { %p39_p0 = scmp.eq.s32.totalorder %s38_s17, 0  ;;  %p48_p1 = scmp.ne.s32.totalorder %s930_s13, %s926_s12 }
   0x5   : > { %p49_p2 = scmp.eq.s32.totalorder %s934_s14, 0  ;;  %p99_p3 = scmp.eq.s32.totalorder %s764_s15, 4 }
   0x6   : > { %s985_s19 = scalar_select %p39_p0, %s930_s13, %s41_s18  }
   0x7   : > { %p50_p4 = por %p49_p2, %p48_p1  ;;  %p987_p5 = por %p99_p3, %p48_p1 }
   0x8   : > { %p767_p6 = scmp.ge.s32.totalorder %s934_s14, 5 }
   0xa   : > { %127 = sbr.rel (%p767_p6) target bundleno = 40 (0x28), region = 24 }
   0xf   : > { %130 = sbr.rel (!%p50_p4) target bundleno = 40 (0x28), region = 28  ;;  %s132_s21 = sand.u32 (%p50_p4), 1, %s930_s13  }
  0x10   : > { %s769_s22 = sshll.u32 (%p50_p4), %s934_s14, 2  ;;  %s768_s23 = sshll.u32 (%p50_p4), %s132_s21, 7 }
  0x11   : > { %s997_s26 = scalar_lea.vmem (%p50_p4), %s1174_s1, %s769_s22  ;;  %s1001_s27 = scalar_lea.vmem (%p50_p4), [#allocation2], %s768_s23 }
  0x12   : > { %v153_v0 = vld [vmem:[%s997_s26] sm:$0xf] (%p50_p4)  ;;  %v155_v1 = vld [vmem:[%s997_s26 + $0x14] sm:$0xf] (%p50_p4)  ;;  %v157_v2 = vld [vmem:[%s997_s26 + $0x28] sm:$0xf] (%p50_p4) }
  0x13   : > { %154 = vst [vmem:[%s1001_s27] sm:$0xf] (%p50_p4), %v153_v0  ;;  %156 = vst [vmem:[%s1001_s27 + $0x4] sm:$0xf] (%p50_p4), %v155_v1  ;;  %v159_v3 = vld [vmem:[%s997_s26 + $0x3c] sm:$0xf] (%p50_p4) }
  0x14   : > { %v161_v4 = vld [vmem:[%s997_s26 + $0x50] sm:$0xf]  ;;  %158 = vst [vmem:[%s1001_s27 + $0x8] sm:$0xf] %v157_v2  ;;  %160 = vst [vmem:[%s1001_s27 + $0xc] sm:$0xf] %v159_v3 }
  0x15   : > { %162 = vst [vmem:[%s1001_s27 + $0x10] sm:$0xf] %v161_v4  ;;  %v163_v5 = vld [vmem:[%s997_s26 + $0x64] sm:$0xf]  ;;  %v165_v6 = vld [vmem:[%s997_s26 + $0x78] sm:$0xf] }
  0x16   : > { %v167_v7 = vld [vmem:[%s997_s26 + $0x8c] sm:$0xf]  ;;  %164 = vst [vmem:[%s1001_s27 + $0x14] sm:$0xf] %v163_v5  ;;  %166 = vst [vmem:[%s1001_s27 + $0x18] sm:$0xf] %v165_v6 }
  0x17   : > { %168 = vst [vmem:[%s1001_s27 + $0x1c] sm:$0xf] %v167_v7  ;;  %v169_v8 = vld [vmem:[%s997_s26 + $0xa0] sm:$0xf]  ;;  %v171_v9 = vld [vmem:[%s997_s26 + $0xb4] sm:$0xf] }
  0x18   : > { %v173_v10 = vld [vmem:[%s997_s26 + $0xc8] sm:$0xf]  ;;  %170 = vst [vmem:[%s1001_s27 + $0x20] sm:$0xf] %v169_v8  ;;  %172 = vst [vmem:[%s1001_s27 + $0x24] sm:$0xf] %v171_v9 }
  0x19   : > { %174 = vst [vmem:[%s1001_s27 + $0x28] sm:$0xf] %v173_v10  ;;  %v175_v11 = vld [vmem:[%s997_s26 + $0xdc] sm:$0xf]  ;;  %v177_v12 = vld [vmem:[%s997_s26 + $0xf0] sm:$0xf] }
  0x1a   : > { %v179_v13 = vld [vmem:[%s997_s26 + $0x104] sm:$0xf]  ;;  %176 = vst [vmem:[%s1001_s27 + $0x2c] sm:$0xf] %v175_v11  ;;  %178 = vst [vmem:[%s1001_s27 + $0x30] sm:$0xf] %v177_v12 }
  0x1b   : > { %180 = vst [vmem:[%s1001_s27 + $0x34] sm:$0xf] %v179_v13  ;;  %v181_v14 = vld [vmem:[%s997_s26 + $0x118] sm:$0xf]  ;;  %v183_v15 = vld [vmem:[%s997_s26 + $0x12c] sm:$0xf] }
  0x1c   : > { %v185_v16 = vld [vmem:[%s997_s26 + $0x140] sm:$0xf]  ;;  %182 = vst [vmem:[%s1001_s27 + $0x38] sm:$0xf] %v181_v14  ;;  %184 = vst [vmem:[%s1001_s27 + $0x3c] sm:$0xf] %v183_v15 }
  0x1d   : > { %186 = vst [vmem:[%s1001_s27 + $0x40] sm:$0xf] %v185_v16  ;;  %v187_v17 = vld [vmem:[%s997_s26 + $0x154] sm:$0xf]  ;;  %v189_v18 = vld [vmem:[%s997_s26 + $0x168] sm:$0xf] }
  0x1e   : > { %v191_v19 = vld [vmem:[%s997_s26 + $0x17c] sm:$0xf]  ;;  %188 = vst [vmem:[%s1001_s27 + $0x44] sm:$0xf] %v187_v17  ;;  %190 = vst [vmem:[%s1001_s27 + $0x48] sm:$0xf] %v189_v18 }
  0x1f   : > { %192 = vst [vmem:[%s1001_s27 + $0x4c] sm:$0xf] %v191_v19  ;;  %v193_v20 = vld [vmem:[%s997_s26 + $0x190] sm:$0xf]  ;;  %v195_v21 = vld [vmem:[%s997_s26 + $0x1a4] sm:$0xf] }
  0x20   : > { %v197_v22 = vld [vmem:[%s997_s26 + $0x1b8] sm:$0xf]  ;;  %194 = vst [vmem:[%s1001_s27 + $0x50] sm:$0xf] %v193_v20  ;;  %196 = vst [vmem:[%s1001_s27 + $0x54] sm:$0xf] %v195_v21 }
  0x21   : > { %198 = vst [vmem:[%s1001_s27 + $0x58] sm:$0xf] %v197_v22  ;;  %v199_v23 = vld [vmem:[%s997_s26 + $0x1cc] sm:$0xf]  ;;  %v201_v24 = vld [vmem:[%s997_s26 + $0x1e0] sm:$0xf] }
  0x22   : > { %v203_v25 = vld [vmem:[%s997_s26 + $0x1f4] sm:$0xf]  ;;  %200 = vst [vmem:[%s1001_s27 + $0x5c] sm:$0xf] %v199_v23  ;;  %202 = vst [vmem:[%s1001_s27 + $0x60] sm:$0xf] %v201_v24 }
  0x23   : > { %204 = vst [vmem:[%s1001_s27 + $0x64] sm:$0xf] %v203_v25  ;;  %v205_v26 = vld [vmem:[%s997_s26 + $0x208] sm:$0xf]  ;;  %v207_v27 = vld [vmem:[%s997_s26 + $0x21c] sm:$0xf] }
  0x24   : > { %v209_v28 = vld [vmem:[%s997_s26 + $0x230] sm:$0xf]  ;;  %206 = vst [vmem:[%s1001_s27 + $0x68] sm:$0xf] %v205_v26  ;;  %208 = vst [vmem:[%s1001_s27 + $0x6c] sm:$0xf] %v207_v27 }
  0x25   : > { %210 = vst [vmem:[%s1001_s27 + $0x70] sm:$0xf] %v209_v28  ;;  %v211_v29 = vld [vmem:[%s997_s26 + $0x244] sm:$0xf]  ;;  %v213_v30 = vld [vmem:[%s997_s26 + $0x258] sm:$0xf] }
  0x26   : > { %v215_v31 = vld [vmem:[%s997_s26 + $0x26c] sm:$0xf]  ;;  %212 = vst [vmem:[%s1001_s27 + $0x74] sm:$0xf] %v211_v29  ;;  %214 = vst [vmem:[%s1001_s27 + $0x78] sm:$0xf] %v213_v30 }
  0x27   : > { %216 = vst [vmem:[%s1001_s27 + $0x7c] sm:$0xf] %v215_v31 }
  0x28 PF: > { %p770_p7 = scmp.ge.s32.totalorder %s934_s14, 1  ;;  %p303_p8 = scmp.lt.s32.totalorder %s934_s14, 6 }
  0x2a   : > { %p304_p9 = pnand %p770_p7, %p303_p8 }
  0x2b   : > { %s310_s28 = sand.u32 (!%p304_p9), 1, %s926_s12  }
  0x2c   : > { %307 = sbr.rel (%p304_p9) target bundleno = 307 (0x133), region = 69  ;;  %s771_s29 = sshll.u32 (!%p304_p9), %s310_s28, 7 }
  0x2d   : > { %s1076_s7 = scalar_lea.vmem (!%p304_p9), [#allocation2], %s771_s29  ;;  %s772_s24 = sshll.u32 (!%p304_p9), %s310_s28, 6 }
  0x2e   : > { %s1138_s25 = scalar_lea.vmem (!%p304_p9), [#allocation3], %s772_s24 }
  0x31   : > { %v902_v32 = vld [vmem:[%s1173_s0 + $0x4] ss:$8 sps:$4 sm:$0xff]   ;;  %v936_v33 = vmov 0   ;;  %v884_v35 = vld [vmem:[%s1076_s7 + $0x78] sm:$0xff]   ;;  %v886_v37 = vld [vmem:[%s1076_s7 + $0x70] sm:$0xff]   ;;  %s798_s12 = sshll.u32 (%p987_p5), %s764_s15, 3 }
  0x32   : > { %883 = vset.pattern.permute.xlu1 %v936_v33  ;;  %882 = vset.pattern.permute.xlu0 %v936_v33  ;;  %v905_v34 = vld [vmem:[%s1173_s0 + $0x24] ss:$8 sps:$4 sm:$0xff]   ;;  %v885_v36 = vld [vmem:[%s1076_s7 + $0x38] sm:$0xff]   ;;  %v887_v38 = vld [vmem:[%s1076_s7 + $0x30] sm:$0xff]   ;;  %s646_s27 = scalar_lea.vmem (%p987_p5), %s1176_s3, %s798_s12 }
  0x33   : > { %589 = vmatprep.mubr.bf16.mxu0 %v902_v32  ;;  %605 = vmatprep.mubr.bf16.mxu1 %v905_v34  ;;  %v888_v39 = vld [vmem:[%s1076_s7 + $0x68] sm:$0xff]   ;;  %v890_v41 = vld [vmem:[%s1076_s7 + $0x60] sm:$0xff]   ;;  %v892_v43 = vld [vmem:[%s1076_s7 + $0x58] sm:$0xff]  }
  0x34   : > { %801 = vmatprep.subr.bf16.mxu0 %v884_v35  ;;  %841 = vmatprep.subr.bf16.mxu1 %v884_v35  ;;  %v889_v40 = vld [vmem:[%s1076_s7 + $0x28] sm:$0xff]   ;;  %v891_v42 = vld [vmem:[%s1076_s7 + $0x20] sm:$0xff]   ;;  %v893_v44 = vld [vmem:[%s1076_s7 + $0x18] sm:$0xff]  }
  0x35   : > { %802 = vmatpush3.bf16.msra.mxu0 %v885_v36  ;;  %849 = vmatpush3.bf16.msra.mxu1 %v885_v36  ;;  %v894_v45 = vld [vmem:[%s1076_s7 + $0x50] sm:$0xff]   ;;  %v373_v47 = vld [vmem:[%s1175_s2] sm:$0xff]  ;;  %v896_v49 = vld [vmem:[%s1076_s7 + $0x48] sm:$0xff]  }
  0x36   : > { %803 = vmatprep.subr.bf16.mxu0 %v886_v37  ;;  %842 = vmatprep.subr.bf16.mxu1 %v886_v37  ;;  %v375_v46 = vld [vmem:[%s1175_s2 + $0x10] sm:$0xff]  ;;  %v376_v50 = vld [vmem:[%s1175_s2 + $0x18] sm:$0xff]  ;;  %v374_v51 = vld [vmem:[%s1175_s2 + $0x8] sm:$0xff] }
  0x37   : > { %v895_v48 = vld [vmem:[%s1076_s7 + $0x10] sm:$0xff]   ;;  %393 = vperm.xlu1 %883, %v375_v46   ;;  %383 = vperm.xlu0 %882, %v373_v47   ;;  %v897_v52 = vld [vmem:[%s1076_s7 + $0x8] sm:$0xff]   ;;  %v898_v53 = vld [vmem:[%s1076_s7 + $0x40] sm:$0xff]  }
  0x38   : > { %v378_v54 = vld [vmem:[%s1175_s2 + $0x28] sm:$0xff]  ;;  %v377_v55 = vld [vmem:[%s1175_s2 + $0x20] sm:$0xff]  ;;  %v380_v59 = vld [vmem:[%s1175_s2 + $0x38] sm:$0xff] }
  0x39   : > { %804 = vmatpush3.bf16.msra.mxu0 %v887_v38  ;;  %850 = vmatpush3.bf16.msra.mxu1 %v887_v38  ;;  %v899_v56 = vld [vmem:[%s1076_s7] sm:$0xff]   ;;  %v379_v60 = vld [vmem:[%s1175_s2 + $0x30] sm:$0xff] }
  0x3a   : > { %805 = vmatprep.subr.bf16.mxu0 %v888_v39  ;;  %843 = vmatprep.subr.bf16.mxu1 %v888_v39  ;;  %v900_v57 = vld [vmem:[%s1173_s0] ss:$8 sps:$4 sm:$0xff]   ;;  %v906_v61 = vld [vmem:[%s1173_s0 + $0x14] ss:$8 sps:$4 sm:$0xff]   ;;  %v910_v63 = vld [vmem:[%s1173_s0 + $0x10] ss:$8 sps:$4 sm:$0xff]  }
  0x3b   : > { %398 = vperm.xlu1 %883, %v376_v50   ;;  %388 = vperm.xlu0 %882, %v374_v51   ;;  %v903_v58 = vld [vmem:[%s1173_s0 + $0x20] ss:$8 sps:$4 sm:$0xff]   ;;  %v908_v62 = vld [vmem:[%s1173_s0 + $0x34] ss:$8 sps:$4 sm:$0xff]   ;;  %v911_v0 = vld [vmem:[%s1173_s0 + $0x30] ss:$8 sps:$4 sm:$0xff]  }
  0x3d   : > { %806 = vmatpush3.bf16.msra.mxu0 %v889_v40  ;;  %851 = vmatpush3.bf16.msra.mxu1 %v889_v40 }
  0x3e   : > { %807 = vmatprep.subr.bf16.mxu0 %v890_v41  ;;  %844 = vmatprep.subr.bf16.mxu1 %v890_v41 }
  0x3f   : > { %408 = vperm.xlu1 %883, %v378_v54   ;;  %403 = vperm.xlu0 %882, %v377_v55  }
  0x41   : > { %808 = vmatpush3.bf16.msra.mxu0 %v891_v42  ;;  %852 = vmatpush3.bf16.msra.mxu1 %v891_v42 }
  0x42   : > { %809 = vmatprep.subr.bf16.mxu0 %v892_v43  ;;  %845 = vmatprep.subr.bf16.mxu1 %v892_v43 }
  0x43   : > { %418 = vperm.xlu1 %883, %v380_v59   ;;  %413 = vperm.xlu0 %882, %v379_v60  }
  0x45   : > { %810 = vmatpush3.bf16.msra.mxu0 %v893_v44  ;;  %853 = vmatpush3.bf16.msra.mxu1 %v893_v44 }
  0x46   : > { %811 = vmatprep.subr.bf16.mxu0 %v894_v45  ;;  %846 = vmatprep.subr.bf16.mxu1 %v894_v45 }
  0x49   : > { %812 = vmatpush3.bf16.msra.mxu0 %v895_v48  ;;  %854 = vmatpush3.bf16.msra.mxu1 %v895_v48 }
  0x4a   : > { %813 = vmatprep.subr.bf16.mxu0 %v896_v49  ;;  %847 = vmatprep.subr.bf16.mxu1 %v896_v49 }
  0x4d   : > { %814 = vmatpush3.bf16.msra.mxu0 %v897_v52  ;;  %855 = vmatpush3.bf16.msra.mxu1 %v897_v52 }
  0x4e   : > { %815 = vmatprep.subr.bf16.mxu0 %v898_v53  ;;  %848 = vmatprep.subr.bf16.mxu1 %v898_v53 }
  0x51   : > { %816 = vmatpush3.bf16.msra.mxu0 %v899_v56  ;;  %856 = vmatpush3.bf16.msra.mxu1 %v899_v56 }
  0x54   : > { %590 = vmatmul.mubr.bf16.vlgmr.msra.gmra.mxu0 %v900_v57  ;;  %606 = vmatmul.mubr.bf16.vlgmr.msra.gmra.mxu1 %v903_v58 }
  0x55   : > { %597 = vmatprep.mubr.bf16.mxu0 %v906_v61  ;;  %613 = vmatprep.mubr.bf16.mxu1 %v908_v62 }
  0x5c   : > { %598 = vmatmul.mubr.bf16.gmra.mxu0 %v910_v63  ;;  %614 = vmatmul.mubr.bf16.gmra.mxu1 %v911_v0 }
  0xb2   : > { %v384_v1 = vpop.permute.xlu0 %383  ;;  %v394_v2 = vpop.permute.xlu1 %393 }
  0xb6   : > { %v389_v3 = vpop.permute.xlu0 %388  ;;  %v399_v6 = vpop.permute.xlu1 %398 }
  0xba   : > { %v404_v9 = vpop.permute.xlu0 %403  ;;  %v409_v18 = vpop.permute.xlu1 %408 }
  0xbe   : > { %v414_v29 = vpop.permute.xlu0 %413  ;;  %v419_v44 = vpop.permute.xlu1 %418 }
 0x114   : > { %v817_v4 = vpop.f32.mrf.mxu0  ;;  %v829_v5 = vpop.f32.mrf.mxu1 }
 0x116   : > { %v818_v7 = vpop.f32.mrf.mxu0  ;;  %v830_v8 = vpop.f32.mrf.mxu1 }
 0x117   : > { %v819_v10 = vadd.f32 %v818_v7, %v817_v4  ;;  %v831_v11 = vadd.f32 %v830_v8, %v829_v5 }
 0x118   : > { %v820_v12 = vpop.f32.mrf.mxu0  ;;  %v832_v13 = vpop.f32.mrf.mxu1 }
 0x119   : > { %v592_v14 = vadd.f32 %v819_v10, %v384_v1  ;;  %v608_v15 = vadd.f32 %v831_v11, %v404_v9 }
 0x11a   : > { %v821_v16 = vpop.f32.mrf.mxu0  ;;  %v833_v17 = vpop.f32.mrf.mxu1 }
 0x11b   : > { %v622_v19 = vmax.f32 %v592_v14, 0.0  ;;  %v626_v20 = vmax.f32 %v608_v15, 0.0  ;;  %v822_v21 = vadd.f32 %v821_v16, %v820_v12  ;;  %v834_v22 = vadd.f32 %v833_v17, %v832_v13 }
 0x11c   : > { %v823_v23 = vpop.f32.mrf.mxu0  ;;  %v835_v24 = vpop.f32.mrf.mxu1 }
 0x11d   : > { %630 = vst [vmem:[%s1138_s25] sm:$0xff] %v622_v19  ;;  %634 = vst [vmem:[%s1138_s25 + $0x20] sm:$0xff] %v626_v20  ;;  %v595_v25 = vadd.f32 %v822_v21, %v389_v3  ;;  %v611_v26 = vadd.f32 %v834_v22, %v409_v18 }
 0x11e   : > { %v824_v27 = vpop.f32.mrf.mxu0  ;;  %v836_v28 = vpop.f32.mrf.mxu1 }
 0x11f   : > { %v623_v30 = vmax.f32 %v595_v25, 0.0  ;;  %v627_v31 = vmax.f32 %v611_v26, 0.0  ;;  %v825_v32 = vadd.f32 %v824_v27, %v823_v23  ;;  %v837_v33 = vadd.f32 %v836_v28, %v835_v24 }
 0x120   : > { %v826_v34 = vpop.f32.mrf.mxu0  ;;  %v838_v35 = vpop.f32.mrf.mxu1 }
 0x121   : > { %631 = vst [vmem:[%s1138_s25 + $0x8] sm:$0xff] %v623_v30  ;;  %635 = vst [vmem:[%s1138_s25 + $0x28] sm:$0xff] %v627_v31  ;;  %v600_v36 = vadd.f32 %v825_v32, %v394_v2  ;;  %v616_v37 = vadd.f32 %v837_v33, %v414_v29 }
 0x122   : > { %v827_v38 = vpop.f32.mrf.mxu0  ;;  %v839_v39 = vpop.f32.mrf.mxu1 }
 0x123   : > { %v624_v40 = vmax.f32 %v600_v36, 0.0  ;;  %v628_v41 = vmax.f32 %v616_v37, 0.0  ;;  %v828_v42 = vadd.f32 %v827_v38, %v826_v34  ;;  %v840_v43 = vadd.f32 %v839_v39, %v838_v35 }
 0x124   : > { %v689_v49 = vld [vmem:[%s1138_s25] sm:$0xff] (%p987_p5) }
 0x125   : > { %632 = vst [vmem:[%s1138_s25 + $0x10] sm:$0xff] %v624_v40  ;;  %636 = vst [vmem:[%s1138_s25 + $0x30] sm:$0xff] %v628_v41  ;;  %v603_v45 = vadd.f32 %v828_v42, %v399_v6  ;;  %v619_v46 = vadd.f32 %v840_v43, %v419_v44  ;;  %644 = sbr.rel (!%p987_p5) target bundleno = 307 (0x133), region = 77  ;;  %v697_v53 = vld [vmem:[%s1138_s25 + $0x20] sm:$0xff] (%p987_p5) }
 0x126   : > { %690 = vst [vmem:[%s646_s27] sm:$0xff] (%p987_p5), %v689_v49  ;;  %698 = vst [vmem:[%s646_s27 + $0xa0] sm:$0xff] (%p987_p5), %v697_v53 }
 0x127   : > { %v625_v47 = vmax.f32 %v603_v45, 0.0  ;;  %v629_v48 = vmax.f32 %v619_v46, 0.0 }
 0x128   : > { %v691_v50 = vld [vmem:[%s1138_s25 + $0x8] sm:$0xff] (%p987_p5) }
 0x129   : > { %633 = vst [vmem:[%s1138_s25 + $0x18] sm:$0xff] %v625_v47  ;;  %637 = vst [vmem:[%s1138_s25 + $0x38] sm:$0xff] %v629_v48  ;;  %v699_v54 = vld [vmem:[%s1138_s25 + $0x28] sm:$0xff] (%p987_p5) }
 0x12a   : > { %692 = vst [vmem:[%s646_s27 + $0x28] sm:$0xff] %v691_v50  ;;  %700 = vst [vmem:[%s646_s27 + $0xc8] sm:$0xff] %v699_v54 }
 0x12c   : > { %v693_v51 = vld [vmem:[%s1138_s25 + $0x10] sm:$0xff] }
 0x12d   : > { %694 = vst [vmem:[%s646_s27 + $0x50] sm:$0xff] %v693_v51  ;;  %v701_v55 = vld [vmem:[%s1138_s25 + $0x30] sm:$0xff] }
 0x12e   : > { %702 = vst [vmem:[%s646_s27 + $0xf0] sm:$0xff] %v701_v55 }
 0x130   : > { %v695_v52 = vld [vmem:[%s1138_s25 + $0x18] sm:$0xff] }
 0x131   : > { %696 = vst [vmem:[%s646_s27 + $0x78] sm:$0xff] %v695_v52  ;;  %v703_v56 = vld [vmem:[%s1138_s25 + $0x38] sm:$0xff] }
 0x132   : > { %704 = vst [vmem:[%s646_s27 + $0x118] sm:$0xff] %v703_v56 }
 0x133 PF: > { %p10_p10 = scmp.ge.s32.totalorder %s974_s16, 7   ;;  %s1178_s12 = smov %s930_s13 }
 0x134   : > { %s1179_s13 = smov %s985_s19  ;;  %s1180_s14 = smov %s974_s16 }
 0x135   :  { %12 = sbr.rel (!%p10_p10) target bundleno = 2 (0x2), region = 146 }

// kernel: sketch_depth_colorizer.28
= control target key start
LH: loop header
LB: loop body
LE: loop exit
PB: predicated region body
PF: predicated region fallthrough
CT: control target
= control target key end

     0   :  { %s1304_s12 = smov 0   ;;  %s1306_s13 = smov 0   ;;  %s1599_s0 = inlined_call_operand.vmem [shape: bf16[3,288], index: 0, kind: input, shape index: {}]   ;;  %s1600_s1 = inlined_call_operand.vmem [shape: bf16[288,2048], index: 1, kind: input, shape index: {}]   ;;  %s1601_s2 = inlined_call_operand.vmem [shape: f32[3,1], index: 2, kind: input, shape index: {}]   ;;  %s1602_s3 = inlined_call_operand.vmem [shape: f32[3,2048], index: 3, kind: output, shape index: {}]  }
   0x1   :  { %s1308_s14 = smov 0  }
   0x2 LB: > { %s1034_s15 = sadd.s32 4294967295, %s1280_s14   ;;  %s1321_s16 = sadd.s32 1, %s1280_s14   ;;  %s1280_s14 = sphi %s1308_s14, %s1605_s14   ;;  %s1276_s13 = sphi %s1306_s13, %s1604_s13   ;;  %s1272_s12 = sphi %s1304_s12, %s1603_s12  }
   0x3   : > { %s38_s17 = ssub.s32 %s1280_s14, %s1321_s16  ;;  %s41_s18 = sadd.s32 1, %s1276_s13 }
   0x4   : > { %p39_p0 = scmp.eq.s32.totalorder %s38_s17, 0  ;;  %p48_p1 = scmp.ne.s32.totalorder %s1276_s13, %s1272_s12 }
   0x5   : > { %p49_p2 = scmp.eq.s32.totalorder %s1280_s14, 0  ;;  %p1037_p4 = scmp.ge.s32.totalorder %s1280_s14, 4 }
   0x6   : > { %s1330_s19 = scalar_select %p39_p0, %s1276_s13, %s41_s18  }
   0x7   : > { %p50_p3 = por %p49_p2, %p48_p1  ;;  %127 = sbr.rel (%p1037_p4) target bundleno = 52 (0x34), region = 24 }
   0xc   : > { %130 = sbr.rel (!%p50_p3) target bundleno = 52 (0x34), region = 28  ;;  %s132_s20 = sand.u32 (%p50_p3), 1, %s1276_s13  }
   0xd   : > { %s1119_s21 = sshll.u32 (%p50_p3), %s1280_s14, 4  ;;  %s1120_s22 = smul.u32 (%p50_p3), 576, %s132_s20 }
   0xe   : > { %s1338_s25 = scalar_lea.vmem (%p50_p3), %s1600_s1, %s1119_s21 }
   0xf   : > { %v150_v0 = vld [vmem:[%s1338_s25] sm:$0xff] (%p50_p3)  ;;  %v152_v1 = vld [vmem:[%s1338_s25 + $0x8] sm:$0xff] (%p50_p3)  ;;  %s1346_s26 = scalar_lea.vmem (%p50_p3), [#allocation2], %s1120_s22 }
  0x10   : > { %v154_v2 = vld [vmem:[%s1338_s25 + $0x40] sm:$0xff] (%p50_p3)  ;;  %v156_v3 = vld [vmem:[%s1338_s25 + $0x48] sm:$0xff] (%p50_p3)  ;;  %151 = vst [vmem:[%s1346_s26] sm:$0xff] (%p50_p3), %v150_v0  ;;  %153 = vst [vmem:[%s1346_s26 + $0x8] sm:$0xff] (%p50_p3), %v152_v1 }
  0x11   : > { %v158_v4 = vld [vmem:[%s1338_s25 + $0x80] sm:$0xff]  ;;  %v160_v5 = vld [vmem:[%s1338_s25 + $0x88] sm:$0xff]  ;;  %155 = vst [vmem:[%s1346_s26 + $0x10] sm:$0xff] %v154_v2  ;;  %157 = vst [vmem:[%s1346_s26 + $0x18] sm:$0xff] %v156_v3 }
  0x12   : > { %159 = vst [vmem:[%s1346_s26 + $0x20] sm:$0xff] %v158_v4  ;;  %161 = vst [vmem:[%s1346_s26 + $0x28] sm:$0xff] %v160_v5  ;;  %v162_v6 = vld [vmem:[%s1338_s25 + $0xc0] sm:$0xff]  ;;  %v164_v7 = vld [vmem:[%s1338_s25 + $0xc8] sm:$0xff] }
  0x13   : > { %v166_v8 = vld [vmem:[%s1338_s25 + $0x100] sm:$0xff]  ;;  %163 = vst [vmem:[%s1346_s26 + $0x30] sm:$0xff] %v162_v6  ;;  %165 = vst [vmem:[%s1346_s26 + $0x38] sm:$0xff] %v164_v7  ;;  %v168_v9 = vld [vmem:[%s1338_s25 + $0x108] sm:$0xff] }
  0x14   : > { %167 = vst [vmem:[%s1346_s26 + $0x40] sm:$0xff] %v166_v8  ;;  %v170_v10 = vld [vmem:[%s1338_s25 + $0x140] sm:$0xff]  ;;  %v172_v11 = vld [vmem:[%s1338_s25 + $0x148] sm:$0xff]  ;;  %169 = vst [vmem:[%s1346_s26 + $0x48] sm:$0xff] %v168_v9 }
  0x15   : > { %171 = vst [vmem:[%s1346_s26 + $0x50] sm:$0xff] %v170_v10  ;;  %173 = vst [vmem:[%s1346_s26 + $0x58] sm:$0xff] %v172_v11  ;;  %v174_v12 = vld [vmem:[%s1338_s25 + $0x180] sm:$0xff]  ;;  %v176_v13 = vld [vmem:[%s1338_s25 + $0x188] sm:$0xff] }
  0x16   : > { %v178_v14 = vld [vmem:[%s1338_s25 + $0x1c0] sm:$0xff]  ;;  %175 = vst [vmem:[%s1346_s26 + $0x60] sm:$0xff] %v174_v12  ;;  %177 = vst [vmem:[%s1346_s26 + $0x68] sm:$0xff] %v176_v13  ;;  %v180_v15 = vld [vmem:[%s1338_s25 + $0x1c8] sm:$0xff] }
  0x17   : > { %179 = vst [vmem:[%s1346_s26 + $0x70] sm:$0xff] %v178_v14  ;;  %v182_v16 = vld [vmem:[%s1338_s25 + $0x200] sm:$0xff]  ;;  %v184_v17 = vld [vmem:[%s1338_s25 + $0x208] sm:$0xff]  ;;  %181 = vst [vmem:[%s1346_s26 + $0x78] sm:$0xff] %v180_v15 }
  0x18   : > { %183 = vst [vmem:[%s1346_s26 + $0x80] sm:$0xff] %v182_v16  ;;  %185 = vst [vmem:[%s1346_s26 + $0x88] sm:$0xff] %v184_v17  ;;  %v186_v18 = vld [vmem:[%s1338_s25 + $0x240] sm:$0xff]  ;;  %v188_v19 = vld [vmem:[%s1338_s25 + $0x248] sm:$0xff] }
  0x19   : > { %v190_v20 = vld [vmem:[%s1338_s25 + $0x280] sm:$0xff]  ;;  %187 = vst [vmem:[%s1346_s26 + $0x90] sm:$0xff] %v186_v18  ;;  %189 = vst [vmem:[%s1346_s26 + $0x98] sm:$0xff] %v188_v19  ;;  %v192_v21 = vld [vmem:[%s1338_s25 + $0x288] sm:$0xff] }
  0x1a   : > { %191 = vst [vmem:[%s1346_s26 + $0xa0] sm:$0xff] %v190_v20  ;;  %v194_v22 = vld [vmem:[%s1338_s25 + $0x2c0] sm:$0xff]  ;;  %v196_v23 = vld [vmem:[%s1338_s25 + $0x2c8] sm:$0xff]  ;;  %193 = vst [vmem:[%s1346_s26 + $0xa8] sm:$0xff] %v192_v21 }
  0x1b   : > { %195 = vst [vmem:[%s1346_s26 + $0xb0] sm:$0xff] %v194_v22  ;;  %197 = vst [vmem:[%s1346_s26 + $0xb8] sm:$0xff] %v196_v23  ;;  %v198_v24 = vld [vmem:[%s1338_s25 + $0x300] sm:$0xff]  ;;  %v200_v25 = vld [vmem:[%s1338_s25 + $0x308] sm:$0xff] }
  0x1c   : > { %v202_v26 = vld [vmem:[%s1338_s25 + $0x340] sm:$0xff]  ;;  %199 = vst [vmem:[%s1346_s26 + $0xc0] sm:$0xff] %v198_v24  ;;  %201 = vst [vmem:[%s1346_s26 + $0xc8] sm:$0xff] %v200_v25  ;;  %v204_v27 = vld [vmem:[%s1338_s25 + $0x348] sm:$0xff] }
  0x1d   : > { %203 = vst [vmem:[%s1346_s26 + $0xd0] sm:$0xff] %v202_v26  ;;  %v206_v28 = vld [vmem:[%s1338_s25 + $0x380] sm:$0xff]  ;;  %v208_v29 = vld [vmem:[%s1338_s25 + $0x388] sm:$0xff]  ;;  %205 = vst [vmem:[%s1346_s26 + $0xd8] sm:$0xff] %v204_v27 }
  0x1e   : > { %207 = vst [vmem:[%s1346_s26 + $0xe0] sm:$0xff] %v206_v28  ;;  %209 = vst [vmem:[%s1346_s26 + $0xe8] sm:$0xff] %v208_v29  ;;  %v210_v30 = vld [vmem:[%s1338_s25 + $0x3c0] sm:$0xff]  ;;  %v212_v31 = vld [vmem:[%s1338_s25 + $0x3c8] sm:$0xff] }
  0x1f   : > { %v214_v32 = vld [vmem:[%s1338_s25 + $0x400] sm:$0xff]  ;;  %211 = vst [vmem:[%s1346_s26 + $0xf0] sm:$0xff] %v210_v30  ;;  %213 = vst [vmem:[%s1346_s26 + $0xf8] sm:$0xff] %v212_v31  ;;  %v216_v33 = vld [vmem:[%s1338_s25 + $0x408] sm:$0xff] }
  0x20   : > { %215 = vst [vmem:[%s1346_s26 + $0x100] sm:$0xff] %v214_v32  ;;  %v218_v34 = vld [vmem:[%s1338_s25 + $0x440] sm:$0xff]  ;;  %v220_v35 = vld [vmem:[%s1338_s25 + $0x448] sm:$0xff]  ;;  %217 = vst [vmem:[%s1346_s26 + $0x108] sm:$0xff] %v216_v33 }
  0x21   : > { %219 = vst [vmem:[%s1346_s26 + $0x110] sm:$0xff] %v218_v34  ;;  %221 = vst [vmem:[%s1346_s26 + $0x118] sm:$0xff] %v220_v35  ;;  %v222_v36 = vld [vmem:[%s1338_s25 + $0x480] sm:$0xff]  ;;  %v224_v37 = vld [vmem:[%s1338_s25 + $0x488] sm:$0xff] }
  0x22   : > { %v226_v38 = vld [vmem:[%s1338_s25 + $0x4c0] sm:$0xff]  ;;  %223 = vst [vmem:[%s1346_s26 + $0x120] sm:$0xff] %v222_v36  ;;  %225 = vst [vmem:[%s1346_s26 + $0x128] sm:$0xff] %v224_v37  ;;  %v228_v39 = vld [vmem:[%s1338_s25 + $0x4c8] sm:$0xff] }
  0x23   : > { %227 = vst [vmem:[%s1346_s26 + $0x130] sm:$0xff] %v226_v38  ;;  %v230_v40 = vld [vmem:[%s1338_s25 + $0x500] sm:$0xff]  ;;  %v232_v41 = vld [vmem:[%s1338_s25 + $0x508] sm:$0xff]  ;;  %229 = vst [vmem:[%s1346_s26 + $0x138] sm:$0xff] %v228_v39 }
  0x24   : > { %231 = vst [vmem:[%s1346_s26 + $0x140] sm:$0xff] %v230_v40  ;;  %233 = vst [vmem:[%s1346_s26 + $0x148] sm:$0xff] %v232_v41  ;;  %v234_v42 = vld [vmem:[%s1338_s25 + $0x540] sm:$0xff]  ;;  %v236_v43 = vld [vmem:[%s1338_s25 + $0x548] sm:$0xff] }
  0x25   : > { %v238_v44 = vld [vmem:[%s1338_s25 + $0x580] sm:$0xff]  ;;  %235 = vst [vmem:[%s1346_s26 + $0x150] sm:$0xff] %v234_v42  ;;  %237 = vst [vmem:[%s1346_s26 + $0x158] sm:$0xff] %v236_v43  ;;  %v240_v45 = vld [vmem:[%s1338_s25 + $0x588] sm:$0xff] }
  0x26   : > { %239 = vst [vmem:[%s1346_s26 + $0x160] sm:$0xff] %v238_v44  ;;  %v242_v46 = vld [vmem:[%s1338_s25 + $0x5c0] sm:$0xff]  ;;  %v244_v47 = vld [vmem:[%s1338_s25 + $0x5c8] sm:$0xff]  ;;  %241 = vst [vmem:[%s1346_s26 + $0x168] sm:$0xff] %v240_v45 }
  0x27   : > { %243 = vst [vmem:[%s1346_s26 + $0x170] sm:$0xff] %v242_v46  ;;  %245 = vst [vmem:[%s1346_s26 + $0x178] sm:$0xff] %v244_v47  ;;  %v246_v48 = vld [vmem:[%s1338_s25 + $0x600] sm:$0xff]  ;;  %v248_v49 = vld [vmem:[%s1338_s25 + $0x608] sm:$0xff] }
  0x28   : > { %v250_v50 = vld [vmem:[%s1338_s25 + $0x640] sm:$0xff]  ;;  %247 = vst [vmem:[%s1346_s26 + $0x180] sm:$0xff] %v246_v48  ;;  %249 = vst [vmem:[%s1346_s26 + $0x188] sm:$0xff] %v248_v49  ;;  %v252_v51 = vld [vmem:[%s1338_s25 + $0x648] sm:$0xff] }
  0x29   : > { %251 = vst [vmem:[%s1346_s26 + $0x190] sm:$0xff] %v250_v50  ;;  %v254_v52 = vld [vmem:[%s1338_s25 + $0x680] sm:$0xff]  ;;  %v256_v53 = vld [vmem:[%s1338_s25 + $0x688] sm:$0xff]  ;;  %253 = vst [vmem:[%s1346_s26 + $0x198] sm:$0xff] %v252_v51 }
  0x2a   : > { %255 = vst [vmem:[%s1346_s26 + $0x1a0] sm:$0xff] %v254_v52  ;;  %257 = vst [vmem:[%s1346_s26 + $0x1a8] sm:$0xff] %v256_v53  ;;  %v258_v54 = vld [vmem:[%s1338_s25 + $0x6c0] sm:$0xff]  ;;  %v260_v55 = vld [vmem:[%s1338_s25 + $0x6c8] sm:$0xff] }
  0x2b   : > { %v262_v56 = vld [vmem:[%s1338_s25 + $0x700] sm:$0xff]  ;;  %259 = vst [vmem:[%s1346_s26 + $0x1b0] sm:$0xff] %v258_v54  ;;  %261 = vst [vmem:[%s1346_s26 + $0x1b8] sm:$0xff] %v260_v55  ;;  %v264_v57 = vld [vmem:[%s1338_s25 + $0x708] sm:$0xff] }
  0x2c   : > { %263 = vst [vmem:[%s1346_s26 + $0x1c0] sm:$0xff] %v262_v56  ;;  %v266_v58 = vld [vmem:[%s1338_s25 + $0x740] sm:$0xff]  ;;  %v268_v59 = vld [vmem:[%s1338_s25 + $0x748] sm:$0xff]  ;;  %265 = vst [vmem:[%s1346_s26 + $0x1c8] sm:$0xff] %v264_v57 }
  0x2d   : > { %267 = vst [vmem:[%s1346_s26 + $0x1d0] sm:$0xff] %v266_v58  ;;  %269 = vst [vmem:[%s1346_s26 + $0x1d8] sm:$0xff] %v268_v59  ;;  %v270_v60 = vld [vmem:[%s1338_s25 + $0x780] sm:$0xff]  ;;  %v272_v61 = vld [vmem:[%s1338_s25 + $0x788] sm:$0xff] }
  0x2e   : > { %v274_v62 = vld [vmem:[%s1338_s25 + $0x7c0] sm:$0xff]  ;;  %271 = vst [vmem:[%s1346_s26 + $0x1e0] sm:$0xff] %v270_v60  ;;  %273 = vst [vmem:[%s1346_s26 + $0x1e8] sm:$0xff] %v272_v61  ;;  %v276_v63 = vld [vmem:[%s1338_s25 + $0x7c8] sm:$0xff] }
  0x2f   : > { %275 = vst [vmem:[%s1346_s26 + $0x1f0] sm:$0xff] %v274_v62  ;;  %v278_v0 = vld [vmem:[%s1338_s25 + $0x800] sm:$0xff]  ;;  %v280_v1 = vld [vmem:[%s1338_s25 + $0x808] sm:$0xff]  ;;  %277 = vst [vmem:[%s1346_s26 + $0x1f8] sm:$0xff] %v276_v63 }
  0x30   : > { %279 = vst [vmem:[%s1346_s26 + $0x200] sm:$0xff] %v278_v0  ;;  %281 = vst [vmem:[%s1346_s26 + $0x208] sm:$0xff] %v280_v1  ;;  %v282_v2 = vld [vmem:[%s1338_s25 + $0x840] sm:$0xff]  ;;  %v284_v3 = vld [vmem:[%s1338_s25 + $0x848] sm:$0xff] }
  0x31   : > { %v286_v4 = vld [vmem:[%s1338_s25 + $0x880] sm:$0xff]  ;;  %283 = vst [vmem:[%s1346_s26 + $0x210] sm:$0xff] %v282_v2  ;;  %285 = vst [vmem:[%s1346_s26 + $0x218] sm:$0xff] %v284_v3  ;;  %v288_v5 = vld [vmem:[%s1338_s25 + $0x888] sm:$0xff] }
  0x32   : > { %287 = vst [vmem:[%s1346_s26 + $0x220] sm:$0xff] %v286_v4  ;;  %v290_v6 = vld [vmem:[%s1338_s25 + $0x8c0] sm:$0xff]  ;;  %v292_v7 = vld [vmem:[%s1338_s25 + $0x8c8] sm:$0xff]  ;;  %289 = vst [vmem:[%s1346_s26 + $0x228] sm:$0xff] %v288_v5 }
  0x33   : > { %291 = vst [vmem:[%s1346_s26 + $0x230] sm:$0xff] %v290_v6  ;;  %293 = vst [vmem:[%s1346_s26 + $0x238] sm:$0xff] %v292_v7 }
  0x34 PF: > { %p1040_p5 = scmp.ge.s32.totalorder %s1280_s14, 1  ;;  %p298_p6 = scmp.lt.s32.totalorder %s1280_s14, 5 }
  0x36   : > { %p299_p7 = pnand %p1040_p5, %p298_p6 }
  0x37   : > { %s305_s27 = sand.u32 (!%p299_p7), 1, %s1272_s12   ;;  %s1041_s7 = sshll.u32 (!%p299_p7), %s1034_s15, 2 }
  0x38   : > { %302 = sbr.rel (%p299_p7) target bundleno = 339 (0x153), region = 51  ;;  %p330_p8 = scmp.lt.s32.totalorder (!%p299_p7), %s1041_s7, 15 }
  0x39   : > { %s1121_s28 = smul.u32 (!%p299_p7), 576, %s305_s27 }
  0x3b   : > { %s1497_s6 = scalar_lea.vmem (!%p299_p7), [#allocation2], %s1121_s28 }
  0x3d   : > { %v420_v8 = vlaneseq  ;;  %v1282_v9 = vmov 0   ;;  %v1283_v10 = vmov 1983009808   ;;  %v409_v12 = vld [vmem:[%s1601_s2] sm:$0x7]  ;;  %vm794_vm0 = vcmask 261120  }
  0x3e   : > { %871 = vmatprep.mubr.bf16.mxu1 %v1282_v9  ;;  %v418_v11 = vunpack.c.l.s4 %v1283_v10  ;;  %1148 = vset.pattern.permute.xlu0 %v1282_v9  ;;  %v336_v14 = vld [vmem:[%s1599_s0] sm:$0x3f]  ;;  %v1164_v30 = vld [vmem:[%s1497_s6 + $0xe8] ss:$16 sps:$4 sm:$0xff]   ;;  %v1166_v31 = vld [vmem:[%s1497_s6 + $0xec] ss:$16 sps:$4 sm:$0xff]  }
  0x3f   : > { %v421_v13 = vshrl.u32 %v420_v8, 7  ;;  %412 = vperm.xlu0 %1148, %v409_v12   ;;  %v1149_v16 = vld [vmem:[%s1497_s6 + $0xe4] ss:$16 sps:$4 sm:$0xff]   ;;  %v1153_v19 = vld [vmem:[%s1497_s6 + $0xe0] ss:$16 sps:$4 sm:$0xff]   ;;  %v416_v22 = vcombine.high %v336_v14, %v336_v14  ;;  %s1607_s7 = smov (!%p330_p8, %s1041_s7), 15 }
  0x40   : > { %v419_v15 = vunpack.c.0.s8 %v418_v11  ;;  %v1151_v17 = vld [vmem:[%s1497_s6 + $0x224] ss:$16 sps:$4 sm:$0xff]   ;;  %798 = vmatprep.subr.bf16.mxu0 %v1149_v16  ;;  %v1154_v20 = vld [vmem:[%s1497_s6 + $0x220] ss:$16 sps:$4 sm:$0xff]   ;;  %v1172_v34 = vld [vmem:[%s1497_s6 + $0xcc] ss:$16 sps:$4 sm:$0xff]  }
  0x41   : > { %851 = vmatprep.subr.bf16.mxu1 %v1151_v17  ;;  %v1155_v21 = vld [vmem:[%s1497_s6 + $0xc4] ss:$16 sps:$4 sm:$0xff]   ;;  %799 = vmatpush1.bf16.msra.mxu0 %v1153_v19  ;;  %v1159_v25 = vld [vmem:[%s1497_s6 + $0xc0] ss:$16 sps:$4 sm:$0xff]   ;;  %v1170_v35 = vld [vmem:[%s1497_s6 + $0xc8] ss:$16 sps:$4 sm:$0xff]  }
  0x42   : > { %v422_v18 = vsub.s32 %v419_v15, %v421_v13  ;;  %852 = vmatpush1.bf16.msra.mxu1 %v1154_v20  ;;  %v1157_v24 = vld [vmem:[%s1497_s6 + $0x204] ss:$16 sps:$4 sm:$0xff]   ;;  %800 = vmatprep.subr.bf16.mxu0 %v1155_v21  ;;  %v1160_v26 = vld [vmem:[%s1497_s6 + $0x200] ss:$16 sps:$4 sm:$0xff]   ;;  %v1178_v38 = vld [vmem:[%s1497_s6 + $0xac] ss:$16 sps:$4 sm:$0xff]  }
  0x43   : > { %853 = vmatprep.subr.bf16.mxu1 %v1157_v24  ;;  %v1161_v28 = vld [vmem:[%s1497_s6 + $0xa4] ss:$16 sps:$4 sm:$0xff]   ;;  %v1167_v32 = vld [vmem:[%s1497_s6 + $0xa0] ss:$16 sps:$4 sm:$0xff]   ;;  %v1176_v39 = vld [vmem:[%s1497_s6 + $0xa8] ss:$16 sps:$4 sm:$0xff]  }
  0x44   : > { %v1504_v23 = vrot.slane %v336_v14, %v422_v18  ;;  %v1512_v29 = vrot.slane %v416_v22, %v422_v18  ;;  %v1168_v33 = vld [vmem:[%s1497_s6 + $0x84] ss:$16 sps:$4 sm:$0xff]   ;;  %v1173_v36 = vld [vmem:[%s1497_s6 + $0x80] ss:$16 sps:$4 sm:$0xff]   ;;  %v1184_v42 = vld [vmem:[%s1497_s6 + $0x8c] ss:$16 sps:$4 sm:$0xff]  }
  0x45   : > { %801 = vmatpush1.bf16.msra.mxu0 %v1159_v25  ;;  %v1174_v37 = vld [vmem:[%s1497_s6 + $0x64] ss:$16 sps:$4 sm:$0xff]   ;;  %v1179_v40 = vld [vmem:[%s1497_s6 + $0x60] ss:$16 sps:$4 sm:$0xff]   ;;  %v1182_v43 = vld [vmem:[%s1497_s6 + $0x88] ss:$16 sps:$4 sm:$0xff]  }
  0x46   : > { %v431_v27 = vcombine.high %v1504_v23, %v1504_v23  ;;  %854 = vmatpush1.bf16.msra.mxu1 %v1160_v26  ;;  %802 = vmatprep.subr.bf16.mxu0 %v1161_v28  ;;  %v1180_v41 = vld [vmem:[%s1497_s6 + $0x44] ss:$16 sps:$4 sm:$0xff]   ;;  %v1185_v44 = vld [vmem:[%s1497_s6 + $0x40] ss:$16 sps:$4 sm:$0xff]   ;;  %v1190_v46 = vld [vmem:[%s1497_s6 + $0x6c] ss:$16 sps:$4 sm:$0xff]  }
  0x47   : > { %880 = vmatprep.subr.bf16.mxu1 %v1166_v31  ;;  %v1186_v45 = vld [vmem:[%s1497_s6 + $0x24] ss:$16 sps:$4 sm:$0xff]   ;;  %v1188_v47 = vld [vmem:[%s1497_s6 + $0x68] ss:$16 sps:$4 sm:$0xff]   ;;  %v1191_v48 = vld [vmem:[%s1497_s6 + $0x20] ss:$16 sps:$4 sm:$0xff]  }
  0x48   : > { %830 = vmatprep.mubr.bf16.mxu0 %v431_v27  ;;  %v1192_v49 = vld [vmem:[%s1497_s6 + $0x4] ss:$16 sps:$4 sm:$0xff]   ;;  %v1196_v50 = vld [vmem:[%s1497_s6 + $0x4c] ss:$16 sps:$4 sm:$0xff]   ;;  %v1194_v51 = vld [vmem:[%s1497_s6 + $0x48] ss:$16 sps:$4 sm:$0xff]  }
  0x49   : > { %1115 = vmatmul.mubr.msk.bf16.vlgmr.msra.gmra.mxu1 %vm794_vm0, %v1512_v29  ;;  %803 = vmatpush1.bf16.msra.mxu0 %v1167_v32  ;;  %v1197_v52 = vld [vmem:[%s1497_s6] ss:$16 sps:$4 sm:$0xff]   ;;  %v1198_v53 = vld [vmem:[%s1497_s6 + $0x1e4] ss:$16 sps:$4 sm:$0xff]   ;;  %v1202_v54 = vld [vmem:[%s1497_s6 + $0x2c] ss:$16 sps:$4 sm:$0xff]  }
  0x4a   : > { %881 = vmatpush1.bf16.msra.mxu1 %v1164_v30  ;;  %804 = vmatprep.subr.bf16.mxu0 %v1168_v33  ;;  %v1200_v55 = vld [vmem:[%s1497_s6 + $0x28] ss:$16 sps:$4 sm:$0xff]   ;;  %v1203_v56 = vld [vmem:[%s1497_s6 + $0x1e0] ss:$16 sps:$4 sm:$0xff]   ;;  %v1204_v57 = vld [vmem:[%s1497_s6 + $0x1c4] ss:$16 sps:$4 sm:$0xff]  }
  0x4b   : > { %882 = vmatprep.subr.bf16.mxu1 %v1172_v34  ;;  %912 = vmatprep.mubr.bf16.mxu1 %v431_v27  ;;  %v1208_v58 = vld [vmem:[%s1497_s6 + $0xc] ss:$16 sps:$4 sm:$0xff]   ;;  %v1206_v59 = vld [vmem:[%s1497_s6 + $0x8] ss:$16 sps:$4 sm:$0xff]   ;;  %v1209_v60 = vld [vmem:[%s1497_s6 + $0x1c0] ss:$16 sps:$4 sm:$0xff]  }
  0x4c   : > { %v1210_v61 = vld [vmem:[%s1497_s6 + $0x1a4] ss:$16 sps:$4 sm:$0xff]   ;;  %v1214_v62 = vld [vmem:[%s1497_s6 + $0x1ec] ss:$16 sps:$4 sm:$0xff]   ;;  %v1212_v63 = vld [vmem:[%s1497_s6 + $0x1e8] ss:$16 sps:$4 sm:$0xff]  }
  0x4d   : > { %805 = vmatpush1.bf16.msra.mxu0 %v1173_v36  ;;  %v1215_v0 = vld [vmem:[%s1497_s6 + $0x1a0] ss:$16 sps:$4 sm:$0xff]   ;;  %v1216_v1 = vld [vmem:[%s1497_s6 + $0x184] ss:$16 sps:$4 sm:$0xff]   ;;  %v1220_v2 = vld [vmem:[%s1497_s6 + $0x1cc] ss:$16 sps:$4 sm:$0xff]  }
  0x4e   : > { %883 = vmatpush1.bf16.msra.mxu1 %v1170_v35  ;;  %806 = vmatprep.subr.bf16.mxu0 %v1174_v37  ;;  %v1218_v3 = vld [vmem:[%s1497_s6 + $0x1c8] ss:$16 sps:$4 sm:$0xff]   ;;  %v1221_v4 = vld [vmem:[%s1497_s6 + $0x180] ss:$16 sps:$4 sm:$0xff]   ;;  %v1222_v5 = vld [vmem:[%s1497_s6 + $0x164] ss:$16 sps:$4 sm:$0xff]  }
  0x4f   : > { %884 = vmatprep.subr.bf16.mxu1 %v1178_v38  ;;  %v1226_v6 = vld [vmem:[%s1497_s6 + $0x1ac] ss:$16 sps:$4 sm:$0xff]   ;;  %v1224_v7 = vld [vmem:[%s1497_s6 + $0x1a8] ss:$16 sps:$4 sm:$0xff]   ;;  %v1227_v8 = vld [vmem:[%s1497_s6 + $0x160] ss:$16 sps:$4 sm:$0xff]  }
  0x50   : > { %v1228_v10 = vld [vmem:[%s1497_s6 + $0x144] ss:$16 sps:$4 sm:$0xff]   ;;  %v1232_v11 = vld [vmem:[%s1497_s6 + $0x18c] ss:$16 sps:$4 sm:$0xff]   ;;  %v1230_v12 = vld [vmem:[%s1497_s6 + $0x188] ss:$16 sps:$4 sm:$0xff]  }
  0x51   : > { %807 = vmatpush1.bf16.msra.mxu0 %v1179_v40  ;;  %v1233_v13 = vld [vmem:[%s1497_s6 + $0x140] ss:$16 sps:$4 sm:$0xff]   ;;  %v1234_v14 = vld [vmem:[%s1497_s6 + $0x124] ss:$16 sps:$4 sm:$0xff]   ;;  %v1238_v15 = vld [vmem:[%s1497_s6 + $0x16c] ss:$16 sps:$4 sm:$0xff]  }
  0x52   : > { %885 = vmatpush1.bf16.msra.mxu1 %v1176_v39  ;;  %808 = vmatprep.subr.bf16.mxu0 %v1180_v41  ;;  %v1236_v16 = vld [vmem:[%s1497_s6 + $0x168] ss:$16 sps:$4 sm:$0xff]   ;;  %v1239_v17 = vld [vmem:[%s1497_s6 + $0x120] ss:$16 sps:$4 sm:$0xff]   ;;  %v1240_v18 = vld [vmem:[%s1497_s6 + $0x104] ss:$16 sps:$4 sm:$0xff]  }
  0x53   : > { %886 = vmatprep.subr.bf16.mxu1 %v1184_v42  ;;  %v1244_v19 = vld [vmem:[%s1497_s6 + $0x14c] ss:$16 sps:$4 sm:$0xff]   ;;  %v1242_v20 = vld [vmem:[%s1497_s6 + $0x148] ss:$16 sps:$4 sm:$0xff]   ;;  %v1245_v21 = vld [vmem:[%s1497_s6 + $0x100] ss:$16 sps:$4 sm:$0xff]  }
  0x54   : > { %v1248_v22 = vld [vmem:[%s1497_s6 + $0x12c] ss:$16 sps:$4 sm:$0xff]   ;;  %v1246_v25 = vld [vmem:[%s1497_s6 + $0x128] ss:$16 sps:$4 sm:$0xff]   ;;  %s1042_s8 = sshll.u32 %s1607_s7, 2 }
  0x55   : > { %809 = vmatpush1.bf16.msra.mxu0 %v1185_v44  ;;  %v1251_v24 = vld [vmem:[%s1497_s6 + $0x22c] ss:$16 sps:$4 sm:$0xff]   ;;  %v1249_v26 = vld [vmem:[%s1497_s6 + $0x228] ss:$16 sps:$4 sm:$0xff]   ;;  %s333_s11 = scalar_lea.vmem %s1602_s3, %s1042_s8 }
  0x56   : > { %887 = vmatpush1.bf16.msra.mxu1 %v1182_v43  ;;  %810 = vmatprep.subr.bf16.mxu0 %v1186_v45  ;;  %v1254_v27 = vld [vmem:[%s1497_s6 + $0x10c] ss:$16 sps:$4 sm:$0xff]   ;;  %v1252_v30 = vld [vmem:[%s1497_s6 + $0x108] ss:$16 sps:$4 sm:$0xff]  }
  0x57   : > { %888 = vmatprep.subr.bf16.mxu1 %v1190_v46  ;;  %v1257_v28 = vld [vmem:[%s1497_s6 + $0x20c] ss:$16 sps:$4 sm:$0xff]   ;;  %v1255_v31 = vld [vmem:[%s1497_s6 + $0x208] ss:$16 sps:$4 sm:$0xff]  }
  0x59   : > { %811 = vmatpush1.bf16.msra.mxu0 %v1191_v48 }
  0x5a   : > { %889 = vmatpush1.bf16.msra.mxu1 %v1188_v47  ;;  %812 = vmatprep.subr.bf16.mxu0 %v1192_v49 }
  0x5b   : > { %890 = vmatprep.subr.bf16.mxu1 %v1196_v50 }
  0x5d   : > { %813 = vmatpush1.bf16.msra.mxu0 %v1197_v52 }
  0x5e   : > { %891 = vmatpush1.bf16.msra.mxu1 %v1194_v51  ;;  %814 = vmatprep.subr.bf16.mxu0 %v1198_v53 }
  0x5f   : > { %892 = vmatprep.subr.bf16.mxu1 %v1202_v54 }
  0x61   : > { %815 = vmatpush2.bf16.msra.mxu0 %v1203_v56 }
  0x62   : > { %893 = vmatpush1.bf16.msra.mxu1 %v1200_v55  ;;  %816 = vmatprep.subr.bf16.mxu0 %v1204_v57 }
  0x63   : > { %894 = vmatprep.subr.bf16.mxu1 %v1208_v58 }
  0x65   : > { %817 = vmatpush2.bf16.msra.mxu0 %v1209_v60 }
  0x66   : > { %895 = vmatpush1.bf16.msra.mxu1 %v1206_v59  ;;  %818 = vmatprep.subr.bf16.mxu0 %v1210_v61 }
  0x67   : > { %896 = vmatprep.subr.bf16.mxu1 %v1214_v62 }
  0x69   : > { %819 = vmatpush2.bf16.msra.mxu0 %v1215_v0 }
  0x6a   : > { %897 = vmatpush2.bf16.msra.mxu1 %v1212_v63  ;;  %820 = vmatprep.subr.bf16.mxu0 %v1216_v1 }
  0x6b   : > { %898 = vmatprep.subr.bf16.mxu1 %v1220_v2 }
  0x6d   : > { %821 = vmatpush2.bf16.msra.mxu0 %v1221_v4 }
  0x6e   : > { %899 = vmatpush2.bf16.msra.mxu1 %v1218_v3  ;;  %822 = vmatprep.subr.bf16.mxu0 %v1222_v5 }
  0x6f   : > { %900 = vmatprep.subr.bf16.mxu1 %v1226_v6 }
  0x71   : > { %823 = vmatpush2.bf16.msra.mxu0 %v1227_v8 }
  0x72   : > { %901 = vmatpush2.bf16.msra.mxu1 %v1224_v7  ;;  %824 = vmatprep.subr.bf16.mxu0 %v1228_v10 }
  0x73   : > { %902 = vmatprep.subr.bf16.mxu1 %v1232_v11 }
  0x75   : > { %825 = vmatpush2.bf16.msra.mxu0 %v1233_v13 }
  0x76   : > { %903 = vmatpush2.bf16.msra.mxu1 %v1230_v12  ;;  %826 = vmatprep.subr.bf16.mxu0 %v1234_v14 }
  0x77   : > { %904 = vmatprep.subr.bf16.mxu1 %v1238_v15 }
  0x79   : > { %827 = vmatpush2.bf16.msra.mxu0 %v1239_v17 }
  0x7a   : > { %905 = vmatpush2.bf16.msra.mxu1 %v1236_v16  ;;  %828 = vmatprep.subr.bf16.mxu0 %v1240_v18 }
  0x7b   : > { %906 = vmatprep.subr.bf16.mxu1 %v1244_v19 }
  0x7d   : > { %829 = vmatpush2.bf16.msra.mxu0 %v1245_v21 }
  0x7e   : > { %907 = vmatpush2.bf16.msra.mxu1 %v1242_v20  ;;  %933 = vmatprep.subr.bf16.mxu0 %v1251_v24 }
  0x7f   : > { %908 = vmatprep.subr.bf16.mxu1 %v1248_v22 }
  0x80   : > { %831 = vmatmul.mubr.bf16.vlgmr.msra.gmra.mxu0 %v1504_v23 }
  0x81   : > { %934 = vmatpush1.bf16.msra.mxu0 %v1249_v26  ;;  %953 = vmatprep.mubr.bf16.mxu0 %v1282_v9 }
  0x82   : > { %909 = vmatpush2.bf16.msra.mxu1 %v1246_v25  ;;  %935 = vmatprep.subr.bf16.mxu0 %v1257_v28 }
  0x83   : > { %910 = vmatprep.subr.bf16.mxu1 %v1254_v27 }
  0x85   : > { %936 = vmatpush1.bf16.msra.mxu0 %v1255_v31 }
  0x86   : > { %911 = vmatpush2.bf16.msra.mxu1 %v1252_v30 }
  0x88   : > { %1116 = vmatmul.mubr.msk.bf16.vlgmr.msra.gmra.mxu0 %vm794_vm0, %v1512_v29 }
  0x89   : > { %913 = vmatmul.mubr.bf16.vlgmr.msra.gmra.mxu1 %v1504_v23 }
  0xba   : > { %v413_v36 = vpop.permute.xlu0 %412 }
 0x109   : > { %v873_v32 = vpop.f32.mrf.mxu1 }
 0x10b   : > { %v875_v33 = vpop.f32.mrf.mxu1 }
 0x10d   : > { %v877_v34 = vpop.f32.mrf.mxu1 }
 0x10f   : > { %v878_v35 = vpop.f32.mrf.mxu1 }
 0x140   : > { %v832_v37 = vpop.f32.mrf.mxu0 }
 0x141   : > { %v833_v38 = vadd.f32 %v832_v37, %v413_v36 }
 0x142   : > { %v834_v39 = vpop.f32.mrf.mxu0 }
 0x143   : > { %v835_v9 = vadd.f32 %v834_v39, %v413_v36  ;;  %v874_v41 = vadd.f32 %v873_v32, %v833_v38 }
 0x144   : > { %v836_v40 = vpop.f32.mrf.mxu0 }
 0x145   : > { %v876_v23 = vadd.f32 %v875_v33, %v835_v9 }
 0x146   : > { %v837_v42 = vpop.f32.mrf.mxu0 }
 0x147   : > { %v966_v29 = vcombine.low %v874_v41, %v876_v23 }
 0x148   : > { %v955_v44 = vpop.f32.mrf.mxu0 }
 0x149   : > { %v914_v43 = vpop.f32.mrf.mxu1  ;;  %970 = vst [vmem:[%s333_s11] sm:$0x77] %v966_v29 }
 0x14a   : > { %v915_v45 = vadd.f32 %v914_v43, %v413_v36  ;;  %v957_v47 = vpop.f32.mrf.mxu0 }
 0x14b   : > { %v916_v46 = vpop.f32.mrf.mxu1 }
 0x14c   : > { %v917_v48 = vadd.f32 %v916_v46, %v413_v36  ;;  %v959_v50 = vpop.f32.mrf.mxu0  ;;  %v956_v51 = vadd.f32 %v955_v44, %v915_v45 }
 0x14d   : > { %v918_v49 = vpop.f32.mrf.mxu1 }
 0x14e   : > { %v958_v52 = vadd.f32 %v957_v47, %v917_v48  ;;  %v960_v54 = vpop.f32.mrf.mxu0 }
 0x14f   : > { %v919_v53 = vpop.f32.mrf.mxu1 }
 0x150   : > { %v967_v55 = vcombine.low %v956_v51, %v958_v52 }
 0x152   : > { %971 = vst [vmem:[%s333_s11 + $0x8] sm:$0x77] %v967_v55 }
 0x153 PF: > { %p10_p9 = scmp.ge.s32.totalorder %s1321_s16, 6   ;;  %s1603_s12 = smov %s1276_s13 }
 0x154   : > { %s1604_s13 = smov %s1330_s19  ;;  %s1605_s14 = smov %s1321_s16 }
 0x155   :  { %12 = sbr.rel (!%p10_p9) target bundleno = 2 (0x2), region = 90 }

// kernel: sketch_depth_colorizer.29
= control target key start
LH: loop header
LB: loop body
LE: loop exit
PB: predicated region body
PF: predicated region fallthrough
CT: control target
= control target key end

     0   :  { %v292_v3 = vmov 1983009808   ;;  %v30_v5 = vlaneseq  ;;  %vm152_vm0 = vcmask 1041408   ;;  %s418_s0 = inlined_call_operand.vmem [shape: f32[3,2,1024], index: 0, kind: input, shape index: {}]   ;;  %s419_s1 = inlined_call_operand.vmem [shape: f32[3,2,1024], index: 1, kind: output, shape index: {}]  }
   0x1   :  { %v8_v0 = vld [vmem:[%s418_s0] sm:$0xff]  ;;  %v9_v1 = vld [vmem:[%s418_s0 + $0x8] sm:$0xff]  ;;  %v28_v4 = vunpack.c.l.s4 %v292_v3  ;;  %v10_v7 = vld [vmem:[%s418_s0 + $0x10] sm:$0xff] }
   0x2   :  { %v12_v2 = vld [vmem:[%s418_s0 + $0x20] sm:$0xff]  ;;  %280 = vtanh.f32 %v8_v0  ;;  %v13_v6 = vld [vmem:[%s418_s0 + $0x28] sm:$0xff]  ;;  %v319_v9 = vshrl.u32 %v30_v5, 7  ;;  %v11_v10 = vld [vmem:[%s418_s0 + $0x18] sm:$0xff] }
   0x3   :  { %282 = vtanh.f32 %v9_v1  ;;  %v29_v8 = vunpack.c.0.s8 %v28_v4 }
   0x4   :  { %284 = vtanh.f32 %v12_v2 }
   0x5   :  { %286 = vtanh.f32 %v13_v6  ;;  %v325_v11 = vsub.s32 %v29_v8, %v319_v9 }
   0x6   :  { %288 = vtanh.f32 %v10_v7 }
   0x7   :  { %290 = vtanh.f32 %v11_v10 }
   0xf   :  { %v327_v12 = vpop.eup %280 }
  0x10   :  { %v329_v13 = vpop.eup %282  ;;  %v26_v14 = vcombine.high %v327_v12, %v327_v12  ;;  %v33_v15 = vrot.slane %v327_v12, %v325_v11 }
  0x11   :  { %v335_v16 = vpop.eup %284  ;;  %v43_v17 = vcombine.high %v329_v13, %v329_v13  ;;  %v50_v18 = vrot.slane %v329_v13, %v325_v11 }
  0x12   :  { %v40_v19 = vrot.slane %v26_v14, %v325_v11  ;;  %v41_v20 = vcombine.high %v33_v15, %v33_v15  ;;  %v153_v21 = vsel %vm152_vm0, %v33_v15, 0.0  ;;  %v94_v22 = vcombine.high %v335_v16, %v335_v16  ;;  %v348_v26 = vpop.eup %286 }
  0x13   :  { %v57_v23 = vrot.slane %v43_v17, %v325_v11  ;;  %v58_v24 = vcombine.high %v50_v18, %v50_v18  ;;  %v101_v25 = vrot.slane %v335_v16, %v325_v11  ;;  %v111_v35 = vcombine.high %v348_v26, %v348_v26  ;;  %v356_v36 = vpop.eup %288 }
  0x14   :  { %v42_v27 = vcombine.high %v40_v19, %v40_v19  ;;  %v154_v28 = vsel %vm152_vm0, %v41_v20, 0.0  ;;  %v156_v29 = vsel %vm152_vm0, %v40_v19, 0.0  ;;  %v108_v30 = vrot.slane %v94_v22, %v325_v11  ;;  %v365_v45 = vpop.eup %290 }
  0x15   :  { %v155_v31 = vadd.f32 %v154_v28, %v153_v21  ;;  %v109_v33 = vcombine.high %v101_v25, %v101_v25  ;;  %v59_v37 = vcombine.high %v57_v23, %v57_v23  ;;  %v118_v39 = vrot.slane %v348_v26, %v325_v11 }
  0x16   :  { %v158_v32 = vsel %vm152_vm0, %v42_v27, 0.0  ;;  %v110_v34 = vcombine.high %v108_v30, %v108_v30  ;;  %v187_v40 = vsel %vm152_vm0, %v101_v25, 0.0  ;;  %v160_v41 = vsel %vm152_vm0, %v50_v18, 0.0 }
  0x17   :  { %v157_v38 = vadd.f32 %v156_v29, %v155_v31  ;;  %v162_v42 = vsel %vm152_vm0, %v58_v24, 0.0  ;;  %v188_v43 = vsel %vm152_vm0, %v109_v33, 0.0  ;;  %v190_v44 = vsel %vm152_vm0, %v108_v30, 0.0 }
  0x18   :  { %v164_v47 = vsel %vm152_vm0, %v57_v23, 0.0  ;;  %v125_v48 = vrot.slane %v111_v35, %v325_v11  ;;  %v189_v49 = vadd.f32 %v188_v43, %v187_v40  ;;  %v126_v50 = vcombine.high %v118_v39, %v118_v39 }
  0x19   :  { %v159_v46 = vadd.f32 %v158_v32, %v157_v38  ;;  %v192_v51 = vsel %vm152_vm0, %v110_v34, 0.0  ;;  %v60_v52 = vcombine.high %v356_v36, %v356_v36  ;;  %v67_v53 = vrot.slane %v356_v36, %v325_v11 }
  0x1a   :  { %v166_v55 = vsel %vm152_vm0, %v59_v37, 0.0  ;;  %v191_v56 = vadd.f32 %v190_v44, %v189_v49  ;;  %v194_v57 = vsel %vm152_vm0, %v118_v39, 0.0  ;;  %v77_v60 = vcombine.high %v365_v45, %v365_v45 }
  0x1b   :  { %v161_v54 = vadd.f32 %v160_v41, %v159_v46  ;;  %v74_v58 = vrot.slane %v60_v52, %v325_v11  ;;  %v75_v59 = vcombine.high %v67_v53, %v67_v53  ;;  %v84_v61 = vrot.slane %v365_v45, %v325_v11 }
  0x1c   :  { %v127_v63 = vcombine.high %v125_v48, %v125_v48  ;;  %v193_v0 = vadd.f32 %v192_v51, %v191_v56  ;;  %v170_v1 = vsel %vm152_vm0, %v67_v53, 0.0  ;;  %v196_v2 = vsel %vm152_vm0, %v126_v50, 0.0 }
  0x1d   :  { %v163_v62 = vadd.f32 %v162_v42, %v161_v54  ;;  %v76_v3 = vcombine.high %v74_v58, %v74_v58  ;;  %v171_v4 = vsel %vm152_vm0, %v75_v59, 0.0  ;;  %v173_v5 = vsel %vm152_vm0, %v74_v58, 0.0 }
  0x1e   :  { %v195_v7 = vadd.f32 %v194_v57, %v193_v0  ;;  %v172_v8 = vadd.f32 %v171_v4, %v170_v1  ;;  %v198_v10 = vsel %vm152_vm0, %v125_v48, 0.0  ;;  %v91_v14 = vrot.slane %v77_v60, %v325_v11 }
  0x1f   :  { %v165_v6 = vadd.f32 %v164_v47, %v163_v62  ;;  %v92_v15 = vcombine.high %v84_v61, %v84_v61  ;;  %v175_v17 = vsel %vm152_vm0, %v76_v3, 0.0  ;;  %v200_v21 = vsel %vm152_vm0, %v127_v63, 0.0 }
  0x20   :  { %v197_v19 = vadd.f32 %v196_v2, %v195_v7  ;;  %v174_v20 = vadd.f32 %v173_v5, %v172_v8  ;;  %v177_v22 = vsel %vm152_vm0, %v84_v61, 0.0  ;;  %v93_v25 = vcombine.high %v91_v14, %v91_v14 }
  0x21   :  { %v167_v18 = vadd.f32 %v166_v55, %v165_v6  ;;  %v179_v27 = vsel %vm152_vm0, %v92_v15, 0.0  ;;  %v181_v11 = vsel %vm152_vm0, %v91_v14, 0.0  ;;  %v293_v34 = vmov 269488144  }
  0x22   :  { %v199_v23 = vadd.f32 %v198_v10, %v197_v19  ;;  %v176_v24 = vadd.f32 %v175_v17, %v174_v20  ;;  %v183_v31 = vsel %vm152_vm0, %v93_v25, 0.0  ;;  %v221_v35 = vunpack.c.l.s4 %v293_v34 }
  0x23   :  { %168 = vadd.xlane.f32.xlu0 %v167_v18  ;;  %v208_v41 = vmul.f32 1.02, %v327_v12  ;;  %v209_v42 = vmul.f32 1.02, %v329_v13  ;;  %v212_v48 = vmul.f32 1.02, %v335_v16 }
  0x24   :  { %v201_v28 = vadd.f32 %v200_v21, %v199_v23  ;;  %v178_v29 = vadd.f32 %v177_v22, %v176_v24  ;;  %v222_v37 = vunpack.c.0.s8 %v221_v35  ;;  %v213_v51 = vmul.f32 1.02, %v348_v26 }
  0x25   :  { %v210_v56 = vmul.f32 1.02, %v356_v36  ;;  %v211_v58 = vmul.f32 1.02, %v365_v45 }
  0x26   :  { %202 = vadd.xlane.f32.xlu1 %v201_v28  ;;  %v180_v30 = vadd.f32 %v179_v27, %v178_v29  ;;  %v225_v39 = vsub.s32 %v222_v37, %v319_v9 }
  0x28   :  { %v182_v32 = vadd.f32 %v181_v11, %v180_v30 }
  0x2a   :  { %v184_v33 = vadd.f32 %v183_v31, %v182_v32 }
  0x2c   :  { %185 = vadd.xlane.f32.xlu0 %v184_v33 }
  0xac   :  { %v169_v38 = vpop.xlane.xlu0 %168 }
  0xad   :  { %v205_v40 = vmul.f32 0.0009765625, %v169_v38 }
  0xaf   :  { %v214_v43 = vmul.f32 0.02, %v205_v40  ;;  %v203_v44 = vpop.xlane.xlu1 %202 }
  0xb0   :  { %v207_v47 = vmul.f32 0.0009765625, %v203_v44 }
  0xb1   :  { %v226_v46 = vrot.slane %v214_v43, %v225_v39 }
  0xb2   :  { %v216_v52 = vmul.f32 0.02, %v207_v47 }
  0xb3   :  { %v244_v49 = vsub.f32 %v208_v41, %v226_v46  ;;  %v245_v50 = vsub.f32 %v209_v42, %v226_v46 }
  0xb4   :  { %v240_v55 = vrot.slane %v216_v52, %v225_v39 }
  0xb5   :  { %v272_v53 = vclamps-f32 %v244_v49, 1.0  ;;  %v273_v54 = vclamps-f32 %v245_v50, 1.0  ;;  %v186_v9 = vpop.xlane.xlu0 %185 }
  0xb6   :  { %v248_v12 = vsub.f32 %v212_v48, %v240_v55  ;;  %v249_v13 = vsub.f32 %v213_v51, %v240_v55  ;;  %v206_v16 = vmul.f32 0.0009765625, %v186_v9 }
  0xb7   :  { %262 = vst [vmem:[%s419_s1] sm:$0xff] %v272_v53  ;;  %263 = vst [vmem:[%s419_s1 + $0x8] sm:$0xff] %v273_v54 }
  0xb8   :  { %v276_v57 = vclamps-f32 %v248_v12, 1.0  ;;  %v277_v26 = vclamps-f32 %v249_v13, 1.0  ;;  %v215_v59 = vmul.f32 0.02, %v206_v16 }
  0xba   :  { %266 = vst [vmem:[%s419_s1 + $0x20] sm:$0xff] %v276_v57  ;;  %267 = vst [vmem:[%s419_s1 + $0x28] sm:$0xff] %v277_v26  ;;  %v233_v60 = vrot.slane %v215_v59, %v225_v39 }
  0xbc   :  { %v246_v61 = vsub.f32 %v210_v56, %v233_v60  ;;  %v247_v62 = vsub.f32 %v211_v58, %v233_v60 }
  0xbe   :  { %v274_v63 = vclamps-f32 %v246_v61, 1.0  ;;  %v275_v0 = vclamps-f32 %v247_v62, 1.0 }
  0xc0   :  { %264 = vst [vmem:[%s419_s1 + $0x10] sm:$0xff] %v274_v63  ;;  %265 = vst [vmem:[%s419_s1 + $0x18] sm:$0xff] %v275_v0 }

</bundles_post_ra>
